<compile_context>
chip_gen: v5e
topology: v5e:2x2
jax: 0.10.0
libtpu: 0.0.40
codegen_flags: <defaults>
</compile_context>

<pallas_src>
from functools import partial

import numpy as np
import jax
import jax.numpy as jnp
from jax import lax
from jax.experimental import pallas as pl
from jax.experimental.pallas import tpu as pltpu

UNVOICED_SYMBOL = 0.0


def _round_up(x, m):
    return ((x + m - 1) // m) * m


# ----------------------------------------------------------------------------- filters
def qmf_high(dtype=np.float64):
    hHP = np.zeros(41, dtype=dtype)
    hHP[0] = +0.00041447996898231424
    hHP[1] = +0.0007812505141729248
    hHP[2] = -0.0010917236836275842
    hHP[3] = -0.001986792567596759
    hHP[4] = +0.0020903896961562292
    hHP[5] = +0.004094057027284935
    hHP[6] = -0.0034025808529816698
    hHP[7] = -0.007496154127205602
    hHP[8] = +0.004972263339933064
    hHP[9] = +0.012738791249119802
    hHP[10] = -0.006696032689574911
    hHP[11] = -0.020694051570247052
    hHP[12] = +0.008432436565041345
    hHP[13] = +0.03307438375870053
    hHP[14] = -0.010018936738799522
    hHP[15] = -0.05423136140580825
    hHP[16] = +0.011293988915051487
    hHP[17] = +0.10020081367388213
    hHP[18] = -0.012120546202484579
    hHP[19] = -0.316300210390957
    hHP[20] = +0.5124068258062764
    hHP[21:] = hHP[19::-1]
    return hHP


def qmf_low(dtype=np.float64):
    hLP = np.zeros(37, dtype=dtype)
    hLP[0] = -0.0006548817007748305
    hLP[1] = +7.561994958159384e-05
    hLP[2] = +0.0020408456937895227
    hLP[3] = -0.0007468053532203044
    hLP[4] = -0.004350223568826493
    hLP[5] = +0.0025966428382642732
    hLP[6] = +0.007639602282756696
    hLP[7] = -0.006490411890149785
    hLP[8] = -0.011765804538954506
    hLP[9] = +0.013649908479276255
    hLP[10] = +0.01636866479016021
    hLP[11] = -0.026075976030529347
    hLP[12] = -0.020910294856659444
    hLP[13] = +0.04826072503231665
    hLP[14] = +0.02476784661104811
    hLP[15] = -0.09617846758336064
    hLP[16] = -0.027359756709866623
    hLP[17] = +0.3148805216163004
    hLP[18] = +0.5282734359405503
    hLP[19:] = hLP[17::-1]
    return hLP


# ----------------------------------------------------------------------------- kernel 1
def _qmf_pair_kernel(xe_ref, xo_ref, yh_ref, yl_ref, *, hp_e, hp_o, lp_e, lp_o,
                     n_chunk, col_tile):
    # layout: xe/xo are (TR, n_chunk+halo) f32 -- (batch*time-chunk) rows in sublanes,
    #         samples in lanes.  The tap loop is innermost; for each 128-lane output
    #         column tile the two accumulators (TR x col_tile) stay vreg-resident and
    #         each shifted slice (read straight from the ref, short liveness) feeds both
    #         the HP and LP accumulators before being discarded.
    TR = yh_ref.shape[0]
    even_taps = sorted(set(hp_e) | set(lp_e))
    odd_taps = sorted(set(hp_o) | set(lp_o))
    for base in range(0, n_chunk, col_tile):
        acc_h = jnp.zeros((TR, col_tile), jnp.float32)
        acc_l = jnp.zeros((TR, col_tile), jnp.float32)
        for m in even_taps:
            sl = xe_ref[:, base + m: base + m + col_tile]
            if m in hp_e:
                acc_h = acc_h + hp_e[m] * sl
            if m in lp_e:
                acc_l = acc_l + lp_e[m] * sl
        for m in odd_taps:
            sl = xo_ref[:, base + m: base + m + col_tile]
            if m in hp_o:
                acc_h = acc_h + hp_o[m] * sl
            if m in lp_o:
                acc_l = acc_l + lp_o[m] * sl
        yh_ref[:, base: base + col_tile] = acc_h     # 128-lane aligned, unmasked stores
        yl_ref[:, base: base + col_tile] = acc_l


def qmf_pair(x, hHP, hLP):
    """Fused (hx, lx) = (conv1d(reflect_pad(x), hHP, stride=2),
                         conv1d(reflect_pad(x), hLP, stride=2))."""
    B, L = x.shape
    pad = 20                      # hHP//2; hLP (pad 18) reuses the same padded signal +2
    halo = 20                     # max even/odd phase offset needed
    n_out = (L - 1) // 2 + 1
    xp = jnp.pad(x.astype(jnp.float32), ((0, 0), (pad, pad)), mode="reflect")
    xe = xp[:, 0::2]
    xo = xp[:, 1::2]

    # phase-split taps; LP offsets are shifted by +1 because its pad is 2 samples less.
    hp_e = {m: float(hHP[2 * m]) for m in range((len(hHP) + 1) // 2)}
    hp_o = {m: float(hHP[2 * m + 1]) for m in range(len(hHP) // 2)}
    lp_e = {m + 1: float(hLP[2 * m]) for m in range((len(hLP) + 1) // 2)}
    lp_o = {m + 1: float(hLP[2 * m + 1]) for m in range(len(hLP) // 2)}

    # TODO(synk): n_chunk could be swept to 1024 on v6e (128 MiB VMEM, single TC).
    n_chunk = min(512, _round_up(n_out, 128))     # lane-dense, 128-aligned output width
    C = -(-n_out // n_chunk)
    rows = B * C
    rows8 = _round_up(rows, 8)
    # small row tiles keep the per-tile accumulators in vregs and give the parallel row
    # grid >= 2 steps whenever possible (v7x dual-TC).
    if rows8 >= 128:
        TR = 64
    elif rows8 >= 64:
        TR = 32
    else:
        TR = 8
    rows_p = _round_up(rows, TR)
    target_len = C * n_chunk + halo

    # TODO(synk): chunkify materializes one extra HBM copy of the decimated signal to
    #             express the 20-sample halo; a pl.Element / manual-DMA window index map
    #             would avoid it.
    def chunkify(a):
        cur = a.shape[1]
        if cur < target_len:
            a = jnp.pad(a, ((0, 0), (0, target_len - cur)))
        parts = [a[:, c * n_chunk: c * n_chunk + n_chunk + halo] for c in range(C)]
        ch = jnp.stack(parts, axis=1).reshape(rows, n_chunk + halo)
        if rows_p != rows:
            ch = jnp.pad(ch, ((0, rows_p - rows), (0, 0)))
        return ch

    xec = chunkify(xe)
    xoc = chunkify(xo)

    kernel = partial(_qmf_pair_kernel, hp_e=hp_e, hp_o=hp_o, lp_e=lp_e, lp_o=lp_o,
                     n_chunk=n_chunk, col_tile=128)
    yh, yl = pl.pallas_call(
        kernel,
        grid=(rows_p // TR,),
        in_specs=[
            pl.BlockSpec((TR, n_chunk + halo), lambda r: (r, 0)),
            pl.BlockSpec((TR, n_chunk + halo), lambda r: (r, 0)),
        ],
        out_specs=[
            pl.BlockSpec((TR, n_chunk), lambda r: (r, 0)),
            pl.BlockSpec((TR, n_chunk), lambda r: (r, 0)),
        ],
        out_shape=(jax.ShapeDtypeStruct((rows_p, n_chunk), jnp.float32),
                   jax.ShapeDtypeStruct((rows_p, n_chunk), jnp.float32)),
        compiler_params=pltpu.CompilerParams(dimension_semantics=("parallel",)),
    )(xec, xoc)

    def unchunk(y):
        return y[:rows].reshape(B, C * n_chunk)[:, :n_out]

    return unchunk(yh), unchunk(yl)


# ----------------------------------------------------------------------------- kernel 2
def _band_kernel(ha_ref, hb_ref, x_ref, w_ref, ws_ref, o_ref, *, seg, eps):
    # layout: ha/hb (TF, seg+2), X (TF, seg) -- frames in sublanes, samples in lanes for
    #         the reductions; every reduced quantity is then carried as a lane-dense
    #         (1, TF) frames-in-lanes row for the scalar stage.  w/ws (1, seg) constants.
    #         out (1, TF) lane-dense block.
    ha = ha_ref[...]
    hb = hb_ref[...]
    Xv = x_ref[...]
    w = w_ref[...]
    ws = ws_ref[...]

    def red(t):                                        # (TF, seg) -> (1, TF)
        return jnp.sum(t, axis=-1)[None, :]

    # 6 design columns = 3 lane shifts of each gathered window (PyTorch unfold+cat).
    rows = [ha[:, m:m + seg] for m in range(3)] + [hb[:, m:m + seg] for m in range(3)]

    # Gram matrix R = Hw^T H (upper triangle), RHS b = Hw^T X, window sums s_i = ws^T H.
    # w*rows[i] is formed inside the i-loop and discarded (no wrows list in VMEM).
    R = {}
    b = [None] * 6
    s_lin = [None] * 6
    for i in range(6):
        wr = w * rows[i]
        for j in range(i, 6):
            v = red(wr * rows[j])
            R[(i, j)] = v
            R[(j, i)] = v
        b[i] = red(wr * Xv)
        s_lin[i] = red(ws * rows[i])
    Sxx = red(w * Xv * Xv)           # sum(w X^2) == sum((ws X)^2) up to f32 rounding
    S1 = red(ws * Xv)                # sum(ws X)

    # Unrolled 6x6 Cholesky of (R + eps*I), vectorized over frames (lane-dense); divisions
    # replaced by EUP rsqrt / multiplies, diagonal clamped to stay positive.
    # TODO(synk): PyTorch retries cholesky_ex with eps*10^n (data-dependent break);
    #             a single regularized factorization with clamping is used here.
    L = {}
    inv_d = [None] * 6
    for j in range(6):
        s = R[(j, j)] + eps
        for k in range(j):
            s = s - L[(j, k)] * L[(j, k)]
        s = jnp.maximum(s, 1e-12)
        inv = lax.rsqrt(s)
        inv_d[j] = inv
        L[(j, j)] = s * inv                          # = sqrt(s)
        for i in range(j + 1, 6):
            s2 = R[(i, j)]
            for k in range(j):
                s2 = s2 - L[(i, k)] * L[(j, k)]
            L[(i, j)] = s2 * inv

    # forward solve  L y = b
    yv = [None] * 6
    for i in range(6):
        s = b[i]
        for k in range(i):
            s = s - L[(i, k)] * yv[k]
        yv[i] = s * inv_d[i]
    # backward solve  L^T a = y
    av = [None] * 6
    for i in range(5, -1, -1):
        s = yv[i]
        for k in range(i + 1, 6):
            s = s - L[(k, i)] * av[k]
        av[i] = s * inv_d[i]

    # Residual statistics from the quadratic-form expansion (Ha never materialized):
    #   sum(w (X - Ha)^2) = Sxx - 2 a^T b + a^T R a,  sum(ws (X - Ha)) = S1 - a^T s_lin.
    atb = av[0] * b[0]
    asum = av[0] * s_lin[0]
    quad = av[0] * av[0] * R[(0, 0)]
    for i in range(1, 6):
        atb = atb + av[i] * b[i]
        asum = asum + av[i] * s_lin[i]
        quad = quad + av[i] * av[i] * R[(i, i)]
    for i in range(6):
        for j in range(i + 1, 6):
            quad = quad + 2.0 * av[i] * av[j] * R[(i, j)]

    segf = float(seg)
    m1 = S1 / segf
    v1 = jnp.maximum((Sxx - segf * m1 * m1) / (segf - 1.0), 0.0)
    m2 = (S1 - asum) / segf
    ss2 = Sxx - 2.0 * atb + quad
    v2 = jnp.maximum((ss2 - segf * m2 * m2) / (segf - 1.0), 0.0)
    o_ref[...] = jnp.sqrt(v2) / (jnp.sqrt(v1) + 1e-16)


def band_analysis(Ha_full, Hb_full, X, w, ws, eps):
    """Ha_full/Hb_full: (B, N, seg+2), X: (B, N, seg)  ->  A: (B, N)"""
    B, N, segp2 = Ha_full.shape
    seg = segp2 - 2
    F = B * N
    F8 = _round_up(F, 8)
    # TF = 128 keeps the working set small on v5e/v7x and gives >= 2 parallel grid steps
    # for realistic frame counts.  TODO(synk): sweep TF up to 256/512 on v6e.
    TF = min(128, F8)
    F_p = _round_up(F, TF)

    def prep(a, width):
        a = a.reshape(F, width).astype(jnp.float32)
        if F_p != F:
            a = jnp.pad(a, ((0, F_p - F), (0, 0)))
        return a

    Haf = prep(Ha_full, segp2)
    Hbf = prep(Hb_full, segp2)
    Xf = prep(X, seg)
    wf = jnp.asarray(w, jnp.float32).reshape(1, seg)
    wsf = jnp.asarray(ws, jnp.float32).reshape(1, seg)

    # TODO(synk): the pitch-synchronous window gather could be moved in here via
    #             PrefetchScalarGridSpec + in-VMEM dynamic slices of the band signal to
    #             avoid materializing Ha/Hb/X in HBM; kept in XLA for robustness.
    kernel = partial(_band_kernel, seg=seg, eps=float(eps))
    A = pl.pallas_call(
        kernel,
        grid=(F_p // TF,),
        in_specs=[
            pl.BlockSpec((TF, segp2), lambda r: (r, 0)),
            pl.BlockSpec((TF, segp2), lambda r: (r, 0)),
            pl.BlockSpec((TF, seg), lambda r: (r, 0)),
            pl.BlockSpec((1, seg), lambda r: (0, 0)),
            pl.BlockSpec((1, seg), lambda r: (0, 0)),
        ],
        out_specs=pl.BlockSpec((1, TF), lambda r: (0, r)),      # lane-dense output block
        out_shape=jax.ShapeDtypeStruct((1, F_p), jnp.float32),
        compiler_params=pltpu.CompilerParams(
            dimension_semantics=("parallel",),
            vmem_limit_bytes=32 * 1024 * 1024),
    )(Haf, Hbf, Xf, wf, wsf)
    return A[0, :F].reshape(B, N)


# ----------------------------------------------------------------------------- kernel 3
def _interp_kernel(bap_ref, m_ref, o_ref, *, lower, upper):
    # layout: bap (TF, n_band+1) frames in sublanes / coarse bands in lanes,
    #         m (n_band+1, L2p) combined gather+interp matrix (lane-padded to 128),
    #         out (TF, L2p).  K <= 8, so an unrolled VPU broadcast-FMA beats the MXU.
    y = jnp.log(jnp.clip(bap_ref[...], lower, upper))
    m = m_ref[...]
    nb1 = m.shape[0]
    acc = y[:, 0:1] * m[0:1, :]
    for k in range(1, nb1):
        acc = acc + y[:, k:k + 1] * m[k:k + 1, :]
    o_ref[...] = jnp.exp(acc)


def interp_bands(bap, interp_matrix, lower, upper):
    """bap: (B, N, n_band+1) -> ap: (B, N, L2)"""
    B, N, nb1 = bap.shape
    K, L2 = interp_matrix.shape
    assert K == nb1
    L2p = _round_up(L2, 128)                 # unmasked, lane-dense stores; sliced after
    F = B * N
    F8 = _round_up(F, 8)
    TF = min(128, F8)
    F_p = _round_up(F, TF)
    bap_f = bap.reshape(F, nb1).astype(jnp.float32)
    if F_p != F:
        bap_f = jnp.pad(bap_f, ((0, F_p - F), (0, 0)), constant_values=1.0)
    Mpad = np.pad(np.asarray(interp_matrix, np.float32), ((0, 0), (0, L2p - L2)))
    Mj = jnp.asarray(Mpad, jnp.float32)

    kernel = partial(_interp_kernel, lower=float(lower), upper=float(upper))
    ap = pl.pallas_call(
        kernel,
        grid=(F_p // TF,),
        in_specs=[
            pl.BlockSpec((TF, nb1), lambda r: (r, 0)),
            pl.BlockSpec((K, L2p), lambda r: (0, 0)),
        ],
        out_specs=pl.BlockSpec((TF, L2p), lambda r: (r, 0)),
        out_shape=jax.ShapeDtypeStruct((F_p, L2p), jnp.float32),
        compiler_params=pltpu.CompilerParams(dimension_semantics=("parallel",)),
    )(bap_f, Mj)
    return ap[:F, :L2].reshape(B, N, L2)


# ----------------------------------------------------------------------------- module
class AperiodicityExtractionByTandem:
    def __init__(self, frame_period, sample_rate, fft_length,
                 lower_bound=0.001, upper_bound=0.999, window_length_ms=30, eps=1e-5):
        self.frame_period = frame_period
        self.sample_rate = sample_rate
        self.lower_bound = lower_bound
        self.upper_bound = upper_bound
        self.n_band = int(np.log2(sample_rate / 600))
        self.default_f0 = 150
        self.eps = eps
        assert fft_length % 2 == 0
        assert self.n_band <= fft_length // 2
        assert 0 <= lower_bound < upper_bound <= 1
        assert 1 <= window_length_ms
        assert 0 < eps

        self.cutoff_list = [sample_rate / 2 ** i for i in range(2, self.n_band + 1)]
        self.cutoff_list.append(self.cutoff_list[-1])

        coarse_axis = [sample_rate / 2 ** i for i in range(self.n_band, 0, -1)]
        coarse_axis.insert(0, 0)
        coarse_axis = np.asarray(coarse_axis)
        L2 = fft_length // 2 + 1
        freq_axis = np.arange(L2) * (sample_rate / fft_length)
        idx = np.searchsorted(coarse_axis, freq_axis) - 1
        idx = np.clip(idx, 0, len(coarse_axis) - 2)
        x0 = coarse_axis[:-1]
        dx = coarse_axis[1:] - x0
        wt = (freq_axis - np.take(x0, idx)) / np.take(dx, idx)
        # fold gather + linear interpolation into one (n_band+1, L2) matrix acting on
        # the log-band values:  out_l = (1-wt_l)*y[idx_l] + wt_l*y[idx_l+1]
        M2 = np.zeros((self.n_band + 1, L2), dtype=np.float32)
        cols = np.arange(L2)
        M2[idx, cols] += (1.0 - wt).astype(np.float32)
        M2[idx + 1, cols] += wt.astype(np.float32)
        self.interp_matrix = M2

        self.segment_length = [int(i * window_length_ms / 500 + 1.5) for i in self.cutoff_list]
        self.ramp = np.arange(-1, self.segment_length[0] + 1, dtype=np.int32)

        self.hHP = qmf_high()
        self.hLP = qmf_low()

        window = np.zeros((self.n_band, self.segment_length[0]))
        for i, s in enumerate(self.segment_length):
            window[i, :s] = np.hanning(s + 2)[1:-1]
        self.window = window.astype(np.float32)
        self.window_sqrt = np.sqrt(window).astype(np.float32)

    def __call__(self, x, f0):
        # layout: waveform x is (B, T) float32; f0 is (B, N) float32;
        #         output aperiodicity is (B, N, fft_length//2 + 1) float32.
        x = x.astype(jnp.float32)
        f0 = f0.astype(jnp.float32)
        f0 = jnp.where(f0 == UNVOICED_SYMBOL, jnp.asarray(self.default_f0, f0.dtype), f0)
        B, N = f0.shape
        time_axis = jnp.arange(N, dtype=f0.dtype) * (self.frame_period / self.sample_rate)
        barange = jnp.arange(B)[:, None, None]

        bap = []
        lx = x
        for i in range(self.n_band):
            if i < self.n_band - 1:
                hx, lx = qmf_pair(lx, self.hHP, self.hLP)   # fused HP/LP band split
                xb = hx
            else:
                xb = lx

            tmp_fs = 2 * self.cutoff_list[i]
            pitch = tmp_fs / f0
            t0 = (pitch + 0.5).astype(jnp.int32)
            index_bias = (pitch * 0.5 + 0.5).astype(jnp.int32)
            curr_pos = (time_axis * tmp_fs + 1.5).astype(jnp.int32)[None, :]
            origin = curr_pos - index_bias                      # (B, N)

            seg = self.segment_length[i]
            j = jnp.asarray(self.ramp[: seg + 2], jnp.int32)    # (seg+2,)
            T1 = xb.shape[-1] - 1

            # TODO(synk): the pitch-synchronous gather stays in XLA (data-dependent
            #             per-frame indices); only the two (seg+2)-wide windows are
            #             materialized (the 6-column H matrix is built in-kernel).
            index_alpha = jnp.clip((origin - t0)[..., None] + j, 0, T1)
            Ha_full = xb[barange, index_alpha]                  # (B, N, seg+2)
            index_beta = jnp.clip((origin + t0)[..., None] + j, 0, T1)
            Hb_full = xb[barange, index_beta]                   # (B, N, seg+2)
            index_gamma = jnp.clip(origin[..., None] + j[1:-1], 0, T1)
            X = xb[barange, index_gamma]                        # (B, N, seg)

            A = band_analysis(Ha_full, Hb_full, X,
                              self.window[i, :seg], self.window_sqrt[i, :seg], self.eps)
            bap.append(A)

        bap.append(bap[-1])
        bap = jnp.stack(bap[::-1], axis=-1)                     # (B, N, n_band+1)
        ap = interp_bands(bap, self.interp_matrix, self.lower_bound, self.upper_bound)
        return ap


class Aperiodicity:
    def __init__(self, frame_period, sample_rate, fft_length,
                 algorithm="tandem", out_format="a", **kwargs):
        assert 1 <= frame_period
        assert 1 <= sample_rate
        if algorithm == "tandem":
            self.extractor = AperiodicityExtractionByTandem(
                frame_period, sample_rate, fft_length, **kwargs)
        else:
            raise ValueError(f"algorithm {algorithm} is not supported")
        if out_format in (0, "a"):
            self.convert = lambda x: x
        elif out_format in (1, "p"):
            self.convert = lambda x: 1 - x
        elif out_format in (2, "a/p"):
            self.convert = lambda x: x / (1 - x)
        elif out_format in (3, "p/a"):
            self.convert = lambda x: (1 - x) / x
        else:
            raise ValueError(f"out_format {out_format} is not supported")

    def __call__(self, x, f0):
        d = x.ndim
        if d == 1:
            x = x[None, :]
        assert x.ndim == 2
        if f0.ndim == 1:
            f0 = f0[None, :]
        assert f0.ndim == 2
        ap = self.convert(self.extractor(x, f0))
        if d == 1:
            ap = ap[0]
        return ap


# ----------------------------------------------------------------------------- main
if __name__ == "__main__":
    key = jax.random.PRNGKey(0)
    kx, kf = jax.random.split(key)

    B, T, N = 2, 2048, 16
    frame_period, sample_rate, fft_length = 80, 4800, 8   # n_band = 3, L/2+1 = 5

    x = jax.random.normal(kx, (B, T), dtype=jnp.float32)
    f0 = 150.0 + 100.0 * jax.random.uniform(kf, (B, N), dtype=jnp.float32)

    module = Aperiodicity(frame_period, sample_rate, fft_length)
    ap = module(x, f0)
    ap = jax.block_until_ready(ap)

    assert ap.shape == (B, N, fft_length // 2 + 1), ap.shape
    assert bool(jnp.all(jnp.isfinite(ap)))
    assert bool(jnp.all(ap > 0))
    print("KERNEL_OK")
</pallas_src>

<mosaic_0001>
module attributes {stable_mosaic.version = 11 : i64} {
  func.func @_qmf_pair_kernel(%arg0: i32, %arg1: memref<8x532xf32, #tpu.memory_space<vmem>>, %arg2: memref<8x532xf32, #tpu.memory_space<vmem>>, %arg3: memref<8x512xf32, #tpu.memory_space<vmem>>, %arg4: memref<8x512xf32, #tpu.memory_space<vmem>>) attributes {dimension_semantics = [#tpu.dimension_semantics<parallel>], iteration_bounds = array<i64: 1>, scalar_prefetch = 0 : i64, scratch_operands = 0 : i64, tpu.core_type = #tpu.core_type<tc>, window_params = [{transform_indices = @transform_0, window_bounds = array<i64: 8, 532>}, {transform_indices = @transform_1, window_bounds = array<i64: 8, 532>}, {transform_indices = @transform_2, window_bounds = array<i64: 8, 512>}, {transform_indices = @transform_3, window_bounds = array<i64: 8, 512>}]} {
    %cst = arith.constant 0.000000e+00 : f32
    %0 = vector.broadcast %cst : f32 to vector<8x128xf32>
    %cst_0 = arith.constant 0.000000e+00 : f32
    %1 = vector.broadcast %cst_0 : f32 to vector<8x128xf32>
    %c0 = arith.constant 0 : index
    %c0_1 = arith.constant 0 : index
    %2 = vector.load %arg1[%c0, %c0_1] : memref<8x532xf32, #tpu.memory_space<vmem>>, vector<8x128xf32>
    %cst_2 = arith.constant 4.1447996E-4 : f32
    %3 = vector.broadcast %cst_2 : f32 to vector<8x128xf32>
    %4 = arith.mulf %3, %2 : vector<8x128xf32>
    %5 = arith.addf %0, %4 : vector<8x128xf32>
    %c0_3 = arith.constant 0 : index
    %c1 = arith.constant 1 : index
    %6 = vector.load %arg1[%c0_3, %c1] : memref<8x532xf32, #tpu.memory_space<vmem>>, vector<8x128xf32>
    %cst_4 = arith.constant -0.00109172368 : f32
    %7 = vector.broadcast %cst_4 : f32 to vector<8x128xf32>
    %8 = arith.mulf %7, %6 : vector<8x128xf32>
    %9 = arith.addf %5, %8 : vector<8x128xf32>
    %cst_5 = arith.constant -6.54881703E-4 : f32
    %10 = vector.broadcast %cst_5 : f32 to vector<8x128xf32>
    %11 = arith.mulf %10, %6 : vector<8x128xf32>
    %12 = arith.addf %1, %11 : vector<8x128xf32>
    %c0_6 = arith.constant 0 : index
    %c2 = arith.constant 2 : index
    %13 = vector.load %arg1[%c0_6, %c2] : memref<8x532xf32, #tpu.memory_space<vmem>>, vector<8x128xf32>
    %cst_7 = arith.constant 0.00209038961 : f32
    %14 = vector.broadcast %cst_7 : f32 to vector<8x128xf32>
    %15 = arith.mulf %14, %13 : vector<8x128xf32>
    %16 = arith.addf %9, %15 : vector<8x128xf32>
    %cst_8 = arith.constant 0.00204084581 : f32
    %17 = vector.broadcast %cst_8 : f32 to vector<8x128xf32>
    %18 = arith.mulf %17, %13 : vector<8x128xf32>
    %19 = arith.addf %12, %18 : vector<8x128xf32>
    %c0_9 = arith.constant 0 : index
    %c3 = arith.constant 3 : index
    %20 = vector.load %arg1[%c0_9, %c3] : memref<8x532xf32, #tpu.memory_space<vmem>>, vector<8x128xf32>
    %cst_10 = arith.constant -0.00340258074 : f32
    %21 = vector.broadcast %cst_10 : f32 to vector<8x128xf32>
    %22 = arith.mulf %21, %20 : vector<8x128xf32>
    %23 = arith.addf %16, %22 : vector<8x128xf32>
    %cst_11 = arith.constant -0.00435022358 : f32
    %24 = vector.broadcast %cst_11 : f32 to vector<8x128xf32>
    %25 = arith.mulf %24, %20 : vector<8x128xf32>
    %26 = arith.addf %19, %25 : vector<8x128xf32>
    %c0_12 = arith.constant 0 : index
    %c4 = arith.constant 4 : index
    %27 = vector.load %arg1[%c0_12, %c4] : memref<8x532xf32, #tpu.memory_space<vmem>>, vector<8x128xf32>
    %cst_13 = arith.constant 0.00497226324 : f32
    %28 = vector.broadcast %cst_13 : f32 to vector<8x128xf32>
    %29 = arith.mulf %28, %27 : vector<8x128xf32>
    %30 = arith.addf %23, %29 : vector<8x128xf32>
    %cst_14 = arith.constant 0.00763960229 : f32
    %31 = vector.broadcast %cst_14 : f32 to vector<8x128xf32>
    %32 = arith.mulf %31, %27 : vector<8x128xf32>
    %33 = arith.addf %26, %32 : vector<8x128xf32>
    %c0_15 = arith.constant 0 : index
    %c5 = arith.constant 5 : index
    %34 = vector.load %arg1[%c0_15, %c5] : memref<8x532xf32, #tpu.memory_space<vmem>>, vector<8x128xf32>
    %cst_16 = arith.constant -0.00669603283 : f32
    %35 = vector.broadcast %cst_16 : f32 to vector<8x128xf32>
    %36 = arith.mulf %35, %34 : vector<8x128xf32>
    %37 = arith.addf %30, %36 : vector<8x128xf32>
    %cst_17 = arith.constant -0.0117658041 : f32
    %38 = vector.broadcast %cst_17 : f32 to vector<8x128xf32>
    %39 = arith.mulf %38, %34 : vector<8x128xf32>
    %40 = arith.addf %33, %39 : vector<8x128xf32>
    %c0_18 = arith.constant 0 : index
    %c6 = arith.constant 6 : index
    %41 = vector.load %arg1[%c0_18, %c6] : memref<8x532xf32, #tpu.memory_space<vmem>>, vector<8x128xf32>
    %cst_19 = arith.constant 0.00843243673 : f32
    %42 = vector.broadcast %cst_19 : f32 to vector<8x128xf32>
    %43 = arith.mulf %42, %41 : vector<8x128xf32>
    %44 = arith.addf %37, %43 : vector<8x128xf32>
    %cst_20 = arith.constant 0.0163686648 : f32
    %45 = vector.broadcast %cst_20 : f32 to vector<8x128xf32>
    %46 = arith.mulf %45, %41 : vector<8x128xf32>
    %47 = arith.addf %40, %46 : vector<8x128xf32>
    %c0_21 = arith.constant 0 : index
    %c7 = arith.constant 7 : index
    %48 = vector.load %arg1[%c0_21, %c7] : memref<8x532xf32, #tpu.memory_space<vmem>>, vector<8x128xf32>
    %cst_22 = arith.constant -0.0100189364 : f32
    %49 = vector.broadcast %cst_22 : f32 to vector<8x128xf32>
    %50 = arith.mulf %49, %48 : vector<8x128xf32>
    %51 = arith.addf %44, %50 : vector<8x128xf32>
    %cst_23 = arith.constant -0.0209102947 : f32
    %52 = vector.broadcast %cst_23 : f32 to vector<8x128xf32>
    %53 = arith.mulf %52, %48 : vector<8x128xf32>
    %54 = arith.addf %47, %53 : vector<8x128xf32>
    %c0_24 = arith.constant 0 : index
    %c8 = arith.constant 8 : index
    %55 = vector.load %arg1[%c0_24, %c8] : memref<8x532xf32, #tpu.memory_space<vmem>>, vector<8x128xf32>
    %cst_25 = arith.constant 0.0112939887 : f32
    %56 = vector.broadcast %cst_25 : f32 to vector<8x128xf32>
    %57 = arith.mulf %56, %55 : vector<8x128xf32>
    %58 = arith.addf %51, %57 : vector<8x128xf32>
    %cst_26 = arith.constant 0.0247678459 : f32
    %59 = vector.broadcast %cst_26 : f32 to vector<8x128xf32>
    %60 = arith.mulf %59, %55 : vector<8x128xf32>
    %61 = arith.addf %54, %60 : vector<8x128xf32>
    %c0_27 = arith.constant 0 : index
    %c9 = arith.constant 9 : index
    %62 = vector.load %arg1[%c0_27, %c9] : memref<8x532xf32, #tpu.memory_space<vmem>>, vector<8x128xf32>
    %cst_28 = arith.constant -0.0121205458 : f32
    %63 = vector.broadcast %cst_28 : f32 to vector<8x128xf32>
    %64 = arith.mulf %63, %62 : vector<8x128xf32>
    %65 = arith.addf %58, %64 : vector<8x128xf32>
    %cst_29 = arith.constant -0.0273597576 : f32
    %66 = vector.broadcast %cst_29 : f32 to vector<8x128xf32>
    %67 = arith.mulf %66, %62 : vector<8x128xf32>
    %68 = arith.addf %61, %67 : vector<8x128xf32>
    %c0_30 = arith.constant 0 : index
    %c10 = arith.constant 10 : index
    %69 = vector.load %arg1[%c0_30, %c10] : memref<8x532xf32, #tpu.memory_space<vmem>>, vector<8x128xf32>
    %cst_31 = arith.constant 0.512406826 : f32
    %70 = vector.broadcast %cst_31 : f32 to vector<8x128xf32>
    %71 = arith.mulf %70, %69 : vector<8x128xf32>
    %72 = arith.addf %65, %71 : vector<8x128xf32>
    %cst_32 = arith.constant 0.528273463 : f32
    %73 = vector.broadcast %cst_32 : f32 to vector<8x128xf32>
    %74 = arith.mulf %73, %69 : vector<8x128xf32>
    %75 = arith.addf %68, %74 : vector<8x128xf32>
    %c0_33 = arith.constant 0 : index
    %c11 = arith.constant 11 : index
    %76 = vector.load %arg1[%c0_33, %c11] : memref<8x532xf32, #tpu.memory_space<vmem>>, vector<8x128xf32>
    %cst_34 = arith.constant -0.0121205458 : f32
    %77 = vector.broadcast %cst_34 : f32 to vector<8x128xf32>
    %78 = arith.mulf %77, %76 : vector<8x128xf32>
    %79 = arith.addf %72, %78 : vector<8x128xf32>
    %cst_35 = arith.constant -0.0273597576 : f32
    %80 = vector.broadcast %cst_35 : f32 to vector<8x128xf32>
    %81 = arith.mulf %80, %76 : vector<8x128xf32>
    %82 = arith.addf %75, %81 : vector<8x128xf32>
    %c0_36 = arith.constant 0 : index
    %c12 = arith.constant 12 : index
    %83 = vector.load %arg1[%c0_36, %c12] : memref<8x532xf32, #tpu.memory_space<vmem>>, vector<8x128xf32>
    %cst_37 = arith.constant 0.0112939887 : f32
    %84 = vector.broadcast %cst_37 : f32 to vector<8x128xf32>
    %85 = arith.mulf %84, %83 : vector<8x128xf32>
    %86 = arith.addf %79, %85 : vector<8x128xf32>
    %cst_38 = arith.constant 0.0247678459 : f32
    %87 = vector.broadcast %cst_38 : f32 to vector<8x128xf32>
    %88 = arith.mulf %87, %83 : vector<8x128xf32>
    %89 = arith.addf %82, %88 : vector<8x128xf32>
    %c0_39 = arith.constant 0 : index
    %c13 = arith.constant 13 : index
    %90 = vector.load %arg1[%c0_39, %c13] : memref<8x532xf32, #tpu.memory_space<vmem>>, vector<8x128xf32>
    %cst_40 = arith.constant -0.0100189364 : f32
    %91 = vector.broadcast %cst_40 : f32 to vector<8x128xf32>
    %92 = arith.mulf %91, %90 : vector<8x128xf32>
    %93 = arith.addf %86, %92 : vector<8x128xf32>
    %cst_41 = arith.constant -0.0209102947 : f32
    %94 = vector.broadcast %cst_41 : f32 to vector<8x128xf32>
    %95 = arith.mulf %94, %90 : vector<8x128xf32>
    %96 = arith.addf %89, %95 : vector<8x128xf32>
    %c0_42 = arith.constant 0 : index
    %c14 = arith.constant 14 : index
    %97 = vector.load %arg1[%c0_42, %c14] : memref<8x532xf32, #tpu.memory_space<vmem>>, vector<8x128xf32>
    %cst_43 = arith.constant 0.00843243673 : f32
    %98 = vector.broadcast %cst_43 : f32 to vector<8x128xf32>
    %99 = arith.mulf %98, %97 : vector<8x128xf32>
    %100 = arith.addf %93, %99 : vector<8x128xf32>
    %cst_44 = arith.constant 0.0163686648 : f32
    %101 = vector.broadcast %cst_44 : f32 to vector<8x128xf32>
    %102 = arith.mulf %101, %97 : vector<8x128xf32>
    %103 = arith.addf %96, %102 : vector<8x128xf32>
    %c0_45 = arith.constant 0 : index
    %c15 = arith.constant 15 : index
    %104 = vector.load %arg1[%c0_45, %c15] : memref<8x532xf32, #tpu.memory_space<vmem>>, vector<8x128xf32>
    %cst_46 = arith.constant -0.00669603283 : f32
    %105 = vector.broadcast %cst_46 : f32 to vector<8x128xf32>
    %106 = arith.mulf %105, %104 : vector<8x128xf32>
    %107 = arith.addf %100, %106 : vector<8x128xf32>
    %cst_47 = arith.constant -0.0117658041 : f32
    %108 = vector.broadcast %cst_47 : f32 to vector<8x128xf32>
    %109 = arith.mulf %108, %104 : vector<8x128xf32>
    %110 = arith.addf %103, %109 : vector<8x128xf32>
    %c0_48 = arith.constant 0 : index
    %c16 = arith.constant 16 : index
    %111 = vector.load %arg1[%c0_48, %c16] : memref<8x532xf32, #tpu.memory_space<vmem>>, vector<8x128xf32>
    %cst_49 = arith.constant 0.00497226324 : f32
    %112 = vector.broadcast %cst_49 : f32 to vector<8x128xf32>
    %113 = arith.mulf %112, %111 : vector<8x128xf32>
    %114 = arith.addf %107, %113 : vector<8x128xf32>
    %cst_50 = arith.constant 0.00763960229 : f32
    %115 = vector.broadcast %cst_50 : f32 to vector<8x128xf32>
    %116 = arith.mulf %115, %111 : vector<8x128xf32>
    %117 = arith.addf %110, %116 : vector<8x128xf32>
    %c0_51 = arith.constant 0 : index
    %c17 = arith.constant 17 : index
    %118 = vector.load %arg1[%c0_51, %c17] : memref<8x532xf32, #tpu.memory_space<vmem>>, vector<8x128xf32>
    %cst_52 = arith.constant -0.00340258074 : f32
    %119 = vector.broadcast %cst_52 : f32 to vector<8x128xf32>
    %120 = arith.mulf %119, %118 : vector<8x128xf32>
    %121 = arith.addf %114, %120 : vector<8x128xf32>
    %cst_53 = arith.constant -0.00435022358 : f32
    %122 = vector.broadcast %cst_53 : f32 to vector<8x128xf32>
    %123 = arith.mulf %122, %118 : vector<8x128xf32>
    %124 = arith.addf %117, %123 : vector<8x128xf32>
    %c0_54 = arith.constant 0 : index
    %c18 = arith.constant 18 : index
    %125 = vector.load %arg1[%c0_54, %c18] : memref<8x532xf32, #tpu.memory_space<vmem>>, vector<8x128xf32>
    %cst_55 = arith.constant 0.00209038961 : f32
    %126 = vector.broadcast %cst_55 : f32 to vector<8x128xf32>
    %127 = arith.mulf %126, %125 : vector<8x128xf32>
    %128 = arith.addf %121, %127 : vector<8x128xf32>
    %cst_56 = arith.constant 0.00204084581 : f32
    %129 = vector.broadcast %cst_56 : f32 to vector<8x128xf32>
    %130 = arith.mulf %129, %125 : vector<8x128xf32>
    %131 = arith.addf %124, %130 : vector<8x128xf32>
    %c0_57 = arith.constant 0 : index
    %c19 = arith.constant 19 : index
    %132 = vector.load %arg1[%c0_57, %c19] : memref<8x532xf32, #tpu.memory_space<vmem>>, vector<8x128xf32>
    %cst_58 = arith.constant -0.00109172368 : f32
    %133 = vector.broadcast %cst_58 : f32 to vector<8x128xf32>
    %134 = arith.mulf %133, %132 : vector<8x128xf32>
    %135 = arith.addf %128, %134 : vector<8x128xf32>
    %cst_59 = arith.constant -6.54881703E-4 : f32
    %136 = vector.broadcast %cst_59 : f32 to vector<8x128xf32>
    %137 = arith.mulf %136, %132 : vector<8x128xf32>
    %138 = arith.addf %131, %137 : vector<8x128xf32>
    %c0_60 = arith.constant 0 : index
    %c20 = arith.constant 20 : index
    %139 = vector.load %arg1[%c0_60, %c20] : memref<8x532xf32, #tpu.memory_space<vmem>>, vector<8x128xf32>
    %cst_61 = arith.constant 4.1447996E-4 : f32
    %140 = vector.broadcast %cst_61 : f32 to vector<8x128xf32>
    %141 = arith.mulf %140, %139 : vector<8x128xf32>
    %142 = arith.addf %135, %141 : vector<8x128xf32>
    %c0_62 = arith.constant 0 : index
    %c0_63 = arith.constant 0 : index
    %143 = vector.load %arg2[%c0_62, %c0_63] : memref<8x532xf32, #tpu.memory_space<vmem>>, vector<8x128xf32>
    %cst_64 = arith.constant 7.81250535E-4 : f32
    %144 = vector.broadcast %cst_64 : f32 to vector<8x128xf32>
    %145 = arith.mulf %144, %143 : vector<8x128xf32>
    %146 = arith.addf %142, %145 : vector<8x128xf32>
    %c0_65 = arith.constant 0 : index
    %c1_66 = arith.constant 1 : index
    %147 = vector.load %arg2[%c0_65, %c1_66] : memref<8x532xf32, #tpu.memory_space<vmem>>, vector<8x128xf32>
    %cst_67 = arith.constant -0.00198679254 : f32
    %148 = vector.broadcast %cst_67 : f32 to vector<8x128xf32>
    %149 = arith.mulf %148, %147 : vector<8x128xf32>
    %150 = arith.addf %146, %149 : vector<8x128xf32>
    %cst_68 = arith.constant 7.56199515E-5 : f32
    %151 = vector.broadcast %cst_68 : f32 to vector<8x128xf32>
    %152 = arith.mulf %151, %147 : vector<8x128xf32>
    %153 = arith.addf %138, %152 : vector<8x128xf32>
    %c0_69 = arith.constant 0 : index
    %c2_70 = arith.constant 2 : index
    %154 = vector.load %arg2[%c0_69, %c2_70] : memref<8x532xf32, #tpu.memory_space<vmem>>, vector<8x128xf32>
    %cst_71 = arith.constant 0.00409405725 : f32
    %155 = vector.broadcast %cst_71 : f32 to vector<8x128xf32>
    %156 = arith.mulf %155, %154 : vector<8x128xf32>
    %157 = arith.addf %150, %156 : vector<8x128xf32>
    %cst_72 = arith.constant -7.46805337E-4 : f32
    %158 = vector.broadcast %cst_72 : f32 to vector<8x128xf32>
    %159 = arith.mulf %158, %154 : vector<8x128xf32>
    %160 = arith.addf %153, %159 : vector<8x128xf32>
    %c0_73 = arith.constant 0 : index
    %c3_74 = arith.constant 3 : index
    %161 = vector.load %arg2[%c0_73, %c3_74] : memref<8x532xf32, #tpu.memory_space<vmem>>, vector<8x128xf32>
    %cst_75 = arith.constant -0.00749615393 : f32
    %162 = vector.broadcast %cst_75 : f32 to vector<8x128xf32>
    %163 = arith.mulf %162, %161 : vector<8x128xf32>
    %164 = arith.addf %157, %163 : vector<8x128xf32>
    %cst_76 = arith.constant 0.00259664282 : f32
    %165 = vector.broadcast %cst_76 : f32 to vector<8x128xf32>
    %166 = arith.mulf %165, %161 : vector<8x128xf32>
    %167 = arith.addf %160, %166 : vector<8x128xf32>
    %c0_77 = arith.constant 0 : index
    %c4_78 = arith.constant 4 : index
    %168 = vector.load %arg2[%c0_77, %c4_78] : memref<8x532xf32, #tpu.memory_space<vmem>>, vector<8x128xf32>
    %cst_79 = arith.constant 0.0127387913 : f32
    %169 = vector.broadcast %cst_79 : f32 to vector<8x128xf32>
    %170 = arith.mulf %169, %168 : vector<8x128xf32>
    %171 = arith.addf %164, %170 : vector<8x128xf32>
    %cst_80 = arith.constant -0.0064904117 : f32
    %172 = vector.broadcast %cst_80 : f32 to vector<8x128xf32>
    %173 = arith.mulf %172, %168 : vector<8x128xf32>
    %174 = arith.addf %167, %173 : vector<8x128xf32>
    %c0_81 = arith.constant 0 : index
    %c5_82 = arith.constant 5 : index
    %175 = vector.load %arg2[%c0_81, %c5_82] : memref<8x532xf32, #tpu.memory_space<vmem>>, vector<8x128xf32>
    %cst_83 = arith.constant -0.0206940509 : f32
    %176 = vector.broadcast %cst_83 : f32 to vector<8x128xf32>
    %177 = arith.mulf %176, %175 : vector<8x128xf32>
    %178 = arith.addf %171, %177 : vector<8x128xf32>
    %cst_84 = arith.constant 0.0136499088 : f32
    %179 = vector.broadcast %cst_84 : f32 to vector<8x128xf32>
    %180 = arith.mulf %179, %175 : vector<8x128xf32>
    %181 = arith.addf %174, %180 : vector<8x128xf32>
    %c0_85 = arith.constant 0 : index
    %c6_86 = arith.constant 6 : index
    %182 = vector.load %arg2[%c0_85, %c6_86] : memref<8x532xf32, #tpu.memory_space<vmem>>, vector<8x128xf32>
    %cst_87 = arith.constant 0.0330743827 : f32
    %183 = vector.broadcast %cst_87 : f32 to vector<8x128xf32>
    %184 = arith.mulf %183, %182 : vector<8x128xf32>
    %185 = arith.addf %178, %184 : vector<8x128xf32>
    %cst_88 = arith.constant -0.026075976 : f32
    %186 = vector.broadcast %cst_88 : f32 to vector<8x128xf32>
    %187 = arith.mulf %186, %182 : vector<8x128xf32>
    %188 = arith.addf %181, %187 : vector<8x128xf32>
    %c0_89 = arith.constant 0 : index
    %c7_90 = arith.constant 7 : index
    %189 = vector.load %arg2[%c0_89, %c7_90] : memref<8x532xf32, #tpu.memory_space<vmem>>, vector<8x128xf32>
    %cst_91 = arith.constant -0.0542313606 : f32
    %190 = vector.broadcast %cst_91 : f32 to vector<8x128xf32>
    %191 = arith.mulf %190, %189 : vector<8x128xf32>
    %192 = arith.addf %185, %191 : vector<8x128xf32>
    %cst_92 = arith.constant 0.048260726 : f32
    %193 = vector.broadcast %cst_92 : f32 to vector<8x128xf32>
    %194 = arith.mulf %193, %189 : vector<8x128xf32>
    %195 = arith.addf %188, %194 : vector<8x128xf32>
    %c0_93 = arith.constant 0 : index
    %c8_94 = arith.constant 8 : index
    %196 = vector.load %arg2[%c0_93, %c8_94] : memref<8x532xf32, #tpu.memory_space<vmem>>, vector<8x128xf32>
    %cst_95 = arith.constant 0.100200817 : f32
    %197 = vector.broadcast %cst_95 : f32 to vector<8x128xf32>
    %198 = arith.mulf %197, %196 : vector<8x128xf32>
    %199 = arith.addf %192, %198 : vector<8x128xf32>
    %cst_96 = arith.constant -0.0961784645 : f32
    %200 = vector.broadcast %cst_96 : f32 to vector<8x128xf32>
    %201 = arith.mulf %200, %196 : vector<8x128xf32>
    %202 = arith.addf %195, %201 : vector<8x128xf32>
    %c0_97 = arith.constant 0 : index
    %c9_98 = arith.constant 9 : index
    %203 = vector.load %arg2[%c0_97, %c9_98] : memref<8x532xf32, #tpu.memory_space<vmem>>, vector<8x128xf32>
    %cst_99 = arith.constant -0.316300213 : f32
    %204 = vector.broadcast %cst_99 : f32 to vector<8x128xf32>
    %205 = arith.mulf %204, %203 : vector<8x128xf32>
    %206 = arith.addf %199, %205 : vector<8x128xf32>
    %cst_100 = arith.constant 0.31488052 : f32
    %207 = vector.broadcast %cst_100 : f32 to vector<8x128xf32>
    %208 = arith.mulf %207, %203 : vector<8x128xf32>
    %209 = arith.addf %202, %208 : vector<8x128xf32>
    %c0_101 = arith.constant 0 : index
    %c10_102 = arith.constant 10 : index
    %210 = vector.load %arg2[%c0_101, %c10_102] : memref<8x532xf32, #tpu.memory_space<vmem>>, vector<8x128xf32>
    %cst_103 = arith.constant -0.316300213 : f32
    %211 = vector.broadcast %cst_103 : f32 to vector<8x128xf32>
    %212 = arith.mulf %211, %210 : vector<8x128xf32>
    %213 = arith.addf %206, %212 : vector<8x128xf32>
    %cst_104 = arith.constant 0.31488052 : f32
    %214 = vector.broadcast %cst_104 : f32 to vector<8x128xf32>
    %215 = arith.mulf %214, %210 : vector<8x128xf32>
    %216 = arith.addf %209, %215 : vector<8x128xf32>
    %c0_105 = arith.constant 0 : index
    %c11_106 = arith.constant 11 : index
    %217 = vector.load %arg2[%c0_105, %c11_106] : memref<8x532xf32, #tpu.memory_space<vmem>>, vector<8x128xf32>
    %cst_107 = arith.constant 0.100200817 : f32
    %218 = vector.broadcast %cst_107 : f32 to vector<8x128xf32>
    %219 = arith.mulf %218, %217 : vector<8x128xf32>
    %220 = arith.addf %213, %219 : vector<8x128xf32>
    %cst_108 = arith.constant -0.0961784645 : f32
    %221 = vector.broadcast %cst_108 : f32 to vector<8x128xf32>
    %222 = arith.mulf %221, %217 : vector<8x128xf32>
    %223 = arith.addf %216, %222 : vector<8x128xf32>
    %c0_109 = arith.constant 0 : index
    %c12_110 = arith.constant 12 : index
    %224 = vector.load %arg2[%c0_109, %c12_110] : memref<8x532xf32, #tpu.memory_space<vmem>>, vector<8x128xf32>
    %cst_111 = arith.constant -0.0542313606 : f32
    %225 = vector.broadcast %cst_111 : f32 to vector<8x128xf32>
    %226 = arith.mulf %225, %224 : vector<8x128xf32>
    %227 = arith.addf %220, %226 : vector<8x128xf32>
    %cst_112 = arith.constant 0.048260726 : f32
    %228 = vector.broadcast %cst_112 : f32 to vector<8x128xf32>
    %229 = arith.mulf %228, %224 : vector<8x128xf32>
    %230 = arith.addf %223, %229 : vector<8x128xf32>
    %c0_113 = arith.constant 0 : index
    %c13_114 = arith.constant 13 : index
    %231 = vector.load %arg2[%c0_113, %c13_114] : memref<8x532xf32, #tpu.memory_space<vmem>>, vector<8x128xf32>
    %cst_115 = arith.constant 0.0330743827 : f32
    %232 = vector.broadcast %cst_115 : f32 to vector<8x128xf32>
    %233 = arith.mulf %232, %231 : vector<8x128xf32>
    %234 = arith.addf %227, %233 : vector<8x128xf32>
    %cst_116 = arith.constant -0.026075976 : f32
    %235 = vector.broadcast %cst_116 : f32 to vector<8x128xf32>
    %236 = arith.mulf %235, %231 : vector<8x128xf32>
    %237 = arith.addf %230, %236 : vector<8x128xf32>
    %c0_117 = arith.constant 0 : index
    %c14_118 = arith.constant 14 : index
    %238 = vector.load %arg2[%c0_117, %c14_118] : memref<8x532xf32, #tpu.memory_space<vmem>>, vector<8x128xf32>
    %cst_119 = arith.constant -0.0206940509 : f32
    %239 = vector.broadcast %cst_119 : f32 to vector<8x128xf32>
    %240 = arith.mulf %239, %238 : vector<8x128xf32>
    %241 = arith.addf %234, %240 : vector<8x128xf32>
    %cst_120 = arith.constant 0.0136499088 : f32
    %242 = vector.broadcast %cst_120 : f32 to vector<8x128xf32>
    %243 = arith.mulf %242, %238 : vector<8x128xf32>
    %244 = arith.addf %237, %243 : vector<8x128xf32>
    %c0_121 = arith.constant 0 : index
    %c15_122 = arith.constant 15 : index
    %245 = vector.load %arg2[%c0_121, %c15_122] : memref<8x532xf32, #tpu.memory_space<vmem>>, vector<8x128xf32>
    %cst_123 = arith.constant 0.0127387913 : f32
    %246 = vector.broadcast %cst_123 : f32 to vector<8x128xf32>
    %247 = arith.mulf %246, %245 : vector<8x128xf32>
    %248 = arith.addf %241, %247 : vector<8x128xf32>
    %cst_124 = arith.constant -0.0064904117 : f32
    %249 = vector.broadcast %cst_124 : f32 to vector<8x128xf32>
    %250 = arith.mulf %249, %245 : vector<8x128xf32>
    %251 = arith.addf %244, %250 : vector<8x128xf32>
    %c0_125 = arith.constant 0 : index
    %c16_126 = arith.constant 16 : index
    %252 = vector.load %arg2[%c0_125, %c16_126] : memref<8x532xf32, #tpu.memory_space<vmem>>, vector<8x128xf32>
    %cst_127 = arith.constant -0.00749615393 : f32
    %253 = vector.broadcast %cst_127 : f32 to vector<8x128xf32>
    %254 = arith.mulf %253, %252 : vector<8x128xf32>
    %255 = arith.addf %248, %254 : vector<8x128xf32>
    %cst_128 = arith.constant 0.00259664282 : f32
    %256 = vector.broadcast %cst_128 : f32 to vector<8x128xf32>
    %257 = arith.mulf %256, %252 : vector<8x128xf32>
    %258 = arith.addf %251, %257 : vector<8x128xf32>
    %c0_129 = arith.constant 0 : index
    %c17_130 = arith.constant 17 : index
    %259 = vector.load %arg2[%c0_129, %c17_130] : memref<8x532xf32, #tpu.memory_space<vmem>>, vector<8x128xf32>
    %cst_131 = arith.constant 0.00409405725 : f32
    %260 = vector.broadcast %cst_131 : f32 to vector<8x128xf32>
    %261 = arith.mulf %260, %259 : vector<8x128xf32>
    %262 = arith.addf %255, %261 : vector<8x128xf32>
    %cst_132 = arith.constant -7.46805337E-4 : f32
    %263 = vector.broadcast %cst_132 : f32 to vector<8x128xf32>
    %264 = arith.mulf %263, %259 : vector<8x128xf32>
    %265 = arith.addf %258, %264 : vector<8x128xf32>
    %c0_133 = arith.constant 0 : index
    %c18_134 = arith.constant 18 : index
    %266 = vector.load %arg2[%c0_133, %c18_134] : memref<8x532xf32, #tpu.memory_space<vmem>>, vector<8x128xf32>
    %cst_135 = arith.constant -0.00198679254 : f32
    %267 = vector.broadcast %cst_135 : f32 to vector<8x128xf32>
    %268 = arith.mulf %267, %266 : vector<8x128xf32>
    %269 = arith.addf %262, %268 : vector<8x128xf32>
    %cst_136 = arith.constant 7.56199515E-5 : f32
    %270 = vector.broadcast %cst_136 : f32 to vector<8x128xf32>
    %271 = arith.mulf %270, %266 : vector<8x128xf32>
    %272 = arith.addf %265, %271 : vector<8x128xf32>
    %c0_137 = arith.constant 0 : index
    %c19_138 = arith.constant 19 : index
    %273 = vector.load %arg2[%c0_137, %c19_138] : memref<8x532xf32, #tpu.memory_space<vmem>>, vector<8x128xf32>
    %cst_139 = arith.constant 7.81250535E-4 : f32
    %274 = vector.broadcast %cst_139 : f32 to vector<8x128xf32>
    %275 = arith.mulf %274, %273 : vector<8x128xf32>
    %276 = arith.addf %269, %275 : vector<8x128xf32>
    %c0_140 = arith.constant 0 : index
    %c0_141 = arith.constant 0 : index
    %277 = vector.load %arg3[%c0_140, %c0_141] : memref<8x512xf32, #tpu.memory_space<vmem>>, vector<8x128xf32>
    tpu.vector_store %arg3[%c0_140, %c0_141], %276 {strides = array<i32>} : memref<8x512xf32, #tpu.memory_space<vmem>>, vector<8x128xf32>,
    %c0_142 = arith.constant 0 : index
    %c0_143 = arith.constant 0 : index
    %278 = vector.load %arg4[%c0_142, %c0_143] : memref<8x512xf32, #tpu.memory_space<vmem>>, vector<8x128xf32>
    tpu.vector_store %arg4[%c0_142, %c0_143], %272 {strides = array<i32>} : memref<8x512xf32, #tpu.memory_space<vmem>>, vector<8x128xf32>,
    %cst_144 = arith.constant 0.000000e+00 : f32
    %279 = vector.broadcast %cst_144 : f32 to vector<8x128xf32>
    %cst_145 = arith.constant 0.000000e+00 : f32
    %280 = vector.broadcast %cst_145 : f32 to vector<8x128xf32>
    %c0_146 = arith.constant 0 : index
    %c128 = arith.constant 128 : index
    %281 = vector.load %arg1[%c0_146, %c128] : memref<8x532xf32, #tpu.memory_space<vmem>>, vector<8x128xf32>
    %cst_147 = arith.constant 4.1447996E-4 : f32
    %282 = vector.broadcast %cst_147 : f32 to vector<8x128xf32>
    %283 = arith.mulf %282, %281 : vector<8x128xf32>
    %284 = arith.addf %279, %283 : vector<8x128xf32>
    %c0_148 = arith.constant 0 : index
    %c129 = arith.constant 129 : index
    %285 = vector.load %arg1[%c0_148, %c129] : memref<8x532xf32, #tpu.memory_space<vmem>>, vector<8x128xf32>
    %cst_149 = arith.constant -0.00109172368 : f32
    %286 = vector.broadcast %cst_149 : f32 to vector<8x128xf32>
    %287 = arith.mulf %286, %285 : vector<8x128xf32>
    %288 = arith.addf %284, %287 : vector<8x128xf32>
    %cst_150 = arith.constant -6.54881703E-4 : f32
    %289 = vector.broadcast %cst_150 : f32 to vector<8x128xf32>
    %290 = arith.mulf %289, %285 : vector<8x128xf32>
    %291 = arith.addf %280, %290 : vector<8x128xf32>
    %c0_151 = arith.constant 0 : index
    %c130 = arith.constant 130 : index
    %292 = vector.load %arg1[%c0_151, %c130] : memref<8x532xf32, #tpu.memory_space<vmem>>, vector<8x128xf32>
    %cst_152 = arith.constant 0.00209038961 : f32
    %293 = vector.broadcast %cst_152 : f32 to vector<8x128xf32>
    %294 = arith.mulf %293, %292 : vector<8x128xf32>
    %295 = arith.addf %288, %294 : vector<8x128xf32>
    %cst_153 = arith.constant 0.00204084581 : f32
    %296 = vector.broadcast %cst_153 : f32 to vector<8x128xf32>
    %297 = arith.mulf %296, %292 : vector<8x128xf32>
    %298 = arith.addf %291, %297 : vector<8x128xf32>
    %c0_154 = arith.constant 0 : index
    %c131 = arith.constant 131 : index
    %299 = vector.load %arg1[%c0_154, %c131] : memref<8x532xf32, #tpu.memory_space<vmem>>, vector<8x128xf32>
    %cst_155 = arith.constant -0.00340258074 : f32
    %300 = vector.broadcast %cst_155 : f32 to vector<8x128xf32>
    %301 = arith.mulf %300, %299 : vector<8x128xf32>
    %302 = arith.addf %295, %301 : vector<8x128xf32>
    %cst_156 = arith.constant -0.00435022358 : f32
    %303 = vector.broadcast %cst_156 : f32 to vector<8x128xf32>
    %304 = arith.mulf %303, %299 : vector<8x128xf32>
    %305 = arith.addf %298, %304 : vector<8x128xf32>
    %c0_157 = arith.constant 0 : index
    %c132 = arith.constant 132 : index
    %306 = vector.load %arg1[%c0_157, %c132] : memref<8x532xf32, #tpu.memory_space<vmem>>, vector<8x128xf32>
    %cst_158 = arith.constant 0.00497226324 : f32
    %307 = vector.broadcast %cst_158 : f32 to vector<8x128xf32>
    %308 = arith.mulf %307, %306 : vector<8x128xf32>
    %309 = arith.addf %302, %308 : vector<8x128xf32>
    %cst_159 = arith.constant 0.00763960229 : f32
    %310 = vector.broadcast %cst_159 : f32 to vector<8x128xf32>
    %311 = arith.mulf %310, %306 : vector<8x128xf32>
    %312 = arith.addf %305, %311 : vector<8x128xf32>
    %c0_160 = arith.constant 0 : index
    %c133 = arith.constant 133 : index
    %313 = vector.load %arg1[%c0_160, %c133] : memref<8x532xf32, #tpu.memory_space<vmem>>, vector<8x128xf32>
    %cst_161 = arith.constant -0.00669603283 : f32
    %314 = vector.broadcast %cst_161 : f32 to vector<8x128xf32>
    %315 = arith.mulf %314, %313 : vector<8x128xf32>
    %316 = arith.addf %309, %315 : vector<8x128xf32>
    %cst_162 = arith.constant -0.0117658041 : f32
    %317 = vector.broadcast %cst_162 : f32 to vector<8x128xf32>
    %318 = arith.mulf %317, %313 : vector<8x128xf32>
    %319 = arith.addf %312, %318 : vector<8x128xf32>
    %c0_163 = arith.constant 0 : index
    %c134 = arith.constant 134 : index
    %320 = vector.load %arg1[%c0_163, %c134] : memref<8x532xf32, #tpu.memory_space<vmem>>, vector<8x128xf32>
    %cst_164 = arith.constant 0.00843243673 : f32
    %321 = vector.broadcast %cst_164 : f32 to vector<8x128xf32>
    %322 = arith.mulf %321, %320 : vector<8x128xf32>
    %323 = arith.addf %316, %322 : vector<8x128xf32>
    %cst_165 = arith.constant 0.0163686648 : f32
    %324 = vector.broadcast %cst_165 : f32 to vector<8x128xf32>
    %325 = arith.mulf %324, %320 : vector<8x128xf32>
    %326 = arith.addf %319, %325 : vector<8x128xf32>
    %c0_166 = arith.constant 0 : index
    %c135 = arith.constant 135 : index
    %327 = vector.load %arg1[%c0_166, %c135] : memref<8x532xf32, #tpu.memory_space<vmem>>, vector<8x128xf32>
    %cst_167 = arith.constant -0.0100189364 : f32
    %328 = vector.broadcast %cst_167 : f32 to vector<8x128xf32>
    %329 = arith.mulf %328, %327 : vector<8x128xf32>
    %330 = arith.addf %323, %329 : vector<8x128xf32>
    %cst_168 = arith.constant -0.0209102947 : f32
    %331 = vector.broadcast %cst_168 : f32 to vector<8x128xf32>
    %332 = arith.mulf %331, %327 : vector<8x128xf32>
    %333 = arith.addf %326, %332 : vector<8x128xf32>
    %c0_169 = arith.constant 0 : index
    %c136 = arith.constant 136 : index
    %334 = vector.load %arg1[%c0_169, %c136] : memref<8x532xf32, #tpu.memory_space<vmem>>, vector<8x128xf32>
    %cst_170 = arith.constant 0.0112939887 : f32
    %335 = vector.broadcast %cst_170 : f32 to vector<8x128xf32>
    %336 = arith.mulf %335, %334 : vector<8x128xf32>
    %337 = arith.addf %330, %336 : vector<8x128xf32>
    %cst_171 = arith.constant 0.0247678459 : f32
    %338 = vector.broadcast %cst_171 : f32 to vector<8x128xf32>
    %339 = arith.mulf %338, %334 : vector<8x128xf32>
    %340 = arith.addf %333, %339 : vector<8x128xf32>
    %c0_172 = arith.constant 0 : index
    %c137 = arith.constant 137 : index
    %341 = vector.load %arg1[%c0_172, %c137] : memref<8x532xf32, #tpu.memory_space<vmem>>, vector<8x128xf32>
    %cst_173 = arith.constant -0.0121205458 : f32
    %342 = vector.broadcast %cst_173 : f32 to vector<8x128xf32>
    %343 = arith.mulf %342, %341 : vector<8x128xf32>
    %344 = arith.addf %337, %343 : vector<8x128xf32>
    %cst_174 = arith.constant -0.0273597576 : f32
    %345 = vector.broadcast %cst_174 : f32 to vector<8x128xf32>
    %346 = arith.mulf %345, %341 : vector<8x128xf32>
    %347 = arith.addf %340, %346 : vector<8x128xf32>
    %c0_175 = arith.constant 0 : index
    %c138 = arith.constant 138 : index
    %348 = vector.load %arg1[%c0_175, %c138] : memref<8x532xf32, #tpu.memory_space<vmem>>, vector<8x128xf32>
    %cst_176 = arith.constant 0.512406826 : f32
    %349 = vector.broadcast %cst_176 : f32 to vector<8x128xf32>
    %350 = arith.mulf %349, %348 : vector<8x128xf32>
    %351 = arith.addf %344, %350 : vector<8x128xf32>
    %cst_177 = arith.constant 0.528273463 : f32
    %352 = vector.broadcast %cst_177 : f32 to vector<8x128xf32>
    %353 = arith.mulf %352, %348 : vector<8x128xf32>
    %354 = arith.addf %347, %353 : vector<8x128xf32>
    %c0_178 = arith.constant 0 : index
    %c139 = arith.constant 139 : index
    %355 = vector.load %arg1[%c0_178, %c139] : memref<8x532xf32, #tpu.memory_space<vmem>>, vector<8x128xf32>
    %cst_179 = arith.constant -0.0121205458 : f32
    %356 = vector.broadcast %cst_179 : f32 to vector<8x128xf32>
    %357 = arith.mulf %356, %355 : vector<8x128xf32>
    %358 = arith.addf %351, %357 : vector<8x128xf32>
    %cst_180 = arith.constant -0.0273597576 : f32
    %359 = vector.broadcast %cst_180 : f32 to vector<8x128xf32>
    %360 = arith.mulf %359, %355 : vector<8x128xf32>
    %361 = arith.addf %354, %360 : vector<8x128xf32>
    %c0_181 = arith.constant 0 : index
    %c140 = arith.constant 140 : index
    %362 = vector.load %arg1[%c0_181, %c140] : memref<8x532xf32, #tpu.memory_space<vmem>>, vector<8x128xf32>
    %cst_182 = arith.constant 0.0112939887 : f32
    %363 = vector.broadcast %cst_182 : f32 to vector<8x128xf32>
    %364 = arith.mulf %363, %362 : vector<8x128xf32>
    %365 = arith.addf %358, %364 : vector<8x128xf32>
    %cst_183 = arith.constant 0.0247678459 : f32
    %366 = vector.broadcast %cst_183 : f32 to vector<8x128xf32>
    %367 = arith.mulf %366, %362 : vector<8x128xf32>
    %368 = arith.addf %361, %367 : vector<8x128xf32>
    %c0_184 = arith.constant 0 : index
    %c141 = arith.constant 141 : index
    %369 = vector.load %arg1[%c0_184, %c141] : memref<8x532xf32, #tpu.memory_space<vmem>>, vector<8x128xf32>
    %cst_185 = arith.constant -0.0100189364 : f32
    %370 = vector.broadcast %cst_185 : f32 to vector<8x128xf32>
    %371 = arith.mulf %370, %369 : vector<8x128xf32>
    %372 = arith.addf %365, %371 : vector<8x128xf32>
    %cst_186 = arith.constant -0.0209102947 : f32
    %373 = vector.broadcast %cst_186 : f32 to vector<8x128xf32>
    %374 = arith.mulf %373, %369 : vector<8x128xf32>
    %375 = arith.addf %368, %374 : vector<8x128xf32>
    %c0_187 = arith.constant 0 : index
    %c142 = arith.constant 142 : index
    %376 = vector.load %arg1[%c0_187, %c142] : memref<8x532xf32, #tpu.memory_space<vmem>>, vector<8x128xf32>
    %cst_188 = arith.constant 0.00843243673 : f32
    %377 = vector.broadcast %cst_188 : f32 to vector<8x128xf32>
    %378 = arith.mulf %377, %376 : vector<8x128xf32>
    %379 = arith.addf %372, %378 : vector<8x128xf32>
    %cst_189 = arith.constant 0.0163686648 : f32
    %380 = vector.broadcast %cst_189 : f32 to vector<8x128xf32>
    %381 = arith.mulf %380, %376 : vector<8x128xf32>
    %382 = arith.addf %375, %381 : vector<8x128xf32>
    %c0_190 = arith.constant 0 : index
    %c143 = arith.constant 143 : index
    %383 = vector.load %arg1[%c0_190, %c143] : memref<8x532xf32, #tpu.memory_space<vmem>>, vector<8x128xf32>
    %cst_191 = arith.constant -0.00669603283 : f32
    %384 = vector.broadcast %cst_191 : f32 to vector<8x128xf32>
    %385 = arith.mulf %384, %383 : vector<8x128xf32>
    %386 = arith.addf %379, %385 : vector<8x128xf32>
    %cst_192 = arith.constant -0.0117658041 : f32
    %387 = vector.broadcast %cst_192 : f32 to vector<8x128xf32>
    %388 = arith.mulf %387, %383 : vector<8x128xf32>
    %389 = arith.addf %382, %388 : vector<8x128xf32>
    %c0_193 = arith.constant 0 : index
    %c144 = arith.constant 144 : index
    %390 = vector.load %arg1[%c0_193, %c144] : memref<8x532xf32, #tpu.memory_space<vmem>>, vector<8x128xf32>
    %cst_194 = arith.constant 0.00497226324 : f32
    %391 = vector.broadcast %cst_194 : f32 to vector<8x128xf32>
    %392 = arith.mulf %391, %390 : vector<8x128xf32>
    %393 = arith.addf %386, %392 : vector<8x128xf32>
    %cst_195 = arith.constant 0.00763960229 : f32
    %394 = vector.broadcast %cst_195 : f32 to vector<8x128xf32>
    %395 = arith.mulf %394, %390 : vector<8x128xf32>
    %396 = arith.addf %389, %395 : vector<8x128xf32>
    %c0_196 = arith.constant 0 : index
    %c145 = arith.constant 145 : index
    %397 = vector.load %arg1[%c0_196, %c145] : memref<8x532xf32, #tpu.memory_space<vmem>>, vector<8x128xf32>
    %cst_197 = arith.constant -0.00340258074 : f32
    %398 = vector.broadcast %cst_197 : f32 to vector<8x128xf32>
    %399 = arith.mulf %398, %397 : vector<8x128xf32>
    %400 = arith.addf %393, %399 : vector<8x128xf32>
    %cst_198 = arith.constant -0.00435022358 : f32
    %401 = vector.broadcast %cst_198 : f32 to vector<8x128xf32>
    %402 = arith.mulf %401, %397 : vector<8x128xf32>
    %403 = arith.addf %396, %402 : vector<8x128xf32>
    %c0_199 = arith.constant 0 : index
    %c146 = arith.constant 146 : index
    %404 = vector.load %arg1[%c0_199, %c146] : memref<8x532xf32, #tpu.memory_space<vmem>>, vector<8x128xf32>
    %cst_200 = arith.constant 0.00209038961 : f32
    %405 = vector.broadcast %cst_200 : f32 to vector<8x128xf32>
    %406 = arith.mulf %405, %404 : vector<8x128xf32>
    %407 = arith.addf %400, %406 : vector<8x128xf32>
    %cst_201 = arith.constant 0.00204084581 : f32
    %408 = vector.broadcast %cst_201 : f32 to vector<8x128xf32>
    %409 = arith.mulf %408, %404 : vector<8x128xf32>
    %410 = arith.addf %403, %409 : vector<8x128xf32>
    %c0_202 = arith.constant 0 : index
    %c147 = arith.constant 147 : index
    %411 = vector.load %arg1[%c0_202, %c147] : memref<8x532xf32, #tpu.memory_space<vmem>>, vector<8x128xf32>
    %cst_203 = arith.constant -0.00109172368 : f32
    %412 = vector.broadcast %cst_203 : f32 to vector<8x128xf32>
    %413 = arith.mulf %412, %411 : vector<8x128xf32>
    %414 = arith.addf %407, %413 : vector<8x128xf32>
    %cst_204 = arith.constant -6.54881703E-4 : f32
    %415 = vector.broadcast %cst_204 : f32 to vector<8x128xf32>
    %416 = arith.mulf %415, %411 : vector<8x128xf32>
    %417 = arith.addf %410, %416 : vector<8x128xf32>
    %c0_205 = arith.constant 0 : index
    %c148 = arith.constant 148 : index
    %418 = vector.load %arg1[%c0_205, %c148] : memref<8x532xf32, #tpu.memory_space<vmem>>, vector<8x128xf32>
    %cst_206 = arith.constant 4.1447996E-4 : f32
    %419 = vector.broadcast %cst_206 : f32 to vector<8x128xf32>
    %420 = arith.mulf %419, %418 : vector<8x128xf32>
    %421 = arith.addf %414, %420 : vector<8x128xf32>
    %c0_207 = arith.constant 0 : index
    %c128_208 = arith.constant 128 : index
    %422 = vector.load %arg2[%c0_207, %c128_208] : memref<8x532xf32, #tpu.memory_space<vmem>>, vector<8x128xf32>
    %cst_209 = arith.constant 7.81250535E-4 : f32
    %423 = vector.broadcast %cst_209 : f32 to vector<8x128xf32>
    %424 = arith.mulf %423, %422 : vector<8x128xf32>
    %425 = arith.addf %421, %424 : vector<8x128xf32>
    %c0_210 = arith.constant 0 : index
    %c129_211 = arith.constant 129 : index
    %426 = vector.load %arg2[%c0_210, %c129_211] : memref<8x532xf32, #tpu.memory_space<vmem>>, vector<8x128xf32>
    %cst_212 = arith.constant -0.00198679254 : f32
    %427 = vector.broadcast %cst_212 : f32 to vector<8x128xf32>
    %428 = arith.mulf %427, %426 : vector<8x128xf32>
    %429 = arith.addf %425, %428 : vector<8x128xf32>
    %cst_213 = arith.constant 7.56199515E-5 : f32
    %430 = vector.broadcast %cst_213 : f32 to vector<8x128xf32>
    %431 = arith.mulf %430, %426 : vector<8x128xf32>
    %432 = arith.addf %417, %431 : vector<8x128xf32>
    %c0_214 = arith.constant 0 : index
    %c130_215 = arith.constant 130 : index
    %433 = vector.load %arg2[%c0_214, %c130_215] : memref<8x532xf32, #tpu.memory_space<vmem>>, vector<8x128xf32>
    %cst_216 = arith.constant 0.00409405725 : f32
    %434 = vector.broadcast %cst_216 : f32 to vector<8x128xf32>
    %435 = arith.mulf %434, %433 : vector<8x128xf32>
    %436 = arith.addf %429, %435 : vector<8x128xf32>
    %cst_217 = arith.constant -7.46805337E-4 : f32
    %437 = vector.broadcast %cst_217 : f32 to vector<8x128xf32>
    %438 = arith.mulf %437, %433 : vector<8x128xf32>
    %439 = arith.addf %432, %438 : vector<8x128xf32>
    %c0_218 = arith.constant 0 : index
    %c131_219 = arith.constant 131 : index
    %440 = vector.load %arg2[%c0_218, %c131_219] : memref<8x532xf32, #tpu.memory_space<vmem>>, vector<8x128xf32>
    %cst_220 = arith.constant -0.00749615393 : f32
    %441 = vector.broadcast %cst_220 : f32 to vector<8x128xf32>
    %442 = arith.mulf %441, %440 : vector<8x128xf32>
    %443 = arith.addf %436, %442 : vector<8x128xf32>
    %cst_221 = arith.constant 0.00259664282 : f32
    %444 = vector.broadcast %cst_221 : f32 to vector<8x128xf32>
    %445 = arith.mulf %444, %440 : vector<8x128xf32>
    %446 = arith.addf %439, %445 : vector<8x128xf32>
    %c0_222 = arith.constant 0 : index
    %c132_223 = arith.constant 132 : index
    %447 = vector.load %arg2[%c0_222, %c132_223] : memref<8x532xf32, #tpu.memory_space<vmem>>, vector<8x128xf32>
    %cst_224 = arith.constant 0.0127387913 : f32
    %448 = vector.broadcast %cst_224 : f32 to vector<8x128xf32>
    %449 = arith.mulf %448, %447 : vector<8x128xf32>
    %450 = arith.addf %443, %449 : vector<8x128xf32>
    %cst_225 = arith.constant -0.0064904117 : f32
    %451 = vector.broadcast %cst_225 : f32 to vector<8x128xf32>
    %452 = arith.mulf %451, %447 : vector<8x128xf32>
    %453 = arith.addf %446, %452 : vector<8x128xf32>
    %c0_226 = arith.constant 0 : index
    %c133_227 = arith.constant 133 : index
    %454 = vector.load %arg2[%c0_226, %c133_227] : memref<8x532xf32, #tpu.memory_space<vmem>>, vector<8x128xf32>
    %cst_228 = arith.constant -0.0206940509 : f32
    %455 = vector.broadcast %cst_228 : f32 to vector<8x128xf32>
    %456 = arith.mulf %455, %454 : vector<8x128xf32>
    %457 = arith.addf %450, %456 : vector<8x128xf32>
    %cst_229 = arith.constant 0.0136499088 : f32
    %458 = vector.broadcast %cst_229 : f32 to vector<8x128xf32>
    %459 = arith.mulf %458, %454 : vector<8x128xf32>
    %460 = arith.addf %453, %459 : vector<8x128xf32>
    %c0_230 = arith.constant 0 : index
    %c134_231 = arith.constant 134 : index
    %461 = vector.load %arg2[%c0_230, %c134_231] : memref<8x532xf32, #tpu.memory_space<vmem>>, vector<8x128xf32>
    %cst_232 = arith.constant 0.0330743827 : f32
    %462 = vector.broadcast %cst_232 : f32 to vector<8x128xf32>
    %463 = arith.mulf %462, %461 : vector<8x128xf32>
    %464 = arith.addf %457, %463 : vector<8x128xf32>
    %cst_233 = arith.constant -0.026075976 : f32
    %465 = vector.broadcast %cst_233 : f32 to vector<8x128xf32>
    %466 = arith.mulf %465, %461 : vector<8x128xf32>
    %467 = arith.addf %460, %466 : vector<8x128xf32>
    %c0_234 = arith.constant 0 : index
    %c135_235 = arith.constant 135 : index
    %468 = vector.load %arg2[%c0_234, %c135_235] : memref<8x532xf32, #tpu.memory_space<vmem>>, vector<8x128xf32>
    %cst_236 = arith.constant -0.0542313606 : f32
    %469 = vector.broadcast %cst_236 : f32 to vector<8x128xf32>
    %470 = arith.mulf %469, %468 : vector<8x128xf32>
    %471 = arith.addf %464, %470 : vector<8x128xf32>
    %cst_237 = arith.constant 0.048260726 : f32
    %472 = vector.broadcast %cst_237 : f32 to vector<8x128xf32>
    %473 = arith.mulf %472, %468 : vector<8x128xf32>
    %474 = arith.addf %467, %473 : vector<8x128xf32>
    %c0_238 = arith.constant 0 : index
    %c136_239 = arith.constant 136 : index
    %475 = vector.load %arg2[%c0_238, %c136_239] : memref<8x532xf32, #tpu.memory_space<vmem>>, vector<8x128xf32>
    %cst_240 = arith.constant 0.100200817 : f32
    %476 = vector.broadcast %cst_240 : f32 to vector<8x128xf32>
    %477 = arith.mulf %476, %475 : vector<8x128xf32>
    %478 = arith.addf %471, %477 : vector<8x128xf32>
    %cst_241 = arith.constant -0.0961784645 : f32
    %479 = vector.broadcast %cst_241 : f32 to vector<8x128xf32>
    %480 = arith.mulf %479, %475 : vector<8x128xf32>
    %481 = arith.addf %474, %480 : vector<8x128xf32>
    %c0_242 = arith.constant 0 : index
    %c137_243 = arith.constant 137 : index
    %482 = vector.load %arg2[%c0_242, %c137_243] : memref<8x532xf32, #tpu.memory_space<vmem>>, vector<8x128xf32>
    %cst_244 = arith.constant -0.316300213 : f32
    %483 = vector.broadcast %cst_244 : f32 to vector<8x128xf32>
    %484 = arith.mulf %483, %482 : vector<8x128xf32>
    %485 = arith.addf %478, %484 : vector<8x128xf32>
    %cst_245 = arith.constant 0.31488052 : f32
    %486 = vector.broadcast %cst_245 : f32 to vector<8x128xf32>
    %487 = arith.mulf %486, %482 : vector<8x128xf32>
    %488 = arith.addf %481, %487 : vector<8x128xf32>
    %c0_246 = arith.constant 0 : index
    %c138_247 = arith.constant 138 : index
    %489 = vector.load %arg2[%c0_246, %c138_247] : memref<8x532xf32, #tpu.memory_space<vmem>>, vector<8x128xf32>
    %cst_248 = arith.constant -0.316300213 : f32
    %490 = vector.broadcast %cst_248 : f32 to vector<8x128xf32>
    %491 = arith.mulf %490, %489 : vector<8x128xf32>
    %492 = arith.addf %485, %491 : vector<8x128xf32>
    %cst_249 = arith.constant 0.31488052 : f32
    %493 = vector.broadcast %cst_249 : f32 to vector<8x128xf32>
    %494 = arith.mulf %493, %489 : vector<8x128xf32>
    %495 = arith.addf %488, %494 : vector<8x128xf32>
    %c0_250 = arith.constant 0 : index
    %c139_251 = arith.constant 139 : index
    %496 = vector.load %arg2[%c0_250, %c139_251] : memref<8x532xf32, #tpu.memory_space<vmem>>, vector<8x128xf32>
    %cst_252 = arith.constant 0.100200817 : f32
    %497 = vector.broadcast %cst_252 : f32 to vector<8x128xf32>
    %498 = arith.mulf %497, %496 : vector<8x128xf32>
    %499 = arith.addf %492, %498 : vector<8x128xf32>
    %cst_253 = arith.constant -0.0961784645 : f32
    %500 = vector.broadcast %cst_253 : f32 to vector<8x128xf32>
    %501 = arith.mulf %500, %496 : vector<8x128xf32>
    %502 = arith.addf %495, %501 : vector<8x128xf32>
    %c0_254 = arith.constant 0 : index
    %c140_255 = arith.constant 140 : index
    %503 = vector.load %arg2[%c0_254, %c140_255] : memref<8x532xf32, #tpu.memory_space<vmem>>, vector<8x128xf32>
    %cst_256 = arith.constant -0.0542313606 : f32
    %504 = vector.broadcast %cst_256 : f32 to vector<8x128xf32>
    %505 = arith.mulf %504, %503 : vector<8x128xf32>
    %506 = arith.addf %499, %505 : vector<8x128xf32>
    %cst_257 = arith.constant 0.048260726 : f32
    %507 = vector.broadcast %cst_257 : f32 to vector<8x128xf32>
    %508 = arith.mulf %507, %503 : vector<8x128xf32>
    %509 = arith.addf %502, %508 : vector<8x128xf32>
    %c0_258 = arith.constant 0 : index
    %c141_259 = arith.constant 141 : index
    %510 = vector.load %arg2[%c0_258, %c141_259] : memref<8x532xf32, #tpu.memory_space<vmem>>, vector<8x128xf32>
    %cst_260 = arith.constant 0.0330743827 : f32
    %511 = vector.broadcast %cst_260 : f32 to vector<8x128xf32>
    %512 = arith.mulf %511, %510 : vector<8x128xf32>
    %513 = arith.addf %506, %512 : vector<8x128xf32>
    %cst_261 = arith.constant -0.026075976 : f32
    %514 = vector.broadcast %cst_261 : f32 to vector<8x128xf32>
    %515 = arith.mulf %514, %510 : vector<8x128xf32>
    %516 = arith.addf %509, %515 : vector<8x128xf32>
    %c0_262 = arith.constant 0 : index
    %c142_263 = arith.constant 142 : index
    %517 = vector.load %arg2[%c0_262, %c142_263] : memref<8x532xf32, #tpu.memory_space<vmem>>, vector<8x128xf32>
    %cst_264 = arith.constant -0.0206940509 : f32
    %518 = vector.broadcast %cst_264 : f32 to vector<8x128xf32>
    %519 = arith.mulf %518, %517 : vector<8x128xf32>
    %520 = arith.addf %513, %519 : vector<8x128xf32>
    %cst_265 = arith.constant 0.0136499088 : f32
    %521 = vector.broadcast %cst_265 : f32 to vector<8x128xf32>
    %522 = arith.mulf %521, %517 : vector<8x128xf32>
    %523 = arith.addf %516, %522 : vector<8x128xf32>
    %c0_266 = arith.constant 0 : index
    %c143_267 = arith.constant 143 : index
    %524 = vector.load %arg2[%c0_266, %c143_267] : memref<8x532xf32, #tpu.memory_space<vmem>>, vector<8x128xf32>
    %cst_268 = arith.constant 0.0127387913 : f32
    %525 = vector.broadcast %cst_268 : f32 to vector<8x128xf32>
    %526 = arith.mulf %525, %524 : vector<8x128xf32>
    %527 = arith.addf %520, %526 : vector<8x128xf32>
    %cst_269 = arith.constant -0.0064904117 : f32
    %528 = vector.broadcast %cst_269 : f32 to vector<8x128xf32>
    %529 = arith.mulf %528, %524 : vector<8x128xf32>
    %530 = arith.addf %523, %529 : vector<8x128xf32>
    %c0_270 = arith.constant 0 : index
    %c144_271 = arith.constant 144 : index
    %531 = vector.load %arg2[%c0_270, %c144_271] : memref<8x532xf32, #tpu.memory_space<vmem>>, vector<8x128xf32>
    %cst_272 = arith.constant -0.00749615393 : f32
    %532 = vector.broadcast %cst_272 : f32 to vector<8x128xf32>
    %533 = arith.mulf %532, %531 : vector<8x128xf32>
    %534 = arith.addf %527, %533 : vector<8x128xf32>
    %cst_273 = arith.constant 0.00259664282 : f32
    %535 = vector.broadcast %cst_273 : f32 to vector<8x128xf32>
    %536 = arith.mulf %535, %531 : vector<8x128xf32>
    %537 = arith.addf %530, %536 : vector<8x128xf32>
    %c0_274 = arith.constant 0 : index
    %c145_275 = arith.constant 145 : index
    %538 = vector.load %arg2[%c0_274, %c145_275] : memref<8x532xf32, #tpu.memory_space<vmem>>, vector<8x128xf32>
    %cst_276 = arith.constant 0.00409405725 : f32
    %539 = vector.broadcast %cst_276 : f32 to vector<8x128xf32>
    %540 = arith.mulf %539, %538 : vector<8x128xf32>
    %541 = arith.addf %534, %540 : vector<8x128xf32>
    %cst_277 = arith.constant -7.46805337E-4 : f32
    %542 = vector.broadcast %cst_277 : f32 to vector<8x128xf32>
    %543 = arith.mulf %542, %538 : vector<8x128xf32>
    %544 = arith.addf %537, %543 : vector<8x128xf32>
    %c0_278 = arith.constant 0 : index
    %c146_279 = arith.constant 146 : index
    %545 = vector.load %arg2[%c0_278, %c146_279] : memref<8x532xf32, #tpu.memory_space<vmem>>, vector<8x128xf32>
    %cst_280 = arith.constant -0.00198679254 : f32
    %546 = vector.broadcast %cst_280 : f32 to vector<8x128xf32>
    %547 = arith.mulf %546, %545 : vector<8x128xf32>
    %548 = arith.addf %541, %547 : vector<8x128xf32>
    %cst_281 = arith.constant 7.56199515E-5 : f32
    %549 = vector.broadcast %cst_281 : f32 to vector<8x128xf32>
    %550 = arith.mulf %549, %545 : vector<8x128xf32>
    %551 = arith.addf %544, %550 : vector<8x128xf32>
    %c0_282 = arith.constant 0 : index
    %c147_283 = arith.constant 147 : index
    %552 = vector.load %arg2[%c0_282, %c147_283] : memref<8x532xf32, #tpu.memory_space<vmem>>, vector<8x128xf32>
    %cst_284 = arith.constant 7.81250535E-4 : f32
    %553 = vector.broadcast %cst_284 : f32 to vector<8x128xf32>
    %554 = arith.mulf %553, %552 : vector<8x128xf32>
    %555 = arith.addf %548, %554 : vector<8x128xf32>
    %c0_285 = arith.constant 0 : index
    %c128_286 = arith.constant 128 : index
    %556 = vector.load %arg3[%c0_285, %c128_286] : memref<8x512xf32, #tpu.memory_space<vmem>>, vector<8x128xf32>
    tpu.vector_store %arg3[%c0_285, %c128_286], %555 {strides = array<i32>} : memref<8x512xf32, #tpu.memory_space<vmem>>, vector<8x128xf32>,
    %c0_287 = arith.constant 0 : index
    %c128_288 = arith.constant 128 : index
    %557 = vector.load %arg4[%c0_287, %c128_288] : memref<8x512xf32, #tpu.memory_space<vmem>>, vector<8x128xf32>
    tpu.vector_store %arg4[%c0_287, %c128_288], %551 {strides = array<i32>} : memref<8x512xf32, #tpu.memory_space<vmem>>, vector<8x128xf32>,
    %cst_289 = arith.constant 0.000000e+00 : f32
    %558 = vector.broadcast %cst_289 : f32 to vector<8x128xf32>
    %cst_290 = arith.constant 0.000000e+00 : f32
    %559 = vector.broadcast %cst_290 : f32 to vector<8x128xf32>
    %c0_291 = arith.constant 0 : index
    %c256 = arith.constant 256 : index
    %560 = vector.load %arg1[%c0_291, %c256] : memref<8x532xf32, #tpu.memory_space<vmem>>, vector<8x128xf32>
    %cst_292 = arith.constant 4.1447996E-4 : f32
    %561 = vector.broadcast %cst_292 : f32 to vector<8x128xf32>
    %562 = arith.mulf %561, %560 : vector<8x128xf32>
    %563 = arith.addf %558, %562 : vector<8x128xf32>
    %c0_293 = arith.constant 0 : index
    %c257 = arith.constant 257 : index
    %564 = vector.load %arg1[%c0_293, %c257] : memref<8x532xf32, #tpu.memory_space<vmem>>, vector<8x128xf32>
    %cst_294 = arith.constant -0.00109172368 : f32
    %565 = vector.broadcast %cst_294 : f32 to vector<8x128xf32>
    %566 = arith.mulf %565, %564 : vector<8x128xf32>
    %567 = arith.addf %563, %566 : vector<8x128xf32>
    %cst_295 = arith.constant -6.54881703E-4 : f32
    %568 = vector.broadcast %cst_295 : f32 to vector<8x128xf32>
    %569 = arith.mulf %568, %564 : vector<8x128xf32>
    %570 = arith.addf %559, %569 : vector<8x128xf32>
    %c0_296 = arith.constant 0 : index
    %c258 = arith.constant 258 : index
    %571 = vector.load %arg1[%c0_296, %c258] : memref<8x532xf32, #tpu.memory_space<vmem>>, vector<8x128xf32>
    %cst_297 = arith.constant 0.00209038961 : f32
    %572 = vector.broadcast %cst_297 : f32 to vector<8x128xf32>
    %573 = arith.mulf %572, %571 : vector<8x128xf32>
    %574 = arith.addf %567, %573 : vector<8x128xf32>
    %cst_298 = arith.constant 0.00204084581 : f32
    %575 = vector.broadcast %cst_298 : f32 to vector<8x128xf32>
    %576 = arith.mulf %575, %571 : vector<8x128xf32>
    %577 = arith.addf %570, %576 : vector<8x128xf32>
    %c0_299 = arith.constant 0 : index
    %c259 = arith.constant 259 : index
    %578 = vector.load %arg1[%c0_299, %c259] : memref<8x532xf32, #tpu.memory_space<vmem>>, vector<8x128xf32>
    %cst_300 = arith.constant -0.00340258074 : f32
    %579 = vector.broadcast %cst_300 : f32 to vector<8x128xf32>
    %580 = arith.mulf %579, %578 : vector<8x128xf32>
    %581 = arith.addf %574, %580 : vector<8x128xf32>
    %cst_301 = arith.constant -0.00435022358 : f32
    %582 = vector.broadcast %cst_301 : f32 to vector<8x128xf32>
    %583 = arith.mulf %582, %578 : vector<8x128xf32>
    %584 = arith.addf %577, %583 : vector<8x128xf32>
    %c0_302 = arith.constant 0 : index
    %c260 = arith.constant 260 : index
    %585 = vector.load %arg1[%c0_302, %c260] : memref<8x532xf32, #tpu.memory_space<vmem>>, vector<8x128xf32>
    %cst_303 = arith.constant 0.00497226324 : f32
    %586 = vector.broadcast %cst_303 : f32 to vector<8x128xf32>
    %587 = arith.mulf %586, %585 : vector<8x128xf32>
    %588 = arith.addf %581, %587 : vector<8x128xf32>
    %cst_304 = arith.constant 0.00763960229 : f32
    %589 = vector.broadcast %cst_304 : f32 to vector<8x128xf32>
    %590 = arith.mulf %589, %585 : vector<8x128xf32>
    %591 = arith.addf %584, %590 : vector<8x128xf32>
    %c0_305 = arith.constant 0 : index
    %c261 = arith.constant 261 : index
    %592 = vector.load %arg1[%c0_305, %c261] : memref<8x532xf32, #tpu.memory_space<vmem>>, vector<8x128xf32>
    %cst_306 = arith.constant -0.00669603283 : f32
    %593 = vector.broadcast %cst_306 : f32 to vector<8x128xf32>
    %594 = arith.mulf %593, %592 : vector<8x128xf32>
    %595 = arith.addf %588, %594 : vector<8x128xf32>
    %cst_307 = arith.constant -0.0117658041 : f32
    %596 = vector.broadcast %cst_307 : f32 to vector<8x128xf32>
    %597 = arith.mulf %596, %592 : vector<8x128xf32>
    %598 = arith.addf %591, %597 : vector<8x128xf32>
    %c0_308 = arith.constant 0 : index
    %c262 = arith.constant 262 : index
    %599 = vector.load %arg1[%c0_308, %c262] : memref<8x532xf32, #tpu.memory_space<vmem>>, vector<8x128xf32>
    %cst_309 = arith.constant 0.00843243673 : f32
    %600 = vector.broadcast %cst_309 : f32 to vector<8x128xf32>
    %601 = arith.mulf %600, %599 : vector<8x128xf32>
    %602 = arith.addf %595, %601 : vector<8x128xf32>
    %cst_310 = arith.constant 0.0163686648 : f32
    %603 = vector.broadcast %cst_310 : f32 to vector<8x128xf32>
    %604 = arith.mulf %603, %599 : vector<8x128xf32>
    %605 = arith.addf %598, %604 : vector<8x128xf32>
    %c0_311 = arith.constant 0 : index
    %c263 = arith.constant 263 : index
    %606 = vector.load %arg1[%c0_311, %c263] : memref<8x532xf32, #tpu.memory_space<vmem>>, vector<8x128xf32>
    %cst_312 = arith.constant -0.0100189364 : f32
    %607 = vector.broadcast %cst_312 : f32 to vector<8x128xf32>
    %608 = arith.mulf %607, %606 : vector<8x128xf32>
    %609 = arith.addf %602, %608 : vector<8x128xf32>
    %cst_313 = arith.constant -0.0209102947 : f32
    %610 = vector.broadcast %cst_313 : f32 to vector<8x128xf32>
    %611 = arith.mulf %610, %606 : vector<8x128xf32>
    %612 = arith.addf %605, %611 : vector<8x128xf32>
    %c0_314 = arith.constant 0 : index
    %c264 = arith.constant 264 : index
    %613 = vector.load %arg1[%c0_314, %c264] : memref<8x532xf32, #tpu.memory_space<vmem>>, vector<8x128xf32>
    %cst_315 = arith.constant 0.0112939887 : f32
    %614 = vector.broadcast %cst_315 : f32 to vector<8x128xf32>
    %615 = arith.mulf %614, %613 : vector<8x128xf32>
    %616 = arith.addf %609, %615 : vector<8x128xf32>
    %cst_316 = arith.constant 0.0247678459 : f32
    %617 = vector.broadcast %cst_316 : f32 to vector<8x128xf32>
    %618 = arith.mulf %617, %613 : vector<8x128xf32>
    %619 = arith.addf %612, %618 : vector<8x128xf32>
    %c0_317 = arith.constant 0 : index
    %c265 = arith.constant 265 : index
    %620 = vector.load %arg1[%c0_317, %c265] : memref<8x532xf32, #tpu.memory_space<vmem>>, vector<8x128xf32>
    %cst_318 = arith.constant -0.0121205458 : f32
    %621 = vector.broadcast %cst_318 : f32 to vector<8x128xf32>
    %622 = arith.mulf %621, %620 : vector<8x128xf32>
    %623 = arith.addf %616, %622 : vector<8x128xf32>
    %cst_319 = arith.constant -0.0273597576 : f32
    %624 = vector.broadcast %cst_319 : f32 to vector<8x128xf32>
    %625 = arith.mulf %624, %620 : vector<8x128xf32>
    %626 = arith.addf %619, %625 : vector<8x128xf32>
    %c0_320 = arith.constant 0 : index
    %c266 = arith.constant 266 : index
    %627 = vector.load %arg1[%c0_320, %c266] : memref<8x532xf32, #tpu.memory_space<vmem>>, vector<8x128xf32>
    %cst_321 = arith.constant 0.512406826 : f32
    %628 = vector.broadcast %cst_321 : f32 to vector<8x128xf32>
    %629 = arith.mulf %628, %627 : vector<8x128xf32>
    %630 = arith.addf %623, %629 : vector<8x128xf32>
    %cst_322 = arith.constant 0.528273463 : f32
    %631 = vector.broadcast %cst_322 : f32 to vector<8x128xf32>
    %632 = arith.mulf %631, %627 : vector<8x128xf32>
    %633 = arith.addf %626, %632 : vector<8x128xf32>
    %c0_323 = arith.constant 0 : index
    %c267 = arith.constant 267 : index
    %634 = vector.load %arg1[%c0_323, %c267] : memref<8x532xf32, #tpu.memory_space<vmem>>, vector<8x128xf32>
    %cst_324 = arith.constant -0.0121205458 : f32
    %635 = vector.broadcast %cst_324 : f32 to vector<8x128xf32>
    %636 = arith.mulf %635, %634 : vector<8x128xf32>
    %637 = arith.addf %630, %636 : vector<8x128xf32>
    %cst_325 = arith.constant -0.0273597576 : f32
    %638 = vector.broadcast %cst_325 : f32 to vector<8x128xf32>
    %639 = arith.mulf %638, %634 : vector<8x128xf32>
    %640 = arith.addf %633, %639 : vector<8x128xf32>
    %c0_326 = arith.constant 0 : index
    %c268 = arith.constant 268 : index
    %641 = vector.load %arg1[%c0_326, %c268] : memref<8x532xf32, #tpu.memory_space<vmem>>, vector<8x128xf32>
    %cst_327 = arith.constant 0.0112939887 : f32
    %642 = vector.broadcast %cst_327 : f32 to vector<8x128xf32>
    %643 = arith.mulf %642, %641 : vector<8x128xf32>
    %644 = arith.addf %637, %643 : vector<8x128xf32>
    %cst_328 = arith.constant 0.0247678459 : f32
    %645 = vector.broadcast %cst_328 : f32 to vector<8x128xf32>
    %646 = arith.mulf %645, %641 : vector<8x128xf32>
    %647 = arith.addf %640, %646 : vector<8x128xf32>
    %c0_329 = arith.constant 0 : index
    %c269 = arith.constant 269 : index
    %648 = vector.load %arg1[%c0_329, %c269] : memref<8x532xf32, #tpu.memory_space<vmem>>, vector<8x128xf32>
    %cst_330 = arith.constant -0.0100189364 : f32
    %649 = vector.broadcast %cst_330 : f32 to vector<8x128xf32>
    %650 = arith.mulf %649, %648 : vector<8x128xf32>
    %651 = arith.addf %644, %650 : vector<8x128xf32>
    %cst_331 = arith.constant -0.0209102947 : f32
    %652 = vector.broadcast %cst_331 : f32 to vector<8x128xf32>
    %653 = arith.mulf %652, %648 : vector<8x128xf32>
    %654 = arith.addf %647, %653 : vector<8x128xf32>
    %c0_332 = arith.constant 0 : index
    %c270 = arith.constant 270 : index
    %655 = vector.load %arg1[%c0_332, %c270] : memref<8x532xf32, #tpu.memory_space<vmem>>, vector<8x128xf32>
    %cst_333 = arith.constant 0.00843243673 : f32
    %656 = vector.broadcast %cst_333 : f32 to vector<8x128xf32>
    %657 = arith.mulf %656, %655 : vector<8x128xf32>
    %658 = arith.addf %651, %657 : vector<8x128xf32>
    %cst_334 = arith.constant 0.0163686648 : f32
    %659 = vector.broadcast %cst_334 : f32 to vector<8x128xf32>
    %660 = arith.mulf %659, %655 : vector<8x128xf32>
    %661 = arith.addf %654, %660 : vector<8x128xf32>
    %c0_335 = arith.constant 0 : index
    %c271 = arith.constant 271 : index
    %662 = vector.load %arg1[%c0_335, %c271] : memref<8x532xf32, #tpu.memory_space<vmem>>, vector<8x128xf32>
    %cst_336 = arith.constant -0.00669603283 : f32
    %663 = vector.broadcast %cst_336 : f32 to vector<8x128xf32>
    %664 = arith.mulf %663, %662 : vector<8x128xf32>
    %665 = arith.addf %658, %664 : vector<8x128xf32>
    %cst_337 = arith.constant -0.0117658041 : f32
    %666 = vector.broadcast %cst_337 : f32 to vector<8x128xf32>
    %667 = arith.mulf %666, %662 : vector<8x128xf32>
    %668 = arith.addf %661, %667 : vector<8x128xf32>
    %c0_338 = arith.constant 0 : index
    %c272 = arith.constant 272 : index
    %669 = vector.load %arg1[%c0_338, %c272] : memref<8x532xf32, #tpu.memory_space<vmem>>, vector<8x128xf32>
    %cst_339 = arith.constant 0.00497226324 : f32
    %670 = vector.broadcast %cst_339 : f32 to vector<8x128xf32>
    %671 = arith.mulf %670, %669 : vector<8x128xf32>
    %672 = arith.addf %665, %671 : vector<8x128xf32>
    %cst_340 = arith.constant 0.00763960229 : f32
    %673 = vector.broadcast %cst_340 : f32 to vector<8x128xf32>
    %674 = arith.mulf %673, %669 : vector<8x128xf32>
    %675 = arith.addf %668, %674 : vector<8x128xf32>
    %c0_341 = arith.constant 0 : index
    %c273 = arith.constant 273 : index
    %676 = vector.load %arg1[%c0_341, %c273] : memref<8x532xf32, #tpu.memory_space<vmem>>, vector<8x128xf32>
    %cst_342 = arith.constant -0.00340258074 : f32
    %677 = vector.broadcast %cst_342 : f32 to vector<8x128xf32>
    %678 = arith.mulf %677, %676 : vector<8x128xf32>
    %679 = arith.addf %672, %678 : vector<8x128xf32>
    %cst_343 = arith.constant -0.00435022358 : f32
    %680 = vector.broadcast %cst_343 : f32 to vector<8x128xf32>
    %681 = arith.mulf %680, %676 : vector<8x128xf32>
    %682 = arith.addf %675, %681 : vector<8x128xf32>
    %c0_344 = arith.constant 0 : index
    %c274 = arith.constant 274 : index
    %683 = vector.load %arg1[%c0_344, %c274] : memref<8x532xf32, #tpu.memory_space<vmem>>, vector<8x128xf32>
    %cst_345 = arith.constant 0.00209038961 : f32
    %684 = vector.broadcast %cst_345 : f32 to vector<8x128xf32>
    %685 = arith.mulf %684, %683 : vector<8x128xf32>
    %686 = arith.addf %679, %685 : vector<8x128xf32>
    %cst_346 = arith.constant 0.00204084581 : f32
    %687 = vector.broadcast %cst_346 : f32 to vector<8x128xf32>
    %688 = arith.mulf %687, %683 : vector<8x128xf32>
    %689 = arith.addf %682, %688 : vector<8x128xf32>
    %c0_347 = arith.constant 0 : index
    %c275 = arith.constant 275 : index
    %690 = vector.load %arg1[%c0_347, %c275] : memref<8x532xf32, #tpu.memory_space<vmem>>, vector<8x128xf32>
    %cst_348 = arith.constant -0.00109172368 : f32
    %691 = vector.broadcast %cst_348 : f32 to vector<8x128xf32>
    %692 = arith.mulf %691, %690 : vector<8x128xf32>
    %693 = arith.addf %686, %692 : vector<8x128xf32>
    %cst_349 = arith.constant -6.54881703E-4 : f32
    %694 = vector.broadcast %cst_349 : f32 to vector<8x128xf32>
    %695 = arith.mulf %694, %690 : vector<8x128xf32>
    %696 = arith.addf %689, %695 : vector<8x128xf32>
    %c0_350 = arith.constant 0 : index
    %c276 = arith.constant 276 : index
    %697 = vector.load %arg1[%c0_350, %c276] : memref<8x532xf32, #tpu.memory_space<vmem>>, vector<8x128xf32>
    %cst_351 = arith.constant 4.1447996E-4 : f32
    %698 = vector.broadcast %cst_351 : f32 to vector<8x128xf32>
    %699 = arith.mulf %698, %697 : vector<8x128xf32>
    %700 = arith.addf %693, %699 : vector<8x128xf32>
    %c0_352 = arith.constant 0 : index
    %c256_353 = arith.constant 256 : index
    %701 = vector.load %arg2[%c0_352, %c256_353] : memref<8x532xf32, #tpu.memory_space<vmem>>, vector<8x128xf32>
    %cst_354 = arith.constant 7.81250535E-4 : f32
    %702 = vector.broadcast %cst_354 : f32 to vector<8x128xf32>
    %703 = arith.mulf %702, %701 : vector<8x128xf32>
    %704 = arith.addf %700, %703 : vector<8x128xf32>
    %c0_355 = arith.constant 0 : index
    %c257_356 = arith.constant 257 : index
    %705 = vector.load %arg2[%c0_355, %c257_356] : memref<8x532xf32, #tpu.memory_space<vmem>>, vector<8x128xf32>
    %cst_357 = arith.constant -0.00198679254 : f32
    %706 = vector.broadcast %cst_357 : f32 to vector<8x128xf32>
    %707 = arith.mulf %706, %705 : vector<8x128xf32>
    %708 = arith.addf %704, %707 : vector<8x128xf32>
    %cst_358 = arith.constant 7.56199515E-5 : f32
    %709 = vector.broadcast %cst_358 : f32 to vector<8x128xf32>
    %710 = arith.mulf %709, %705 : vector<8x128xf32>
    %711 = arith.addf %696, %710 : vector<8x128xf32>
    %c0_359 = arith.constant 0 : index
    %c258_360 = arith.constant 258 : index
    %712 = vector.load %arg2[%c0_359, %c258_360] : memref<8x532xf32, #tpu.memory_space<vmem>>, vector<8x128xf32>
    %cst_361 = arith.constant 0.00409405725 : f32
    %713 = vector.broadcast %cst_361 : f32 to vector<8x128xf32>
    %714 = arith.mulf %713, %712 : vector<8x128xf32>
    %715 = arith.addf %708, %714 : vector<8x128xf32>
    %cst_362 = arith.constant -7.46805337E-4 : f32
    %716 = vector.broadcast %cst_362 : f32 to vector<8x128xf32>
    %717 = arith.mulf %716, %712 : vector<8x128xf32>
    %718 = arith.addf %711, %717 : vector<8x128xf32>
    %c0_363 = arith.constant 0 : index
    %c259_364 = arith.constant 259 : index
    %719 = vector.load %arg2[%c0_363, %c259_364] : memref<8x532xf32, #tpu.memory_space<vmem>>, vector<8x128xf32>
    %cst_365 = arith.constant -0.00749615393 : f32
    %720 = vector.broadcast %cst_365 : f32 to vector<8x128xf32>
    %721 = arith.mulf %720, %719 : vector<8x128xf32>
    %722 = arith.addf %715, %721 : vector<8x128xf32>
    %cst_366 = arith.constant 0.00259664282 : f32
    %723 = vector.broadcast %cst_366 : f32 to vector<8x128xf32>
    %724 = arith.mulf %723, %719 : vector<8x128xf32>
    %725 = arith.addf %718, %724 : vector<8x128xf32>
    %c0_367 = arith.constant 0 : index
    %c260_368 = arith.constant 260 : index
    %726 = vector.load %arg2[%c0_367, %c260_368] : memref<8x532xf32, #tpu.memory_space<vmem>>, vector<8x128xf32>
    %cst_369 = arith.constant 0.0127387913 : f32
    %727 = vector.broadcast %cst_369 : f32 to vector<8x128xf32>
    %728 = arith.mulf %727, %726 : vector<8x128xf32>
    %729 = arith.addf %722, %728 : vector<8x128xf32>
    %cst_370 = arith.constant -0.0064904117 : f32
    %730 = vector.broadcast %cst_370 : f32 to vector<8x128xf32>
    %731 = arith.mulf %730, %726 : vector<8x128xf32>
    %732 = arith.addf %725, %731 : vector<8x128xf32>
    %c0_371 = arith.constant 0 : index
    %c261_372 = arith.constant 261 : index
    %733 = vector.load %arg2[%c0_371, %c261_372] : memref<8x532xf32, #tpu.memory_space<vmem>>, vector<8x128xf32>
    %cst_373 = arith.constant -0.0206940509 : f32
    %734 = vector.broadcast %cst_373 : f32 to vector<8x128xf32>
    %735 = arith.mulf %734, %733 : vector<8x128xf32>
    %736 = arith.addf %729, %735 : vector<8x128xf32>
    %cst_374 = arith.constant 0.0136499088 : f32
    %737 = vector.broadcast %cst_374 : f32 to vector<8x128xf32>
    %738 = arith.mulf %737, %733 : vector<8x128xf32>
    %739 = arith.addf %732, %738 : vector<8x128xf32>
    %c0_375 = arith.constant 0 : index
    %c262_376 = arith.constant 262 : index
    %740 = vector.load %arg2[%c0_375, %c262_376] : memref<8x532xf32, #tpu.memory_space<vmem>>, vector<8x128xf32>
    %cst_377 = arith.constant 0.0330743827 : f32
    %741 = vector.broadcast %cst_377 : f32 to vector<8x128xf32>
    %742 = arith.mulf %741, %740 : vector<8x128xf32>
    %743 = arith.addf %736, %742 : vector<8x128xf32>
    %cst_378 = arith.constant -0.026075976 : f32
    %744 = vector.broadcast %cst_378 : f32 to vector<8x128xf32>
    %745 = arith.mulf %744, %740 : vector<8x128xf32>
    %746 = arith.addf %739, %745 : vector<8x128xf32>
    %c0_379 = arith.constant 0 : index
    %c263_380 = arith.constant 263 : index
    %747 = vector.load %arg2[%c0_379, %c263_380] : memref<8x532xf32, #tpu.memory_space<vmem>>, vector<8x128xf32>
    %cst_381 = arith.constant -0.0542313606 : f32
    %748 = vector.broadcast %cst_381 : f32 to vector<8x128xf32>
    %749 = arith.mulf %748, %747 : vector<8x128xf32>
    %750 = arith.addf %743, %749 : vector<8x128xf32>
    %cst_382 = arith.constant 0.048260726 : f32
    %751 = vector.broadcast %cst_382 : f32 to vector<8x128xf32>
    %752 = arith.mulf %751, %747 : vector<8x128xf32>
    %753 = arith.addf %746, %752 : vector<8x128xf32>
    %c0_383 = arith.constant 0 : index
    %c264_384 = arith.constant 264 : index
    %754 = vector.load %arg2[%c0_383, %c264_384] : memref<8x532xf32, #tpu.memory_space<vmem>>, vector<8x128xf32>
    %cst_385 = arith.constant 0.100200817 : f32
    %755 = vector.broadcast %cst_385 : f32 to vector<8x128xf32>
    %756 = arith.mulf %755, %754 : vector<8x128xf32>
    %757 = arith.addf %750, %756 : vector<8x128xf32>
    %cst_386 = arith.constant -0.0961784645 : f32
    %758 = vector.broadcast %cst_386 : f32 to vector<8x128xf32>
    %759 = arith.mulf %758, %754 : vector<8x128xf32>
    %760 = arith.addf %753, %759 : vector<8x128xf32>
    %c0_387 = arith.constant 0 : index
    %c265_388 = arith.constant 265 : index
    %761 = vector.load %arg2[%c0_387, %c265_388] : memref<8x532xf32, #tpu.memory_space<vmem>>, vector<8x128xf32>
    %cst_389 = arith.constant -0.316300213 : f32
    %762 = vector.broadcast %cst_389 : f32 to vector<8x128xf32>
    %763 = arith.mulf %762, %761 : vector<8x128xf32>
    %764 = arith.addf %757, %763 : vector<8x128xf32>
    %cst_390 = arith.constant 0.31488052 : f32
    %765 = vector.broadcast %cst_390 : f32 to vector<8x128xf32>
    %766 = arith.mulf %765, %761 : vector<8x128xf32>
    %767 = arith.addf %760, %766 : vector<8x128xf32>
    %c0_391 = arith.constant 0 : index
    %c266_392 = arith.constant 266 : index
    %768 = vector.load %arg2[%c0_391, %c266_392] : memref<8x532xf32, #tpu.memory_space<vmem>>, vector<8x128xf32>
    %cst_393 = arith.constant -0.316300213 : f32
    %769 = vector.broadcast %cst_393 : f32 to vector<8x128xf32>
    %770 = arith.mulf %769, %768 : vector<8x128xf32>
    %771 = arith.addf %764, %770 : vector<8x128xf32>
    %cst_394 = arith.constant 0.31488052 : f32
    %772 = vector.broadcast %cst_394 : f32 to vector<8x128xf32>
    %773 = arith.mulf %772, %768 : vector<8x128xf32>
    %774 = arith.addf %767, %773 : vector<8x128xf32>
    %c0_395 = arith.constant 0 : index
    %c267_396 = arith.constant 267 : index
    %775 = vector.load %arg2[%c0_395, %c267_396] : memref<8x532xf32, #tpu.memory_space<vmem>>, vector<8x128xf32>
    %cst_397 = arith.constant 0.100200817 : f32
    %776 = vector.broadcast %cst_397 : f32 to vector<8x128xf32>
    %777 = arith.mulf %776, %775 : vector<8x128xf32>
    %778 = arith.addf %771, %777 : vector<8x128xf32>
    %cst_398 = arith.constant -0.0961784645 : f32
    %779 = vector.broadcast %cst_398 : f32 to vector<8x128xf32>
    %780 = arith.mulf %779, %775 : vector<8x128xf32>
    %781 = arith.addf %774, %780 : vector<8x128xf32>
    %c0_399 = arith.constant 0 : index
    %c268_400 = arith.constant 268 : index
    %782 = vector.load %arg2[%c0_399, %c268_400] : memref<8x532xf32, #tpu.memory_space<vmem>>, vector<8x128xf32>
    %cst_401 = arith.constant -0.0542313606 : f32
    %783 = vector.broadcast %cst_401 : f32 to vector<8x128xf32>
    %784 = arith.mulf %783, %782 : vector<8x128xf32>
    %785 = arith.addf %778, %784 : vector<8x128xf32>
    %cst_402 = arith.constant 0.048260726 : f32
    %786 = vector.broadcast %cst_402 : f32 to vector<8x128xf32>
    %787 = arith.mulf %786, %782 : vector<8x128xf32>
    %788 = arith.addf %781, %787 : vector<8x128xf32>
    %c0_403 = arith.constant 0 : index
    %c269_404 = arith.constant 269 : index
    %789 = vector.load %arg2[%c0_403, %c269_404] : memref<8x532xf32, #tpu.memory_space<vmem>>, vector<8x128xf32>
    %cst_405 = arith.constant 0.0330743827 : f32
    %790 = vector.broadcast %cst_405 : f32 to vector<8x128xf32>
    %791 = arith.mulf %790, %789 : vector<8x128xf32>
    %792 = arith.addf %785, %791 : vector<8x128xf32>
    %cst_406 = arith.constant -0.026075976 : f32
    %793 = vector.broadcast %cst_406 : f32 to vector<8x128xf32>
    %794 = arith.mulf %793, %789 : vector<8x128xf32>
    %795 = arith.addf %788, %794 : vector<8x128xf32>
    %c0_407 = arith.constant 0 : index
    %c270_408 = arith.constant 270 : index
    %796 = vector.load %arg2[%c0_407, %c270_408] : memref<8x532xf32, #tpu.memory_space<vmem>>, vector<8x128xf32>
    %cst_409 = arith.constant -0.0206940509 : f32
    %797 = vector.broadcast %cst_409 : f32 to vector<8x128xf32>
    %798 = arith.mulf %797, %796 : vector<8x128xf32>
    %799 = arith.addf %792, %798 : vector<8x128xf32>
    %cst_410 = arith.constant 0.0136499088 : f32
    %800 = vector.broadcast %cst_410 : f32 to vector<8x128xf32>
    %801 = arith.mulf %800, %796 : vector<8x128xf32>
    %802 = arith.addf %795, %801 : vector<8x128xf32>
    %c0_411 = arith.constant 0 : index
    %c271_412 = arith.constant 271 : index
    %803 = vector.load %arg2[%c0_411, %c271_412] : memref<8x532xf32, #tpu.memory_space<vmem>>, vector<8x128xf32>
    %cst_413 = arith.constant 0.0127387913 : f32
    %804 = vector.broadcast %cst_413 : f32 to vector<8x128xf32>
    %805 = arith.mulf %804, %803 : vector<8x128xf32>
    %806 = arith.addf %799, %805 : vector<8x128xf32>
    %cst_414 = arith.constant -0.0064904117 : f32
    %807 = vector.broadcast %cst_414 : f32 to vector<8x128xf32>
    %808 = arith.mulf %807, %803 : vector<8x128xf32>
    %809 = arith.addf %802, %808 : vector<8x128xf32>
    %c0_415 = arith.constant 0 : index
    %c272_416 = arith.constant 272 : index
    %810 = vector.load %arg2[%c0_415, %c272_416] : memref<8x532xf32, #tpu.memory_space<vmem>>, vector<8x128xf32>
    %cst_417 = arith.constant -0.00749615393 : f32
    %811 = vector.broadcast %cst_417 : f32 to vector<8x128xf32>
    %812 = arith.mulf %811, %810 : vector<8x128xf32>
    %813 = arith.addf %806, %812 : vector<8x128xf32>
    %cst_418 = arith.constant 0.00259664282 : f32
    %814 = vector.broadcast %cst_418 : f32 to vector<8x128xf32>
    %815 = arith.mulf %814, %810 : vector<8x128xf32>
    %816 = arith.addf %809, %815 : vector<8x128xf32>
    %c0_419 = arith.constant 0 : index
    %c273_420 = arith.constant 273 : index
    %817 = vector.load %arg2[%c0_419, %c273_420] : memref<8x532xf32, #tpu.memory_space<vmem>>, vector<8x128xf32>
    %cst_421 = arith.constant 0.00409405725 : f32
    %818 = vector.broadcast %cst_421 : f32 to vector<8x128xf32>
    %819 = arith.mulf %818, %817 : vector<8x128xf32>
    %820 = arith.addf %813, %819 : vector<8x128xf32>
    %cst_422 = arith.constant -7.46805337E-4 : f32
    %821 = vector.broadcast %cst_422 : f32 to vector<8x128xf32>
    %822 = arith.mulf %821, %817 : vector<8x128xf32>
    %823 = arith.addf %816, %822 : vector<8x128xf32>
    %c0_423 = arith.constant 0 : index
    %c274_424 = arith.constant 274 : index
    %824 = vector.load %arg2[%c0_423, %c274_424] : memref<8x532xf32, #tpu.memory_space<vmem>>, vector<8x128xf32>
    %cst_425 = arith.constant -0.00198679254 : f32
    %825 = vector.broadcast %cst_425 : f32 to vector<8x128xf32>
    %826 = arith.mulf %825, %824 : vector<8x128xf32>
    %827 = arith.addf %820, %826 : vector<8x128xf32>
    %cst_426 = arith.constant 7.56199515E-5 : f32
    %828 = vector.broadcast %cst_426 : f32 to vector<8x128xf32>
    %829 = arith.mulf %828, %824 : vector<8x128xf32>
    %830 = arith.addf %823, %829 : vector<8x128xf32>
    %c0_427 = arith.constant 0 : index
    %c275_428 = arith.constant 275 : index
    %831 = vector.load %arg2[%c0_427, %c275_428] : memref<8x532xf32, #tpu.memory_space<vmem>>, vector<8x128xf32>
    %cst_429 = arith.constant 7.81250535E-4 : f32
    %832 = vector.broadcast %cst_429 : f32 to vector<8x128xf32>
    %833 = arith.mulf %832, %831 : vector<8x128xf32>
    %834 = arith.addf %827, %833 : vector<8x128xf32>
    %c0_430 = arith.constant 0 : index
    %c256_431 = arith.constant 256 : index
    %835 = vector.load %arg3[%c0_430, %c256_431] : memref<8x512xf32, #tpu.memory_space<vmem>>, vector<8x128xf32>
    tpu.vector_store %arg3[%c0_430, %c256_431], %834 {strides = array<i32>} : memref<8x512xf32, #tpu.memory_space<vmem>>, vector<8x128xf32>,
    %c0_432 = arith.constant 0 : index
    %c256_433 = arith.constant 256 : index
    %836 = vector.load %arg4[%c0_432, %c256_433] : memref<8x512xf32, #tpu.memory_space<vmem>>, vector<8x128xf32>
    tpu.vector_store %arg4[%c0_432, %c256_433], %830 {strides = array<i32>} : memref<8x512xf32, #tpu.memory_space<vmem>>, vector<8x128xf32>,
    %cst_434 = arith.constant 0.000000e+00 : f32
    %837 = vector.broadcast %cst_434 : f32 to vector<8x128xf32>
    %cst_435 = arith.constant 0.000000e+00 : f32
    %838 = vector.broadcast %cst_435 : f32 to vector<8x128xf32>
    %c0_436 = arith.constant 0 : index
    %c384 = arith.constant 384 : index
    %839 = vector.load %arg1[%c0_436, %c384] : memref<8x532xf32, #tpu.memory_space<vmem>>, vector<8x128xf32>
    %cst_437 = arith.constant 4.1447996E-4 : f32
    %840 = vector.broadcast %cst_437 : f32 to vector<8x128xf32>
    %841 = arith.mulf %840, %839 : vector<8x128xf32>
    %842 = arith.addf %837, %841 : vector<8x128xf32>
    %c0_438 = arith.constant 0 : index
    %c385 = arith.constant 385 : index
    %843 = vector.load %arg1[%c0_438, %c385] : memref<8x532xf32, #tpu.memory_space<vmem>>, vector<8x128xf32>
    %cst_439 = arith.constant -0.00109172368 : f32
    %844 = vector.broadcast %cst_439 : f32 to vector<8x128xf32>
    %845 = arith.mulf %844, %843 : vector<8x128xf32>
    %846 = arith.addf %842, %845 : vector<8x128xf32>
    %cst_440 = arith.constant -6.54881703E-4 : f32
    %847 = vector.broadcast %cst_440 : f32 to vector<8x128xf32>
    %848 = arith.mulf %847, %843 : vector<8x128xf32>
    %849 = arith.addf %838, %848 : vector<8x128xf32>
    %c0_441 = arith.constant 0 : index
    %c386 = arith.constant 386 : index
    %850 = vector.load %arg1[%c0_441, %c386] : memref<8x532xf32, #tpu.memory_space<vmem>>, vector<8x128xf32>
    %cst_442 = arith.constant 0.00209038961 : f32
    %851 = vector.broadcast %cst_442 : f32 to vector<8x128xf32>
    %852 = arith.mulf %851, %850 : vector<8x128xf32>
    %853 = arith.addf %846, %852 : vector<8x128xf32>
    %cst_443 = arith.constant 0.00204084581 : f32
    %854 = vector.broadcast %cst_443 : f32 to vector<8x128xf32>
    %855 = arith.mulf %854, %850 : vector<8x128xf32>
    %856 = arith.addf %849, %855 : vector<8x128xf32>
    %c0_444 = arith.constant 0 : index
    %c387 = arith.constant 387 : index
    %857 = vector.load %arg1[%c0_444, %c387] : memref<8x532xf32, #tpu.memory_space<vmem>>, vector<8x128xf32>
    %cst_445 = arith.constant -0.00340258074 : f32
    %858 = vector.broadcast %cst_445 : f32 to vector<8x128xf32>
    %859 = arith.mulf %858, %857 : vector<8x128xf32>
    %860 = arith.addf %853, %859 : vector<8x128xf32>
    %cst_446 = arith.constant -0.00435022358 : f32
    %861 = vector.broadcast %cst_446 : f32 to vector<8x128xf32>
    %862 = arith.mulf %861, %857 : vector<8x128xf32>
    %863 = arith.addf %856, %862 : vector<8x128xf32>
    %c0_447 = arith.constant 0 : index
    %c388 = arith.constant 388 : index
    %864 = vector.load %arg1[%c0_447, %c388] : memref<8x532xf32, #tpu.memory_space<vmem>>, vector<8x128xf32>
    %cst_448 = arith.constant 0.00497226324 : f32
    %865 = vector.broadcast %cst_448 : f32 to vector<8x128xf32>
    %866 = arith.mulf %865, %864 : vector<8x128xf32>
    %867 = arith.addf %860, %866 : vector<8x128xf32>
    %cst_449 = arith.constant 0.00763960229 : f32
    %868 = vector.broadcast %cst_449 : f32 to vector<8x128xf32>
    %869 = arith.mulf %868, %864 : vector<8x128xf32>
    %870 = arith.addf %863, %869 : vector<8x128xf32>
    %c0_450 = arith.constant 0 : index
    %c389 = arith.constant 389 : index
    %871 = vector.load %arg1[%c0_450, %c389] : memref<8x532xf32, #tpu.memory_space<vmem>>, vector<8x128xf32>
    %cst_451 = arith.constant -0.00669603283 : f32
    %872 = vector.broadcast %cst_451 : f32 to vector<8x128xf32>
    %873 = arith.mulf %872, %871 : vector<8x128xf32>
    %874 = arith.addf %867, %873 : vector<8x128xf32>
    %cst_452 = arith.constant -0.0117658041 : f32
    %875 = vector.broadcast %cst_452 : f32 to vector<8x128xf32>
    %876 = arith.mulf %875, %871 : vector<8x128xf32>
    %877 = arith.addf %870, %876 : vector<8x128xf32>
    %c0_453 = arith.constant 0 : index
    %c390 = arith.constant 390 : index
    %878 = vector.load %arg1[%c0_453, %c390] : memref<8x532xf32, #tpu.memory_space<vmem>>, vector<8x128xf32>
    %cst_454 = arith.constant 0.00843243673 : f32
    %879 = vector.broadcast %cst_454 : f32 to vector<8x128xf32>
    %880 = arith.mulf %879, %878 : vector<8x128xf32>
    %881 = arith.addf %874, %880 : vector<8x128xf32>
    %cst_455 = arith.constant 0.0163686648 : f32
    %882 = vector.broadcast %cst_455 : f32 to vector<8x128xf32>
    %883 = arith.mulf %882, %878 : vector<8x128xf32>
    %884 = arith.addf %877, %883 : vector<8x128xf32>
    %c0_456 = arith.constant 0 : index
    %c391 = arith.constant 391 : index
    %885 = vector.load %arg1[%c0_456, %c391] : memref<8x532xf32, #tpu.memory_space<vmem>>, vector<8x128xf32>
    %cst_457 = arith.constant -0.0100189364 : f32
    %886 = vector.broadcast %cst_457 : f32 to vector<8x128xf32>
    %887 = arith.mulf %886, %885 : vector<8x128xf32>
    %888 = arith.addf %881, %887 : vector<8x128xf32>
    %cst_458 = arith.constant -0.0209102947 : f32
    %889 = vector.broadcast %cst_458 : f32 to vector<8x128xf32>
    %890 = arith.mulf %889, %885 : vector<8x128xf32>
    %891 = arith.addf %884, %890 : vector<8x128xf32>
    %c0_459 = arith.constant 0 : index
    %c392 = arith.constant 392 : index
    %892 = vector.load %arg1[%c0_459, %c392] : memref<8x532xf32, #tpu.memory_space<vmem>>, vector<8x128xf32>
    %cst_460 = arith.constant 0.0112939887 : f32
    %893 = vector.broadcast %cst_460 : f32 to vector<8x128xf32>
    %894 = arith.mulf %893, %892 : vector<8x128xf32>
    %895 = arith.addf %888, %894 : vector<8x128xf32>
    %cst_461 = arith.constant 0.0247678459 : f32
    %896 = vector.broadcast %cst_461 : f32 to vector<8x128xf32>
    %897 = arith.mulf %896, %892 : vector<8x128xf32>
    %898 = arith.addf %891, %897 : vector<8x128xf32>
    %c0_462 = arith.constant 0 : index
    %c393 = arith.constant 393 : index
    %899 = vector.load %arg1[%c0_462, %c393] : memref<8x532xf32, #tpu.memory_space<vmem>>, vector<8x128xf32>
    %cst_463 = arith.constant -0.0121205458 : f32
    %900 = vector.broadcast %cst_463 : f32 to vector<8x128xf32>
    %901 = arith.mulf %900, %899 : vector<8x128xf32>
    %902 = arith.addf %895, %901 : vector<8x128xf32>
    %cst_464 = arith.constant -0.0273597576 : f32
    %903 = vector.broadcast %cst_464 : f32 to vector<8x128xf32>
    %904 = arith.mulf %903, %899 : vector<8x128xf32>
    %905 = arith.addf %898, %904 : vector<8x128xf32>
    %c0_465 = arith.constant 0 : index
    %c394 = arith.constant 394 : index
    %906 = vector.load %arg1[%c0_465, %c394] : memref<8x532xf32, #tpu.memory_space<vmem>>, vector<8x128xf32>
    %cst_466 = arith.constant 0.512406826 : f32
    %907 = vector.broadcast %cst_466 : f32 to vector<8x128xf32>
    %908 = arith.mulf %907, %906 : vector<8x128xf32>
    %909 = arith.addf %902, %908 : vector<8x128xf32>
    %cst_467 = arith.constant 0.528273463 : f32
    %910 = vector.broadcast %cst_467 : f32 to vector<8x128xf32>
    %911 = arith.mulf %910, %906 : vector<8x128xf32>
    %912 = arith.addf %905, %911 : vector<8x128xf32>
    %c0_468 = arith.constant 0 : index
    %c395 = arith.constant 395 : index
    %913 = vector.load %arg1[%c0_468, %c395] : memref<8x532xf32, #tpu.memory_space<vmem>>, vector<8x128xf32>
    %cst_469 = arith.constant -0.0121205458 : f32
    %914 = vector.broadcast %cst_469 : f32 to vector<8x128xf32>
    %915 = arith.mulf %914, %913 : vector<8x128xf32>
    %916 = arith.addf %909, %915 : vector<8x128xf32>
    %cst_470 = arith.constant -0.0273597576 : f32
    %917 = vector.broadcast %cst_470 : f32 to vector<8x128xf32>
    %918 = arith.mulf %917, %913 : vector<8x128xf32>
    %919 = arith.addf %912, %918 : vector<8x128xf32>
    %c0_471 = arith.constant 0 : index
    %c396 = arith.constant 396 : index
    %920 = vector.load %arg1[%c0_471, %c396] : memref<8x532xf32, #tpu.memory_space<vmem>>, vector<8x128xf32>
    %cst_472 = arith.constant 0.0112939887 : f32
    %921 = vector.broadcast %cst_472 : f32 to vector<8x128xf32>
    %922 = arith.mulf %921, %920 : vector<8x128xf32>
    %923 = arith.addf %916, %922 : vector<8x128xf32>
    %cst_473 = arith.constant 0.0247678459 : f32
    %924 = vector.broadcast %cst_473 : f32 to vector<8x128xf32>
    %925 = arith.mulf %924, %920 : vector<8x128xf32>
    %926 = arith.addf %919, %925 : vector<8x128xf32>
    %c0_474 = arith.constant 0 : index
    %c397 = arith.constant 397 : index
    %927 = vector.load %arg1[%c0_474, %c397] : memref<8x532xf32, #tpu.memory_space<vmem>>, vector<8x128xf32>
    %cst_475 = arith.constant -0.0100189364 : f32
    %928 = vector.broadcast %cst_475 : f32 to vector<8x128xf32>
    %929 = arith.mulf %928, %927 : vector<8x128xf32>
    %930 = arith.addf %923, %929 : vector<8x128xf32>
    %cst_476 = arith.constant -0.0209102947 : f32
    %931 = vector.broadcast %cst_476 : f32 to vector<8x128xf32>
    %932 = arith.mulf %931, %927 : vector<8x128xf32>
    %933 = arith.addf %926, %932 : vector<8x128xf32>
    %c0_477 = arith.constant 0 : index
    %c398 = arith.constant 398 : index
    %934 = vector.load %arg1[%c0_477, %c398] : memref<8x532xf32, #tpu.memory_space<vmem>>, vector<8x128xf32>
    %cst_478 = arith.constant 0.00843243673 : f32
    %935 = vector.broadcast %cst_478 : f32 to vector<8x128xf32>
    %936 = arith.mulf %935, %934 : vector<8x128xf32>
    %937 = arith.addf %930, %936 : vector<8x128xf32>
    %cst_479 = arith.constant 0.0163686648 : f32
    %938 = vector.broadcast %cst_479 : f32 to vector<8x128xf32>
    %939 = arith.mulf %938, %934 : vector<8x128xf32>
    %940 = arith.addf %933, %939 : vector<8x128xf32>
    %c0_480 = arith.constant 0 : index
    %c399 = arith.constant 399 : index
    %941 = vector.load %arg1[%c0_480, %c399] : memref<8x532xf32, #tpu.memory_space<vmem>>, vector<8x128xf32>
    %cst_481 = arith.constant -0.00669603283 : f32
    %942 = vector.broadcast %cst_481 : f32 to vector<8x128xf32>
    %943 = arith.mulf %942, %941 : vector<8x128xf32>
    %944 = arith.addf %937, %943 : vector<8x128xf32>
    %cst_482 = arith.constant -0.0117658041 : f32
    %945 = vector.broadcast %cst_482 : f32 to vector<8x128xf32>
    %946 = arith.mulf %945, %941 : vector<8x128xf32>
    %947 = arith.addf %940, %946 : vector<8x128xf32>
    %c0_483 = arith.constant 0 : index
    %c400 = arith.constant 400 : index
    %948 = vector.load %arg1[%c0_483, %c400] : memref<8x532xf32, #tpu.memory_space<vmem>>, vector<8x128xf32>
    %cst_484 = arith.constant 0.00497226324 : f32
    %949 = vector.broadcast %cst_484 : f32 to vector<8x128xf32>
    %950 = arith.mulf %949, %948 : vector<8x128xf32>
    %951 = arith.addf %944, %950 : vector<8x128xf32>
    %cst_485 = arith.constant 0.00763960229 : f32
    %952 = vector.broadcast %cst_485 : f32 to vector<8x128xf32>
    %953 = arith.mulf %952, %948 : vector<8x128xf32>
    %954 = arith.addf %947, %953 : vector<8x128xf32>
    %c0_486 = arith.constant 0 : index
    %c401 = arith.constant 401 : index
    %955 = vector.load %arg1[%c0_486, %c401] : memref<8x532xf32, #tpu.memory_space<vmem>>, vector<8x128xf32>
    %cst_487 = arith.constant -0.00340258074 : f32
    %956 = vector.broadcast %cst_487 : f32 to vector<8x128xf32>
    %957 = arith.mulf %956, %955 : vector<8x128xf32>
    %958 = arith.addf %951, %957 : vector<8x128xf32>
    %cst_488 = arith.constant -0.00435022358 : f32
    %959 = vector.broadcast %cst_488 : f32 to vector<8x128xf32>
    %960 = arith.mulf %959, %955 : vector<8x128xf32>
    %961 = arith.addf %954, %960 : vector<8x128xf32>
    %c0_489 = arith.constant 0 : index
    %c402 = arith.constant 402 : index
    %962 = vector.load %arg1[%c0_489, %c402] : memref<8x532xf32, #tpu.memory_space<vmem>>, vector<8x128xf32>
    %cst_490 = arith.constant 0.00209038961 : f32
    %963 = vector.broadcast %cst_490 : f32 to vector<8x128xf32>
    %964 = arith.mulf %963, %962 : vector<8x128xf32>
    %965 = arith.addf %958, %964 : vector<8x128xf32>
    %cst_491 = arith.constant 0.00204084581 : f32
    %966 = vector.broadcast %cst_491 : f32 to vector<8x128xf32>
    %967 = arith.mulf %966, %962 : vector<8x128xf32>
    %968 = arith.addf %961, %967 : vector<8x128xf32>
    %c0_492 = arith.constant 0 : index
    %c403 = arith.constant 403 : index
    %969 = vector.load %arg1[%c0_492, %c403] : memref<8x532xf32, #tpu.memory_space<vmem>>, vector<8x128xf32>
    %cst_493 = arith.constant -0.00109172368 : f32
    %970 = vector.broadcast %cst_493 : f32 to vector<8x128xf32>
    %971 = arith.mulf %970, %969 : vector<8x128xf32>
    %972 = arith.addf %965, %971 : vector<8x128xf32>
    %cst_494 = arith.constant -6.54881703E-4 : f32
    %973 = vector.broadcast %cst_494 : f32 to vector<8x128xf32>
    %974 = arith.mulf %973, %969 : vector<8x128xf32>
    %975 = arith.addf %968, %974 : vector<8x128xf32>
    %c0_495 = arith.constant 0 : index
    %c404 = arith.constant 404 : index
    %976 = vector.load %arg1[%c0_495, %c404] : memref<8x532xf32, #tpu.memory_space<vmem>>, vector<8x128xf32>
    %cst_496 = arith.constant 4.1447996E-4 : f32
    %977 = vector.broadcast %cst_496 : f32 to vector<8x128xf32>
    %978 = arith.mulf %977, %976 : vector<8x128xf32>
    %979 = arith.addf %972, %978 : vector<8x128xf32>
    %c0_497 = arith.constant 0 : index
    %c384_498 = arith.constant 384 : index
    %980 = vector.load %arg2[%c0_497, %c384_498] : memref<8x532xf32, #tpu.memory_space<vmem>>, vector<8x128xf32>
    %cst_499 = arith.constant 7.81250535E-4 : f32
    %981 = vector.broadcast %cst_499 : f32 to vector<8x128xf32>
    %982 = arith.mulf %981, %980 : vector<8x128xf32>
    %983 = arith.addf %979, %982 : vector<8x128xf32>
    %c0_500 = arith.constant 0 : index
    %c385_501 = arith.constant 385 : index
    %984 = vector.load %arg2[%c0_500, %c385_501] : memref<8x532xf32, #tpu.memory_space<vmem>>, vector<8x128xf32>
    %cst_502 = arith.constant -0.00198679254 : f32
    %985 = vector.broadcast %cst_502 : f32 to vector<8x128xf32>
    %986 = arith.mulf %985, %984 : vector<8x128xf32>
    %987 = arith.addf %983, %986 : vector<8x128xf32>
    %cst_503 = arith.constant 7.56199515E-5 : f32
    %988 = vector.broadcast %cst_503 : f32 to vector<8x128xf32>
    %989 = arith.mulf %988, %984 : vector<8x128xf32>
    %990 = arith.addf %975, %989 : vector<8x128xf32>
    %c0_504 = arith.constant 0 : index
    %c386_505 = arith.constant 386 : index
    %991 = vector.load %arg2[%c0_504, %c386_505] : memref<8x532xf32, #tpu.memory_space<vmem>>, vector<8x128xf32>
    %cst_506 = arith.constant 0.00409405725 : f32
    %992 = vector.broadcast %cst_506 : f32 to vector<8x128xf32>
    %993 = arith.mulf %992, %991 : vector<8x128xf32>
    %994 = arith.addf %987, %993 : vector<8x128xf32>
    %cst_507 = arith.constant -7.46805337E-4 : f32
    %995 = vector.broadcast %cst_507 : f32 to vector<8x128xf32>
    %996 = arith.mulf %995, %991 : vector<8x128xf32>
    %997 = arith.addf %990, %996 : vector<8x128xf32>
    %c0_508 = arith.constant 0 : index
    %c387_509 = arith.constant 387 : index
    %998 = vector.load %arg2[%c0_508, %c387_509] : memref<8x532xf32, #tpu.memory_space<vmem>>, vector<8x128xf32>
    %cst_510 = arith.constant -0.00749615393 : f32
    %999 = vector.broadcast %cst_510 : f32 to vector<8x128xf32>
    %1000 = arith.mulf %999, %998 : vector<8x128xf32>
    %1001 = arith.addf %994, %1000 : vector<8x128xf32>
    %cst_511 = arith.constant 0.00259664282 : f32
    %1002 = vector.broadcast %cst_511 : f32 to vector<8x128xf32>
    %1003 = arith.mulf %1002, %998 : vector<8x128xf32>
    %1004 = arith.addf %997, %1003 : vector<8x128xf32>
    %c0_512 = arith.constant 0 : index
    %c388_513 = arith.constant 388 : index
    %1005 = vector.load %arg2[%c0_512, %c388_513] : memref<8x532xf32, #tpu.memory_space<vmem>>, vector<8x128xf32>
    %cst_514 = arith.constant 0.0127387913 : f32
    %1006 = vector.broadcast %cst_514 : f32 to vector<8x128xf32>
    %1007 = arith.mulf %1006, %1005 : vector<8x128xf32>
    %1008 = arith.addf %1001, %1007 : vector<8x128xf32>
    %cst_515 = arith.constant -0.0064904117 : f32
    %1009 = vector.broadcast %cst_515 : f32 to vector<8x128xf32>
    %1010 = arith.mulf %1009, %1005 : vector<8x128xf32>
    %1011 = arith.addf %1004, %1010 : vector<8x128xf32>
    %c0_516 = arith.constant 0 : index
    %c389_517 = arith.constant 389 : index
    %1012 = vector.load %arg2[%c0_516, %c389_517] : memref<8x532xf32, #tpu.memory_space<vmem>>, vector<8x128xf32>
    %cst_518 = arith.constant -0.0206940509 : f32
    %1013 = vector.broadcast %cst_518 : f32 to vector<8x128xf32>
    %1014 = arith.mulf %1013, %1012 : vector<8x128xf32>
    %1015 = arith.addf %1008, %1014 : vector<8x128xf32>
    %cst_519 = arith.constant 0.0136499088 : f32
    %1016 = vector.broadcast %cst_519 : f32 to vector<8x128xf32>
    %1017 = arith.mulf %1016, %1012 : vector<8x128xf32>
    %1018 = arith.addf %1011, %1017 : vector<8x128xf32>
    %c0_520 = arith.constant 0 : index
    %c390_521 = arith.constant 390 : index
    %1019 = vector.load %arg2[%c0_520, %c390_521] : memref<8x532xf32, #tpu.memory_space<vmem>>, vector<8x128xf32>
    %cst_522 = arith.constant 0.0330743827 : f32
    %1020 = vector.broadcast %cst_522 : f32 to vector<8x128xf32>
    %1021 = arith.mulf %1020, %1019 : vector<8x128xf32>
    %1022 = arith.addf %1015, %1021 : vector<8x128xf32>
    %cst_523 = arith.constant -0.026075976 : f32
    %1023 = vector.broadcast %cst_523 : f32 to vector<8x128xf32>
    %1024 = arith.mulf %1023, %1019 : vector<8x128xf32>
    %1025 = arith.addf %1018, %1024 : vector<8x128xf32>
    %c0_524 = arith.constant 0 : index
    %c391_525 = arith.constant 391 : index
    %1026 = vector.load %arg2[%c0_524, %c391_525] : memref<8x532xf32, #tpu.memory_space<vmem>>, vector<8x128xf32>
    %cst_526 = arith.constant -0.0542313606 : f32
    %1027 = vector.broadcast %cst_526 : f32 to vector<8x128xf32>
    %1028 = arith.mulf %1027, %1026 : vector<8x128xf32>
    %1029 = arith.addf %1022, %1028 : vector<8x128xf32>
    %cst_527 = arith.constant 0.048260726 : f32
    %1030 = vector.broadcast %cst_527 : f32 to vector<8x128xf32>
    %1031 = arith.mulf %1030, %1026 : vector<8x128xf32>
    %1032 = arith.addf %1025, %1031 : vector<8x128xf32>
    %c0_528 = arith.constant 0 : index
    %c392_529 = arith.constant 392 : index
    %1033 = vector.load %arg2[%c0_528, %c392_529] : memref<8x532xf32, #tpu.memory_space<vmem>>, vector<8x128xf32>
    %cst_530 = arith.constant 0.100200817 : f32
    %1034 = vector.broadcast %cst_530 : f32 to vector<8x128xf32>
    %1035 = arith.mulf %1034, %1033 : vector<8x128xf32>
    %1036 = arith.addf %1029, %1035 : vector<8x128xf32>
    %cst_531 = arith.constant -0.0961784645 : f32
    %1037 = vector.broadcast %cst_531 : f32 to vector<8x128xf32>
    %1038 = arith.mulf %1037, %1033 : vector<8x128xf32>
    %1039 = arith.addf %1032, %1038 : vector<8x128xf32>
    %c0_532 = arith.constant 0 : index
    %c393_533 = arith.constant 393 : index
    %1040 = vector.load %arg2[%c0_532, %c393_533] : memref<8x532xf32, #tpu.memory_space<vmem>>, vector<8x128xf32>
    %cst_534 = arith.constant -0.316300213 : f32
    %1041 = vector.broadcast %cst_534 : f32 to vector<8x128xf32>
    %1042 = arith.mulf %1041, %1040 : vector<8x128xf32>
    %1043 = arith.addf %1036, %1042 : vector<8x128xf32>
    %cst_535 = arith.constant 0.31488052 : f32
    %1044 = vector.broadcast %cst_535 : f32 to vector<8x128xf32>
    %1045 = arith.mulf %1044, %1040 : vector<8x128xf32>
    %1046 = arith.addf %1039, %1045 : vector<8x128xf32>
    %c0_536 = arith.constant 0 : index
    %c394_537 = arith.constant 394 : index
    %1047 = vector.load %arg2[%c0_536, %c394_537] : memref<8x532xf32, #tpu.memory_space<vmem>>, vector<8x128xf32>
    %cst_538 = arith.constant -0.316300213 : f32
    %1048 = vector.broadcast %cst_538 : f32 to vector<8x128xf32>
    %1049 = arith.mulf %1048, %1047 : vector<8x128xf32>
    %1050 = arith.addf %1043, %1049 : vector<8x128xf32>
    %cst_539 = arith.constant 0.31488052 : f32
    %1051 = vector.broadcast %cst_539 : f32 to vector<8x128xf32>
    %1052 = arith.mulf %1051, %1047 : vector<8x128xf32>
    %1053 = arith.addf %1046, %1052 : vector<8x128xf32>
    %c0_540 = arith.constant 0 : index
    %c395_541 = arith.constant 395 : index
    %1054 = vector.load %arg2[%c0_540, %c395_541] : memref<8x532xf32, #tpu.memory_space<vmem>>, vector<8x128xf32>
    %cst_542 = arith.constant 0.100200817 : f32
    %1055 = vector.broadcast %cst_542 : f32 to vector<8x128xf32>
    %1056 = arith.mulf %1055, %1054 : vector<8x128xf32>
    %1057 = arith.addf %1050, %1056 : vector<8x128xf32>
    %cst_543 = arith.constant -0.0961784645 : f32
    %1058 = vector.broadcast %cst_543 : f32 to vector<8x128xf32>
    %1059 = arith.mulf %1058, %1054 : vector<8x128xf32>
    %1060 = arith.addf %1053, %1059 : vector<8x128xf32>
    %c0_544 = arith.constant 0 : index
    %c396_545 = arith.constant 396 : index
    %1061 = vector.load %arg2[%c0_544, %c396_545] : memref<8x532xf32, #tpu.memory_space<vmem>>, vector<8x128xf32>
    %cst_546 = arith.constant -0.0542313606 : f32
    %1062 = vector.broadcast %cst_546 : f32 to vector<8x128xf32>
    %1063 = arith.mulf %1062, %1061 : vector<8x128xf32>
    %1064 = arith.addf %1057, %1063 : vector<8x128xf32>
    %cst_547 = arith.constant 0.048260726 : f32
    %1065 = vector.broadcast %cst_547 : f32 to vector<8x128xf32>
    %1066 = arith.mulf %1065, %1061 : vector<8x128xf32>
    %1067 = arith.addf %1060, %1066 : vector<8x128xf32>
    %c0_548 = arith.constant 0 : index
    %c397_549 = arith.constant 397 : index
    %1068 = vector.load %arg2[%c0_548, %c397_549] : memref<8x532xf32, #tpu.memory_space<vmem>>, vector<8x128xf32>
    %cst_550 = arith.constant 0.0330743827 : f32
    %1069 = vector.broadcast %cst_550 : f32 to vector<8x128xf32>
    %1070 = arith.mulf %1069, %1068 : vector<8x128xf32>
    %1071 = arith.addf %1064, %1070 : vector<8x128xf32>
    %cst_551 = arith.constant -0.026075976 : f32
    %1072 = vector.broadcast %cst_551 : f32 to vector<8x128xf32>
    %1073 = arith.mulf %1072, %1068 : vector<8x128xf32>
    %1074 = arith.addf %1067, %1073 : vector<8x128xf32>
    %c0_552 = arith.constant 0 : index
    %c398_553 = arith.constant 398 : index
    %1075 = vector.load %arg2[%c0_552, %c398_553] : memref<8x532xf32, #tpu.memory_space<vmem>>, vector<8x128xf32>
    %cst_554 = arith.constant -0.0206940509 : f32
    %1076 = vector.broadcast %cst_554 : f32 to vector<8x128xf32>
    %1077 = arith.mulf %1076, %1075 : vector<8x128xf32>
    %1078 = arith.addf %1071, %1077 : vector<8x128xf32>
    %cst_555 = arith.constant 0.0136499088 : f32
    %1079 = vector.broadcast %cst_555 : f32 to vector<8x128xf32>
    %1080 = arith.mulf %1079, %1075 : vector<8x128xf32>
    %1081 = arith.addf %1074, %1080 : vector<8x128xf32>
    %c0_556 = arith.constant 0 : index
    %c399_557 = arith.constant 399 : index
    %1082 = vector.load %arg2[%c0_556, %c399_557] : memref<8x532xf32, #tpu.memory_space<vmem>>, vector<8x128xf32>
    %cst_558 = arith.constant 0.0127387913 : f32
    %1083 = vector.broadcast %cst_558 : f32 to vector<8x128xf32>
    %1084 = arith.mulf %1083, %1082 : vector<8x128xf32>
    %1085 = arith.addf %1078, %1084 : vector<8x128xf32>
    %cst_559 = arith.constant -0.0064904117 : f32
    %1086 = vector.broadcast %cst_559 : f32 to vector<8x128xf32>
    %1087 = arith.mulf %1086, %1082 : vector<8x128xf32>
    %1088 = arith.addf %1081, %1087 : vector<8x128xf32>
    %c0_560 = arith.constant 0 : index
    %c400_561 = arith.constant 400 : index
    %1089 = vector.load %arg2[%c0_560, %c400_561] : memref<8x532xf32, #tpu.memory_space<vmem>>, vector<8x128xf32>
    %cst_562 = arith.constant -0.00749615393 : f32
    %1090 = vector.broadcast %cst_562 : f32 to vector<8x128xf32>
    %1091 = arith.mulf %1090, %1089 : vector<8x128xf32>
    %1092 = arith.addf %1085, %1091 : vector<8x128xf32>
    %cst_563 = arith.constant 0.00259664282 : f32
    %1093 = vector.broadcast %cst_563 : f32 to vector<8x128xf32>
    %1094 = arith.mulf %1093, %1089 : vector<8x128xf32>
    %1095 = arith.addf %1088, %1094 : vector<8x128xf32>
    %c0_564 = arith.constant 0 : index
    %c401_565 = arith.constant 401 : index
    %1096 = vector.load %arg2[%c0_564, %c401_565] : memref<8x532xf32, #tpu.memory_space<vmem>>, vector<8x128xf32>
    %cst_566 = arith.constant 0.00409405725 : f32
    %1097 = vector.broadcast %cst_566 : f32 to vector<8x128xf32>
    %1098 = arith.mulf %1097, %1096 : vector<8x128xf32>
    %1099 = arith.addf %1092, %1098 : vector<8x128xf32>
    %cst_567 = arith.constant -7.46805337E-4 : f32
    %1100 = vector.broadcast %cst_567 : f32 to vector<8x128xf32>
    %1101 = arith.mulf %1100, %1096 : vector<8x128xf32>
    %1102 = arith.addf %1095, %1101 : vector<8x128xf32>
    %c0_568 = arith.constant 0 : index
    %c402_569 = arith.constant 402 : index
    %1103 = vector.load %arg2[%c0_568, %c402_569] : memref<8x532xf32, #tpu.memory_space<vmem>>, vector<8x128xf32>
    %cst_570 = arith.constant -0.00198679254 : f32
    %1104 = vector.broadcast %cst_570 : f32 to vector<8x128xf32>
    %1105 = arith.mulf %1104, %1103 : vector<8x128xf32>
    %1106 = arith.addf %1099, %1105 : vector<8x128xf32>
    %cst_571 = arith.constant 7.56199515E-5 : f32
    %1107 = vector.broadcast %cst_571 : f32 to vector<8x128xf32>
    %1108 = arith.mulf %1107, %1103 : vector<8x128xf32>
    %1109 = arith.addf %1102, %1108 : vector<8x128xf32>
    %c0_572 = arith.constant 0 : index
    %c403_573 = arith.constant 403 : index
    %1110 = vector.load %arg2[%c0_572, %c403_573] : memref<8x532xf32, #tpu.memory_space<vmem>>, vector<8x128xf32>
    %cst_574 = arith.constant 7.81250535E-4 : f32
    %1111 = vector.broadcast %cst_574 : f32 to vector<8x128xf32>
    %1112 = arith.mulf %1111, %1110 : vector<8x128xf32>
    %1113 = arith.addf %1106, %1112 : vector<8x128xf32>
    %c0_575 = arith.constant 0 : index
    %c384_576 = arith.constant 384 : index
    %1114 = vector.load %arg3[%c0_575, %c384_576] : memref<8x512xf32, #tpu.memory_space<vmem>>, vector<8x128xf32>
    tpu.vector_store %arg3[%c0_575, %c384_576], %1113 {strides = array<i32>} : memref<8x512xf32, #tpu.memory_space<vmem>>, vector<8x128xf32>,
    %c0_577 = arith.constant 0 : index
    %c384_578 = arith.constant 384 : index
    %1115 = vector.load %arg4[%c0_577, %c384_578] : memref<8x512xf32, #tpu.memory_space<vmem>>, vector<8x128xf32>
    tpu.vector_store %arg4[%c0_577, %c384_578], %1109 {strides = array<i32>} : memref<8x512xf32, #tpu.memory_space<vmem>>, vector<8x128xf32>,
    return
  }
  func.func @transform_0(%arg0: i32) -> (i32, i32) {
    %c0_i32 = arith.constant 0 : i32
    %c0_i32_0 = arith.constant 0 : i32
    return %arg0, %c0_i32 : i32, i32
  }
  func.func @transform_1(%arg0: i32) -> (i32, i32) {
    %c0_i32 = arith.constant 0 : i32
    %c0_i32_0 = arith.constant 0 : i32
    return %arg0, %c0_i32 : i32, i32
  }
  func.func @transform_2(%arg0: i32) -> (i32, i32) {
    %c0_i32 = arith.constant 0 : i32
    %c0_i32_0 = arith.constant 0 : i32
    return %arg0, %c0_i32 : i32, i32
  }
  func.func @transform_3(%arg0: i32) -> (i32, i32) {
    %c0_i32 = arith.constant 0 : i32
    %c0_i32_0 = arith.constant 0 : i32
    return %arg0, %c0_i32 : i32, i32
  }
}

</mosaic_0001>

<bundles_post_ra>
// kernel: tpu_custom_call.1
= control target key start
LH: loop header
LB: loop body
LE: loop exit
PB: predicated region body
PF: predicated region fallthrough
CT: control target
= control target key end

     0   :  { %9 = vsyncpa [#allocation3], 0  ;;  %s6760_s0 = inlined_call_operand.hbm [shape: f32[8,532], index: 0, kind: input, shape index: {}]   ;;  %s6761_s1 = inlined_call_operand.hbm [shape: f32[8,532], index: 1, kind: input, shape index: {}]   ;;  %s6762_s2 = inlined_call_operand.hbm [shape: f32[8,512], index: 2, kind: output, shape index: {0}]   ;;  %s6763_s3 = inlined_call_operand.hbm [shape: f32[8,512], index: 3, kind: output, shape index: {1}]  }
   0x1   :  { %10 = vsyncpa [#allocation6], 0 }
   0x2   :  { %11 = vsyncpa [#allocation4], 0 }
   0x3   :  { %12 = vsyncpa [#allocation9], 0  ;;  %s18_s14 = sshll.u32 %s6760_s0, 4  ;;  %s3297_s15 = smov [#allocation2]   ;;  %s19_s14 = int_to_ptr.hbm [resolvable:$true] %s18_s14 }
   0x4   :  { %s20_s16 = sshll.u32 %s3297_s15, 4  ;;  %s29_s19 = sshll.u32 %s6761_s1, 4  ;;  %s21_s16 = int_to_ptr.vmem [resolvable:$true] %s20_s16  ;;  %s30_s19 = int_to_ptr.hbm [resolvable:$true] %s29_s19 }
   0x5   :  { %23 = dma.hbm_to_vmem [thread:$0]  %s19_s14, 640, %s21_s16, [#allocation3]  }
   0x6   :  { %s3298_s20 = smov [#allocation5]  }
   0x7   :  { %s31_s21 = sshll.u32 %s3298_s20, 4  ;;  %s32_s21 = int_to_ptr.vmem [resolvable:$true] %s31_s21 }
   0x8   :  { %34 = dma.hbm_to_vmem [thread:$0]  %s30_s19, 640, %s32_s21, [#allocation6]  }
   0x9   :  { %3289 = dma.done.wait [#allocation3], 640  }
   0xa   :  { %3290 = vsyncadd [#allocation3], 4294966656 }
   0xb   :  { %3291 = dma.done.wait [#allocation6], 640  }
   0xc   :  { %3292 = vsyncadd [#allocation6], 4294966656  ;;  %v3347_v0 = vld [vmem:[#allocation2] sm:$0xff]  ;;  %s3299_s0 = smov 126   ;;  %s3300_s1 = smov 127   ;;  %v3362_v4 = vld [vmem:[#allocation2 + $0x8] sm:$0xff] }
   0xd   :  { %v3350_v1 = vmul.f32 0.0020903896, %v3347_v0  ;;  %v3353_v2 = vmul.f32 -0.0010917237, %v3347_v0  ;;  %v3360_v3 = vmul.f32 0.0020408458, %v3347_v0 }
   0xe   :  { %v3367_v5 = vmul.f32 0.0020903896, %v3362_v4  ;;  %v3370_v6 = vmul.f32 -0.0010917237, %v3362_v4  ;;  %v3373_v7 = vmul.f32 0.0020408458, %v3362_v4 }
   0xf   :  { %67 = vrot.lane.b32.xlu1 %v3350_v1, %s3299_s0  ;;  %51 = vrot.lane.b32.xlu0 %v3353_v2, %s3300_s1  ;;  %v3382_v8 = vmul.f32 -0.0034025807, %v3362_v4  ;;  %v3385_v9 = vmul.f32 -0.0034025807, %v3347_v0  ;;  %v3388_v10 = vmul.f32 -0.0043502236, %v3347_v0 }
  0x10   :  { %79 = vrot.lane.b32.xlu2 %v3360_v3, %s3300_s1  ;;  %s3301_s22 = smov 125   ;;  %v3397_v11 = vmul.f32 0.0049722632, %v3347_v0  ;;  %v3400_v12 = vmul.f32 -0.0043502236, %v3362_v4  ;;  %s3302_s23 = smov 124  }
  0x11   :  { %v3403_v13 = vmul.f32 0.0049722632, %v3362_v4  ;;  %v3412_v14 = vmul.f32 0.0076396023, %v3362_v4  ;;  %v3415_v15 = vmul.f32 0.0076396023, %v3347_v0 }
  0x12   :  { %v3418_v16 = vmul.f32 -0.006696033, %v3347_v0  ;;  %s3303_s24 = smov 123   ;;  %v3427_v17 = vmul.f32 -0.011765804, %v3347_v0  ;;  %s3304_s25 = smov 122  }
  0x13   :  { %v3430_v18 = vmul.f32 -0.006696033, %v3362_v4  ;;  %v3433_v19 = vmul.f32 -0.011765804, %v3362_v4  ;;  %v3442_v20 = vmul.f32 0.008432437, %v3362_v4 }
  0x14   :  { %v3445_v21 = vmul.f32 0.008432437, %v3347_v0  ;;  %v3448_v22 = vmul.f32 0.016368665, %v3347_v0  ;;  %v188_v23 = vmul.f32 -0.010018936, %v3347_v0 }
  0x15   :  { %v3458_v24 = vmul.f32 0.016368665, %v3362_v4  ;;  %v189_v25 = vmul.f32 -0.010018936, %v3362_v4  ;;  %s3305_s26 = smov 121   ;;  %s3306_s27 = smov 120  }
  0x16   :  { %v201_v26 = vmul.f32 -0.020910295, %v3362_v4  ;;  %v200_v27 = vmul.f32 -0.020910295, %v3347_v0  ;;  %v213_v28 = vmul.f32 0.011293989, %v3347_v0 }
  0x17   :  { %69 = vrot.lane.b32.xlu1 %v3367_v5, %s3299_s0  ;;  %53 = vrot.lane.b32.xlu0 %v3370_v6, %s3300_s1  ;;  %v225_v29 = vmul.f32 0.024767846, %v3347_v0  ;;  %v214_v30 = vmul.f32 0.011293989, %v3362_v4  ;;  %v226_v31 = vmul.f32 0.024767846, %v3362_v4 }
  0x18   :  { %81 = vrot.lane.b32.xlu2 %v3373_v7, %s3300_s1  ;;  %v239_v32 = vmul.f32 -0.012120546, %v3362_v4  ;;  %v238_v33 = vmul.f32 -0.012120546, %v3347_v0  ;;  %v250_v34 = vmul.f32 -0.027359758, %v3347_v0 }
  0x19   :  { %s3307_s28 = smov 119   ;;  %v263_v35 = vmul.f32 0.5124068, %v3347_v0  ;;  %v251_v36 = vmul.f32 -0.027359758, %v3362_v4  ;;  %s3308_s29 = smov 118  }
  0x1a   :  { %v264_v37 = vmul.f32 0.5124068, %v3362_v4  ;;  %v276_v38 = vmul.f32 0.52827346, %v3362_v4  ;;  %v275_v39 = vmul.f32 0.52827346, %v3347_v0 }
  0x1b   :  { %s3309_s30 = smov 117   ;;  %s3310_s4 = smov 116   ;;  %vm55_vm0 = vcmask 1039360   ;;  %vm71_vm1 = vcmask 1031168   ;;  %vm96_vm2 = vcmask 1022976   ;;  %vm121_vm3 = vcmask 1014784  }
  0x1c   :  { %s3311_s5 = smov 115   ;;  %s3312_s6 = smov 114   ;;  %vm146_vm4 = vcmask 1006592   ;;  %vm171_vm5 = vcmask 998400   ;;  %vm196_vm6 = vcmask 990208   ;;  %vm221_vm7 = vcmask 982016  }
  0x1d   :  { %s3313_s7 = smov 113   ;;  %s3314_s8 = smov 112   ;;  %vm6777_vm8 = vcmask 973824   ;;  %vm6779_vm9 = vcmask 965632   ;;  %vm6778_vm10 = vcmask 957440   ;;  %vm6773_vm11 = vcmask 949248  }
  0x1e   :  { %s3315_s9 = smov 111   ;;  %s3316_s10 = smov 110   ;;  %vm6772_vm12 = vcmask 941056   ;;  %vm6774_vm13 = vcmask 932864   ;;  %vm360_vm14 = vcmask 924672   ;;  %vm6775_vm15 = vcmask 916480  }
  0x1f   :  { %94 = vrot.lane.b32.xlu1 %v3382_v8, %s3301_s22  ;;  %92 = vrot.lane.b32.xlu0 %v3385_v9, %s3301_s22  ;;  %s3317_s11 = smov 109   ;;  %s3318_s12 = smov 108  }
  0x20   :  { %104 = vrot.lane.b32.xlu2 %v3388_v10, %s3299_s0  ;;  %s3319_s13 = smov [#allocation7]   ;;  %s3142_s17 = sshll.u32 %s6762_s2, 4  ;;  %s3143_s17 = int_to_ptr.hbm [resolvable:$true] %s3142_s17 }
  0x21   :  { %s3140_s14 = sshll.u32 %s3319_s13, 4  ;;  %s3320_s18 = smov [#allocation8]   ;;  %s3141_s14 = int_to_ptr.vmem [resolvable:$true] %s3140_s14 }
  0x22   :  { %s3151_s19 = sshll.u32 %s3320_s18, 4  ;;  %s3152_s19 = int_to_ptr.vmem [resolvable:$true] %s3151_s19 }
  0x27   :  { %117 = vrot.lane.b32.xlu1 %v3397_v11, %s3302_s23  ;;  %106 = vrot.lane.b32.xlu0 %v3400_v12, %s3299_s0 }
  0x28   :  { %119 = vrot.lane.b32.xlu2 %v3403_v13, %s3302_s23 }
  0x2f   :  { %131 = vrot.lane.b32.xlu1 %v3412_v14, %s3301_s22  ;;  %129 = vrot.lane.b32.xlu0 %v3415_v15, %s3301_s22 }
  0x30   :  { %142 = vrot.lane.b32.xlu2 %v3418_v16, %s3303_s24 }
  0x37   :  { %154 = vrot.lane.b32.xlu1 %v3427_v17, %s3302_s23  ;;  %144 = vrot.lane.b32.xlu0 %v3430_v18, %s3303_s24 }
  0x38   :  { %156 = vrot.lane.b32.xlu2 %v3433_v19, %s3302_s23 }
  0x3f   :  { %169 = vrot.lane.b32.xlu1 %v3442_v20, %s3304_s25  ;;  %167 = vrot.lane.b32.xlu0 %v3445_v21, %s3304_s25 }
  0x40   :  { %179 = vrot.lane.b32.xlu2 %v3448_v22, %s3303_s24 }
  0x47   :  { %192 = vrot.lane.b32.xlu1 %v188_v23, %s3305_s26  ;;  %181 = vrot.lane.b32.xlu0 %v3458_v24, %s3303_s24 }
  0x48   :  { %194 = vrot.lane.b32.xlu2 %v189_v25, %s3305_s26 }
  0x4f   :  { %206 = vrot.lane.b32.xlu1 %v201_v26, %s3304_s25  ;;  %204 = vrot.lane.b32.xlu0 %v200_v27, %s3304_s25 }
  0x50   :  { %217 = vrot.lane.b32.xlu2 %v213_v28, %s3306_s27 }
  0x57   :  { %229 = vrot.lane.b32.xlu1 %v225_v29, %s3305_s26  ;;  %219 = vrot.lane.b32.xlu0 %v214_v30, %s3306_s27 }
  0x58   :  { %231 = vrot.lane.b32.xlu2 %v226_v31, %s3305_s26 }
  0x5f   :  { %244 = vrot.lane.b32.xlu1 %v239_v32, %s3307_s28  ;;  %242 = vrot.lane.b32.xlu0 %v238_v33, %s3307_s28 }
  0x60   :  { %254 = vrot.lane.b32.xlu2 %v250_v34, %s3306_s27 }
  0x67   :  { %267 = vrot.lane.b32.xlu1 %v263_v35, %s3308_s29  ;;  %256 = vrot.lane.b32.xlu0 %v251_v36, %s3306_s27 }
  0x68   :  { %269 = vrot.lane.b32.xlu2 %v264_v37, %s3308_s29 }
  0x6a   :  { %v3491_v40 = vpop.permute.xlu2 %79 }
  0x6f   :  { %281 = vrot.lane.b32.xlu1 %v276_v38, %s3307_s28  ;;  %279 = vrot.lane.b32.xlu0 %v275_v39, %s3307_s28 }
  0x70   :  { %288 = vrot.lane.b32.xlu2 %v238_v33, %s3309_s30 }
  0x72   :  { %v3496_v41 = vpop.permute.xlu2 %81 }
  0x77   :  { %296 = vrot.lane.b32.xlu1 %v250_v34, %s3308_s29  ;;  %290 = vrot.lane.b32.xlu0 %v239_v32, %s3309_s30 }
  0x78   :  { %298 = vrot.lane.b32.xlu2 %v251_v36, %s3308_s29 }
  0x7a   :  { %v3501_v42 = vpop.permute.xlu2 %104 }
  0x7f   :  { %307 = vrot.lane.b32.xlu1 %v214_v30, %s3310_s4  ;;  %305 = vrot.lane.b32.xlu0 %v213_v28, %s3310_s4 }
  0x80   :  { %313 = vrot.lane.b32.xlu2 %v225_v29, %s3309_s30 }
  0x81   :  { %v3505_v43 = vpop.permute.xlu1 %67  ;;  %v3507_v44 = vpop.permute.xlu0 %51 }
  0x82   :  { %v3510_v45 = vpop.permute.xlu2 %119 }
  0x87   :  { %322 = vrot.lane.b32.xlu1 %v188_v23, %s3311_s5  ;;  %315 = vrot.lane.b32.xlu0 %v226_v31, %s3309_s30 }
  0x88   :  { %324 = vrot.lane.b32.xlu2 %v189_v25, %s3311_s5 }
  0x89   :  { %v3514_v46 = vpop.permute.xlu1 %69  ;;  %v3516_v47 = vpop.permute.xlu0 %53 }
  0x8a   :  { %v3519_v48 = vpop.permute.xlu2 %142 }
  0x8b   :  { %6808 = vst [vmem:[#allocation14_spill] sm:$0xff] %v3519_v48 }
  0x8f   :  { %332 = vrot.lane.b32.xlu1 %v201_v26, %s3310_s4  ;;  %330 = vrot.lane.b32.xlu0 %v200_v27, %s3310_s4 }
  0x90   :  { %339 = vrot.lane.b32.xlu2 %v3445_v21, %s3312_s6 }
  0x91   :  { %v3523_v49 = vpop.permute.xlu1 %94  ;;  %v3525_v50 = vpop.permute.xlu0 %92 }
  0x92   :  { %v3529_v51 = vpop.permute.xlu2 %156 }
  0x97   :  { %347 = vrot.lane.b32.xlu1 %v3448_v22, %s3311_s5  ;;  %341 = vrot.lane.b32.xlu0 %v3442_v20, %s3312_s6 }
  0x98   :  { %349 = vrot.lane.b32.xlu2 %v3458_v24, %s3311_s5 }
  0x99   :  { %v3535_v52 = vpop.permute.xlu1 %117  ;;  %v3537_v53 = vpop.permute.xlu0 %106 }
  0x9a   :  { %v3541_v54 = vpop.permute.xlu2 %179 }
  0x9b   :  { %6809 = vst [vmem:[#allocation15_spill] sm:$0xff] %v3541_v54 }
  0x9f   :  { %358 = vrot.lane.b32.xlu1 %v3430_v18, %s3313_s7  ;;  %356 = vrot.lane.b32.xlu0 %v3418_v16, %s3313_s7 }
  0xa0   :  { %364 = vrot.lane.b32.xlu2 %v3427_v17, %s3312_s6 }
  0xa1   :  { %v3547_v55 = vpop.permute.xlu1 %131  ;;  %v3549_v56 = vpop.permute.xlu0 %129 }
  0xa2   :  { %6810 = vst [vmem:[#allocation16_spill] sm:$0xff] %v3549_v56  ;;  %v3553_v57 = vpop.permute.xlu2 %194 }
  0xa3   :  { %6811 = vst [vmem:[#allocation17_spill] sm:$0xff] %v3553_v57 }
  0xa7   :  { %373 = vrot.lane.b32.xlu1 %v3397_v11, %s3314_s8  ;;  %366 = vrot.lane.b32.xlu0 %v3433_v19, %s3312_s6  ;;  %v3642_v19 = vld [vmem:[#allocation5 + $0x8] sm:$0xff] }
  0xa8   :  { %375 = vrot.lane.b32.xlu2 %v3403_v13, %s3314_s8  ;;  %v3645_v20 = vmul.f32 -0.0019867925, %v3642_v19  ;;  %v3681_v29 = vmul.f32 -0.00074680534, %v3642_v19  ;;  %v3686_v31 = vmul.f32 -0.007496154, %v3642_v19 }
  0xa9   :  { %v3559_v58 = vpop.permute.xlu1 %154  ;;  %v3561_v59 = vpop.permute.xlu0 %144  ;;  %v3699_v34 = vmul.f32 0.0025966428, %v3642_v19 }
  0xaa   :  { %6812 = vst [vmem:[#allocation18_spill] sm:$0xff] %v3559_v58  ;;  %v3565_v60 = vpop.permute.xlu2 %217 }
  0xab   :  { %6813 = vst [vmem:[#allocation19_spill] sm:$0xff] %v3561_v59 }
  0xac   :  { %6814 = vst [vmem:[#allocation20_spill] sm:$0xff] %v3565_v60 }
  0xaf   :  { %383 = vrot.lane.b32.xlu1 %v3412_v14, %s3313_s7  ;;  %381 = vrot.lane.b32.xlu0 %v3415_v15, %s3313_s7  ;;  %v3619_v15 = vmul.f32 -0.0006548817, %v3347_v0 }
  0xb0   :  { %390 = vrot.lane.b32.xlu2 %v3385_v9, %s3315_s9 }
  0xb1   :  { %v3571_v61 = vpop.permute.xlu1 %169  ;;  %v3573_v62 = vpop.permute.xlu0 %167 }
  0xb2   :  { %6815 = vst [vmem:[#allocation21_spill] sm:$0xff] %v3571_v61  ;;  %v3577_v63 = vpop.permute.xlu2 %231 }
  0xb3   :  { %6816 = vst [vmem:[#allocation22_spill] sm:$0xff] %v3573_v62 }
  0xb7   :  { %398 = vrot.lane.b32.xlu1 %v3388_v10, %s3314_s8  ;;  %392 = vrot.lane.b32.xlu0 %v3382_v8, %s3315_s9 }
  0xb8   :  { %400 = vrot.lane.b32.xlu2 %v3400_v12, %s3314_s8 }
  0xb9   :  { %v3583_v11 = vpop.permute.xlu1 %192  ;;  %v3585_v13 = vpop.permute.xlu0 %181 }
  0xba   :  { %6817 = vst [vmem:[#allocation23_spill] sm:$0xff] %v3583_v11  ;;  %v3589_v14 = vpop.permute.xlu2 %254 }
  0xbb   :  { %6818 = vst [vmem:[#allocation24_spill] sm:$0xff] %v3589_v14  ;;  %v3770_v14 = vmul.f32 0.033074383, %v3642_v19 }
  0xbf   :  { %409 = vrot.lane.b32.xlu1 %v3367_v5, %s3316_s10  ;;  %407 = vrot.lane.b32.xlu0 %v3350_v1, %s3316_s10 }
  0xc0   :  { %415 = vrot.lane.b32.xlu2 %v3360_v3, %s3315_s9  ;;  %v3616_v3 = vmul.f32 -0.0006548817, %v3362_v4 }
  0xc1   :  { %v3595_v9 = vpop.permute.xlu1 %206  ;;  %v3597_v10 = vpop.permute.xlu0 %204 }
  0xc2   :  { %6819 = vst [vmem:[#allocation25_spill] sm:$0xff] %v3597_v10  ;;  %v3601_v8 = vpop.permute.xlu2 %269 }
  0xc3   :  { %6820 = vst [vmem:[#allocation26_spill] sm:$0xff] %v3601_v8 }
  0xc7   :  { %424 = vrot.lane.b32.xlu1 %v3353_v2, %s3317_s11  ;;  %417 = vrot.lane.b32.xlu0 %v3373_v7, %s3315_s9  ;;  %v3622_v2 = vmul.f32 0.00041447996, %v3347_v0  ;;  %v3628_v7 = vld [vmem:[#allocation5] sm:$0xff]  ;;  %v443_v0 = vmul.f32 0.00041447996, %v3362_v4 }
  0xc8   :  { %426 = vrot.lane.b32.xlu2 %v3370_v6, %s3317_s11  ;;  %v3637_v17 = vmul.f32 -0.0019867925, %v3628_v7  ;;  %v3657_v4 = vmul.f32 0.0040940573, %v3642_v19  ;;  %v3660_v23 = vmul.f32 0.0040940573, %v3628_v7 }
  0xc9   :  { %v3607_v5 = vpop.permute.xlu1 %229  ;;  %v3609_v12 = vpop.permute.xlu0 %219  ;;  %v3665_v25 = vmul.f32 -0.00074680534, %v3628_v7  ;;  %v3678_v28 = vmul.f32 -0.007496154, %v3628_v7  ;;  %v3702_v35 = vmul.f32 0.0025966428, %v3628_v7 }
  0xca   :  { %6821 = vst [vmem:[#allocation27_spill] sm:$0xff] %v3607_v5  ;;  %v3613_v1 = vpop.permute.xlu2 %288  ;;  %v3707_v37 = vmul.f32 0.012738791, %v3628_v7  ;;  %v3762_v8 = vmul.f32 0.033074383, %v3628_v7 }
  0xcb   :  { %6822 = vst [vmem:[#allocation28_spill] sm:$0xff] %v3609_v12  ;;  %v593_v12 = vmul.f32 -0.05423136, %v3628_v7  ;;  %v604_v5 = vmul.f32 0.048260726, %v3628_v7 }
  0xcc   :  { %6823 = vst [vmem:[#allocation29_spill] sm:$0xff] %v3613_v1  ;;  %v3741_v1 = vmul.f32 -0.020694051, %v3642_v19 }
  0xcf   :  { %436 = vrot.lane.b32.xlu1 %v3616_v3, %s3316_s10  ;;  %434 = vrot.lane.b32.xlu0 %v3619_v15, %s3316_s10 }
  0xd0   :  { %446 = vrot.lane.b32.xlu2 %v3622_v2, %s3318_s12 }
  0xd1   :  { %v3630_v6 = vpop.permute.xlu1 %244  ;;  %v3632_v16 = vpop.permute.xlu0 %242 }
  0xd2   :  { %6824 = vst [vmem:[#allocation30_spill] sm:$0xff] %v3630_v6  ;;  %v3640_v18 = vpop.permute.xlu2 %298  ;;  %v3783_v6 = vmul.f32 -0.026075976, %v3642_v19 }
  0xd3   :  { %6825 = vst [vmem:[#allocation31_spill] sm:$0xff] %v3632_v16 }
  0xd4   :  { %6826 = vst [vmem:[#allocation32_spill] sm:$0xff] %v3640_v18 }
  0xd7   :  { %462 = vrot.lane.b32.xlu1 %v3637_v17, %s3300_s1  ;;  %448 = vrot.lane.b32.xlu0 %v443_v0, %s3318_s12  ;;  %v3720_v0 = vmul.f32 -0.0064904117, %v3628_v7 }
  0xd8   :  { %464 = vrot.lane.b32.xlu2 %v3645_v20, %s3300_s1 }
  0xd9   :  { %v3650_v21 = vpop.permute.xlu1 %267  ;;  %v3652_v22 = vpop.permute.xlu0 %256 }
  0xda   :  { %6827 = vst [vmem:[#allocation33_spill] sm:$0xff] %v3650_v21  ;;  %v3662_v24 = vpop.permute.xlu2 %313 }
  0xdb   :  { %6828 = vst [vmem:[#allocation34_spill] sm:$0xff] %v3662_v24  ;;  %v3728_v24 = vmul.f32 -0.0064904117, %v3642_v19 }
  0xdf   :  { %479 = vrot.lane.b32.xlu1 %v3657_v4, %s3299_s0  ;;  %477 = vrot.lane.b32.xlu0 %v3660_v23, %s3299_s0 }
  0xe0   :  { %488 = vrot.lane.b32.xlu2 %v3665_v25, %s3300_s1 }
  0xe1   :  { %v3671_v26 = vpop.permute.xlu1 %281  ;;  %v3673_v27 = vpop.permute.xlu0 %279 }
  0xe2   :  { %6829 = vst [vmem:[#allocation35_spill] sm:$0xff] %v3673_v27  ;;  %v3683_v30 = vpop.permute.xlu2 %324  ;;  %v3749_v27 = vmul.f32 0.013649909, %v3628_v7 }
  0xe3   :  { %6830 = vst [vmem:[#allocation36_spill] sm:$0xff] %v3683_v30 }
  0xe7   :  { %501 = vrot.lane.b32.xlu1 %v3678_v28, %s3301_s22  ;;  %490 = vrot.lane.b32.xlu0 %v3681_v29, %s3300_s1 }
  0xe8   :  { %503 = vrot.lane.b32.xlu2 %v3686_v31, %s3301_s22 }
  0xe9   :  { %v3692_v32 = vpop.permute.xlu1 %296  ;;  %v3694_v33 = vpop.permute.xlu0 %290 }
  0xea   :  { %6831 = vst [vmem:[#allocation37_spill] sm:$0xff] %v3692_v32  ;;  %v3704_v36 = vpop.permute.xlu2 %339 }
  0xeb   :  { %6832 = vst [vmem:[#allocation38_spill] sm:$0xff] %v3694_v33  ;;  %v3744_v33 = vmul.f32 -0.020694051, %v3628_v7 }
  0xec   :  { %6833 = vst [vmem:[#allocation39_spill] sm:$0xff] %v3704_v36  ;;  %v3723_v36 = vmul.f32 0.012738791, %v3642_v19 }
  0xef   :  { %514 = vrot.lane.b32.xlu1 %v3699_v34, %s3299_s0  ;;  %512 = vrot.lane.b32.xlu0 %v3702_v35, %s3299_s0 }
  0xf0   :  { %525 = vrot.lane.b32.xlu2 %v3707_v37, %s3302_s23 }
  0xf1   :  { %v3713_v38 = vpop.permute.xlu1 %307  ;;  %v3715_v39 = vpop.permute.xlu0 %305 }
  0xf2   :  { %6834 = vst [vmem:[#allocation40_spill] sm:$0xff] %v3713_v38  ;;  %v3725_v30 = vpop.permute.xlu2 %349 }
  0xf3   :  { %6835 = vst [vmem:[#allocation41_spill] sm:$0xff] %v3715_v39 }
  0xf4   :  { %6836 = vst [vmem:[#allocation42_spill] sm:$0xff] %v3725_v30 }
  0xf7   :  { %536 = vrot.lane.b32.xlu1 %v3720_v0, %s3301_s22  ;;  %527 = vrot.lane.b32.xlu0 %v3723_v36, %s3302_s23 }
  0xf8   :  { %538 = vrot.lane.b32.xlu2 %v3728_v24, %s3301_s22 }
  0xf9   :  { %v3734_v39 = vpop.permute.xlu1 %322  ;;  %v3736_v38 = vpop.permute.xlu0 %315 }
  0xfa   :  { %6837 = vst [vmem:[#allocation43_spill] sm:$0xff] %v3734_v39  ;;  %v3746_v32 = vpop.permute.xlu2 %364 }
  0xfb   :  { %6838 = vst [vmem:[#allocation44_spill] sm:$0xff] %v3736_v38 }
  0xfc   :  { %6839 = vst [vmem:[#allocation45_spill] sm:$0xff] %v3746_v32  ;;  %v3765_v32 = vmul.f32 0.013649909, %v3642_v19 }
  0xff   :  { %551 = vrot.lane.b32.xlu1 %v3741_v1, %s3303_s24  ;;  %549 = vrot.lane.b32.xlu0 %v3744_v33, %s3303_s24 }
 0x100   :  { %560 = vrot.lane.b32.xlu2 %v3749_v27, %s3302_s23 }
 0x101   :  { %v3755_v39 = vpop.permute.xlu1 %332  ;;  %v3757_v21 = vpop.permute.xlu0 %330 }
 0x102   :  { %6840 = vst [vmem:[#allocation46_spill] sm:$0xff] %v3755_v39  ;;  %v3767_v30 = vpop.permute.xlu2 %375  ;;  %v594_v39 = vmul.f32 -0.05423136, %v3642_v19 }
 0x103   :  { %6841 = vst [vmem:[#allocation47_spill] sm:$0xff] %v3757_v21 }
 0x104   :  { %6842 = vst [vmem:[#allocation48_spill] sm:$0xff] %v3767_v30  ;;  %v3786_v30 = vmul.f32 -0.026075976, %v3628_v7 }
 0x107   :  { %573 = vrot.lane.b32.xlu1 %v3762_v8, %s3304_s25  ;;  %562 = vrot.lane.b32.xlu0 %v3765_v32, %s3302_s23 }
 0x108   :  { %575 = vrot.lane.b32.xlu2 %v3770_v14, %s3304_s25 }
 0x109   :  { %v3776_v21 = vpop.permute.xlu1 %347  ;;  %v3778_v16 = vpop.permute.xlu0 %341 }
 0x10a   :  { %6843 = vst [vmem:[#allocation49_spill] sm:$0xff] %v3776_v21  ;;  %v3788_v60 = vpop.permute.xlu2 %390 }
 0x10b   :  { %6844 = vst [vmem:[#allocation50_spill] sm:$0xff] %v3778_v16 }
 0x10c   :  { %6845 = vst [vmem:[#allocation51_spill] sm:$0xff] %v3788_v60  ;;  %v605_v60 = vmul.f32 0.048260726, %v3642_v19 }
 0x10f   :  { %586 = vrot.lane.b32.xlu1 %v3783_v6, %s3303_s24  ;;  %584 = vrot.lane.b32.xlu0 %v3786_v30, %s3303_s24 }
 0x110   :  { %597 = vrot.lane.b32.xlu2 %v593_v12, %s3305_s26 }
 0x111   :  { %v3795_v16 = vpop.permute.xlu1 %358  ;;  %v3797_v21 = vpop.permute.xlu0 %356 }
 0x112   :  { %6846 = vst [vmem:[#allocation52_spill] sm:$0xff] %v3795_v16  ;;  %v3802_v10 = vpop.permute.xlu2 %400  ;;  %v617_v16 = vmul.f32 0.10020082, %v3628_v7 }
 0x113   :  { %6847 = vst [vmem:[#allocation53_spill] sm:$0xff] %v3797_v21  ;;  %v618_v21 = vmul.f32 0.10020082, %v3642_v19 }
 0x114   :  { %6848 = vst [vmem:[#allocation54_spill] sm:$0xff] %v3802_v10  ;;  %v628_v10 = vmul.f32 -0.096178465, %v3628_v7 }
 0x117   :  { %608 = vrot.lane.b32.xlu1 %v604_v5, %s3304_s25  ;;  %599 = vrot.lane.b32.xlu0 %v594_v39, %s3305_s26 }
 0x118   :  { %610 = vrot.lane.b32.xlu2 %v605_v60, %s3304_s25 }
 0x119   :  { %v3807_v11 = vpop.permute.xlu1 %373  ;;  %v3809_v57 = vpop.permute.xlu0 %366 }
 0x11a   :  { %6849 = vst [vmem:[#allocation55_spill] sm:$0xff] %v3807_v11  ;;  %v3814_v38 = vpop.permute.xlu2 %415  ;;  %v641_v11 = vmul.f32 -0.3163002, %v3628_v7 }
 0x11b   :  { %6850 = vst [vmem:[#allocation56_spill] sm:$0xff] %v3809_v57  ;;  %v629_v57 = vmul.f32 -0.096178465, %v3642_v19 }
 0x11c   :  { %6851 = vst [vmem:[#allocation57_spill] sm:$0xff] %v3814_v38  ;;  %v642_v38 = vmul.f32 -0.3163002, %v3642_v19 }
 0x11f   :  { %623 = vrot.lane.b32.xlu1 %v618_v21, %s3306_s27  ;;  %621 = vrot.lane.b32.xlu0 %v617_v16, %s3306_s27 }
 0x120   :  { %632 = vrot.lane.b32.xlu2 %v628_v10, %s3305_s26 }
 0x121   :  { %v3819_v54 = vpop.permute.xlu1 %383  ;;  %v3821_v62 = vpop.permute.xlu0 %381 }
 0x122   :  { %6852 = vst [vmem:[#allocation58_spill] sm:$0xff] %v3819_v54  ;;  %v3826_v61 = vpop.permute.xlu2 %426  ;;  %v652_v54 = vmul.f32 0.31488052, %v3628_v7 }
 0x123   :  { %6853 = vst [vmem:[#allocation59_spill] sm:$0xff] %v3821_v62  ;;  %v653_v62 = vmul.f32 0.31488052, %v3642_v19 }
 0x124   :  { %6854 = vst [vmem:[#allocation60_spill] sm:$0xff] %v3826_v61 }
 0x127   :  { %645 = vrot.lane.b32.xlu1 %v641_v11, %s3307_s28  ;;  %634 = vrot.lane.b32.xlu0 %v629_v57, %s3305_s26 }
 0x128   :  { %647 = vrot.lane.b32.xlu2 %v642_v38, %s3307_s28 }
 0x129   :  { %v3831_v18 = vpop.permute.xlu1 %398  ;;  %v3833_v48 = vpop.permute.xlu0 %392 }
 0x12a   :  { %6855 = vst [vmem:[#allocation61_spill] sm:$0xff] %v3831_v18  ;;  %v3838_v59 = vpop.permute.xlu2 %446 }
 0x12b   :  { %6856 = vst [vmem:[#allocation62_spill] sm:$0xff] %v3833_v48 }
 0x12c   :  { %6857 = vst [vmem:[#allocation63_spill] sm:$0xff] %v3838_v59 }
 0x12f   :  { %658 = vrot.lane.b32.xlu1 %v653_v62, %s3306_s27  ;;  %656 = vrot.lane.b32.xlu0 %v652_v54, %s3306_s27 }
 0x130   :  { %665 = vrot.lane.b32.xlu2 %v641_v11, %s3308_s29 }
 0x131   :  { %v3842_v61 = vpop.permute.xlu1 %409  ;;  %v3844_v58 = vpop.permute.xlu0 %407 }
 0x132   :  { %6858 = vst [vmem:[#allocation64_spill] sm:$0xff] %v3844_v58  ;;  %v3847_v18 = vpop.permute.xlu2 %464 }
 0x137   :  { %672 = vrot.lane.b32.xlu1 %v652_v54, %s3307_s28  ;;  %667 = vrot.lane.b32.xlu0 %v642_v38, %s3308_s29 }
 0x138   :  { %674 = vrot.lane.b32.xlu2 %v653_v62, %s3307_s28 }
 0x139   :  { %v3851_v48 = vpop.permute.xlu1 %424  ;;  %v3853_v56 = vpop.permute.xlu0 %417 }
 0x13a   :  { %v3856_v59 = vpop.permute.xlu2 %488 }
 0x13f   :  { %683 = vrot.lane.b32.xlu1 %v618_v21, %s3309_s30  ;;  %681 = vrot.lane.b32.xlu0 %v617_v16, %s3309_s30 }
 0x140   :  { %688 = vrot.lane.b32.xlu2 %v628_v10, %s3308_s29 }
 0x141   :  { %v3860_v58 = vpop.permute.xlu1 %436  ;;  %v3862_v11 = vpop.permute.xlu0 %434 }
 0x142   :  { %v3865_v54 = vpop.permute.xlu2 %503 }
 0x147   :  { %697 = vrot.lane.b32.xlu1 %v593_v12, %s3310_s4  ;;  %690 = vrot.lane.b32.xlu0 %v629_v57, %s3308_s29 }
 0x148   :  { %699 = vrot.lane.b32.xlu2 %v594_v39, %s3310_s4 }
 0x149   :  { %v3869_v38 = vpop.permute.xlu1 %462  ;;  %v3871_v62 = vpop.permute.xlu0 %448 }
 0x14a   :  { %v3874_v21 = vpop.permute.xlu2 %525 }
 0x14f   :  { %706 = vrot.lane.b32.xlu1 %v605_v60, %s3309_s30  ;;  %704 = vrot.lane.b32.xlu0 %v604_v5, %s3309_s30 }
 0x150   :  { %713 = vrot.lane.b32.xlu2 %v3762_v8, %s3311_s5 }
 0x151   :  { %v3878_v16 = vpop.permute.xlu1 %479  ;;  %v3880_v10 = vpop.permute.xlu0 %477 }
 0x152   :  { %v3884_v57 = vpop.permute.xlu2 %538 }
 0x157   :  { %720 = vrot.lane.b32.xlu1 %v3786_v30, %s3310_s4  ;;  %715 = vrot.lane.b32.xlu0 %v3770_v14, %s3311_s5 }
 0x158   :  { %722 = vrot.lane.b32.xlu2 %v3783_v6, %s3310_s4 }
 0x159   :  { %v3890_v12 = vpop.permute.xlu1 %501  ;;  %v3892_v60 = vpop.permute.xlu0 %490 }
 0x15a   :  { %v3896_v5 = vpop.permute.xlu2 %560 }
 0x15f   :  { %731 = vrot.lane.b32.xlu1 %v3741_v1, %s3312_s6  ;;  %729 = vrot.lane.b32.xlu0 %v3744_v33, %s3312_s6 }
 0x160   :  { %736 = vrot.lane.b32.xlu2 %v3749_v27, %s3311_s5 }
 0x161   :  { %v3902_v8 = vpop.permute.xlu1 %514  ;;  %v3904_v30 = vpop.permute.xlu0 %512 }
 0x162   :  { %v3908_v14 = vpop.permute.xlu2 %575 }
 0x163   :  { %6859 = vst [vmem:[#allocation65_spill] sm:$0xff] %v3908_v14 }
 0x167   :  { %745 = vrot.lane.b32.xlu1 %v3707_v37, %s3313_s7  ;;  %738 = vrot.lane.b32.xlu0 %v3765_v32, %s3311_s5 }
 0x168   :  { %747 = vrot.lane.b32.xlu2 %v3723_v36, %s3313_s7 }
 0x169   :  { %v3914_v6 = vpop.permute.xlu1 %536  ;;  %v3916_v1 = vpop.permute.xlu0 %527 }
 0x16a   :  { %v3920_v33 = vpop.permute.xlu2 %597 }
 0x16b   :  { %6860 = vst [vmem:[#allocation66_spill] sm:$0xff] %v3920_v33 }
 0x16f   :  { %754 = vrot.lane.b32.xlu1 %v3728_v24, %s3312_s6  ;;  %752 = vrot.lane.b32.xlu0 %v3720_v0, %s3312_s6 }
 0x170   :  { %761 = vrot.lane.b32.xlu2 %v3678_v28, %s3314_s8 }
 0x171   :  { %v3926_v27 = vpop.permute.xlu1 %551  ;;  %v3928_v37 = vpop.permute.xlu0 %549 }
 0x172   :  { %6861 = vst [vmem:[#allocation67_spill] sm:$0xff] %v3928_v37  ;;  %v3932_v32 = vpop.permute.xlu2 %610 }
 0x177   :  { %768 = vrot.lane.b32.xlu1 %v3702_v35, %s3313_s7  ;;  %763 = vrot.lane.b32.xlu0 %v3686_v31, %s3314_s8 }
 0x178   :  { %770 = vrot.lane.b32.xlu2 %v3699_v34, %s3313_s7 }
 0x179   :  { %v3938_v36 = vpop.permute.xlu1 %573  ;;  %v3940_v24 = vpop.permute.xlu0 %562 }
 0x17a   :  { %6862 = vst [vmem:[#allocation68_spill] sm:$0xff] %v3938_v36  ;;  %v3944_v39 = vpop.permute.xlu2 %632 }
 0x17b   :  { %6863 = vst [vmem:[#allocation69_spill] sm:$0xff] %v3944_v39 }
 0x17f   :  { %779 = vrot.lane.b32.xlu1 %v3657_v4, %s3315_s9  ;;  %777 = vrot.lane.b32.xlu0 %v3660_v23, %s3315_s9  ;;  %v3969_v23 = vmul.f32 7.561995e-05, %v3642_v19 }
 0x180   :  { %784 = vrot.lane.b32.xlu2 %v3665_v25, %s3314_s8  ;;  %v3972_v25 = vmul.f32 7.561995e-05, %v3628_v7 }
 0x181   :  { %v3950_v28 = vpop.permute.xlu1 %586  ;;  %v3952_v35 = vpop.permute.xlu0 %584 }
 0x182   :  { %v3960_v31 = vpop.permute.xlu2 %647 }
 0x183   :  { %6864 = vst [vmem:[#allocation70_spill] sm:$0xff] %v3960_v31  ;;  %v811_v31 = vmul.f32 0.00078125054, %v3642_v19 }
 0x187   :  { %793 = vrot.lane.b32.xlu1 %v3637_v17, %s3316_s10  ;;  %786 = vrot.lane.b32.xlu0 %v3681_v29, %s3314_s8  ;;  %v3975_v17 = vmul.f32 0.00078125054, %v3628_v7 }
 0x188   :  { %795 = vrot.lane.b32.xlu2 %v3645_v20, %s3316_s10 }
 0x189   :  { %v3962_v34 = vpop.permute.xlu1 %608  ;;  %v3964_v4 = vpop.permute.xlu0 %599 }
 0x18a   :  { %6865 = vst [vmem:[#allocation71_spill] sm:$0xff] %v3964_v4  ;;  %v3987_v20 = vpop.permute.xlu2 %665 }
 0x18b   :  { %6868 = vst [vmem:[#allocation74_spill] sm:$0xff] %v3987_v20 }
 0x18f   :  { %804 = vrot.lane.b32.xlu1 %v3969_v23, %s3315_s9  ;;  %802 = vrot.lane.b32.xlu0 %v3972_v25, %s3315_s9 }
 0x190   :  { %814 = vrot.lane.b32.xlu2 %v3975_v17, %s3317_s11 }
 0x191   :  { %v3981_v29 = vpop.permute.xlu1 %623  ;;  %v3983_v0 = vpop.permute.xlu0 %621 }
 0x192   :  { %6866 = vst [vmem:[#allocation72_spill] sm:$0xff] %v3981_v29  ;;  %v3995_v4 = vpop.permute.xlu2 %674 }
 0x193   :  { %6867 = vst [vmem:[#allocation73_spill] sm:$0xff] %v3983_v0  ;;  %v87_v0 = vadd.f32 %v3496_v41, %v3616_v3 }
 0x194   :  { %6870 = vst [vmem:[#allocation76_spill] sm:$0xff] %v3995_v4 }
 0x195   :  { %v112_v20 = vadd.f32 %v3537_v53, %v87_v0  ;;  %v56_v0 = vsel %vm55_vm0, %v3507_v44, %v3516_v47  ;;  %v72_v44 = vsel %vm71_vm1, %v3505_v43, %v3514_v46  ;;  %v97_v47 = vsel %vm96_vm2, %v3525_v50, %v3523_v49  ;;  %v6879_v46 = vld [vmem:[#allocation16_spill] sm:$0xff] }
 0x196   :  { %v122_v43 = vsel %vm121_vm3, %v3535_v52, %v3510_v45  ;;  %v133_v49 = vsel %vm96_vm2, %v6879_v46, %v3547_v55  ;;  %v6884_v45 = vld [vmem:[#allocation21_spill] sm:$0xff]  ;;  %v6885_v52 = vld [vmem:[#allocation22_spill] sm:$0xff] }
 0x197   :  { %816 = vrot.lane.b32.xlu0 %v811_v31, %s3317_s11 }
 0x199   :  { %v3991_v7 = vpop.permute.xlu1 %645  ;;  %v3993_v33 = vpop.permute.xlu0 %634 }
 0x19a   :  { %6869 = vst [vmem:[#allocation75_spill] sm:$0xff] %v3991_v7  ;;  %v4003_v14 = vpop.permute.xlu2 %688  ;;  %v137_v7 = vadd.f32 %v3547_v55, %v112_v20  ;;  %v58_v20 = vadd.f32 %v56_v0, %v3622_v2  ;;  %v108_v2 = vsel %vm71_vm1, %v3501_v42, %v3537_v53  ;;  %v6880_v42 = vld [vmem:[#allocation18_spill] sm:$0xff]  ;;  %v172_v55 = vsel %vm171_vm5, %v6885_v52, %v6884_v45 }
 0x19b   :  { %6872 = vst [vmem:[#allocation78_spill] sm:$0xff] %v4003_v14  ;;  %v158_v53 = vsel %vm121_vm3, %v6880_v42, %v3529_v51 }
 0x19c   :  { %v162_v39 = vadd.f32 %v3529_v51, %v137_v7 }
 0x19e   :  { %v187_v4 = vadd.f32 %v3585_v13, %v162_v39  ;;  %v83_v39 = vsel %vm55_vm0, %v3491_v40, %v3496_v41 }
 0x1a0   :  { %v212_v14 = vadd.f32 %v3595_v9, %v187_v4 }
 0x1a1   :  { %v3997_v36 = vpop.permute.xlu1 %658  ;;  %v3999_v29 = vpop.permute.xlu0 %656 }
 0x1a2   :  { %6871 = vst [vmem:[#allocation77_spill] sm:$0xff] %v3999_v29  ;;  %v4013_v37 = vpop.permute.xlu2 %699 }
 0x1a3   :  { %6874 = vst [vmem:[#allocation80_spill] sm:$0xff] %v4013_v37 }
 0x1a9   :  { %v4006_v19 = vpop.permute.xlu1 %672  ;;  %v4008_v31 = vpop.permute.xlu0 %667 }
 0x1aa   :  { %6873 = vst [vmem:[#allocation79_spill] sm:$0xff] %v4008_v31  ;;  %v237_v31 = vadd.f32 %v3577_v63, %v212_v14  ;;  %v4043_v41 = vpop.permute.xlu2 %713  ;;  %v74_v14 = vadd.f32 %v72_v44, %v58_v20  ;;  %v6882_v20 = vld [vmem:[#allocation14_spill] sm:$0xff] }
 0x1ab   :  { %6878 = vst [vmem:[#allocation84_spill] sm:$0xff] %v4043_v41 }
 0x1ac   :  { %v262_v7 = vadd.f32 %v3652_v22, %v237_v31  ;;  %v86_v31 = vadd.f32 %v83_v39, %v3619_v15  ;;  %v99_v50 = vadd.f32 %v97_v47, %v74_v14  ;;  %v6883_v39 = vld [vmem:[#allocation32_spill] sm:$0xff]  ;;  %v6886_v47 = vld [vmem:[#allocation15_spill] sm:$0xff] }
 0x1ad   :  { %v6887_v14 = vld [vmem:[#allocation44_spill] sm:$0xff] }
 0x1ae   :  { %v287_v40 = vadd.f32 %v3671_v26, %v262_v7  ;;  %v111_v0 = vadd.f32 %v108_v2, %v86_v31  ;;  %v6881_v7 = vld [vmem:[#allocation19_spill] sm:$0xff]  ;;  %v124_v41 = vadd.f32 %v122_v43, %v99_v50  ;;  %v183_v2 = vsel %vm146_vm4, %v6886_v47, %v3585_v13  ;;  %v6890_v50 = vld [vmem:[#allocation25_spill] sm:$0xff] }
 0x1af   :  { %v147_v15 = vsel %vm146_vm4, %v6882_v20, %v6881_v7  ;;  %v6889_v43 = vld [vmem:[#allocation23_spill] sm:$0xff]  ;;  %v6891_v20 = vld [vmem:[#allocation46_spill] sm:$0xff] }
 0x1b0   :  { %v304_v44 = vadd.f32 %v6883_v39, %v287_v40  ;;  %v149_v46 = vadd.f32 %v147_v15, %v124_v41  ;;  %v6888_v40 = vld [vmem:[#allocation17_spill] sm:$0xff]  ;;  %v6894_v15 = vld [vmem:[#allocation20_spill] sm:$0xff] }
 0x1b1   :  { %v4015_v29 = vpop.permute.xlu1 %683  ;;  %v4017_v3 = vpop.permute.xlu0 %681 }
 0x1b2   :  { %6875 = vst [vmem:[#allocation81_spill] sm:$0xff] %v4015_v29  ;;  %v321_v31 = vadd.f32 %v6887_v14, %v304_v44  ;;  %v174_v13 = vadd.f32 %v172_v55, %v149_v46  ;;  %v4083_v47 = vpop.permute.xlu2 %722  ;;  %v6897_v55 = vld [vmem:[#allocation24_spill] sm:$0xff] }
 0x1b3   :  { %6876 = vst [vmem:[#allocation82_spill] sm:$0xff] %v4017_v3  ;;  %v6895_v3 = vld [vmem:[#allocation30_spill] sm:$0xff] }
 0x1b4   :  { %v338_v45 = vadd.f32 %v6891_v20, %v321_v31 }
 0x1b9   :  { %v4029_v37 = vpop.permute.xlu1 %697  ;;  %v4031_v4 = vpop.permute.xlu0 %690 }
 0x1ba   :  { %6877 = vst [vmem:[#allocation83_spill] sm:$0xff] %v4029_v37  ;;  %v136_v37 = vadd.f32 %v133_v49, %v111_v0  ;;  %v197_v49 = vsel %vm196_vm6, %v6889_v43, %v6888_v40  ;;  %v208_v0 = vsel %vm171_vm5, %v6890_v50, %v3595_v9  ;;  %v6896_v9 = vld [vmem:[#allocation31_spill] sm:$0xff] }
 0x1bb   :  { %v199_v40 = vadd.f32 %v197_v49, %v174_v13  ;;  %v247_v31 = vsel %vm6777_vm8, %v6896_v9, %v6895_v3  ;;  %v6901_v49 = vld [vmem:[#allocation35_spill] sm:$0xff]  ;;  %v6902_v13 = vld [vmem:[#allocation56_spill] sm:$0xff] }
 0x1bc   :  { %v161_v51 = vadd.f32 %v158_v53, %v136_v37  ;;  %v6892_v37 = vld [vmem:[#allocation27_spill] sm:$0xff]  ;;  %v6893_v53 = vld [vmem:[#allocation28_spill] sm:$0xff] }
 0x1bd   :  { %v233_v41 = vsel %vm196_vm6, %v6892_v37, %v3577_v63  ;;  %v222_v44 = vsel %vm221_vm7, %v6894_v15, %v6893_v53  ;;  %v6899_v37 = vld [vmem:[#allocation26_spill] sm:$0xff]  ;;  %v6900_v53 = vld [vmem:[#allocation33_spill] sm:$0xff] }
 0x1be   :  { %v186_v52 = vadd.f32 %v183_v2, %v161_v51  ;;  %v258_v2 = vsel %vm221_vm7, %v6897_v55, %v3652_v22  ;;  %v6898_v51 = vld [vmem:[#allocation42_spill] sm:$0xff]  ;;  %v224_v50 = vadd.f32 %v222_v44, %v199_v40  ;;  %v272_v15 = vsel %vm6779_vm9, %v6900_v53, %v6899_v37  ;;  %v6906_v40 = vld [vmem:[#allocation29_spill] sm:$0xff] }
 0x1bf   :  { %v355_v46 = vadd.f32 %v6898_v51, %v338_v45  ;;  %v6904_v45 = vld [vmem:[#allocation37_spill] sm:$0xff]  ;;  %v6905_v44 = vld [vmem:[#allocation38_spill] sm:$0xff] }
 0x1c0   :  { %v211_v43 = vadd.f32 %v208_v0, %v186_v52  ;;  %v283_v0 = vsel %vm6777_vm8, %v6901_v49, %v3671_v26  ;;  %v249_v3 = vadd.f32 %v247_v31, %v224_v50  ;;  %v6907_v55 = vld [vmem:[#allocation58_spill] sm:$0xff]  ;;  %v6908_v31 = vld [vmem:[#allocation40_spill] sm:$0xff] }
 0x1c1   :  { %v4066_v42 = vpop.permute.xlu1 %706  ;;  %v4068_v7 = vpop.permute.xlu0 %704  ;;  %v372_v52 = vadd.f32 %v6902_v13, %v355_v46 }
 0x1c2   :  { %v236_v63 = vadd.f32 %v233_v41, %v211_v43  ;;  %v300_v41 = vsel %vm6779_vm9, %v6904_v45, %v6883_v39  ;;  %v293_v43 = vsel %vm6778_vm10, %v6906_v40, %v6905_v44  ;;  %v274_v26 = vadd.f32 %v272_v15, %v249_v3  ;;  %v6911_v39 = vld [vmem:[#allocation36_spill] sm:$0xff]  ;;  %v6912_v45 = vld [vmem:[#allocation43_spill] sm:$0xff] }
 0x1c3   :  { %v389_v37 = vadd.f32 %v6907_v55, %v372_v52  ;;  %v327_v44 = vsel %vm6772_vm12, %v6912_v45, %v6911_v39  ;;  %v6913_v52 = vld [vmem:[#allocation47_spill] sm:$0xff] }
 0x1c4   :  { %v261_v9 = vadd.f32 %v258_v2, %v236_v63  ;;  %v6909_v2 = vld [vmem:[#allocation41_spill] sm:$0xff]  ;;  %v6910_v63 = vld [vmem:[#allocation34_spill] sm:$0xff]  ;;  %v334_v15 = vsel %vm6773_vm11, %v6913_v52, %v6891_v20 }
 0x1c5   :  { %v310_v46 = vsel %vm6773_vm11, %v6909_v2, %v6908_v31  ;;  %v317_v50 = vsel %vm6778_vm10, %v6910_v63, %v6887_v14  ;;  %v6915_v14 = vld [vmem:[#allocation49_spill] sm:$0xff]  ;;  %vm411_vm11 = vcmask 900096  }
 0x1c6   :  { %v286_v53 = vadd.f32 %v283_v0, %v261_v9  ;;  %v6914_v0 = vld [vmem:[#allocation54_spill] sm:$0xff]  ;;  %v4123_v9 = vpop.permute.xlu2 %736 }
 0x1c7   :  { %v406_v3 = vadd.f32 %v6914_v0, %v389_v37 }
 0x1c8   :  { %v303_v49 = vadd.f32 %v300_v41, %v286_v53  ;;  %v351_v41 = vsel %vm6772_vm12, %v6915_v14, %v6898_v51  ;;  %vm394_vm12 = vcmask 908288  }
 0x1c9   :  { %v4099_v29 = vpop.permute.xlu1 %720  ;;  %v4101_v22 = vpop.permute.xlu0 %715  ;;  %v423_v2 = vadd.f32 %v3853_v56, %v406_v3 }
 0x1ca   :  { %6903 = vst [vmem:[#allocation16_spill] sm:$0xff] %v4101_v22  ;;  %v295_v22 = vadd.f32 %v293_v43, %v274_v26  ;;  %v320_v31 = vadd.f32 %v317_v50, %v303_v49  ;;  %v6916_v43 = vld [vmem:[#allocation50_spill] sm:$0xff]  ;;  %v6917_v26 = vld [vmem:[#allocation39_spill] sm:$0xff]  ;;  %v6920_v49 = vld [vmem:[#allocation45_spill] sm:$0xff] }
 0x1cb   :  { %v344_v53 = vsel %vm6774_vm13, %v6917_v26, %v6916_v43  ;;  %v368_v51 = vsel %vm6774_vm13, %v6920_v49, %v6902_v13  ;;  %v442_v45 = vadd.f32 %v3860_v58, %v423_v2  ;;  %v6926_v2 = vld [vmem:[#allocation51_spill] sm:$0xff]  ;;  %vm428_vm13 = vcmask 891904  }
 0x1cc   :  { %v312_v40 = vadd.f32 %v310_v46, %v295_v22  ;;  %v337_v39 = vadd.f32 %v334_v15, %v320_v31  ;;  %v6918_v22 = vld [vmem:[#allocation52_spill] sm:$0xff]  ;;  %v6919_v46 = vld [vmem:[#allocation53_spill] sm:$0xff]  ;;  %v6922_v15 = vld [vmem:[#allocation55_spill] sm:$0xff] }
 0x1cd   :  { %v361_v50 = vsel %vm360_vm14, %v6919_v46, %v6918_v22  ;;  %v6924_v22 = vld [vmem:[#allocation61_spill] sm:$0xff]  ;;  %v6925_v46 = vld [vmem:[#allocation62_spill] sm:$0xff] }
 0x1ce   :  { %v329_v63 = vadd.f32 %v327_v44, %v312_v40  ;;  %v354_v52 = vadd.f32 %v351_v41, %v337_v39  ;;  %v6921_v44 = vld [vmem:[#allocation48_spill] sm:$0xff]  ;;  %v6923_v40 = vld [vmem:[#allocation59_spill] sm:$0xff]  ;;  %v402_v13 = vsel %vm6775_vm15, %v6924_v22, %v6914_v0  ;;  %v395_v41 = vsel %vm394_vm12, %v6926_v2, %v6925_v46  ;;  %v6928_v0 = vld [vmem:[#allocation57_spill] sm:$0xff] }
 0x1cf   :  { %v378_v3 = vsel %vm6775_vm15, %v6922_v15, %v6921_v44  ;;  %v385_v31 = vsel %vm360_vm14, %v6923_v40, %v6907_v55  ;;  %v4168_v44 = vpop.permute.xlu2 %747  ;;  %vm6776_vm15 = vcmask 883712   ;;  %v6929_v40 = vld [vmem:[#allocation60_spill] sm:$0xff]  ;;  %v6930_v22 = vld [vmem:[#allocation63_spill] sm:$0xff] }
 0x1d0   :  { %v346_v14 = vadd.f32 %v344_v53, %v329_v63  ;;  %v371_v26 = vadd.f32 %v368_v51, %v354_v52  ;;  %v472_v53 = vadd.f32 %v3969_v23, %v442_v45  ;;  %v4156_v63 = vld [vmem:[#allocation2 + $0x8] sm:$0xff]  ;;  %v419_v52 = vsel %vm394_vm12, %v6928_v0, %v3853_v56 }
 0x1d1   :  { %v4132_v20 = vpop.permute.xlu1 %731  ;;  %v4134_v37 = vpop.permute.xlu0 %729  ;;  %v4159_v55 = vmul.f32 -0.0010917237, %v4156_v63  ;;  %v438_v56 = vsel %vm411_vm11, %v3862_v11, %v3860_v58  ;;  %v492_v58 = vsel %vm55_vm0, %v3856_v59, %v3892_v60 }
 0x1d2   :  { %v363_v43 = vadd.f32 %v361_v50, %v346_v14  ;;  %v388_v49 = vadd.f32 %v385_v31, %v371_v26  ;;  %v6927_v50 = vld [vmem:[#allocation64_spill] sm:$0xff]  ;;  %v496_v14 = vadd.f32 %v3892_v60, %v472_v53  ;;  %v4187_v53 = vld [vmem:[#allocation2 + $0x10] sm:$0xff] }
 0x1d3   :  { %v412_v51 = vsel %vm411_vm11, %v6927_v50, %v3842_v61  ;;  %839 = vrot.lane.b32.xlu0 %v4159_v55, %s3300_s1  ;;  %v429_v61 = vsel %vm428_vm13, %v3851_v48, %v6929_v40  ;;  %v4190_v48 = vmul.f32 0.0020903896, %v4187_v53 }
 0x1d4   :  { %v380_v39 = vadd.f32 %v378_v3, %v363_v43  ;;  %v405_v23 = vadd.f32 %v402_v13, %v388_v49  ;;  %v520_v31 = vadd.f32 %v3902_v8, %v496_v14  ;;  %v451_v13 = vsel %vm6776_vm15, %v6930_v22, %v3871_v62 }
 0x1d5   :  { %vm6946_vm15 = vcmask 949248  }
 0x1d6   :  { %v397_v45 = vadd.f32 %v395_v41, %v380_v39  ;;  %v422_v26 = vadd.f32 %v419_v52, %v405_v23  ;;  %v544_v41 = vadd.f32 %v3884_v57, %v520_v31  ;;  %v4214_v23 = vmul.f32 -0.0034025807, %v4156_v63 }
 0x1d7   :  { %v4208_v60 = vpop.permute.xlu2 %761 }
 0x1d8   :  { %v414_v43 = vadd.f32 %v412_v51, %v397_v45  ;;  %v441_v2 = vadd.f32 %v438_v56, %v422_v26  ;;  %v568_v11 = vadd.f32 %v3940_v24, %v544_v41  ;;  %v516_v51 = vsel %vm71_vm1, %v3904_v30, %v3902_v8 }
 0x1d9   :  { %v4170_v15 = vpop.permute.xlu1 %745  ;;  %v4172_v3 = vpop.permute.xlu0 %738  ;;  %v466_v45 = vsel %vm55_vm0, %v3869_v38, %v3847_v18  ;;  %v481_v8 = vsel %vm71_vm1, %v3880_v10, %v3878_v16  ;;  %v564_v30 = vsel %vm121_vm3, %v3896_v5, %v3940_v24  ;;  %v588_v18 = vsel %vm146_vm4, %v3952_v35, %v3950_v28  ;;  %v6931_v35 = vld [vmem:[#allocation67_spill] sm:$0xff] }
 0x1da   :  { %v431_v46 = vadd.f32 %v429_v61, %v414_v43  ;;  %v471_v49 = vadd.f32 %v3972_v25, %v441_v2  ;;  %v592_v0 = vadd.f32 %v3950_v28, %v568_v11  ;;  %v540_v25 = vsel %vm96_vm2, %v3914_v6, %v3884_v57  ;;  %v6932_v43 = vld [vmem:[#allocation69_spill] sm:$0xff] }
 0x1db   :  { %856 = vrot.lane.b32.xlu0 %v4190_v48, %s3299_s0  ;;  %v505_v6 = vsel %vm96_vm2, %v3890_v12, %v3865_v54  ;;  %v529_v5 = vsel %vm121_vm3, %v3874_v21, %v3916_v1  ;;  %v612_v54 = vsel %vm171_vm5, %v3962_v34, %v3932_v32  ;;  %v553_v31 = vsel %vm146_vm4, %v6931_v35, %v3926_v27  ;;  %v6933_v1 = vld [vmem:[#allocation65_spill] sm:$0xff] }
 0x1dc   :  { %v453_v39 = vadd.f32 %v451_v13, %v431_v46  ;;  %v495_v59 = vadd.f32 %v492_v58, %v471_v49  ;;  %v636_v26 = vsel %vm196_vm6, %v6932_v43, %v3993_v33  ;;  %v4251_v21 = vmul.f32 -0.0043502236, %v4187_v53  ;;  %v6935_v2 = vld [vmem:[#allocation77_spill] sm:$0xff]  ;;  %v6937_v49 = vld [vmem:[#allocation71_spill] sm:$0xff] }
 0x1dd   :  { %v660_v41 = vsel %vm221_vm7, %v6935_v2, %v3997_v36  ;;  %v724_v43 = vsel %vm6946_vm15, %v4099_v29, %v4083_v47  ;;  %v6950_v29 = vld [vmem:[#allocation80_spill] sm:$0xff] }
 0x1de   :  { %v456_v52 = vadd.f32 %v3975_v17, %v453_v39  ;;  %v519_v14 = vadd.f32 %v516_v51, %v495_v59  ;;  %v616_v17 = vadd.f32 %v3932_v32, %v592_v0  ;;  %v6934_v32 = vld [vmem:[#allocation68_spill] sm:$0xff] }
 0x1df   :  { %v771_v46 = vpop.permute.xlu2 %770  ;;  %v577_v34 = vsel %vm171_vm5, %v6934_v32, %v6933_v1  ;;  %v6936_v39 = vld [vmem:[#allocation76_spill] sm:$0xff] }
 0x1e0   :  { %v468_v40 = vadd.f32 %v466_v45, %v456_v52  ;;  %v543_v57 = vadd.f32 %v540_v25, %v519_v14  ;;  %v640_v38 = vadd.f32 %v3993_v33, %v616_v17  ;;  %v6938_v33 = vld [vmem:[#allocation66_spill] sm:$0xff]  ;;  %v676_v0 = vsel %vm6777_vm8, %v4006_v19, %v6936_v39 }
 0x1e1   :  { %v4197_v50 = vpop.permute.xlu1 %754  ;;  %v4199_v62 = vpop.permute.xlu0 %752  ;;  %v601_v51 = vsel %vm196_vm6, %v6938_v33, %v6937_v49  ;;  %v6941_v17 = vld [vmem:[#allocation78_spill] sm:$0xff]  ;;  %v6954_v33 = vld [vmem:[#allocation84_spill] sm:$0xff] }
 0x1e2   :  { %v483_v61 = vadd.f32 %v481_v8, %v468_v40  ;;  %v567_v16 = vadd.f32 %v564_v30, %v543_v57  ;;  %v664_v12 = vadd.f32 %v3997_v36, %v640_v38  ;;  %v6939_v36 = vld [vmem:[#allocation72_spill] sm:$0xff]  ;;  %v6940_v8 = vld [vmem:[#allocation73_spill] sm:$0xff]  ;;  %v692_v40 = vsel %vm6779_vm9, %v6941_v17, %v4031_v4  ;;  %v6943_v38 = vld [vmem:[#allocation75_spill] sm:$0xff] }
 0x1e3   :  { %878 = vrot.lane.b32.xlu0 %v4214_v23, %s3301_s22  ;;  %v625_v30 = vsel %vm221_vm7, %v6940_v8, %v6939_v36 }
 0x1e4   :  { %v507_v24 = vadd.f32 %v505_v6, %v483_v61  ;;  %v591_v28 = vadd.f32 %v588_v18, %v567_v16  ;;  %v680_v27 = vadd.f32 %v6936_v39, %v664_v12  ;;  %v6942_v18 = vld [vmem:[#allocation70_spill] sm:$0xff]  ;;  %v708_v16 = vsel %vm6778_vm10, %v4068_v7, %v4066_v42 }
 0x1e5   :  { %v649_v61 = vsel %vm6777_vm8, %v6943_v38, %v6942_v18  ;;  %vm6949_vm8 = vcmask 941056  }
 0x1e6   :  { %v531_v22 = vadd.f32 %v529_v5, %v507_v24  ;;  %v615_v13 = vadd.f32 %v612_v54, %v591_v28  ;;  %v696_v52 = vadd.f32 %v4031_v4, %v680_v27  ;;  %v4283_v24 = vmul.f32 0.0076396023, %v4156_v63  ;;  %v6944_v28 = vld [vmem:[#allocation79_spill] sm:$0xff]  ;;  %v6945_v4 = vld [vmem:[#allocation74_spill] sm:$0xff] }
 0x1e7   :  { %v785_v12 = vpop.permute.xlu2 %784  ;;  %v669_v35 = vsel %vm6779_vm9, %v6945_v4, %v6944_v28  ;;  %v740_v1 = vsel %vm6949_vm8, %v4123_v9, %v4172_v3  ;;  %vm6956_vm9 = vcmask 916480   ;;  %v4339_v4 = vmul.f32 -0.0010917237, %v4187_v53 }
 0x1e8   :  { %v555_v58 = vadd.f32 %v553_v31, %v531_v22  ;;  %v639_v11 = vadd.f32 %v636_v26, %v615_v13  ;;  %v712_v57 = vadd.f32 %v4066_v42, %v696_v52  ;;  %v6947_v13 = vld [vmem:[#allocation81_spill] sm:$0xff]  ;;  %v6948_v42 = vld [vmem:[#allocation82_spill] sm:$0xff] }
 0x1e9   :  { %v769_v10 = vpop.permute.xlu1 %768  ;;  %v4233_v56 = vpop.permute.xlu0 %763  ;;  %v685_v7 = vsel %vm6778_vm10, %v6948_v42, %v6947_v13  ;;  %vm6952_vm10 = vcmask 932864   ;;  %v4368_v13 = vmul.f32 -0.0034025807, %v4187_v53  ;;  %v4376_v42 = vmul.f32 0.011293989, %v4187_v53 }
 0x1ea   :  { %v579_v59 = vadd.f32 %v577_v34, %v555_v58  ;;  %v663_v25 = vadd.f32 %v660_v41, %v639_v11  ;;  %v728_v31 = vadd.f32 %v4083_v47, %v712_v57  ;;  %v6951_v47 = vld [vmem:[#allocation83_spill] sm:$0xff]  ;;  %v756_v11 = vsel %vm6952_vm10, %v4199_v62, %v4197_v50 }
 0x1eb   :  { %891 = vrot.lane.b32.xlu0 %v4251_v21, %s3299_s0  ;;  %v701_v27 = vsel %vm6946_vm15, %v6951_v47, %v6950_v29  ;;  %vm6955_vm15 = vmmov %vm6952_vm10  ;;  %v4402_v29 = vmul.f32 -0.011765804, %v4156_v63  ;;  %v1053_v47 = vmul.f32 0.52827346, %v4156_v63 }
 0x1ec   :  { %v603_v19 = vadd.f32 %v601_v51, %v579_v59  ;;  %v679_v6 = vadd.f32 %v676_v0, %v663_v25  ;;  %v744_v32 = vadd.f32 %v4172_v3, %v728_v31  ;;  %v6953_v3 = vld [vmem:[#allocation16_spill] sm:$0xff]  ;;  %v772_v0 = vsel %vm360_vm14, %v769_v10, %v771_v46  ;;  %vm6957_vm10 = vmmov %vm6956_vm9 }
 0x1ed   :  { %v717_v51 = vsel %vm6949_vm8, %v6954_v33, %v6953_v3  ;;  %v4313_v25 = vmul.f32 -0.006696033, %v4187_v53  ;;  %v733_v36 = vsel %vm6955_vm15, %v4134_v37, %v4132_v20  ;;  %v765_v20 = vsel %vm6957_vm10, %v4208_v60, %v4233_v56 }
 0x1ee   :  { %v627_v5 = vadd.f32 %v625_v30, %v603_v19  ;;  %v695_v54 = vadd.f32 %v692_v40, %v679_v6  ;;  %v760_v58 = vadd.f32 %v4197_v50, %v744_v32  ;;  %v749_v40 = vsel %vm360_vm14, %v4170_v15, %v4168_v44 }
 0x1ef   :  { %v796_v17 = vpop.permute.xlu2 %795  ;;  %v4332_v15 = vmul.f32 0.008432437, %v4156_v63  ;;  %v4336_v60 = vmul.f32 0.0020903896, %v4156_v63  ;;  %v4352_v31 = vmul.f32 0.0020408458, %v4187_v53 }
 0x1f0   :  { %v651_v26 = vadd.f32 %v649_v61, %v627_v5  ;;  %v711_v22 = vadd.f32 %v708_v16, %v695_v54  ;;  %v776_v8 = vadd.f32 %v771_v46, %v760_v58  ;;  %v1018_v32 = vmul.f32 -0.012120546, %v4156_v63 }
 0x1f1   :  { %v780_v14 = vpop.permute.xlu1 %779  ;;  %v778_v45 = vpop.permute.xlu0 %777  ;;  %v947_v58 = vmul.f32 0.008432437, %v4187_v53  ;;  %v994_v3 = vmul.f32 0.011293989, %v4156_v63  ;;  %v982_v33 = vmul.f32 -0.020910295, %v4187_v53 }
 0x1f2   :  { %v671_v34 = vadd.f32 %v669_v35, %v651_v26  ;;  %v727_v2 = vadd.f32 %v724_v43, %v711_v22  ;;  %v781_v16 = vsel %vm394_vm12, %v778_v45, %v780_v14  ;;  %v4349_v35 = vmul.f32 0.016368665, %v4187_v53 }
 0x1f3   :  { %913 = vrot.lane.b32.xlu0 %v4283_v24, %s3301_s22  ;;  %v4355_v43 = vmul.f32 0.0020408458, %v4156_v63  ;;  %v981_v26 = vmul.f32 -0.020910295, %v4156_v63  ;;  %v4365_v22 = vmul.f32 -0.0043502236, %v4156_v63 }
 0x1f4   :  { %v687_v9 = vadd.f32 %v685_v7, %v671_v34  ;;  %v743_v49 = vadd.f32 %v740_v1, %v727_v2  ;;  %v4379_v7 = vmul.f32 0.0049722632, %v4187_v53  ;;  %v4382_v1 = vmul.f32 0.0049722632, %v4156_v63 }
 0x1f5   :  { %v922_v34 = vmul.f32 -0.006696033, %v4156_v63  ;;  %v4393_v2 = vmul.f32 0.0076396023, %v4187_v53  ;;  %vm7004_vm8 = vcmask 965632   ;;  %vm7005_vm15 = vcmask 957440  }
 0x1f6   :  { %v703_v52 = vadd.f32 %v701_v27, %v687_v9  ;;  %v759_v59 = vadd.f32 %v756_v11, %v743_v49  ;;  %v4410_v27 = vmul.f32 0.016368665, %v4156_v63  ;;  %v1019_v11 = vmul.f32 -0.012120546, %v4187_v53 }
 0x1f7   :  { %v971_v9 = vmul.f32 -0.010018936, %v4187_v53  ;;  %v970_v49 = vmul.f32 -0.010018936, %v4156_v63  ;;  %vm7006_vm10 = vcmask 949248  }
 0x1f8   :  { %v719_v62 = vadd.f32 %v717_v51, %v703_v52  ;;  %v775_v30 = vadd.f32 %v772_v0, %v759_v59  ;;  %v1006_v0 = vmul.f32 0.024767846, %v4187_v53  ;;  %v1005_v52 = vmul.f32 0.024767846, %v4156_v63 }
 0x1f9   :  { %v794_v41 = vpop.permute.xlu1 %793  ;;  %v787_v39 = vpop.permute.xlu0 %786 }
 0x1fa   :  { %v788_v50 = vsel %vm6956_vm9, %v785_v12, %v787_v39  ;;  %v792_v10 = vadd.f32 %v787_v39, %v776_v8  ;;  %v735_v57 = vadd.f32 %v733_v36, %v719_v62  ;;  %v797_v5 = vsel %vm411_vm11, %v794_v41, %v796_v17  ;;  %v815_v12 = vpop.permute.xlu2 %814 }
 0x1fb   :  { %v791_v19 = vadd.f32 %v788_v50, %v775_v30  ;;  %928 = vrot.lane.b32.xlu0 %v4313_v25, %s3303_s24  ;;  %v1030_v41 = vmul.f32 -0.027359758, %v4187_v53  ;;  %v934_v39 = vmul.f32 -0.011765804, %v4187_v53  ;;  %v1029_v36 = vmul.f32 -0.027359758, %v4156_v63 }
 0x1fc   :  { %v751_v38 = vadd.f32 %v749_v40, %v735_v57  ;;  %v1043_v62 = vmul.f32 0.5124068, %v4187_v53  ;;  %v1042_v30 = vmul.f32 0.5124068, %v4156_v63  ;;  %vm7003_vm9 = vcmask 973824  }
 0x1fe   :  { %v767_v44 = vadd.f32 %v765_v20, %v751_v38 }
 0x200   :  { %v783_v54 = vadd.f32 %v781_v16, %v767_v44 }
 0x201   :  { %v805_v6 = vpop.permute.xlu1 %804  ;;  %v803_v18 = vpop.permute.xlu0 %802 }
 0x202   :  { %v810_v37 = vadd.f32 %v805_v6, %v792_v10  ;;  %v806_v46 = vsel %vm394_vm12, %v803_v18, %v805_v6  ;;  %v799_v56 = vadd.f32 %v797_v5, %v783_v54  ;;  %v1054_v10 = vmul.f32 0.52827346, %v4187_v53 }
 0x203   :  { %v809_v61 = vadd.f32 %v806_v46, %v791_v19  ;;  %950 = vrot.lane.b32.xlu0 %v4332_v15, %s3304_s25 }
 0x204   :  { %826 = vrot.lane.b32.xlu2 %v810_v37, %s3300_s1 }
 0x205   :  { %824 = vrot.lane.b32.xlu1 %v809_v61, %s3300_s1 }
 0x209   :  { %v817_v28 = vpop.permute.xlu0 %816 }
 0x20a   :  { %v818_v14 = vsel %vm428_vm13, %v815_v12, %v817_v28 }
 0x20b   :  { %v820_v45 = vadd.f32 %v818_v14, %v799_v56  ;;  %963 = vrot.lane.b32.xlu0 %v4349_v35, %s3303_s24 }
 0x20c   :  { %854 = vrot.lane.b32.xlu2 %v4336_v60, %s3299_s0 }
 0x20d   :  { %821 = vst [vmem:[#allocation7] sm:$0xff] %v820_v45  ;;  %841 = vrot.lane.b32.xlu1 %v4339_v4, %s3300_s1 }
 0x213   :  { %985 = vrot.lane.b32.xlu0 %v981_v26, %s3304_s25 }
 0x214   :  { %867 = vrot.lane.b32.xlu2 %v4352_v31, %s3300_s1 }
 0x215   :  { %865 = vrot.lane.b32.xlu1 %v4355_v43, %s3300_s1 }
 0x21b   :  { %1000 = vrot.lane.b32.xlu0 %v4376_v42, %s3306_s27 }
 0x21c   :  { %889 = vrot.lane.b32.xlu2 %v4365_v22, %s3299_s0 }
 0x21d   :  { %880 = vrot.lane.b32.xlu1 %v4368_v13, %s3301_s22 }
 0x223   :  { %1022 = vrot.lane.b32.xlu0 %v1018_v32, %s3307_s28 }
 0x224   :  { %904 = vrot.lane.b32.xlu2 %v4379_v7, %s3302_s23 }
 0x225   :  { %902 = vrot.lane.b32.xlu1 %v4382_v1, %s3302_s23 }
 0x22b   :  { %1035 = vrot.lane.b32.xlu0 %v1030_v41, %s3306_s27 }
 0x22c   :  { %926 = vrot.lane.b32.xlu2 %v922_v34, %s3303_s24 }
 0x22d   :  { %915 = vrot.lane.b32.xlu1 %v4393_v2, %s3301_s22 }
 0x233   :  { %1057 = vrot.lane.b32.xlu0 %v1053_v47, %s3307_s28 }
 0x234   :  { %939 = vrot.lane.b32.xlu2 %v934_v39, %s3302_s23 }
 0x235   :  { %937 = vrot.lane.b32.xlu1 %v4402_v29, %s3302_s23 }
 0x23b   :  { %1068 = vrot.lane.b32.xlu0 %v1019_v11, %s3309_s30 }
 0x23c   :  { %961 = vrot.lane.b32.xlu2 %v4410_v27, %s3303_s24 }
 0x23d   :  { %952 = vrot.lane.b32.xlu1 %v947_v58, %s3304_s25 }
 0x243   :  { %1082 = vrot.lane.b32.xlu0 %v994_v3, %s3310_s4 }
 0x244   :  { %976 = vrot.lane.b32.xlu2 %v971_v9, %s3305_s26 }
 0x245   :  { %974 = vrot.lane.b32.xlu1 %v970_v49, %s3305_s26  ;;  %v4426_v51 = vpop.permute.xlu0 %839 }
 0x246   :  { %6958 = vst [vmem:[#allocation18_spill] sm:$0xff] %v4426_v51 }
 0x24b   :  { %1091 = vrot.lane.b32.xlu0 %v1006_v0, %s3309_s30 }
 0x24c   :  { %998 = vrot.lane.b32.xlu2 %v994_v3, %s3306_s27  ;;  %v4612_v3 = vmul.f32 -0.0006548817, %v4187_v53 }
 0x24d   :  { %987 = vrot.lane.b32.xlu1 %v982_v33, %s3304_s25  ;;  %v4433_v59 = vpop.permute.xlu0 %856 }
 0x24e   :  { %6959 = vst [vmem:[#allocation19_spill] sm:$0xff] %v4433_v59 }
 0x24f   :  { %6983 = vst [vmem:[#allocation29_spill] sm:$0xff] %v4612_v3 }
 0x253   :  { %1105 = vrot.lane.b32.xlu0 %v981_v26, %s3310_s4 }
 0x254   :  { %1011 = vrot.lane.b32.xlu2 %v1006_v0, %s3305_s26 }
 0x255   :  { %1009 = vrot.lane.b32.xlu1 %v1005_v52, %s3305_s26  ;;  %v4439_v8 = vpop.permute.xlu0 %878 }
 0x256   :  { %6960 = vst [vmem:[#allocation14_spill] sm:$0xff] %v4439_v8 }
 0x25b   :  { %1116 = vrot.lane.b32.xlu0 %v947_v58, %s3312_s6 }
 0x25c   :  { %1033 = vrot.lane.b32.xlu2 %v1029_v36, %s3306_s27 }
 0x25d   :  { %1024 = vrot.lane.b32.xlu1 %v1019_v11, %s3307_s28  ;;  %v4446_v17 = vpop.permute.xlu0 %891 }
 0x25e   :  { %v827_v50 = vpop.permute.xlu2 %826  ;;  %6961 = vst [vmem:[#allocation32_spill] sm:$0xff] %v4446_v17 }
 0x263   :  { %1130 = vrot.lane.b32.xlu0 %v922_v34, %s3313_s7 }
 0x264   :  { %1048 = vrot.lane.b32.xlu2 %v1043_v62, %s3308_s29 }
 0x265   :  { %1046 = vrot.lane.b32.xlu1 %v1042_v30, %s3308_s29  ;;  %v4454_v57 = vpop.permute.xlu0 %913 }
 0x266   :  { %v4450_v40 = vpop.permute.xlu2 %854 }
 0x267   :  { %6962 = vst [vmem:[#allocation21_spill] sm:$0xff] %v4450_v40 }
 0x26b   :  { %1139 = vrot.lane.b32.xlu0 %v934_v39, %s3312_s6 }
 0x26c   :  { %1066 = vrot.lane.b32.xlu2 %v1018_v32, %s3309_s30 }
 0x26d   :  { %1059 = vrot.lane.b32.xlu1 %v1054_v10, %s3307_s28  ;;  %v4461_v6 = vpop.permute.xlu0 %928 }
 0x26e   :  { %v4458_v19 = vpop.permute.xlu2 %867  ;;  %6964 = vst [vmem:[#allocation15_spill] sm:$0xff] %v4461_v6 }
 0x26f   :  { %6963 = vst [vmem:[#allocation22_spill] sm:$0xff] %v4458_v19 }
 0x273   :  { %1153 = vrot.lane.b32.xlu0 %v4283_v24, %s3313_s7 }
 0x274   :  { %1075 = vrot.lane.b32.xlu2 %v1030_v41, %s3308_s29 }
 0x275   :  { %1073 = vrot.lane.b32.xlu1 %v1029_v36, %s3308_s29  ;;  %v4470_v46 = vpop.permute.xlu0 %950 }
 0x276   :  { %v4465_v18 = vpop.permute.xlu2 %889  ;;  %6965 = vst [vmem:[#allocation44_spill] sm:$0xff] %v4470_v46 }
 0x277   :  { %v825_v20 = vpop.permute.xlu1 %824 }
 0x278   :  { %v828_v37 = vsel %vm55_vm0, %v825_v20, %v827_v50 }
 0x279   :  { %830 = vst [vmem:[#allocation8] sm:$0xff] %v828_v37 }
 0x27b   :  { %1164 = vrot.lane.b32.xlu0 %v4368_v13, %s3315_s9 }
 0x27c   :  { %1089 = vrot.lane.b32.xlu2 %v1005_v52, %s3309_s30 }
 0x27d   :  { %1084 = vrot.lane.b32.xlu1 %v4376_v42, %s3310_s4  ;;  %v4481_v16 = vpop.permute.xlu0 %963  ;;  %v4537_v42 = vld [vmem:[#allocation5 + $0x8] sm:$0xff] }
 0x27e   :  { %v4475_v38 = vpop.permute.xlu2 %904  ;;  %v4542_v32 = vmul.f32 0.0040940573, %v4537_v42  ;;  %v4574_v47 = vmul.f32 0.0025966428, %v4537_v42  ;;  %v4646_v62 = vmul.f32 -0.026075976, %v4537_v42 }
 0x27f   :  { %6966 = vst [vmem:[#allocation17_spill] sm:$0xff] %v4475_v38  ;;  %v4477_v61 = vpop.permute.xlu1 %841  ;;  %v4649_v30 = vmul.f32 -0.00074680534, %v4537_v42  ;;  %v4727_v6 = vmul.f32 0.013649909, %v4537_v42 }
 0x280   :  { %6967 = vst [vmem:[#allocation23_spill] sm:$0xff] %v4477_v61  ;;  %v4747_v40 = vmul.f32 0.033074383, %v4537_v42 }
 0x281   :  { %6978 = vst [vmem:[#allocation33_spill] sm:$0xff] %v4574_v47 }
 0x282   :  { %6989 = vst [vmem:[#allocation43_spill] sm:$0xff] %v4649_v30 }
 0x283   :  { %1178 = vrot.lane.b32.xlu0 %v4336_v60, %s3316_s10 }
 0x284   :  { %1100 = vrot.lane.b32.xlu2 %v971_v9, %s3311_s5  ;;  %v4604_v9 = vmul.f32 -0.020694051, %v4537_v42 }
 0x285   :  { %1098 = vrot.lane.b32.xlu1 %v970_v49, %s3311_s5  ;;  %v4491_v5 = vpop.permute.xlu0 %985  ;;  %v4609_v49 = vmul.f32 0.00041447996, %v4156_v63 }
 0x286   :  { %v4485_v24 = vpop.permute.xlu2 %926 }
 0x287   :  { %6968 = vst [vmem:[#allocation25_spill] sm:$0xff] %v4485_v24  ;;  %v4487_v44 = vpop.permute.xlu1 %865  ;;  %v4724_v24 = vmul.f32 0.31488052, %v4537_v42 }
 0x288   :  { %6982 = vst [vmem:[#allocation38_spill] sm:$0xff] %v4609_v49 }
 0x28b   :  { %1187 = vrot.lane.b32.xlu0 %v4352_v31, %s3315_s9  ;;  %v1212_v31 = vmul.f32 0.00041447996, %v4187_v53  ;;  %v4631_v53 = vmul.f32 -0.0019867925, %v4537_v42 }
 0x28c   :  { %1114 = vrot.lane.b32.xlu2 %v4332_v15, %s3312_s6  ;;  %v4511_v15 = vmul.f32 -0.0006548817, %v4156_v63 }
 0x28d   :  { %1107 = vrot.lane.b32.xlu1 %v982_v33, %s3310_s4  ;;  %v4502_v56 = vpop.permute.xlu0 %1000  ;;  %6986 = vst [vmem:[#allocation41_spill] sm:$0xff] %v4631_v53 }
 0x28e   :  { %v4496_v54 = vpop.permute.xlu2 %939  ;;  %6970 = vst [vmem:[#allocation27_spill] sm:$0xff] %v4502_v56 }
 0x28f   :  { %v4498_v12 = vpop.permute.xlu1 %880 }
 0x290   :  { %6969 = vst [vmem:[#allocation46_spill] sm:$0xff] %v4498_v12 }
 0x293   :  { %1203 = vrot.lane.b32.xlu0 %v4511_v15, %s3316_s10 }
 0x294   :  { %1123 = vrot.lane.b32.xlu2 %v4349_v35, %s3311_s5 }
 0x295   :  { %1121 = vrot.lane.b32.xlu1 %v4410_v27, %s3311_s5  ;;  %v4517_v14 = vpop.permute.xlu0 %1022 }
 0x296   :  { %v4508_v60 = vpop.permute.xlu2 %961  ;;  %6972 = vst [vmem:[#allocation20_spill] sm:$0xff] %v4517_v14 }
 0x297   :  { %v4513_v28 = vpop.permute.xlu1 %902 }
 0x298   :  { %6971 = vst [vmem:[#allocation28_spill] sm:$0xff] %v4513_v28 }
 0x29b   :  { %1217 = vrot.lane.b32.xlu0 %v1212_v31, %s3318_s12 }
 0x29c   :  { %1137 = vrot.lane.b32.xlu2 %v4402_v29, %s3312_s6 }
 0x29d   :  { %1132 = vrot.lane.b32.xlu1 %v4313_v25, %s3313_s7  ;;  %v4529_v26 = vpop.permute.xlu0 %1035 }
 0x29e   :  { %v4523_v45 = vpop.permute.xlu2 %976 }
 0x29f   :  { %6973 = vst [vmem:[#allocation30_spill] sm:$0xff] %v4523_v45  ;;  %v4525_v35 = vpop.permute.xlu1 %915  ;;  %v4710_v45 = vmul.f32 -0.0064904117, %v4537_v42 }
 0x2a3   :  { %1245 = vrot.lane.b32.xlu0 %v4542_v32, %s3299_s0 }
 0x2a4   :  { %1148 = vrot.lane.b32.xlu2 %v4379_v7, %s3314_s8 }
 0x2a5   :  { %1146 = vrot.lane.b32.xlu1 %v4382_v1, %s3314_s8  ;;  %v4546_v34 = vpop.permute.xlu0 %1057  ;;  %v4554_v1 = vld [vmem:[#allocation5 + $0x10] sm:$0xff] }
 0x2a6   :  { %v4535_v13 = vpop.permute.xlu2 %998  ;;  %v4559_v39 = vmul.f32 -0.00074680534, %v4554_v1  ;;  %v4589_v58 = vmul.f32 0.012738791, %v4554_v1  ;;  %v4625_v0 = vmul.f32 0.013649909, %v4554_v1 }
 0x2a7   :  { %6974 = vst [vmem:[#allocation31_spill] sm:$0xff] %v4535_v13  ;;  %v4539_v25 = vpop.permute.xlu1 %937  ;;  %v4628_v63 = vmul.f32 -0.0019867925, %v4554_v1  ;;  %v4652_v10 = vmul.f32 0.0040940573, %v4554_v1 }
 0x2a8   :  { %v4692_v14 = vmul.f32 0.0025966428, %v4554_v1  ;;  %v1397_v56 = vmul.f32 -0.096178465, %v4554_v1  ;;  %v4730_v28 = vmul.f32 -0.020694051, %v4554_v1 }
 0x2a9   :  { %6985 = vst [vmem:[#allocation40_spill] sm:$0xff] %v4628_v63  ;;  %v1410_v8 = vmul.f32 -0.3163002, %v4554_v1  ;;  %v1338_v12 = vmul.f32 0.033074383, %v4554_v1 }
 0x2aa   :  { %6990 = vst [vmem:[#allocation47_spill] sm:$0xff] %v4652_v10  ;;  %v4763_v51 = vmul.f32 -0.026075976, %v4554_v1 }
 0x2ab   :  { %1258 = vrot.lane.b32.xlu0 %v4559_v39, %s3300_s1  ;;  %6994 = vst [vmem:[#allocation39_spill] sm:$0xff] %v4692_v14 }
 0x2ac   :  { %1162 = vrot.lane.b32.xlu2 %v4214_v23, %s3315_s9 }
 0x2ad   :  { %1155 = vrot.lane.b32.xlu1 %v4393_v2, %s3313_s7  ;;  %v4563_v29 = vpop.permute.xlu0 %1068 }
 0x2ae   :  { %v4552_v7 = vpop.permute.xlu2 %1011  ;;  %6976 = vst [vmem:[#allocation42_spill] sm:$0xff] %v4563_v29 }
 0x2af   :  { %v4556_v41 = vpop.permute.xlu1 %952 }
 0x2b0   :  { %6975 = vst [vmem:[#allocation24_spill] sm:$0xff] %v4556_v41 }
 0x2b3   :  { %1280 = vrot.lane.b32.xlu0 %v4574_v47, %s3299_s0  ;;  %v893_v47 = vsel %vm71_vm1, %v4465_v18, %v4446_v17 }
 0x2b4   :  { %1171 = vrot.lane.b32.xlu2 %v4251_v21, %s3314_s8 }
 0x2b5   :  { %1169 = vrot.lane.b32.xlu1 %v4365_v22, %s3314_s8  ;;  %v4578_v27 = vpop.permute.xlu0 %1082 }
 0x2b6   :  { %v4569_v23 = vpop.permute.xlu2 %1033  ;;  %6979 = vst [vmem:[#allocation35_spill] sm:$0xff] %v4578_v27  ;;  %v4670_v27 = vmul.f32 -0.007496154, %v4554_v1 }
 0x2b7   :  { %v4571_v2 = vpop.permute.xlu1 %974 }
 0x2b8   :  { %6977 = vst [vmem:[#allocation26_spill] sm:$0xff] %v4571_v2  ;;  %v4707_v2 = vmul.f32 -0.0064904117, %v4554_v1 }
 0x2bb   :  { %1295 = vrot.lane.b32.xlu0 %v4589_v58, %s3302_s23 }
 0x2bc   :  { %1185 = vrot.lane.b32.xlu2 %v4355_v43, %s3315_s9 }
 0x2bd   :  { %1180 = vrot.lane.b32.xlu1 %v4190_v48, %s3316_s10  ;;  %v4593_v11 = vpop.permute.xlu0 %1091 }
 0x2be   :  { %v4584_v21 = vpop.permute.xlu2 %1048 }
 0x2bf   :  { %6980 = vst [vmem:[#allocation56_spill] sm:$0xff] %v4584_v21  ;;  %v4586_v22 = vpop.permute.xlu1 %987  ;;  %v4689_v21 = vmul.f32 0.012738791, %v4537_v42 }
 0x2c3   :  { %1317 = vrot.lane.b32.xlu0 %v4604_v9, %s3303_s24 }
 0x2c4   :  { %1196 = vrot.lane.b32.xlu2 %v4339_v4, %s3317_s11 }
 0x2c5   :  { %1194 = vrot.lane.b32.xlu1 %v4159_v55, %s3317_s11  ;;  %v4614_v4 = vpop.permute.xlu0 %1105 }
 0x2c6   :  { %v4599_v43 = vpop.permute.xlu2 %1066 }
 0x2c7   :  { %6981 = vst [vmem:[#allocation37_spill] sm:$0xff] %v4599_v43  ;;  %v4601_v48 = vpop.permute.xlu1 %1009  ;;  %v4673_v43 = vmul.f32 -0.007496154, %v4537_v42 }
 0x2cb   :  { %1330 = vrot.lane.b32.xlu0 %v4625_v0, %s3302_s23 }
 0x2cc   :  { %1215 = vrot.lane.b32.xlu2 %v4609_v49, %s3318_s12  ;;  %v4760_v49 = vmul.f32 -0.05423136, %v4537_v42 }
 0x2cd   :  { %1205 = vrot.lane.b32.xlu1 %v4612_v3, %s3316_s10  ;;  %v4635_v52 = vpop.permute.xlu0 %1116 }
 0x2ce   :  { %v4620_v55 = vpop.permute.xlu2 %1075  ;;  %6987 = vst [vmem:[#allocation34_spill] sm:$0xff] %v4635_v52  ;;  %v4667_v52 = vmul.f32 -0.05423136, %v4554_v1 }
 0x2cf   :  { %v4622_v33 = vpop.permute.xlu1 %1024 }
 0x2d0   :  { %6984 = vst [vmem:[#allocation58_spill] sm:$0xff] %v4622_v33 }
 0x2d3   :  { %1352 = vrot.lane.b32.xlu0 %v4646_v62, %s3303_s24 }
 0x2d4   :  { %1232 = vrot.lane.b32.xlu2 %v4628_v63, %s3300_s1  ;;  %v4780_v63 = vmul.f32 0.048260726, %v4554_v1 }
 0x2d5   :  { %1230 = vrot.lane.b32.xlu1 %v4631_v53, %s3300_s1  ;;  %v4656_v20 = vpop.permute.xlu0 %1130  ;;  %v869_v53 = vsel %vm55_vm0, %v4487_v44, %v4458_v19  ;;  %v917_v44 = vsel %vm96_vm2, %v4454_v57, %v4525_v35  ;;  %v965_v57 = vsel %vm146_vm4, %v4508_v60, %v4481_v16  ;;  %v1409_v60 = vmul.f32 -0.3163002, %v4537_v42 }
 0x2d6   :  { %v4641_v36 = vpop.permute.xlu2 %1089  ;;  %6991 = vst [vmem:[#allocation54_spill] sm:$0xff] %v4656_v20 }
 0x2d7   :  { %v4643_v50 = vpop.permute.xlu1 %1046 }
 0x2d8   :  { %6988 = vst [vmem:[#allocation36_spill] sm:$0xff] %v4643_v50  ;;  %v1385_v50 = vmul.f32 0.10020082, %v4537_v42 }
 0x2db   :  { %1367 = vrot.lane.b32.xlu0 %v4667_v52, %s3305_s26 }
 0x2dc   :  { %1256 = vrot.lane.b32.xlu2 %v4649_v30, %s3300_s1 }
 0x2dd   :  { %1247 = vrot.lane.b32.xlu1 %v4652_v10, %s3299_s0  ;;  %v4677_v20 = vpop.permute.xlu0 %1139  ;;  %v872_v10 = vadd.f32 %v869_v53, %v4511_v15  ;;  %v941_v15 = vsel %vm121_vm3, %v4539_v25, %v4496_v54  ;;  %v1396_v53 = vmul.f32 -0.096178465, %v4537_v42  ;;  %v989_v25 = vsel %vm171_vm5, %v4491_v5, %v4586_v22 }
 0x2de   :  { %v4662_v37 = vpop.permute.xlu2 %1100  ;;  %v1037_v5 = vsel %vm221_vm7, %v4569_v23, %v4529_v26 }
 0x2df   :  { %6992 = vst [vmem:[#allocation49_spill] sm:$0xff] %v4662_v37  ;;  %v4664_v31 = vpop.permute.xlu1 %1059  ;;  %v896_v19 = vadd.f32 %v893_v47, %v872_v10 }
 0x2e1   :  { %v920_v18 = vadd.f32 %v917_v44, %v896_v19 }
 0x2e3   :  { %1389 = vrot.lane.b32.xlu0 %v1385_v50, %s3306_s27  ;;  %v944_v17 = vadd.f32 %v941_v15, %v920_v18 }
 0x2e4   :  { %1271 = vrot.lane.b32.xlu2 %v4670_v27, %s3301_s22 }
 0x2e5   :  { %1269 = vrot.lane.b32.xlu1 %v4673_v43, %s3301_s22  ;;  %v4695_v33 = vpop.permute.xlu0 %1153  ;;  %v968_v47 = vadd.f32 %v965_v57, %v944_v17  ;;  %v1061_v17 = vsel %vm7003_vm9, %v4546_v34, %v4664_v31  ;;  %v1093_v34 = vsel %vm7005_vm15, %v4641_v36, %v4593_v11  ;;  %vm7007_vm9 = vcmask 941056  }
 0x2e6   :  { %v4683_v37 = vpop.permute.xlu2 %1114  ;;  %vm7009_vm15 = vcmask 916480  }
 0x2e7   :  { %6993 = vst [vmem:[#allocation50_spill] sm:$0xff] %v4683_v37  ;;  %v4685_v29 = vpop.permute.xlu1 %1073  ;;  %v992_v44 = vadd.f32 %v989_v25, %v968_v47 }
 0x2eb   :  { %1402 = vrot.lane.b32.xlu0 %v1397_v56, %s3305_s26 }
 0x2ec   :  { %1293 = vrot.lane.b32.xlu2 %v4689_v21, %s3302_s23 }
 0x2ed   :  { %1282 = vrot.lane.b32.xlu1 %v4692_v14, %s3299_s0  ;;  %v4713_v46 = vpop.permute.xlu0 %1164 }
 0x2ee   :  { %v4701_v37 = vpop.permute.xlu2 %1123  ;;  %6996 = vst [vmem:[#allocation53_spill] sm:$0xff] %v4713_v46 }
 0x2ef   :  { %v4703_v13 = vpop.permute.xlu1 %1084 }
 0x2f0   :  { %6995 = vst [vmem:[#allocation52_spill] sm:$0xff] %v4703_v13 }
 0x2f3   :  { %1424 = vrot.lane.b32.xlu0 %v4724_v24, %s3306_s27 }
 0x2f4   :  { %1306 = vrot.lane.b32.xlu2 %v4707_v2, %s3301_s22 }
 0x2f5   :  { %1304 = vrot.lane.b32.xlu1 %v4710_v45, %s3301_s22  ;;  %v4734_v46 = vpop.permute.xlu0 %1178 }
 0x2f6   :  { %v4719_v41 = vpop.permute.xlu2 %1137  ;;  %6998 = vst [vmem:[#allocation48_spill] sm:$0xff] %v4734_v46 }
 0x2f7   :  { %v4721_v13 = vpop.permute.xlu1 %1098 }
 0x2f8   :  { %6997 = vst [vmem:[#allocation45_spill] sm:$0xff] %v4721_v13 }
 0x2fb   :  { %1435 = vrot.lane.b32.xlu0 %v1410_v8, %s3308_s29 }
 0x2fc   :  { %1328 = vrot.lane.b32.xlu2 %v4727_v6, %s3302_s23 }
 0x2fd   :  { %1319 = vrot.lane.b32.xlu1 %v4730_v28, %s3303_s24  ;;  %v4750_v46 = vpop.permute.xlu0 %1187 }
 0x2fe   :  { %v4740_v13 = vpop.permute.xlu2 %1148 }
 0x2ff   :  { %6999 = vst [vmem:[#allocation55_spill] sm:$0xff] %v4740_v13  ;;  %v4742_v38 = vpop.permute.xlu1 %1107 }
 0x303   :  { %1449 = vrot.lane.b32.xlu0 %v1385_v50, %s3309_s30  ;;  %v1372_v50 = vmul.f32 0.048260726, %v4537_v42 }
 0x304   :  { %1343 = vrot.lane.b32.xlu2 %v1338_v12, %s3304_s25 }
 0x305   :  { %1341 = vrot.lane.b32.xlu1 %v4747_v40, %s3304_s25  ;;  %v4766_v61 = vpop.permute.xlu0 %1203 }
 0x306   :  { %v4755_v59 = vpop.permute.xlu2 %1162 }
 0x307   :  { %7000 = vst [vmem:[#allocation59_spill] sm:$0xff] %v4755_v59  ;;  %v4757_v13 = vpop.permute.xlu1 %1121 }
 0x30b   :  { %1458 = vrot.lane.b32.xlu0 %v1397_v56, %s3308_s29 }
 0x30c   :  { %1365 = vrot.lane.b32.xlu2 %v4760_v49, %s3305_s26 }
 0x30d   :  { %1354 = vrot.lane.b32.xlu1 %v4763_v51, %s3303_s24  ;;  %v4785_v30 = vpop.permute.xlu0 %1217 }
 0x30e   :  { %v4772_v3 = vpop.permute.xlu2 %1171  ;;  %7002 = vst [vmem:[#allocation62_spill] sm:$0xff] %v4785_v30  ;;  %v1386_v30 = vmul.f32 0.10020082, %v4554_v1 }
 0x30f   :  { %v4774_v59 = vpop.permute.xlu1 %1132 }
 0x310   :  { %7001 = vst [vmem:[#allocation61_spill] sm:$0xff] %v4774_v59 }
 0x313   :  { %1472 = vrot.lane.b32.xlu0 %v1372_v50, %s3309_s30 }
 0x314   :  { %1378 = vrot.lane.b32.xlu2 %v4780_v63, %s3304_s25 }
 0x315   :  { %1376 = vrot.lane.b32.xlu1 %v1372_v50, %s3304_s25  ;;  %v4804_v14 = vpop.permute.xlu0 %1245  ;;  %v1013_v50 = vsel %vm196_vm6, %v4601_v48, %v4552_v7 }
 0x316   :  { %v1186_v59 = vpop.permute.xlu2 %1185  ;;  %v1016_v15 = vadd.f32 %v1013_v50, %v992_v44  ;;  %v1421_v50 = vmul.f32 0.31488052, %v4554_v1 }
 0x317   :  { %v4796_v56 = vpop.permute.xlu1 %1146 }
 0x318   :  { %v1040_v57 = vadd.f32 %v1037_v5, %v1016_v15 }
 0x31a   :  { %v1064_v47 = vadd.f32 %v1061_v17, %v1040_v57 }
 0x31b   :  { %1483 = vrot.lane.b32.xlu0 %v1338_v12, %s3311_s5  ;;  %v1077_v12 = vsel %vm7004_vm8, %v4685_v29, %v4620_v55  ;;  %v1109_v29 = vsel %vm7006_vm10, %v4614_v4, %v4742_v38  ;;  %vm7008_vm8 = vcmask 932864   ;;  %vm7055_vm10 = vcmask 973824  }
 0x31c   :  { %1400 = vrot.lane.b32.xlu2 %v1396_v53, %s3305_s26  ;;  %v1141_v4 = vsel %vm7008_vm8, %v4719_v41, %v4677_v20  ;;  %vm7061_vm8 = vcmask 957440  }
 0x31d   :  { %1391 = vrot.lane.b32.xlu1 %v1386_v30, %s3306_s27  ;;  %v4823_v18 = vpop.permute.xlu0 %1258 }
 0x31e   :  { %v4814_v19 = vpop.permute.xlu2 %1196 }
 0x31f   :  { %v4816_v10 = vpop.permute.xlu1 %1155 }
 0x323   :  { %1497 = vrot.lane.b32.xlu0 %v4604_v9, %s3312_s6  ;;  %v1125_v9 = vsel %vm7007_vm9, %v4757_v13, %v4701_v37  ;;  %v1157_v13 = vsel %vm360_vm14, %v4695_v33, %v4816_v10  ;;  %vm7058_vm9 = vcmask 965632  }
 0x324   :  { %1415 = vrot.lane.b32.xlu2 %v1410_v8, %s3307_s28  ;;  %v1080_v8 = vadd.f32 %v1077_v12, %v1064_v47 }
 0x325   :  { %1413 = vrot.lane.b32.xlu1 %v1409_v60, %s3307_s28  ;;  %v4841_v23 = vpop.permute.xlu0 %1280 }
 0x326   :  { %v4833_v48 = vpop.permute.xlu2 %1215  ;;  %v1096_v15 = vadd.f32 %v1093_v34, %v1080_v8 }
 0x327   :  { %v1170_v25 = vpop.permute.xlu1 %1169 }
 0x328   :  { %v1112_v17 = vadd.f32 %v1109_v29, %v1096_v15  ;;  %v1173_v47 = vsel %vm7009_vm15, %v1170_v25, %v4772_v3  ;;  %v1237_v25 = vmul.f32 7.561995e-05, %v4537_v42  ;;  %vm7064_vm15 = vcmask 949248  }
 0x32a   :  { %v1128_v36 = vadd.f32 %v1125_v9, %v1112_v17 }
 0x32b   :  { %1506 = vrot.lane.b32.xlu0 %v4625_v0, %s3311_s5 }
 0x32c   :  { %1433 = vrot.lane.b32.xlu2 %v1409_v60, %s3308_s29  ;;  %v1144_v12 = vadd.f32 %v1141_v4, %v1128_v36  ;;  %v7016_v4 = vld [vmem:[#allocation33_spill] sm:$0xff] }
 0x32d   :  { %1426 = vrot.lane.b32.xlu1 %v1421_v50, %s3306_s27  ;;  %v4860_v60 = vpop.permute.xlu0 %1295 }
 0x32e   :  { %v4851_v44 = vpop.permute.xlu2 %1232  ;;  %v1160_v8 = vadd.f32 %v1157_v13, %v1144_v12 }
 0x32f   :  { %v4853_v5 = vpop.permute.xlu1 %1180 }
 0x330   :  { %v1176_v41 = vadd.f32 %v1173_v47, %v1160_v8 }
 0x333   :  { %1520 = vrot.lane.b32.xlu0 %v4710_v45, %s3312_s6 }
 0x334   :  { %1442 = vrot.lane.b32.xlu2 %v1421_v50, %s3307_s28 }
 0x335   :  { %1440 = vrot.lane.b32.xlu1 %v4724_v24, %s3307_s28  ;;  %v4879_v50 = vpop.permute.xlu0 %1317  ;;  %v1189_v24 = vsel %vm394_vm12, %v1186_v59, %v4750_v46 }
 0x336   :  { %v4871_v57 = vpop.permute.xlu2 %1256  ;;  %v1192_v34 = vadd.f32 %v1189_v24, %v1176_v41 }
 0x337   :  { %v4873_v0 = vpop.permute.xlu1 %1194 }
 0x33b   :  { %1531 = vrot.lane.b32.xlu0 %v4670_v27, %s3314_s8 }
 0x33c   :  { %1456 = vrot.lane.b32.xlu2 %v1396_v53, %s3308_s29 }
 0x33d   :  { %1451 = vrot.lane.b32.xlu1 %v1386_v30, %s3309_s30  ;;  %v4897_v53 = vpop.permute.xlu0 %1330 }
 0x33e   :  { %v4885_v33 = vpop.permute.xlu2 %1271 }
 0x33f   :  { %v4887_v29 = vpop.permute.xlu1 %1205 }
 0x340   :  { %v1207_v45 = vsel %vm411_vm11, %v4766_v61, %v4887_v29 }
 0x341   :  { %v1210_v15 = vadd.f32 %v1207_v45, %v1192_v34  ;;  %v7023_v34 = vld [vmem:[#allocation40_spill] sm:$0xff] }
 0x343   :  { %v4895_v59 = vadd.f32 %v1237_v25, %v1210_v15  ;;  %1545 = vrot.lane.b32.xlu0 %v4542_v32, %s3315_s9 }
 0x344   :  { %1467 = vrot.lane.b32.xlu2 %v4667_v52, %s3310_s4 }
 0x345   :  { %1465 = vrot.lane.b32.xlu1 %v4760_v49, %s3310_s4  ;;  %v4913_v61 = vpop.permute.xlu0 %1352 }
 0x346   :  { %v4903_v30 = vpop.permute.xlu2 %1293  ;;  %7010 = vst [vmem:[#allocation51_spill] sm:$0xff] %v4913_v61 }
 0x347   :  { %v4905_v9 = vpop.permute.xlu1 %1230 }
 0x34b   :  { %1554 = vrot.lane.b32.xlu0 %v4559_v39, %s3314_s8 }
 0x34c   :  { %1481 = vrot.lane.b32.xlu2 %v4747_v40, %s3311_s5 }
 0x34d   :  { %1474 = vrot.lane.b32.xlu1 %v4780_v63, %s3309_s30  ;;  %v4929_v49 = vpop.permute.xlu0 %1367 }
 0x34e   :  { %v4915_v27 = vpop.permute.xlu2 %1306 }
 0x34f   :  { %v4917_v52 = vpop.permute.xlu1 %1247 }
 0x353   :  { %1570 = vrot.lane.b32.xlu0 %v1237_v25, %s3315_s9  ;;  %v7024_v25 = vld [vmem:[#allocation41_spill] sm:$0xff] }
 0x354   :  { %1490 = vrot.lane.b32.xlu2 %v4763_v51, %s3310_s4 }
 0x355   :  { %1488 = vrot.lane.b32.xlu1 %v4646_v62, %s3310_s4  ;;  %v4940_v63 = vpop.permute.xlu0 %1389  ;;  %v1579_v62 = vmul.f32 0.00078125054, %v4554_v1 }
 0x356   :  { %v4925_v32 = vpop.permute.xlu2 %1328  ;;  %7012 = vst [vmem:[#allocation57_spill] sm:$0xff] %v4940_v63  ;;  %v7039_v63 = vld [vmem:[#allocation46_spill] sm:$0xff] }
 0x357   :  { %7011 = vst [vmem:[#allocation64_spill] sm:$0xff] %v4925_v32  ;;  %v4927_v40 = vpop.permute.xlu1 %1269 }
 0x35b   :  { %1584 = vrot.lane.b32.xlu0 %v1579_v62, %s3317_s11 }
 0x35c   :  { %1504 = vrot.lane.b32.xlu2 %v4727_v6, %s3311_s5 }
 0x35d   :  { %1499 = vrot.lane.b32.xlu1 %v4730_v28, %s3312_s6  ;;  %v4952_v28 = vpop.permute.xlu0 %1402 }
 0x35e   :  { %v4936_v39 = vpop.permute.xlu2 %1343  ;;  %7013 = vst [vmem:[#allocation60_spill] sm:$0xff] %v4952_v28  ;;  %v7037_v28 = vld [vmem:[#allocation19_spill] sm:$0xff] }
 0x35f   :  { %v4938_v51 = vpop.permute.xlu1 %1282 }
 0x364   :  { %1515 = vrot.lane.b32.xlu2 %v4589_v58, %s3313_s7 }
 0x365   :  { %1513 = vrot.lane.b32.xlu1 %v4689_v21, %s3313_s7  ;;  %v7015_v21 = vld [vmem:[#allocation39_spill] sm:$0xff]  ;;  %v4966_v13 = vpop.permute.xlu0 %1424 }
 0x366   :  { %v4947_v17 = vpop.permute.xlu2 %1365  ;;  %7017 = vst [vmem:[#allocation67_spill] sm:$0xff] %v4966_v13 }
 0x367   :  { %v4949_v6 = vpop.permute.xlu1 %1304 }
 0x36c   :  { %1529 = vrot.lane.b32.xlu2 %v4673_v43, %s3314_s8  ;;  %v7019_v43 = vld [vmem:[#allocation43_spill] sm:$0xff] }
 0x36d   :  { %1522 = vrot.lane.b32.xlu1 %v4707_v2, %s3312_s6  ;;  %v7020_v2 = vld [vmem:[#allocation47_spill] sm:$0xff]  ;;  %v4980_v24 = vpop.permute.xlu0 %1435 }
 0x36e   :  { %v4958_v58 = vpop.permute.xlu2 %1378  ;;  %7022 = vst [vmem:[#allocation68_spill] sm:$0xff] %v4980_v24 }
 0x36f   :  { %7014 = vst [vmem:[#allocation63_spill] sm:$0xff] %v4958_v58  ;;  %v4960_v36 = vpop.permute.xlu1 %1319 }
 0x374   :  { %1538 = vrot.lane.b32.xlu2 %v7015_v21, %s3313_s7  ;;  %v4993_v21 = vmul.f32 0.00078125054, %v4537_v42 }
 0x375   :  { %1536 = vrot.lane.b32.xlu1 %v7016_v4, %s3313_s7  ;;  %v4990_v62 = vpop.permute.xlu0 %1449  ;;  %v4996_v4 = vmul.f32 7.561995e-05, %v4554_v1 }
 0x376   :  { %v4968_v12 = vpop.permute.xlu2 %1400  ;;  %7027 = vst [vmem:[#allocation71_spill] sm:$0xff] %v4990_v62  ;;  %v7032_v62 = vld [vmem:[#allocation23_spill] sm:$0xff] }
 0x377   :  { %7018 = vst [vmem:[#allocation69_spill] sm:$0xff] %v4968_v12  ;;  %v4970_v47 = vpop.permute.xlu1 %1341  ;;  %v7033_v12 = vld [vmem:[#allocation18_spill] sm:$0xff] }
 0x378   :  { %v843_v42 = vsel %vm55_vm0, %v7033_v12, %v7032_v62 }
 0x37c   :  { %1552 = vrot.lane.b32.xlu2 %v7019_v43, %s3314_s8  ;;  %v7028_v43 = vld [vmem:[#allocation29_spill] sm:$0xff] }
 0x37d   :  { %1547 = vrot.lane.b32.xlu1 %v7020_v2, %s3315_s9  ;;  %v7029_v2 = vld [vmem:[#allocation22_spill] sm:$0xff] }
 0x37e   :  { %v4976_v8 = vpop.permute.xlu2 %1415  ;;  %v873_v13 = vadd.f32 %v7029_v2, %v7028_v43  ;;  %v5014_v2 = vpop.permute.xlu0 %1458 }
 0x37f   :  { %7021 = vst [vmem:[#allocation65_spill] sm:$0xff] %v4976_v8  ;;  %v4978_v41 = vpop.permute.xlu1 %1354  ;;  %v7038_v8 = vld [vmem:[#allocation21_spill] sm:$0xff] }
 0x380   :  { %7036 = vst [vmem:[#allocation73_spill] sm:$0xff] %v5014_v2  ;;  %v858_v61 = vsel %vm71_vm1, %v7038_v8, %v7037_v28  ;;  %v7044_v28 = vld [vmem:[#allocation15_spill] sm:$0xff]  ;;  %v7045_v8 = vld [vmem:[#allocation25_spill] sm:$0xff] }
 0x381   :  { %v930_v2 = vsel %vm146_vm4, %v7045_v8, %v7044_v28  ;;  %v7053_v8 = vld [vmem:[#allocation58_spill] sm:$0xff] }
 0x384   :  { %1563 = vrot.lane.b32.xlu2 %v7023_v34, %s3316_s10 }
 0x385   :  { %1561 = vrot.lane.b32.xlu1 %v7024_v25, %s3316_s10 }
 0x386   :  { %v4986_v45 = vpop.permute.xlu2 %1433 }
 0x387   :  { %7025 = vst [vmem:[#allocation77_spill] sm:$0xff] %v4986_v45  ;;  %v4988_v15 = vpop.permute.xlu1 %1376  ;;  %v7034_v45 = vld [vmem:[#allocation32_spill] sm:$0xff] }
 0x388   :  { %7026 = vst [vmem:[#allocation76_spill] sm:$0xff] %v4988_v15  ;;  %v897_v1 = vadd.f32 %v7034_v45, %v873_v13  ;;  %v7035_v15 = vld [vmem:[#allocation38_spill] sm:$0xff]  ;;  %v7043_v45 = vld [vmem:[#allocation28_spill] sm:$0xff] }
 0x389   :  { %v845_v43 = vadd.f32 %v843_v42, %v7035_v15 }
 0x38a   :  { %v921_v24 = vadd.f32 %v4525_v35, %v897_v1  ;;  %v7042_v35 = vld [vmem:[#allocation17_spill] sm:$0xff] }
 0x38b   :  { %v860_v12 = vadd.f32 %v858_v61, %v845_v43  ;;  %v906_v15 = vsel %vm121_vm3, %v7043_v45, %v7042_v35  ;;  %v7048_v61 = vld [vmem:[#allocation44_spill] sm:$0xff] }
 0x38c   :  { %1582 = vrot.lane.b32.xlu2 %v4993_v21, %s3317_s11  ;;  %v945_v58 = vadd.f32 %v4496_v54, %v921_v24  ;;  %v5035_v54 = vpop.permute.xlu0 %1472  ;;  %v7047_v24 = vld [vmem:[#allocation24_spill] sm:$0xff] }
 0x38d   :  { %1572 = vrot.lane.b32.xlu1 %v4996_v4, %s3315_s9  ;;  %7046 = vst [vmem:[#allocation70_spill] sm:$0xff] %v5035_v54 }
 0x38e   :  { %v5004_v34 = vpop.permute.xlu2 %1442  ;;  %v969_v42 = vadd.f32 %v4481_v16, %v945_v58  ;;  %v7050_v16 = vld [vmem:[#allocation26_spill] sm:$0xff] }
 0x38f   :  { %7030 = vst [vmem:[#allocation66_spill] sm:$0xff] %v5004_v34  ;;  %v5006_v25 = vpop.permute.xlu1 %1391  ;;  %v7040_v34 = vld [vmem:[#allocation14_spill] sm:$0xff] }
 0x390   :  { %7031 = vst [vmem:[#allocation72_spill] sm:$0xff] %v5006_v25  ;;  %v882_v25 = vsel %vm96_vm2, %v7040_v34, %v7039_v63  ;;  %v993_v63 = vadd.f32 %v4586_v22, %v969_v42  ;;  %v954_v34 = vsel %vm171_vm5, %v7048_v61, %v7047_v24  ;;  %v7051_v22 = vld [vmem:[#allocation27_spill] sm:$0xff]  ;;  %v7054_v24 = vld [vmem:[#allocation20_spill] sm:$0xff] }
 0x391   :  { %v884_v62 = vadd.f32 %v882_v25, %v860_v12  ;;  %v7049_v25 = vld [vmem:[#allocation30_spill] sm:$0xff] }
 0x392   :  { %v978_v58 = vsel %vm196_vm6, %v7050_v16, %v7049_v25  ;;  %v1017_v12 = vadd.f32 %v4552_v7, %v993_v63  ;;  %v7057_v63 = vld [vmem:[#allocation36_spill] sm:$0xff] }
 0x393   :  { %v908_v1 = vadd.f32 %v906_v15, %v884_v62  ;;  %v7052_v62 = vld [vmem:[#allocation31_spill] sm:$0xff] }
 0x394   :  { %v1002_v42 = vsel %vm221_vm7, %v7052_v62, %v7051_v22  ;;  %v1041_v28 = vadd.f32 %v4529_v26, %v1017_v12  ;;  %v5060_v7 = vpop.permute.xlu0 %1483  ;;  %v7059_v12 = vld [vmem:[#allocation42_spill] sm:$0xff]  ;;  %v7062_v62 = vld [vmem:[#allocation52_spill] sm:$0xff] }
 0x396   :  { %v5023_v32 = vpop.permute.xlu2 %1456 }
 0x397   :  { %7041 = vst [vmem:[#allocation78_spill] sm:$0xff] %v5023_v32  ;;  %v5025_v13 = vpop.permute.xlu1 %1413  ;;  %v932_v32 = vadd.f32 %v930_v2, %v908_v1  ;;  %v1026_v2 = vsel %vm7055_vm10, %v7054_v24, %v7053_v8  ;;  %v1065_v1 = vadd.f32 %v4664_v31, %v1041_v28  ;;  %vm7067_vm10 = vcmask 941056  }
 0x399   :  { %v956_v45 = vadd.f32 %v954_v34, %v932_v32  ;;  %v7056_v32 = vld [vmem:[#allocation56_spill] sm:$0xff]  ;;  %v1081_v26 = vadd.f32 %v4620_v55, %v1065_v1 }
 0x39a   :  { %v1050_v34 = vsel %vm7058_vm9, %v7057_v63, %v7056_v32  ;;  %v7065_v32 = vld [vmem:[#allocation49_spill] sm:$0xff]  ;;  %vm7070_vm9 = vcmask 932864  }
 0x39b   :  { %v980_v15 = vadd.f32 %v978_v58, %v956_v45  ;;  %v7060_v45 = vld [vmem:[#allocation37_spill] sm:$0xff]  ;;  %v1097_v31 = vadd.f32 %v4593_v11, %v1081_v26  ;;  %v7068_v11 = vld [vmem:[#allocation34_spill] sm:$0xff] }
 0x39c   :  { %v1070_v22 = vsel %vm7061_vm8, %v7060_v45, %v7059_v12  ;;  %v5081_v63 = vpop.permute.xlu0 %1497  ;;  %v7071_v12 = vld [vmem:[#allocation61_spill] sm:$0xff]  ;;  %v7072_v45 = vld [vmem:[#allocation54_spill] sm:$0xff]  ;;  %vm7074_vm8 = vcmask 916480  }
 0x39d   :  { %v1004_v54 = vadd.f32 %v1002_v42, %v980_v15  ;;  %v7063_v15 = vld [vmem:[#allocation35_spill] sm:$0xff] }
 0x39e   :  { %v5040_v43 = vpop.permute.xlu2 %1467  ;;  %v1086_v42 = vsel %vm7064_vm15, %v7063_v15, %v7062_v62  ;;  %vm7079_vm15 = vcmask 883712  }
 0x39f   :  { %v5042_v35 = vpop.permute.xlu1 %1426  ;;  %v1028_v16 = vadd.f32 %v1026_v2, %v1004_v54  ;;  %v7066_v54 = vld [vmem:[#allocation45_spill] sm:$0xff]  ;;  %v1113_v2 = vadd.f32 %v4742_v38, %v1097_v31  ;;  %v7073_v38 = vld [vmem:[#allocation55_spill] sm:$0xff] }
 0x3a0   :  { %v1102_v55 = vsel %vm7067_vm10, %v7066_v54, %v7065_v32  ;;  %v1150_v31 = vsel %vm7074_vm8, %v4796_v56, %v7073_v38  ;;  %vm7086_vm10 = vcmask 973824   ;;  %vm7094_vm8 = vcmask 957440  }
 0x3a1   :  { %v1052_v58 = vadd.f32 %v1050_v34, %v1028_v16  ;;  %v7069_v16 = vld [vmem:[#allocation50_spill] sm:$0xff] }
 0x3a2   :  { %v1118_v26 = vsel %vm7070_vm9, %v7069_v16, %v7068_v11  ;;  %vm7091_vm9 = vcmask 965632  }
 0x3a3   :  { %v1072_v28 = vadd.f32 %v1070_v22, %v1052_v58  ;;  %v1129_v58 = vadd.f32 %v4701_v37, %v1113_v2  ;;  %v1134_v22 = vsel %vm360_vm14, %v7072_v45, %v7071_v12  ;;  %v7075_v2 = vld [vmem:[#allocation53_spill] sm:$0xff] }
 0x3a4   :  { %v5099_v37 = vpop.permute.xlu0 %1506 }
 0x3a5   :  { %v1088_v1 = vadd.f32 %v1086_v42, %v1072_v28  ;;  %v1145_v32 = vadd.f32 %v4677_v20, %v1129_v58  ;;  %v7077_v20 = vld [vmem:[#allocation48_spill] sm:$0xff] }
 0x3a6   :  { %v5056_v61 = vpop.permute.xlu2 %1481  ;;  %v1182_v16 = vsel %vm411_vm11, %v7077_v20, %v4853_v5  ;;  %v1345_v20 = vsel %vm171_vm5, %v4970_v47, %v4936_v39  ;;  %v1369_v39 = vsel %vm196_vm6, %v4947_v17, %v4929_v49  ;;  %v7085_v17 = vld [vmem:[#allocation65_spill] sm:$0xff] }
 0x3a7   :  { %v5058_v25 = vpop.permute.xlu1 %1440  ;;  %v1104_v34 = vadd.f32 %v1102_v55, %v1088_v1  ;;  %v1161_v54 = vadd.f32 %v4816_v10, %v1145_v32  ;;  %v7076_v1 = vld [vmem:[#allocation59_spill] sm:$0xff]  ;;  %v1198_v10 = vsel %vm428_vm13, %v4873_v0, %v4814_v19 }
 0x3a9   :  { %v1120_v62 = vadd.f32 %v1118_v26, %v1104_v34  ;;  %v1166_v34 = vsel %vm394_vm12, %v7076_v1, %v7075_v2  ;;  %v1177_v11 = vadd.f32 %v4772_v3, %v1161_v54 }
 0x3ab   :  { %v1136_v42 = vadd.f32 %v1134_v22, %v1120_v62  ;;  %v1193_v12 = vadd.f32 %v4750_v46, %v1177_v11  ;;  %v7078_v62 = vld [vmem:[#allocation62_spill] sm:$0xff]  ;;  %v1234_v46 = vsel %vm55_vm0, %v4905_v9, %v4851_v44 }
 0x3ac   :  { %v1219_v3 = vsel %vm7079_vm15, %v4833_v48, %v7078_v62  ;;  %v5120_v5 = vpop.permute.xlu0 %1520  ;;  %v1249_v48 = vsel %vm71_vm1, %v4804_v14, %v4917_v52  ;;  %v1297_v14 = vsel %vm121_vm3, %v4903_v30, %v4860_v60  ;;  %v1284_v60 = vsel %vm71_vm1, %v4841_v23, %v4938_v51  ;;  %v7082_v62 = vld [vmem:[#allocation72_spill] sm:$0xff] }
 0x3ad   :  { %v1152_v55 = vadd.f32 %v1150_v31, %v1136_v42  ;;  %v1211_v32 = vadd.f32 %v4887_v29, %v1193_v12  ;;  %v7081_v12 = vld [vmem:[#allocation63_spill] sm:$0xff]  ;;  %vm7097_vm15 = vcmask 949248  }
 0x3ae   :  { %v5075_v24 = vpop.permute.xlu2 %1490 }
 0x3af   :  { %v5073_v8 = vpop.permute.xlu1 %1451  ;;  %v1168_v26 = vadd.f32 %v1166_v34, %v1152_v55  ;;  %v1240_v42 = vadd.f32 %v4996_v4, %v1211_v32  ;;  %v1273_v55 = vsel %vm96_vm2, %v4927_v40, %v4885_v33  ;;  %v1260_v33 = vsel %vm55_vm0, %v4871_v57, %v4823_v18 }
 0x3b0   :  { %v1321_v40 = vsel %vm146_vm4, %v4879_v50, %v4960_v36  ;;  %v1308_v50 = vsel %vm96_vm2, %v4949_v6, %v4915_v27  ;;  %v5186_v6 = vld [vmem:[#allocation2 + $0x18] sm:$0xff] }
 0x3b1   :  { %v1184_v58 = vadd.f32 %v1182_v16, %v1168_v26  ;;  %v1264_v0 = vadd.f32 %v4823_v18, %v1240_v42  ;;  %v1263_v18 = vadd.f32 %v1260_v33, %v4895_v59  ;;  %v7080_v59 = vld [vmem:[#allocation64_spill] sm:$0xff]  ;;  %v7084_v42 = vld [vmem:[#allocation51_spill] sm:$0xff] }
 0x3b2   :  { %v1356_v49 = vsel %vm146_vm4, %v7084_v42, %v4978_v41  ;;  %v5235_v42 = vmul.f32 -0.0043502236, %v5186_v6 }
 0x3b3   :  { %v1200_v45 = vadd.f32 %v1198_v10, %v1184_v58  ;;  %v1288_v4 = vadd.f32 %v4938_v51, %v1264_v0  ;;  %v1287_v10 = vadd.f32 %v1284_v60, %v1263_v18  ;;  %v1332_v58 = vsel %vm121_vm3, %v7080_v59, %v4897_v53  ;;  %v7093_v18 = vld [vmem:[#allocation71_spill] sm:$0xff] }
 0x3b4   :  { %v5141_v44 = vpop.permute.xlu0 %1531 }
 0x3b5   :  { %v1221_v38 = vadd.f32 %v1219_v3, %v1200_v45  ;;  %v1312_v52 = vadd.f32 %v4915_v27, %v1288_v4  ;;  %v1311_v47 = vadd.f32 %v1308_v50, %v1287_v10  ;;  %v7083_v3 = vld [vmem:[#allocation57_spill] sm:$0xff] }
 0x3b6   :  { %v5096_v28 = vpop.permute.xlu2 %1504  ;;  %v1393_v27 = vsel %vm221_vm7, %v7083_v3, %v7082_v62  ;;  %v7098_v3 = vld [vmem:[#allocation73_spill] sm:$0xff] }
 0x3b7   :  { %v5090_v15 = vpop.permute.xlu1 %1465  ;;  %v1224_v19 = vadd.f32 %v4993_v21, %v1221_v38  ;;  %v5143_v21 = vld [vmem:[#allocation2 + $0x10] sm:$0xff]  ;;  %v1336_v30 = vadd.f32 %v4897_v53, %v1312_v52  ;;  %v5189_v38 = vmul.f32 0.0020903896, %v5186_v6  ;;  %v1417_v53 = vsel %vm7086_vm10, %v5025_v13, %v7085_v17  ;;  %v7090_v52 = vld [vmem:[#allocation77_spill] sm:$0xff] }
 0x3b8   :  { %v5150_v34 = vmul.f32 -0.0010917237, %v5143_v21  ;;  %v5210_v60 = vmul.f32 -0.0034025807, %v5143_v21 }
 0x3b9   :  { %v1236_v29 = vadd.f32 %v1234_v46, %v1224_v19  ;;  %v1360_v36 = vadd.f32 %v4978_v41, %v1336_v30  ;;  %v1335_v46 = vadd.f32 %v1332_v58, %v1311_v47  ;;  %v7089_v41 = vld [vmem:[#allocation68_spill] sm:$0xff]  ;;  %v7092_v30 = vld [vmem:[#allocation69_spill] sm:$0xff]  ;;  %v1469_v47 = vsel %vm7097_vm15, %v5090_v15, %v5040_v43 }
 0x3ba   :  { %1607 = vrot.lane.b32.xlu0 %v5150_v34, %s3300_s1  ;;  %v1437_v13 = vsel %vm7091_vm9, %v7090_v52, %v7089_v41  ;;  %vm7099_vm9 = vcmask 941056   ;;  %vm7102_vm15 = vcmask 932864  }
 0x3bb   :  { %v1251_v2 = vadd.f32 %v1249_v48, %v1236_v29  ;;  %v1384_v45 = vadd.f32 %v7081_v12, %v1360_v36  ;;  %v7087_v48 = vld [vmem:[#allocation60_spill] sm:$0xff]  ;;  %v7095_v36 = vld [vmem:[#allocation67_spill] sm:$0xff] }
 0x3bc   :  { %v5174_v51 = vpop.permute.xlu0 %1545  ;;  %v1428_v10 = vsel %vm221_vm7, %v7095_v36, %v5042_v35 }
 0x3bd   :  { %v1275_v9 = vadd.f32 %v1273_v55, %v1251_v2  ;;  %v1408_v29 = vadd.f32 %v7087_v48, %v1384_v45  ;;  %v7088_v55 = vld [vmem:[#allocation76_spill] sm:$0xff]  ;;  %v1359_v2 = vadd.f32 %v1356_v49, %v1335_v46  ;;  %v7100_v49 = vld [vmem:[#allocation78_spill] sm:$0xff] }
 0x3be   :  { %v5114_v22 = vpop.permute.xlu2 %1515  ;;  %v1380_v4 = vsel %vm171_vm5, %v7088_v55, %v7081_v12 }
 0x3bf   :  { %v5108_v56 = vpop.permute.xlu1 %1474  ;;  %v1299_v11 = vadd.f32 %v1297_v14, %v1275_v9  ;;  %v1432_v33 = vadd.f32 %v5042_v35, %v1408_v29 }
 0x3c1   :  { %v1323_v57 = vadd.f32 %v1321_v40, %v1299_v11  ;;  %v1383_v40 = vadd.f32 %v1380_v4, %v1359_v2 }
 0x3c2   :  { %1624 = vrot.lane.b32.xlu0 %v5189_v38, %s3299_s0 }
 0x3c3   :  { %v1347_v23 = vadd.f32 %v1345_v20, %v1323_v57  ;;  %v1404_v20 = vsel %vm196_vm6, %v7092_v30, %v7087_v48  ;;  %v1453_v57 = vsel %vm7094_vm8, %v7093_v18, %v5073_v8  ;;  %vm7101_vm8 = vcmask 965632  }
 0x3c4   :  { %v1555_v11 = vpop.permute.xlu0 %1554  ;;  %v1407_v59 = vadd.f32 %v1404_v20, %v1383_v40  ;;  %v1460_v17 = vsel %vm7101_vm8, %v7100_v49, %v7098_v3  ;;  %vm7106_vm8 = vcmask 916480   ;;  %v1690_v49 = vmul.f32 -0.006696033, %v5143_v21 }
 0x3c5   :  { %v1371_v32 = vadd.f32 %v1369_v39, %v1347_v23  ;;  %v7096_v23 = vld [vmem:[#allocation66_spill] sm:$0xff] }
 0x3c6   :  { %v5133_v54 = vpop.permute.xlu2 %1529  ;;  %v1448_v39 = vadd.f32 %v7096_v23, %v1432_v33  ;;  %v1444_v8 = vsel %vm7086_vm10, %v5058_v25, %v7096_v23  ;;  %v1431_v45 = vadd.f32 %v1428_v10, %v1407_v59  ;;  %vm7104_vm10 = vcmask 957440  }
 0x3c7   :  { %v5122_v31 = vpop.permute.xlu1 %1488  ;;  %v1395_v19 = vadd.f32 %v1393_v27, %v1371_v32  ;;  %v1485_v27 = vsel %vm7099_vm9, %v5056_v61, %v5060_v7  ;;  %vm7105_vm9 = vcmask 949248  }
 0x3c8   :  { %v1464_v35 = vadd.f32 %v7098_v3, %v1448_v39  ;;  %v1447_v32 = vadd.f32 %v1444_v8, %v1431_v45  ;;  %v5305_v8 = vmul.f32 0.0020408458, %v5186_v6  ;;  %v5308_v45 = vmul.f32 0.0020408458, %v5143_v21 }
 0x3c9   :  { %v1419_v9 = vadd.f32 %v1417_v53, %v1395_v19  ;;  %v7103_v19 = vld [vmem:[#allocation70_spill] sm:$0xff]  ;;  %v5318_v3 = vmul.f32 -0.0043502236, %v5143_v21 }
 0x3ca   :  { %1646 = vrot.lane.b32.xlu0 %v5210_v60, %s3301_s22  ;;  %v1480_v25 = vadd.f32 %v5108_v56, %v1464_v35  ;;  %v1476_v61 = vsel %vm7104_vm10, %v7103_v19, %v5108_v56  ;;  %v1463_v48 = vadd.f32 %v1460_v17, %v1447_v32  ;;  %v1533_v56 = vsel %vm7106_vm8, %v5133_v54, %v5141_v44 }
 0x3cb   :  { %v1439_v50 = vadd.f32 %v1437_v13, %v1419_v9  ;;  %vm7108_vm10 = vcmask 932864   ;;  %v5321_v35 = vmul.f32 -0.0034025807, %v5186_v6  ;;  %v5332_v32 = vmul.f32 0.0049722632, %v5186_v6 }
 0x3cc   :  { %v1571_v43 = vpop.permute.xlu0 %1570  ;;  %v1496_v4 = vadd.f32 %v5075_v24, %v1480_v25  ;;  %v5346_v17 = vmul.f32 0.0076396023, %v5186_v6  ;;  %v1798_v25 = vmul.f32 -0.027359758, %v5186_v6  ;;  %v1821_v19 = vmul.f32 0.52827346, %v5143_v21 }
 0x3cd   :  { %v1455_v58 = vadd.f32 %v1453_v57, %v1439_v50 }
 0x3ce   :  { %v5168_v26 = vpop.permute.xlu2 %1538 }
 0x3cf   :  { %v5139_v1 = vpop.permute.xlu1 %1499  ;;  %v1471_v62 = vadd.f32 %v1469_v47, %v1455_v58 }
 0x3d0   :  { %v1501_v53 = vsel %vm7102_vm15, %v5081_v63, %v5139_v1  ;;  %v1492_v63 = vsel %vm7105_vm9, %v5122_v31, %v5075_v24  ;;  %v1479_v1 = vadd.f32 %v1476_v61, %v1463_v48  ;;  %vm7107_vm15 = vcmask 941056   ;;  %vm7109_vm9 = vmmov %vm7106_vm8 }
 0x3d1   :  { %v1487_v46 = vadd.f32 %v1485_v27, %v1471_v62  ;;  %v1508_v41 = vsel %vm7107_vm15, %v5096_v28, %v5099_v37  ;;  %v1749_v62 = vmul.f32 -0.020910295, %v5143_v21  ;;  %v5329_v27 = vmul.f32 0.011293989, %v5186_v6 }
 0x3d2   :  { %1659 = vrot.lane.b32.xlu0 %v5235_v42, %s3299_s0  ;;  %v1495_v9 = vadd.f32 %v1492_v63, %v1479_v1  ;;  %v5363_v61 = vmul.f32 0.016368665, %v5143_v21  ;;  %v1787_v48 = vmul.f32 -0.012120546, %v5186_v6  ;;  %v1750_v63 = vmul.f32 -0.020910295, %v5186_v6 }
 0x3d3   :  { %v1503_v29 = vadd.f32 %v1501_v53, %v1487_v46  ;;  %v1702_v53 = vmul.f32 -0.011765804, %v5186_v6  ;;  %v5355_v46 = vmul.f32 -0.011765804, %v5143_v21  ;;  %vm7155_vm8 = vcmask 973824  }
 0x3d4   :  { %v1585_v31 = vpop.permute.xlu0 %1584  ;;  %v1511_v44 = vadd.f32 %v1508_v41, %v1495_v9  ;;  %vm7156_vm15 = vcmask 965632  }
 0x3d6   :  { %v5203_v14 = vpop.permute.xlu2 %1552 }
 0x3d7   :  { %v1514_v16 = vpop.permute.xlu1 %1513  ;;  %v1556_v36 = vsel %vm7109_vm9, %v5203_v14, %v1555_v11  ;;  %v5290_v14 = vmul.f32 0.0020903896, %v5143_v21  ;;  %vm7158_vm9 = vcmask 949248  }
 0x3d8   :  { %v1517_v7 = vsel %vm360_vm14, %v1514_v16, %v5114_v22  ;;  %v5259_v22 = vmul.f32 0.0076396023, %v5143_v21  ;;  %v1512_v16 = vadd.f32 %v5099_v37, %v1496_v4  ;;  %v1762_v4 = vmul.f32 0.011293989, %v5143_v21 }
 0x3d9   :  { %v1519_v2 = vadd.f32 %v1517_v7, %v1503_v29  ;;  %v1715_v7 = vmul.f32 0.008432437, %v5186_v6  ;;  %v1739_v29 = vmul.f32 -0.010018936, %v5186_v6 }
 0x3da   :  { %1681 = vrot.lane.b32.xlu0 %v5259_v22, %s3301_s22 }
 0x3db   :  { %v1535_v24 = vadd.f32 %v1533_v56, %v1519_v2  ;;  %v1774_v2 = vmul.f32 0.024767846, %v5186_v6  ;;  %v1773_v56 = vmul.f32 0.024767846, %v5143_v21 }
 0x3de   :  { %v1564_v15 = vpop.permute.xlu2 %1563 }
 0x3df   :  { %v1523_v0 = vpop.permute.xlu1 %1522 }
 0x3e0   :  { %v1524_v33 = vsel %vm7108_vm10, %v5120_v5, %v1523_v0  ;;  %v1528_v54 = vadd.f32 %v1523_v0, %v1512_v16  ;;  %v5277_v0 = vmul.f32 -0.006696033, %v5186_v6  ;;  %v1797_v16 = vmul.f32 -0.027359758, %v5143_v21 }
 0x3e1   :  { %vm7157_vm10 = vcmask 957440  }
 0x3e2   :  { %v1544_v57 = vadd.f32 %v5168_v26, %v1528_v54  ;;  %1696 = vrot.lane.b32.xlu0 %v5277_v0, %s3303_s24  ;;  %v1822_v54 = vmul.f32 0.52827346, %v5186_v6 }
 0x3e4   :  { %v1560_v10 = vadd.f32 %v1555_v11, %v1544_v57  ;;  %v5293_v11 = vmul.f32 -0.0010917237, %v5186_v6 }
 0x3e6   :  { %v1583_v13 = vpop.permute.xlu2 %1582 }
 0x3e7   :  { %v1537_v12 = vpop.permute.xlu1 %1536  ;;  %v1586_v37 = vsel %vm428_vm13, %v1583_v13, %v1585_v31  ;;  %v1810_v31 = vmul.f32 0.5124068, %v5143_v21 }
 0x3e8   :  { %v1540_v20 = vsel %vm360_vm14, %v1537_v12, %v5168_v26  ;;  %v5287_v26 = vmul.f32 0.008432437, %v5143_v21  ;;  %v5302_v12 = vmul.f32 0.016368665, %v5186_v6 }
 0x3ea   :  { %1718 = vrot.lane.b32.xlu0 %v5287_v26, %s3304_s25 }
 0x3ef   :  { %v1548_v55 = vpop.permute.xlu1 %1547 }
 0x3f0   :  { %v1549_v52 = vsel %vm394_vm12, %v5174_v51, %v1548_v55  ;;  %v1527_v51 = vadd.f32 %v1524_v33, %v1511_v44  ;;  %v1738_v55 = vmul.f32 -0.010018936, %v5143_v21 }
 0x3f1   :  { %v1551_v40 = vadd.f32 %v1549_v52, %v1535_v24  ;;  %v1811_v24 = vmul.f32 0.5124068, %v5186_v6 }
 0x3f2   :  { %v1543_v50 = vadd.f32 %v1540_v20, %v1527_v51  ;;  %1731 = vrot.lane.b32.xlu0 %v5302_v12, %s3303_s24 }
 0x3f4   :  { %v1559_v23 = vadd.f32 %v1556_v36, %v1543_v50 }
 0x3f7   :  { %v1562_v30 = vpop.permute.xlu1 %1561 }
 0x3f8   :  { %v1565_v28 = vsel %vm411_vm11, %v1562_v30, %v1564_v15  ;;  %v1786_v15 = vmul.f32 -0.012120546, %v5143_v21 }
 0x3f9   :  { %v1567_v18 = vadd.f32 %v1565_v28, %v1551_v40 }
 0x3fa   :  { %1753 = vrot.lane.b32.xlu0 %v1749_v62, %s3304_s25 }
 0x3fb   :  { %v1588_v5 = vadd.f32 %v1586_v37, %v1567_v18 }
 0x3fd   :  { %1589 = vst [vmem:[#allocation7 + $0x8] sm:$0xff] %v1588_v5 }
 0x3ff   :  { %v1573_v39 = vpop.permute.xlu1 %1572 }
 0x400   :  { %v1574_v47 = vsel %vm394_vm12, %v1571_v43, %v1573_v39  ;;  %v1578_v59 = vadd.f32 %v1573_v39, %v1560_v10  ;;  %v5335_v43 = vmul.f32 0.0049722632, %v5143_v21 }
 0x401   :  { %v1577_v58 = vadd.f32 %v1574_v47, %v1559_v23 }
 0x402   :  { %1594 = vrot.lane.b32.xlu2 %v1578_v59, %s3300_s1  ;;  %1768 = vrot.lane.b32.xlu0 %v5329_v27, %s3306_s27  ;;  %v5464_v59 = vmul.f32 -0.0006548817, %v5143_v21 }
 0x403   :  { %1592 = vrot.lane.b32.xlu1 %v1577_v58, %s3300_s1 }
 0x40a   :  { %1622 = vrot.lane.b32.xlu2 %v5290_v14, %s3299_s0  ;;  %1790 = vrot.lane.b32.xlu0 %v1786_v15, %s3307_s28 }
 0x40b   :  { %1609 = vrot.lane.b32.xlu1 %v5293_v11, %s3300_s1 }
 0x412   :  { %1635 = vrot.lane.b32.xlu2 %v5305_v8, %s3300_s1  ;;  %1803 = vrot.lane.b32.xlu0 %v1798_v25, %s3306_s27 }
 0x413   :  { %1633 = vrot.lane.b32.xlu1 %v5308_v45, %s3300_s1 }
 0x41a   :  { %1657 = vrot.lane.b32.xlu2 %v5318_v3, %s3299_s0  ;;  %1825 = vrot.lane.b32.xlu0 %v1821_v19, %s3307_s28 }
 0x41b   :  { %1648 = vrot.lane.b32.xlu1 %v5321_v35, %s3301_s22 }
 0x422   :  { %1672 = vrot.lane.b32.xlu2 %v5332_v32, %s3302_s23  ;;  %1836 = vrot.lane.b32.xlu0 %v1787_v48, %s3309_s30 }
 0x423   :  { %1670 = vrot.lane.b32.xlu1 %v5335_v43, %s3302_s23 }
 0x42a   :  { %1694 = vrot.lane.b32.xlu2 %v1690_v49, %s3303_s24  ;;  %1850 = vrot.lane.b32.xlu0 %v1762_v4, %s3310_s4 }
 0x42b   :  { %1683 = vrot.lane.b32.xlu1 %v5346_v17, %s3301_s22 }
 0x42c   :  { %v5379_v1 = vpop.permute.xlu0 %1607 }
 0x42d   :  { %7110 = vst [vmem:[#allocation75_spill] sm:$0xff] %v5379_v1 }
 0x432   :  { %1707 = vrot.lane.b32.xlu2 %v1702_v53, %s3302_s23  ;;  %1859 = vrot.lane.b32.xlu0 %v1774_v2, %s3309_s30 }
 0x433   :  { %1705 = vrot.lane.b32.xlu1 %v5355_v46, %s3302_s23 }
 0x434   :  { %v5386_v9 = vpop.permute.xlu0 %1624 }
 0x435   :  { %7111 = vst [vmem:[#allocation79_spill] sm:$0xff] %v5386_v9 }
 0x43a   :  { %1729 = vrot.lane.b32.xlu2 %v5363_v61, %s3303_s24  ;;  %1873 = vrot.lane.b32.xlu0 %v1749_v62, %s3310_s4 }
 0x43b   :  { %1720 = vrot.lane.b32.xlu1 %v1715_v7, %s3304_s25 }
 0x43c   :  { %v5392_v41 = vpop.permute.xlu0 %1646 }
 0x43d   :  { %7112 = vst [vmem:[#allocation74_spill] sm:$0xff] %v5392_v41 }
 0x442   :  { %1744 = vrot.lane.b32.xlu2 %v1739_v29, %s3305_s26  ;;  %1884 = vrot.lane.b32.xlu0 %v1715_v7, %s3312_s6 }
 0x443   :  { %1742 = vrot.lane.b32.xlu1 %v1738_v55, %s3305_s26 }
 0x444   :  { %v5399_v13 = vpop.permute.xlu0 %1659 }
 0x445   :  { %7113 = vst [vmem:[#allocation81_spill] sm:$0xff] %v5399_v13 }
 0x44a   :  { %1766 = vrot.lane.b32.xlu2 %v1762_v4, %s3306_s27  ;;  %1898 = vrot.lane.b32.xlu0 %v1690_v49, %s3313_s7  ;;  %v5565_v4 = vmul.f32 -0.0006548817, %v5186_v6 }
 0x44b   :  { %1755 = vrot.lane.b32.xlu1 %v1750_v63, %s3304_s25 }
 0x44c   :  { %v5407_v44 = vpop.permute.xlu0 %1681  ;;  %7135 = vst [vmem:[#allocation17_spill] sm:$0xff] %v5565_v4 }
 0x452   :  { %1779 = vrot.lane.b32.xlu2 %v1774_v2, %s3305_s26  ;;  %1907 = vrot.lane.b32.xlu0 %v1702_v53, %s3312_s6 }
 0x453   :  { %1777 = vrot.lane.b32.xlu1 %v1773_v56, %s3305_s26 }
 0x454   :  { %v5414_v30 = vpop.permute.xlu0 %1696 }
 0x455   :  { %7116 = vst [vmem:[#allocation83_spill] sm:$0xff] %v5414_v30 }
 0x45a   :  { %1801 = vrot.lane.b32.xlu2 %v1797_v16, %s3306_s27  ;;  %1921 = vrot.lane.b32.xlu0 %v5259_v22, %s3313_s7 }
 0x45b   :  { %1792 = vrot.lane.b32.xlu1 %v1787_v48, %s3307_s28 }
 0x45c   :  { %v1595_v52 = vpop.permute.xlu2 %1594  ;;  %v5423_v51 = vpop.permute.xlu0 %1718 }
 0x45d   :  { %7117 = vst [vmem:[#allocation16_spill] sm:$0xff] %v5423_v51 }
 0x462   :  { %1816 = vrot.lane.b32.xlu2 %v1811_v24, %s3308_s29  ;;  %1932 = vrot.lane.b32.xlu0 %v5321_v35, %s3315_s9 }
 0x463   :  { %1814 = vrot.lane.b32.xlu1 %v1810_v31, %s3308_s29 }
 0x464   :  { %v5403_v33 = vpop.permute.xlu2 %1622  ;;  %v5434_v50 = vpop.permute.xlu0 %1731 }
 0x465   :  { %7114 = vst [vmem:[#allocation82_spill] sm:$0xff] %v5403_v33 }
 0x46a   :  { %1834 = vrot.lane.b32.xlu2 %v1786_v15, %s3309_s30  ;;  %1946 = vrot.lane.b32.xlu0 %v5290_v14, %s3316_s10 }
 0x46b   :  { %1827 = vrot.lane.b32.xlu1 %v1822_v54, %s3307_s28 }
 0x46c   :  { %v5411_v40 = vpop.permute.xlu2 %1635  ;;  %v5444_v36 = vpop.permute.xlu0 %1753 }
 0x46d   :  { %7115 = vst [vmem:[#allocation80_spill] sm:$0xff] %v5411_v40 }
 0x472   :  { %1843 = vrot.lane.b32.xlu2 %v1798_v25, %s3308_s29  ;;  %1955 = vrot.lane.b32.xlu0 %v5305_v8, %s3315_s9  ;;  %v1980_v8 = vmul.f32 0.00041447996, %v5186_v6 }
 0x473   :  { %1841 = vrot.lane.b32.xlu1 %v1797_v16, %s3308_s29 }
 0x474   :  { %v5418_v20 = vpop.permute.xlu2 %1657  ;;  %v5455_v39 = vpop.permute.xlu0 %1768 }
 0x475   :  { %v1593_v28 = vpop.permute.xlu1 %1592  ;;  %7122 = vst [vmem:[#allocation47_spill] sm:$0xff] %v5455_v39 }
 0x476   :  { %v1596_v37 = vsel %vm55_vm0, %v1593_v28, %v1595_v52 }
 0x477   :  { %1598 = vst [vmem:[#allocation8 + $0x8] sm:$0xff] %v1596_v37 }
 0x47a   :  { %1857 = vrot.lane.b32.xlu2 %v1773_v56, %s3309_s30  ;;  %1971 = vrot.lane.b32.xlu0 %v5464_v59, %s3316_s10 }
 0x47b   :  { %1852 = vrot.lane.b32.xlu1 %v5329_v27, %s3310_s4  ;;  %v5490_v27 = vld [vmem:[#allocation5 + $0x10] sm:$0xff] }
 0x47c   :  { %v5428_v18 = vpop.permute.xlu2 %1672  ;;  %v5495_v15 = vmul.f32 0.0040940573, %v5490_v27  ;;  %v5527_v19 = vmul.f32 0.0025966428, %v5490_v27  ;;  %v5584_v6 = vmul.f32 -0.0019867925, %v5490_v27 }
 0x47d   :  { %7118 = vst [vmem:[#allocation84_spill] sm:$0xff] %v5428_v18  ;;  %v5430_v57 = vpop.permute.xlu1 %1609  ;;  %v5599_v24 = vmul.f32 -0.026075976, %v5490_v27  ;;  %v5602_v31 = vmul.f32 -0.00074680534, %v5490_v27 }
 0x47e   :  { %7119 = vst [vmem:[#allocation39_spill] sm:$0xff] %v5430_v57  ;;  %v5680_v30 = vmul.f32 0.013649909, %v5490_v27  ;;  %v5700_v33 = vmul.f32 0.033074383, %v5490_v27 }
 0x47f   :  { %7130 = vst [vmem:[#allocation38_spill] sm:$0xff] %v5527_v19 }
 0x480   :  { %7138 = vst [vmem:[#allocation25_spill] sm:$0xff] %v5584_v6 }
 0x481   :  { %7141 = vst [vmem:[#allocation30_spill] sm:$0xff] %v5602_v31 }
 0x482   :  { %1868 = vrot.lane.b32.xlu2 %v1739_v29, %s3311_s5  ;;  %1985 = vrot.lane.b32.xlu0 %v1980_v8, %s3318_s12  ;;  %v5557_v29 = vmul.f32 -0.020694051, %v5490_v27 }
 0x483   :  { %1866 = vrot.lane.b32.xlu1 %v1738_v55, %s3311_s5  ;;  %v5562_v55 = vmul.f32 0.00041447996, %v5143_v21 }
 0x484   :  { %v5438_v22 = vpop.permute.xlu2 %1694 }
 0x485   :  { %7120 = vst [vmem:[#allocation33_spill] sm:$0xff] %v5438_v22  ;;  %v5440_v5 = vpop.permute.xlu1 %1633  ;;  %v5677_v22 = vmul.f32 0.31488052, %v5490_v27 }
 0x486   :  { %7134 = vst [vmem:[#allocation14_spill] sm:$0xff] %v5562_v55 }
 0x48a   :  { %1882 = vrot.lane.b32.xlu2 %v5287_v26, %s3312_s6  ;;  %v5470_v26 = vpop.permute.xlu0 %1790  ;;  %2013 = vrot.lane.b32.xlu0 %v5495_v15, %s3299_s0 }
 0x48b   :  { %1875 = vrot.lane.b32.xlu1 %v1750_v63, %s3310_s4  ;;  %7124 = vst [vmem:[#allocation41_spill] sm:$0xff] %v5470_v26 }
 0x48c   :  { %v5449_v10 = vpop.permute.xlu2 %1707 }
 0x48d   :  { %v5451_v23 = vpop.permute.xlu1 %1648 }
 0x48e   :  { %7121 = vst [vmem:[#allocation43_spill] sm:$0xff] %v5451_v23 }
 0x492   :  { %1891 = vrot.lane.b32.xlu2 %v5302_v12, %s3311_s5  ;;  %v5482_v62 = vpop.permute.xlu0 %1803 }
 0x493   :  { %1889 = vrot.lane.b32.xlu1 %v5363_v61, %s3311_s5 }
 0x494   :  { %v5461_v47 = vpop.permute.xlu2 %1729 }
 0x495   :  { %v5466_v58 = vpop.permute.xlu1 %1670 }
 0x496   :  { %7123 = vst [vmem:[#allocation40_spill] sm:$0xff] %v5466_v58 }
 0x49a   :  { %1905 = vrot.lane.b32.xlu2 %v5355_v46, %s3312_s6  ;;  %v5499_v49 = vpop.permute.xlu0 %1825 }
 0x49b   :  { %1900 = vrot.lane.b32.xlu1 %v5277_v0, %s3313_s7 }
 0x49c   :  { %v5476_v14 = vpop.permute.xlu2 %1744 }
 0x49d   :  { %7125 = vst [vmem:[#allocation29_spill] sm:$0xff] %v5476_v14  ;;  %v5478_v12 = vpop.permute.xlu1 %1683  ;;  %v5663_v14 = vmul.f32 -0.0064904117, %v5490_v27 }
 0x4a2   :  { %1916 = vrot.lane.b32.xlu2 %v5332_v32, %s3314_s8  ;;  %v5516_v46 = vpop.permute.xlu0 %1836 }
 0x4a3   :  { %1914 = vrot.lane.b32.xlu1 %v5335_v43, %s3314_s8  ;;  %v5507_v43 = vld [vmem:[#allocation5 + $0x18] sm:$0xff]  ;;  %7128 = vst [vmem:[#allocation18_spill] sm:$0xff] %v5516_v46 }
 0x4a4   :  { %v5488_v35 = vpop.permute.xlu2 %1766  ;;  %v5512_v53 = vmul.f32 -0.00074680534, %v5507_v43  ;;  %v5542_v7 = vmul.f32 0.012738791, %v5507_v43  ;;  %v5578_v2 = vmul.f32 0.013649909, %v5507_v43 }
 0x4a5   :  { %7126 = vst [vmem:[#allocation22_spill] sm:$0xff] %v5488_v35  ;;  %v5492_v0 = vpop.permute.xlu1 %1705  ;;  %v5581_v21 = vmul.f32 -0.0019867925, %v5507_v43  ;;  %v5605_v54 = vmul.f32 0.0040940573, %v5507_v43 }
 0x4a6   :  { %2026 = vrot.lane.b32.xlu0 %v5512_v53, %s3300_s1  ;;  %v5645_v26 = vmul.f32 0.0025966428, %v5507_v43  ;;  %v2165_v39 = vmul.f32 -0.096178465, %v5507_v43  ;;  %v5683_v58 = vmul.f32 -0.020694051, %v5507_v43 }
 0x4a7   :  { %7137 = vst [vmem:[#allocation15_spill] sm:$0xff] %v5581_v21  ;;  %v2178_v41 = vmul.f32 -0.3163002, %v5507_v43  ;;  %v2106_v23 = vmul.f32 0.033074383, %v5507_v43 }
 0x4a8   :  { %7142 = vst [vmem:[#allocation26_spill] sm:$0xff] %v5605_v54  ;;  %v5716_v1 = vmul.f32 -0.026075976, %v5507_v43 }
 0x4a9   :  { %7146 = vst [vmem:[#allocation20_spill] sm:$0xff] %v5645_v26 }
 0x4aa   :  { %1930 = vrot.lane.b32.xlu2 %v5210_v60, %s3315_s9  ;;  %v5531_v61 = vpop.permute.xlu0 %1850 }
 0x4ab   :  { %1923 = vrot.lane.b32.xlu1 %v5346_v17, %s3313_s7  ;;  %7131 = vst [vmem:[#allocation19_spill] sm:$0xff] %v5531_v61  ;;  %v5623_v61 = vmul.f32 -0.007496154, %v5507_v43 }
 0x4ac   :  { %v5505_v32 = vpop.permute.xlu2 %1779 }
 0x4ad   :  { %v5509_v25 = vpop.permute.xlu1 %1720 }
 0x4ae   :  { %7127 = vst [vmem:[#allocation23_spill] sm:$0xff] %v5509_v25  ;;  %2048 = vrot.lane.b32.xlu0 %v5527_v19, %s3299_s0  ;;  %v1661_v19 = vsel %vm71_vm1, %v5418_v20, %v5399_v13 }
 0x4b2   :  { %1939 = vrot.lane.b32.xlu2 %v5235_v42, %s3314_s8  ;;  %v5546_v48 = vpop.permute.xlu0 %1859 }
 0x4b3   :  { %1937 = vrot.lane.b32.xlu1 %v5318_v3, %s3314_s8 }
 0x4b4   :  { %v5522_v60 = vpop.permute.xlu2 %1801 }
 0x4b5   :  { %v5524_v17 = vpop.permute.xlu1 %1742 }
 0x4b6   :  { %7129 = vst [vmem:[#allocation32_spill] sm:$0xff] %v5524_v17  ;;  %2063 = vrot.lane.b32.xlu0 %v5542_v7, %s3302_s23  ;;  %v5660_v17 = vmul.f32 -0.0064904117, %v5507_v43 }
 0x4ba   :  { %1953 = vrot.lane.b32.xlu2 %v5308_v45, %s3315_s9 }
 0x4bb   :  { %1948 = vrot.lane.b32.xlu1 %v5189_v38, %s3316_s10 }
 0x4bc   :  { %v5537_v42 = vpop.permute.xlu2 %1816 }
 0x4bd   :  { %7132 = vst [vmem:[#allocation21_spill] sm:$0xff] %v5537_v42  ;;  %v5539_v3 = vpop.permute.xlu1 %1755  ;;  %v5642_v42 = vmul.f32 0.012738791, %v5490_v27 }
 0x4be   :  { %2085 = vrot.lane.b32.xlu0 %v5557_v29, %s3303_s24 }
 0x4c2   :  { %1964 = vrot.lane.b32.xlu2 %v5293_v11, %s3317_s11  ;;  %v5567_v11 = vpop.permute.xlu0 %1873 }
 0x4c3   :  { %1962 = vrot.lane.b32.xlu1 %v5150_v34, %s3317_s11 }
 0x4c4   :  { %v5552_v45 = vpop.permute.xlu2 %1834 }
 0x4c5   :  { %7133 = vst [vmem:[#allocation46_spill] sm:$0xff] %v5552_v45  ;;  %v5554_v38 = vpop.permute.xlu1 %1777  ;;  %v5626_v45 = vmul.f32 -0.007496154, %v5490_v27 }
 0x4c6   :  { %2098 = vrot.lane.b32.xlu0 %v5578_v2, %s3302_s23 }
 0x4ca   :  { %1983 = vrot.lane.b32.xlu2 %v5562_v55, %s3318_s12  ;;  %v5588_v56 = vpop.permute.xlu0 %1884  ;;  %v5713_v55 = vmul.f32 -0.05423136, %v5490_v27 }
 0x4cb   :  { %1973 = vrot.lane.b32.xlu1 %v5565_v4, %s3316_s10  ;;  %7139 = vst [vmem:[#allocation24_spill] sm:$0xff] %v5588_v56  ;;  %v5620_v56 = vmul.f32 -0.05423136, %v5507_v43 }
 0x4cc   :  { %v5573_v34 = vpop.permute.xlu2 %1843 }
 0x4cd   :  { %v5575_v63 = vpop.permute.xlu1 %1792 }
 0x4ce   :  { %7136 = vst [vmem:[#allocation28_spill] sm:$0xff] %v5575_v63  ;;  %2120 = vrot.lane.b32.xlu0 %v5599_v24, %s3303_s24 }
 0x4d2   :  { %2000 = vrot.lane.b32.xlu2 %v5581_v21, %s3300_s1  ;;  %v5609_v28 = vpop.permute.xlu0 %1898  ;;  %v5733_v21 = vmul.f32 0.048260726, %v5507_v43 }
 0x4d3   :  { %1998 = vrot.lane.b32.xlu1 %v5584_v6, %s3300_s1  ;;  %7143 = vst [vmem:[#allocation27_spill] sm:$0xff] %v5609_v28  ;;  %v1637_v6 = vsel %vm55_vm0, %v5440_v5, %v5411_v40  ;;  %v1685_v5 = vsel %vm96_vm2, %v5407_v44, %v5478_v12  ;;  %v1733_v44 = vsel %vm146_vm4, %v5461_v47, %v5434_v50  ;;  %v2177_v47 = vmul.f32 -0.3163002, %v5490_v27 }
 0x4d4   :  { %v5594_v16 = vpop.permute.xlu2 %1857 }
 0x4d5   :  { %v5596_v52 = vpop.permute.xlu1 %1814 }
 0x4d6   :  { %7140 = vst [vmem:[#allocation44_spill] sm:$0xff] %v5596_v52  ;;  %2135 = vrot.lane.b32.xlu0 %v5620_v56, %s3305_s26  ;;  %v2153_v52 = vmul.f32 0.10020082, %v5490_v27 }
 0x4da   :  { %2024 = vrot.lane.b32.xlu2 %v5602_v31, %s3300_s1  ;;  %v5630_v28 = vpop.permute.xlu0 %1907 }
 0x4db   :  { %2015 = vrot.lane.b32.xlu1 %v5605_v54, %s3299_s0  ;;  %v1640_v54 = vadd.f32 %v1637_v6, %v5464_v59  ;;  %v1709_v59 = vsel %vm121_vm3, %v5492_v0, %v5449_v10  ;;  %v2164_v6 = vmul.f32 -0.096178465, %v5490_v27  ;;  %v1757_v0 = vsel %vm171_vm5, %v5444_v36, %v5539_v3 }
 0x4dc   :  { %v5615_v37 = vpop.permute.xlu2 %1868  ;;  %v1805_v36 = vsel %vm221_vm7, %v5522_v60, %v5482_v62 }
 0x4dd   :  { %7144 = vst [vmem:[#allocation31_spill] sm:$0xff] %v5615_v37  ;;  %v5617_v8 = vpop.permute.xlu1 %1827  ;;  %v1664_v40 = vadd.f32 %v1661_v19, %v1640_v54 }
 0x4de   :  { %2157 = vrot.lane.b32.xlu0 %v2153_v52, %s3306_s27 }
 0x4df   :  { %v1688_v20 = vadd.f32 %v1685_v5, %v1664_v40 }
 0x4e1   :  { %v1712_v13 = vadd.f32 %v1709_v59, %v1688_v20 }
 0x4e2   :  { %2039 = vrot.lane.b32.xlu2 %v5623_v61, %s3301_s22  ;;  %v5648_v63 = vpop.permute.xlu0 %1921 }
 0x4e3   :  { %2037 = vrot.lane.b32.xlu1 %v5626_v45, %s3301_s22  ;;  %v1736_v19 = vadd.f32 %v1733_v44, %v1712_v13  ;;  %v1829_v13 = vsel %vm7155_vm8, %v5499_v49, %v5617_v8  ;;  %v1861_v49 = vsel %vm7157_vm10, %v5594_v16, %v5546_v48  ;;  %vm7159_vm8 = vcmask 941056  }
 0x4e4   :  { %v5636_v37 = vpop.permute.xlu2 %1882  ;;  %vm7161_vm10 = vcmask 916480  }
 0x4e5   :  { %7145 = vst [vmem:[#allocation58_spill] sm:$0xff] %v5636_v37  ;;  %v5638_v46 = vpop.permute.xlu1 %1841  ;;  %v1760_v5 = vadd.f32 %v1757_v0, %v1736_v19 }
 0x4e6   :  { %2170 = vrot.lane.b32.xlu0 %v2165_v39, %s3305_s26 }
 0x4ea   :  { %2061 = vrot.lane.b32.xlu2 %v5642_v42, %s3302_s23  ;;  %v5666_v51 = vpop.permute.xlu0 %1932 }
 0x4eb   :  { %2050 = vrot.lane.b32.xlu1 %v5645_v26, %s3299_s0  ;;  %7148 = vst [vmem:[#allocation36_spill] sm:$0xff] %v5666_v51 }
 0x4ec   :  { %v5654_v37 = vpop.permute.xlu2 %1891 }
 0x4ed   :  { %v5656_v35 = vpop.permute.xlu1 %1852 }
 0x4ee   :  { %7147 = vst [vmem:[#allocation56_spill] sm:$0xff] %v5656_v35  ;;  %2192 = vrot.lane.b32.xlu0 %v5677_v22, %s3306_s27 }
 0x4f2   :  { %2074 = vrot.lane.b32.xlu2 %v5660_v17, %s3301_s22  ;;  %v5687_v51 = vpop.permute.xlu0 %1946 }
 0x4f3   :  { %2072 = vrot.lane.b32.xlu1 %v5663_v14, %s3301_s22  ;;  %7150 = vst [vmem:[#allocation37_spill] sm:$0xff] %v5687_v51 }
 0x4f4   :  { %v5672_v25 = vpop.permute.xlu2 %1905 }
 0x4f5   :  { %v5674_v35 = vpop.permute.xlu1 %1866 }
 0x4f6   :  { %7149 = vst [vmem:[#allocation42_spill] sm:$0xff] %v5674_v35  ;;  %2203 = vrot.lane.b32.xlu0 %v2178_v41, %s3308_s29 }
 0x4fa   :  { %2096 = vrot.lane.b32.xlu2 %v5680_v30, %s3302_s23  ;;  %v5703_v51 = vpop.permute.xlu0 %1955 }
 0x4fb   :  { %2087 = vrot.lane.b32.xlu1 %v5683_v58, %s3303_s24 }
 0x4fc   :  { %v5693_v35 = vpop.permute.xlu2 %1916 }
 0x4fd   :  { %7151 = vst [vmem:[#allocation52_spill] sm:$0xff] %v5693_v35  ;;  %v5695_v18 = vpop.permute.xlu1 %1875 }
 0x4fe   :  { %2217 = vrot.lane.b32.xlu0 %v2153_v52, %s3309_s30  ;;  %v2140_v52 = vmul.f32 0.048260726, %v5490_v27 }
 0x502   :  { %2111 = vrot.lane.b32.xlu2 %v2106_v23, %s3304_s25  ;;  %v5719_v57 = vpop.permute.xlu0 %1971 }
 0x503   :  { %2109 = vrot.lane.b32.xlu1 %v5700_v33, %s3304_s25 }
 0x504   :  { %v5708_v9 = vpop.permute.xlu2 %1930 }
 0x505   :  { %7152 = vst [vmem:[#allocation35_spill] sm:$0xff] %v5708_v9  ;;  %v5710_v35 = vpop.permute.xlu1 %1889 }
 0x506   :  { %2226 = vrot.lane.b32.xlu0 %v2165_v39, %s3308_s29 }
 0x50a   :  { %2133 = vrot.lane.b32.xlu2 %v5713_v55, %s3305_s26  ;;  %v5738_v31 = vpop.permute.xlu0 %1985 }
 0x50b   :  { %2122 = vrot.lane.b32.xlu1 %v5716_v1, %s3303_s24  ;;  %7154 = vst [vmem:[#allocation45_spill] sm:$0xff] %v5738_v31  ;;  %v2154_v31 = vmul.f32 0.10020082, %v5507_v43 }
 0x50c   :  { %v5725_v4 = vpop.permute.xlu2 %1939 }
 0x50d   :  { %v5727_v9 = vpop.permute.xlu1 %1900 }
 0x50e   :  { %7153 = vst [vmem:[#allocation49_spill] sm:$0xff] %v5727_v9  ;;  %2240 = vrot.lane.b32.xlu0 %v2140_v52, %s3309_s30 }
 0x512   :  { %2146 = vrot.lane.b32.xlu2 %v5733_v21, %s3304_s25  ;;  %v5757_v26 = vpop.permute.xlu0 %2013 }
 0x513   :  { %2144 = vrot.lane.b32.xlu1 %v2140_v52, %s3304_s25  ;;  %v1781_v52 = vsel %vm196_vm6, %v5554_v38, %v5505_v32 }
 0x514   :  { %v1954_v9 = vpop.permute.xlu2 %1953  ;;  %v1784_v59 = vadd.f32 %v1781_v52, %v1760_v5  ;;  %v2189_v52 = vmul.f32 0.31488052, %v5507_v43 }
 0x515   :  { %v5749_v39 = vpop.permute.xlu1 %1914 }
 0x516   :  { %2251 = vrot.lane.b32.xlu0 %v2106_v23, %s3311_s5  ;;  %v1808_v44 = vadd.f32 %v1805_v36, %v1784_v59  ;;  %v1845_v23 = vsel %vm7156_vm15, %v5638_v46, %v5573_v34  ;;  %v1877_v46 = vsel %vm7158_vm9, %v5567_v11, %v5695_v18  ;;  %vm7160_vm15 = vcmask 932864  }
 0x517   :  { %v1909_v11 = vsel %vm7160_vm15, %v5672_v25, %v5630_v28  ;;  %vm7207_vm9 = vcmask 973824   ;;  %vm7213_vm15 = vcmask 957440  }
 0x518   :  { %v1832_v19 = vadd.f32 %v1829_v13, %v1808_v44 }
 0x51a   :  { %2168 = vrot.lane.b32.xlu2 %v2164_v6, %s3305_s26  ;;  %v5776_v20 = vpop.permute.xlu0 %2026 }
 0x51b   :  { %2159 = vrot.lane.b32.xlu1 %v2154_v31, %s3306_s27 }
 0x51c   :  { %v5767_v40 = vpop.permute.xlu2 %1964 }
 0x51d   :  { %v5769_v54 = vpop.permute.xlu1 %1923 }
 0x51e   :  { %2265 = vrot.lane.b32.xlu0 %v5557_v29, %s3312_s6  ;;  %v1893_v29 = vsel %vm7159_vm8, %v5710_v35, %v5654_v37  ;;  %v1925_v35 = vsel %vm360_vm14, %v5648_v63, %v5769_v54  ;;  %vm7210_vm8 = vcmask 965632  }
 0x522   :  { %2183 = vrot.lane.b32.xlu2 %v2178_v41, %s3307_s28  ;;  %v1848_v41 = vadd.f32 %v1845_v23, %v1832_v19  ;;  %v5794_v60 = vpop.permute.xlu0 %2048 }
 0x523   :  { %2181 = vrot.lane.b32.xlu1 %v2177_v47, %s3307_s28 }
 0x524   :  { %v5786_v38 = vpop.permute.xlu2 %1983  ;;  %v1864_v59 = vadd.f32 %v1861_v49, %v1848_v41 }
 0x525   :  { %v1938_v0 = vpop.permute.xlu1 %1937 }
 0x526   :  { %v1880_v13 = vadd.f32 %v1877_v46, %v1864_v59  ;;  %2274 = vrot.lane.b32.xlu0 %v5578_v2, %s3311_s5  ;;  %v1941_v19 = vsel %vm7161_vm10, %v1938_v0, %v5725_v4  ;;  %v2005_v0 = vmul.f32 7.561995e-05, %v5490_v27  ;;  %vm7216_vm10 = vcmask 949248  }
 0x528   :  { %v1896_v16 = vadd.f32 %v1893_v29, %v1880_v13 }
 0x52a   :  { %2201 = vrot.lane.b32.xlu2 %v2177_v47, %s3308_s29  ;;  %v5813_v47 = vpop.permute.xlu0 %2063  ;;  %v1912_v23 = vadd.f32 %v1909_v11, %v1896_v16  ;;  %v7168_v11 = vld [vmem:[#allocation38_spill] sm:$0xff] }
 0x52b   :  { %2194 = vrot.lane.b32.xlu1 %v2189_v52, %s3306_s27 }
 0x52c   :  { %v5804_v5 = vpop.permute.xlu2 %2000  ;;  %v1928_v41 = vadd.f32 %v1925_v35, %v1912_v23 }
 0x52d   :  { %v5806_v36 = vpop.permute.xlu1 %1948 }
 0x52e   :  { %2288 = vrot.lane.b32.xlu0 %v5663_v14, %s3312_s6  ;;  %v1944_v25 = vadd.f32 %v1941_v19, %v1928_v41 }
 0x532   :  { %2210 = vrot.lane.b32.xlu2 %v2189_v52, %s3307_s28  ;;  %v5832_v52 = vpop.permute.xlu0 %2085 }
 0x533   :  { %2208 = vrot.lane.b32.xlu1 %v5677_v22, %s3307_s28  ;;  %v1957_v22 = vsel %vm394_vm12, %v1954_v9, %v5703_v51 }
 0x534   :  { %v5824_v44 = vpop.permute.xlu2 %2024  ;;  %v1960_v49 = vadd.f32 %v1957_v22, %v1944_v25 }
 0x535   :  { %v5826_v2 = vpop.permute.xlu1 %1962 }
 0x536   :  { %2299 = vrot.lane.b32.xlu0 %v5623_v61, %s3314_s8 }
 0x53a   :  { %2224 = vrot.lane.b32.xlu2 %v2164_v6, %s3308_s29  ;;  %v5850_v6 = vpop.permute.xlu0 %2098 }
 0x53b   :  { %2219 = vrot.lane.b32.xlu1 %v2154_v31, %s3309_s30 }
 0x53c   :  { %v5838_v63 = vpop.permute.xlu2 %2039 }
 0x53d   :  { %v5840_v46 = vpop.permute.xlu1 %1973 }
 0x53e   :  { %v1975_v14 = vsel %vm411_vm11, %v5719_v57, %v5840_v46  ;;  %2313 = vrot.lane.b32.xlu0 %v5495_v15, %s3315_s9 }
 0x53f   :  { %v1978_v59 = vadd.f32 %v1975_v14, %v1960_v49  ;;  %v7175_v49 = vld [vmem:[#allocation15_spill] sm:$0xff] }
 0x541   :  { %v5848_v9 = vadd.f32 %v2005_v0, %v1978_v59 }
 0x542   :  { %2235 = vrot.lane.b32.xlu2 %v5620_v56, %s3310_s4  ;;  %v5866_v57 = vpop.permute.xlu0 %2120 }
 0x543   :  { %2233 = vrot.lane.b32.xlu1 %v5713_v55, %s3310_s4  ;;  %7162 = vst [vmem:[#allocation34_spill] sm:$0xff] %v5866_v57 }
 0x544   :  { %v5856_v31 = vpop.permute.xlu2 %2061 }
 0x545   :  { %v5858_v29 = vpop.permute.xlu1 %1998 }
 0x546   :  { %2322 = vrot.lane.b32.xlu0 %v5512_v53, %s3314_s8 }
 0x54a   :  { %2249 = vrot.lane.b32.xlu2 %v5700_v33, %s3311_s5  ;;  %v5882_v55 = vpop.permute.xlu0 %2135 }
 0x54b   :  { %2242 = vrot.lane.b32.xlu1 %v5733_v21, %s3309_s30 }
 0x54c   :  { %v5868_v61 = vpop.permute.xlu2 %2074 }
 0x54d   :  { %v5870_v56 = vpop.permute.xlu1 %2015 }
 0x54e   :  { %2338 = vrot.lane.b32.xlu0 %v2005_v0, %s3315_s9  ;;  %v7176_v0 = vld [vmem:[#allocation25_spill] sm:$0xff] }
 0x552   :  { %2258 = vrot.lane.b32.xlu2 %v5716_v1, %s3310_s4  ;;  %v5893_v21 = vpop.permute.xlu0 %2157 }
 0x553   :  { %2256 = vrot.lane.b32.xlu1 %v5599_v24, %s3310_s4  ;;  %7164 = vst [vmem:[#allocation61_spill] sm:$0xff] %v5893_v21  ;;  %v2347_v24 = vmul.f32 0.00078125054, %v5507_v43  ;;  %v7191_v21 = vld [vmem:[#allocation43_spill] sm:$0xff] }
 0x554   :  { %v5878_v15 = vpop.permute.xlu2 %2096 }
 0x555   :  { %7163 = vst [vmem:[#allocation50_spill] sm:$0xff] %v5878_v15  ;;  %v5880_v33 = vpop.permute.xlu1 %2037 }
 0x556   :  { %2352 = vrot.lane.b32.xlu0 %v2347_v24, %s3317_s11 }
 0x55a   :  { %2272 = vrot.lane.b32.xlu2 %v5680_v30, %s3311_s5 }
 0x55b   :  { %2267 = vrot.lane.b32.xlu1 %v5683_v58, %s3312_s6  ;;  %v5905_v58 = vpop.permute.xlu0 %2170 }
 0x55c   :  { %v5889_v53 = vpop.permute.xlu2 %2111  ;;  %7165 = vst [vmem:[#allocation54_spill] sm:$0xff] %v5905_v58  ;;  %v7189_v58 = vld [vmem:[#allocation79_spill] sm:$0xff] }
 0x55d   :  { %v5891_v1 = vpop.permute.xlu1 %2050 }
 0x562   :  { %2283 = vrot.lane.b32.xlu2 %v5542_v7, %s3313_s7 }
 0x563   :  { %2281 = vrot.lane.b32.xlu1 %v5642_v42, %s3313_s7  ;;  %v7167_v42 = vld [vmem:[#allocation20_spill] sm:$0xff]  ;;  %v5919_v35 = vpop.permute.xlu0 %2192 }
 0x564   :  { %v5900_v13 = vpop.permute.xlu2 %2133  ;;  %7169 = vst [vmem:[#allocation53_spill] sm:$0xff] %v5919_v35 }
 0x565   :  { %v5902_v30 = vpop.permute.xlu1 %2072 }
 0x56a   :  { %2297 = vrot.lane.b32.xlu2 %v5626_v45, %s3314_s8  ;;  %v7171_v45 = vld [vmem:[#allocation30_spill] sm:$0xff] }
 0x56b   :  { %2290 = vrot.lane.b32.xlu1 %v5660_v17, %s3312_s6  ;;  %v7172_v17 = vld [vmem:[#allocation26_spill] sm:$0xff]  ;;  %v5933_v22 = vpop.permute.xlu0 %2203 }
 0x56c   :  { %v5911_v7 = vpop.permute.xlu2 %2146  ;;  %7174 = vst [vmem:[#allocation62_spill] sm:$0xff] %v5933_v22 }
 0x56d   :  { %7166 = vst [vmem:[#allocation55_spill] sm:$0xff] %v5911_v7  ;;  %v5913_v16 = vpop.permute.xlu1 %2087 }
 0x572   :  { %2306 = vrot.lane.b32.xlu2 %v7167_v42, %s3313_s7  ;;  %v5946_v42 = vmul.f32 0.00078125054, %v5490_v27 }
 0x573   :  { %2304 = vrot.lane.b32.xlu1 %v7168_v11, %s3313_s7  ;;  %v5943_v24 = vpop.permute.xlu0 %2217  ;;  %v5949_v11 = vmul.f32 7.561995e-05, %v5507_v43 }
 0x574   :  { %v5921_v23 = vpop.permute.xlu2 %2168  ;;  %7179 = vst [vmem:[#allocation72_spill] sm:$0xff] %v5943_v24  ;;  %v7184_v24 = vld [vmem:[#allocation39_spill] sm:$0xff] }
 0x575   :  { %7170 = vst [vmem:[#allocation59_spill] sm:$0xff] %v5921_v23  ;;  %v5923_v19 = vpop.permute.xlu1 %2109  ;;  %v7185_v23 = vld [vmem:[#allocation75_spill] sm:$0xff] }
 0x576   :  { %v1611_v27 = vsel %vm55_vm0, %v7185_v23, %v7184_v24 }
 0x57a   :  { %2320 = vrot.lane.b32.xlu2 %v7171_v45, %s3314_s8  ;;  %v7180_v45 = vld [vmem:[#allocation17_spill] sm:$0xff] }
 0x57b   :  { %2315 = vrot.lane.b32.xlu1 %v7172_v17, %s3315_s9  ;;  %v7181_v17 = vld [vmem:[#allocation80_spill] sm:$0xff] }
 0x57c   :  { %v5929_v41 = vpop.permute.xlu2 %2183  ;;  %v1641_v35 = vadd.f32 %v7181_v17, %v7180_v45  ;;  %v5967_v17 = vpop.permute.xlu0 %2226 }
 0x57d   :  { %7173 = vst [vmem:[#allocation48_spill] sm:$0xff] %v5929_v41  ;;  %v5931_v25 = vpop.permute.xlu1 %2122  ;;  %v7190_v41 = vld [vmem:[#allocation82_spill] sm:$0xff] }
 0x57e   :  { %7188 = vst [vmem:[#allocation65_spill] sm:$0xff] %v5967_v17  ;;  %v1626_v57 = vsel %vm71_vm1, %v7190_v41, %v7189_v58  ;;  %v7196_v58 = vld [vmem:[#allocation83_spill] sm:$0xff]  ;;  %v7197_v41 = vld [vmem:[#allocation33_spill] sm:$0xff] }
 0x57f   :  { %v1698_v17 = vsel %vm146_vm4, %v7197_v41, %v7196_v58  ;;  %v7205_v41 = vld [vmem:[#allocation28_spill] sm:$0xff] }
 0x582   :  { %2331 = vrot.lane.b32.xlu2 %v7175_v49, %s3316_s10 }
 0x583   :  { %2329 = vrot.lane.b32.xlu1 %v7176_v0, %s3316_s10 }
 0x584   :  { %v5939_v14 = vpop.permute.xlu2 %2201 }
 0x585   :  { %7177 = vst [vmem:[#allocation64_spill] sm:$0xff] %v5939_v14  ;;  %v5941_v59 = vpop.permute.xlu1 %2144  ;;  %v7186_v14 = vld [vmem:[#allocation81_spill] sm:$0xff] }
 0x586   :  { %7178 = vst [vmem:[#allocation63_spill] sm:$0xff] %v5941_v59  ;;  %v1665_v43 = vadd.f32 %v7186_v14, %v1641_v35  ;;  %v7187_v59 = vld [vmem:[#allocation14_spill] sm:$0xff]  ;;  %v7195_v14 = vld [vmem:[#allocation40_spill] sm:$0xff] }
 0x587   :  { %v1613_v45 = vadd.f32 %v1611_v27, %v7187_v59 }
 0x588   :  { %v1689_v22 = vadd.f32 %v5478_v12, %v1665_v43  ;;  %v7194_v12 = vld [vmem:[#allocation84_spill] sm:$0xff] }
 0x589   :  { %v1628_v23 = vadd.f32 %v1626_v57, %v1613_v45  ;;  %v1674_v59 = vsel %vm121_vm3, %v7195_v14, %v7194_v12  ;;  %v7200_v57 = vld [vmem:[#allocation16_spill] sm:$0xff] }
 0x58a   :  { %2350 = vrot.lane.b32.xlu2 %v5946_v42, %s3317_s11  ;;  %v1713_v7 = vadd.f32 %v5449_v10, %v1689_v22  ;;  %v5988_v10 = vpop.permute.xlu0 %2240  ;;  %v7199_v22 = vld [vmem:[#allocation23_spill] sm:$0xff] }
 0x58b   :  { %2340 = vrot.lane.b32.xlu1 %v5949_v11, %s3315_s9  ;;  %7198 = vst [vmem:[#allocation76_spill] sm:$0xff] %v5988_v10 }
 0x58c   :  { %v5957_v49 = vpop.permute.xlu2 %2210  ;;  %v1737_v27 = vadd.f32 %v5434_v50, %v1713_v7  ;;  %v7202_v50 = vld [vmem:[#allocation32_spill] sm:$0xff] }
 0x58d   :  { %7182 = vst [vmem:[#allocation57_spill] sm:$0xff] %v5957_v49  ;;  %v5959_v0 = vpop.permute.xlu1 %2159  ;;  %v7192_v49 = vld [vmem:[#allocation74_spill] sm:$0xff] }
 0x58e   :  { %7183 = vst [vmem:[#allocation51_spill] sm:$0xff] %v5959_v0  ;;  %v1650_v0 = vsel %vm96_vm2, %v7192_v49, %v7191_v21  ;;  %v1761_v21 = vadd.f32 %v5539_v3, %v1737_v27  ;;  %v1722_v49 = vsel %vm171_vm5, %v7200_v57, %v7199_v22  ;;  %v7203_v3 = vld [vmem:[#allocation47_spill] sm:$0xff]  ;;  %v7206_v22 = vld [vmem:[#allocation41_spill] sm:$0xff] }
 0x58f   :  { %v1652_v24 = vadd.f32 %v1650_v0, %v1628_v23  ;;  %v7201_v0 = vld [vmem:[#allocation29_spill] sm:$0xff] }
 0x590   :  { %v1746_v7 = vsel %vm196_vm6, %v7202_v50, %v7201_v0  ;;  %v1785_v23 = vadd.f32 %v5505_v32, %v1761_v21  ;;  %v7209_v21 = vld [vmem:[#allocation44_spill] sm:$0xff] }
 0x591   :  { %v1676_v43 = vadd.f32 %v1674_v59, %v1652_v24  ;;  %v7204_v24 = vld [vmem:[#allocation22_spill] sm:$0xff] }
 0x592   :  { %v1770_v27 = vsel %vm221_vm7, %v7204_v24, %v7203_v3  ;;  %v1809_v58 = vadd.f32 %v5482_v62, %v1785_v23  ;;  %v6013_v32 = vpop.permute.xlu0 %2251  ;;  %v7211_v23 = vld [vmem:[#allocation18_spill] sm:$0xff]  ;;  %v7214_v24 = vld [vmem:[#allocation56_spill] sm:$0xff] }
 0x594   :  { %v5976_v15 = vpop.permute.xlu2 %2224 }
 0x595   :  { %7193 = vst [vmem:[#allocation60_spill] sm:$0xff] %v5976_v15  ;;  %v5978_v35 = vpop.permute.xlu1 %2181  ;;  %v1700_v15 = vadd.f32 %v1698_v17, %v1676_v43  ;;  %v1794_v17 = vsel %vm7207_vm9, %v7206_v22, %v7205_v41  ;;  %v1833_v43 = vadd.f32 %v5617_v8, %v1809_v58  ;;  %vm7219_vm9 = vcmask 941056  }
 0x597   :  { %v1724_v14 = vadd.f32 %v1722_v49, %v1700_v15  ;;  %v7208_v15 = vld [vmem:[#allocation21_spill] sm:$0xff]  ;;  %v1849_v62 = vadd.f32 %v5573_v34, %v1833_v43 }
 0x598   :  { %v1818_v49 = vsel %vm7210_vm8, %v7209_v21, %v7208_v15  ;;  %v7217_v15 = vld [vmem:[#allocation31_spill] sm:$0xff]  ;;  %vm7222_vm8 = vcmask 932864  }
 0x599   :  { %v1748_v59 = vadd.f32 %v1746_v7, %v1724_v14  ;;  %v7212_v14 = vld [vmem:[#allocation46_spill] sm:$0xff]  ;;  %v1865_v8 = vadd.f32 %v5546_v48, %v1849_v62  ;;  %v7220_v48 = vld [vmem:[#allocation24_spill] sm:$0xff] }
 0x59a   :  { %v1838_v3 = vsel %vm7213_vm15, %v7212_v14, %v7211_v23  ;;  %v6034_v21 = vpop.permute.xlu0 %2265  ;;  %v7223_v23 = vld [vmem:[#allocation49_spill] sm:$0xff]  ;;  %v7224_v14 = vld [vmem:[#allocation27_spill] sm:$0xff]  ;;  %vm7226_vm15 = vcmask 916480  }
 0x59b   :  { %v1772_v10 = vadd.f32 %v1770_v27, %v1748_v59  ;;  %v7215_v59 = vld [vmem:[#allocation19_spill] sm:$0xff] }
 0x59c   :  { %v5993_v45 = vpop.permute.xlu2 %2235  ;;  %v1854_v27 = vsel %vm7216_vm10, %v7215_v59, %v7214_v24  ;;  %vm7231_vm10 = vcmask 883712  }
 0x59d   :  { %v5995_v12 = vpop.permute.xlu1 %2194  ;;  %v1796_v50 = vadd.f32 %v1794_v17, %v1772_v10  ;;  %v7218_v10 = vld [vmem:[#allocation42_spill] sm:$0xff]  ;;  %v1881_v17 = vadd.f32 %v5695_v18, %v1865_v8  ;;  %v7225_v18 = vld [vmem:[#allocation52_spill] sm:$0xff] }
 0x59e   :  { %v1870_v34 = vsel %vm7219_vm9, %v7218_v10, %v7217_v15  ;;  %v1918_v8 = vsel %vm7226_vm15, %v5749_v39, %v7225_v18  ;;  %vm7238_vm9 = vcmask 973824   ;;  %vm7246_vm15 = vcmask 957440  }
 0x59f   :  { %v1820_v7 = vadd.f32 %v1818_v49, %v1796_v50  ;;  %v7221_v50 = vld [vmem:[#allocation58_spill] sm:$0xff] }
 0x5a0   :  { %v1886_v62 = vsel %vm7222_vm8, %v7221_v50, %v7220_v48  ;;  %vm7243_vm8 = vcmask 965632  }
 0x5a1   :  { %v1840_v58 = vadd.f32 %v1838_v3, %v1820_v7  ;;  %v1897_v7 = vadd.f32 %v5654_v37, %v1881_v17  ;;  %v1902_v3 = vsel %vm360_vm14, %v7224_v14, %v7223_v23  ;;  %v7227_v17 = vld [vmem:[#allocation36_spill] sm:$0xff] }
 0x5a2   :  { %v6052_v37 = vpop.permute.xlu0 %2274 }
 0x5a3   :  { %v1856_v43 = vadd.f32 %v1854_v27, %v1840_v58  ;;  %v1913_v15 = vadd.f32 %v5630_v28, %v1897_v7  ;;  %v7229_v28 = vld [vmem:[#allocation37_spill] sm:$0xff] }
 0x5a4   :  { %v6009_v57 = vpop.permute.xlu2 %2249  ;;  %v1950_v50 = vsel %vm411_vm11, %v7229_v28, %v5806_v36  ;;  %v2052_v28 = vsel %vm71_vm1, %v5794_v60, %v5891_v1  ;;  %v2076_v60 = vsel %vm96_vm2, %v5902_v30, %v5868_v61  ;;  %v7234_v30 = vld [vmem:[#allocation51_spill] sm:$0xff] }
 0x5a5   :  { %v6011_v0 = vpop.permute.xlu1 %2208  ;;  %v1872_v49 = vadd.f32 %v1870_v34, %v1856_v43  ;;  %v1929_v10 = vadd.f32 %v5769_v54, %v1913_v15  ;;  %v7228_v43 = vld [vmem:[#allocation35_spill] sm:$0xff]  ;;  %v1966_v54 = vsel %vm428_vm13, %v5826_v2, %v5767_v40 }
 0x5a7   :  { %v1888_v24 = vadd.f32 %v1886_v62, %v1872_v49  ;;  %v1934_v49 = vsel %vm394_vm12, %v7228_v43, %v7227_v17  ;;  %v1945_v48 = vadd.f32 %v5725_v4, %v1929_v10  ;;  %v6092_v17 = vld [vmem:[#allocation2 + $0x18] sm:$0xff] }
 0x5a8   :  { %v6099_v43 = vmul.f32 -0.0010917237, %v6092_v17 }
 0x5a9   :  { %v1904_v27 = vadd.f32 %v1902_v3, %v1888_v24  ;;  %v1961_v23 = vadd.f32 %v5703_v51, %v1945_v48  ;;  %v7230_v24 = vld [vmem:[#allocation45_spill] sm:$0xff]  ;;  %v2002_v51 = vsel %vm55_vm0, %v5858_v29, %v5804_v5 }
 0x5aa   :  { %v1987_v4 = vsel %vm7231_vm10, %v5786_v38, %v7230_v24  ;;  %v6073_v36 = vpop.permute.xlu0 %2288  ;;  %v2017_v38 = vsel %vm71_vm1, %v5757_v26, %v5870_v56  ;;  %2375 = vrot.lane.b32.xlu0 %v6099_v43, %s3300_s1  ;;  %v7233_v24 = vld [vmem:[#allocation55_spill] sm:$0xff]  ;;  %vm7249_vm10 = vcmask 949248  }
 0x5ab   :  { %v1920_v34 = vadd.f32 %v1918_v8, %v1904_v27  ;;  %v1979_v15 = vadd.f32 %v5840_v46, %v1961_v23  ;;  %v7232_v23 = vld [vmem:[#allocation50_spill] sm:$0xff] }
 0x5ac   :  { %v6028_v22 = vpop.permute.xlu2 %2258 }
 0x5ad   :  { %v6026_v41 = vpop.permute.xlu1 %2219  ;;  %v1936_v62 = vadd.f32 %v1934_v49, %v1920_v34  ;;  %v2008_v27 = vadd.f32 %v5949_v11, %v1979_v15  ;;  %v2041_v34 = vsel %vm96_vm2, %v5880_v33, %v5838_v63  ;;  %v2065_v63 = vsel %vm121_vm3, %v5856_v31, %v5813_v47  ;;  %v6120_v31 = vld [vmem:[#allocation2 + $0x20] sm:$0xff] }
 0x5ae   :  { %v2028_v33 = vsel %vm55_vm0, %v5824_v44, %v5776_v20  ;;  %v2089_v49 = vsel %vm146_vm4, %v5832_v52, %v5913_v16  ;;  %v2113_v47 = vsel %vm171_vm5, %v5923_v19, %v5889_v53  ;;  %v6126_v52 = vmul.f32 0.0020903896, %v6120_v31 }
 0x5af   :  { %v1952_v7 = vadd.f32 %v1950_v50, %v1936_v62  ;;  %v2032_v2 = vadd.f32 %v5776_v20, %v2008_v27  ;;  %v2031_v62 = vadd.f32 %v2028_v33, %v5848_v9  ;;  %v2137_v9 = vsel %vm196_vm6, %v5900_v13, %v5882_v55  ;;  %v7236_v27 = vld [vmem:[#allocation34_spill] sm:$0xff] }
 0x5b1   :  { %v1968_v14 = vadd.f32 %v1966_v54, %v1952_v7  ;;  %v2056_v11 = vadd.f32 %v5891_v1, %v2032_v2  ;;  %v2055_v16 = vadd.f32 %v2052_v28, %v2031_v62  ;;  %v7245_v62 = vld [vmem:[#allocation72_spill] sm:$0xff] }
 0x5b2   :  { %2392 = vrot.lane.b32.xlu0 %v6126_v52, %s3299_s0 }
 0x5b3   :  { %v1989_v18 = vadd.f32 %v1987_v4, %v1968_v14  ;;  %v2080_v56 = vadd.f32 %v5868_v61, %v2056_v11  ;;  %v2079_v19 = vadd.f32 %v2076_v60, %v2055_v16  ;;  %v2100_v14 = vsel %vm121_vm3, %v7232_v23, %v5850_v6  ;;  %v7235_v4 = vld [vmem:[#allocation61_spill] sm:$0xff]  ;;  %v7240_v11 = vld [vmem:[#allocation63_spill] sm:$0xff] }
 0x5b4   :  { %v6049_v58 = vpop.permute.xlu2 %2272  ;;  %v2161_v15 = vsel %vm221_vm7, %v7235_v4, %v7234_v30  ;;  %v7247_v16 = vld [vmem:[#allocation53_spill] sm:$0xff] }
 0x5b5   :  { %v6043_v59 = vpop.permute.xlu1 %2233  ;;  %v1992_v40 = vadd.f32 %v5946_v42, %v1989_v18  ;;  %v6096_v42 = vpop.permute.xlu0 %2299  ;;  %v2104_v50 = vadd.f32 %v5850_v6, %v2080_v56  ;;  %v2103_v13 = vadd.f32 %v2100_v14, %v2079_v19  ;;  %v6153_v6 = vmul.f32 -0.0034025807, %v6092_v17 }
 0x5b6   :  { %v2237_v23 = vsel %vm7249_vm10, %v6043_v59, %v5993_v45  ;;  %vm7254_vm10 = vcmask 932864  }
 0x5b7   :  { %v2004_v46 = vadd.f32 %v2002_v51, %v1992_v40  ;;  %v2128_v1 = vadd.f32 %v5931_v25, %v2104_v50  ;;  %v2124_v51 = vsel %vm146_vm4, %v7236_v27, %v5931_v25  ;;  %v7237_v40 = vld [vmem:[#allocation48_spill] sm:$0xff]  ;;  %v7241_v25 = vld [vmem:[#allocation62_spill] sm:$0xff]  ;;  %v7244_v50 = vld [vmem:[#allocation59_spill] sm:$0xff] }
 0x5b8   :  { %v2185_v55 = vsel %vm7238_vm9, %v5978_v35, %v7237_v40  ;;  %v7242_v35 = vld [vmem:[#allocation64_spill] sm:$0xff] }
 0x5b9   :  { %v2019_v5 = vadd.f32 %v2017_v38, %v2004_v46  ;;  %v2152_v61 = vadd.f32 %v7233_v24, %v2128_v1  ;;  %v7239_v46 = vld [vmem:[#allocation54_spill] sm:$0xff]  ;;  %v2205_v33 = vsel %vm7243_vm8, %v7242_v35, %v7241_v25  ;;  %v6174_v1 = vmul.f32 -0.0043502236, %v6120_v31 }
 0x5ba   :  { %2414 = vrot.lane.b32.xlu0 %v6153_v6, %s3301_s22  ;;  %vm7251_vm8 = vcmask 941056  }
 0x5bb   :  { %v2043_v26 = vadd.f32 %v2041_v34, %v2019_v5  ;;  %v2176_v34 = vadd.f32 %v7239_v46, %v2152_v61  ;;  %v2148_v5 = vsel %vm171_vm5, %v7240_v11, %v7233_v24 }
 0x5bc   :  { %v6067_v3 = vpop.permute.xlu2 %2283 }
 0x5bd   :  { %v6061_v39 = vpop.permute.xlu1 %2242  ;;  %v2067_v48 = vadd.f32 %v2065_v63, %v2043_v26  ;;  %v6132_v53 = vpop.permute.xlu0 %2313  ;;  %v2127_v26 = vadd.f32 %v2124_v51, %v2103_v13  ;;  %v7252_v51 = vld [vmem:[#allocation60_spill] sm:$0xff] }
 0x5bf   :  { %v2091_v20 = vadd.f32 %v2089_v49, %v2067_v48  ;;  %v2200_v49 = vadd.f32 %v5995_v12, %v2176_v34  ;;  %v2151_v48 = vadd.f32 %v2148_v5, %v2127_v26 }
 0x5c1   :  { %v2115_v7 = vadd.f32 %v2113_v47, %v2091_v20  ;;  %v2172_v47 = vsel %vm196_vm6, %v7244_v50, %v7239_v46  ;;  %v2221_v20 = vsel %vm7246_vm15, %v7245_v62, %v6026_v41  ;;  %vm7253_vm15 = vcmask 965632   ;;  %v7255_v46 = vld [vmem:[#allocation76_spill] sm:$0xff] }
 0x5c2   :  { %v2175_v14 = vadd.f32 %v2172_v47, %v2151_v48  ;;  %2427 = vrot.lane.b32.xlu0 %v6174_v1, %s3299_s0 }
 0x5c3   :  { %v2139_v18 = vadd.f32 %v2137_v9, %v2115_v7  ;;  %v2196_v7 = vsel %vm221_vm7, %v7247_v16, %v5995_v12  ;;  %v7248_v9 = vld [vmem:[#allocation57_spill] sm:$0xff] }
 0x5c4   :  { %v6086_v10 = vpop.permute.xlu2 %2297  ;;  %v2216_v19 = vadd.f32 %v7248_v9, %v2200_v49  ;;  %v2212_v41 = vsel %vm7238_vm9, %v6011_v0, %v7248_v9  ;;  %v2199_v30 = vadd.f32 %v2196_v7, %v2175_v14  ;;  %vm7256_vm9 = vcmask 957440  }
 0x5c5   :  { %v6075_v8 = vpop.permute.xlu1 %2256  ;;  %v2163_v2 = vadd.f32 %v2161_v15, %v2139_v18  ;;  %v2323_v28 = vpop.permute.xlu0 %2322  ;;  %v7250_v15 = vld [vmem:[#allocation65_spill] sm:$0xff]  ;;  %v2253_v18 = vsel %vm7251_vm8, %v6009_v57, %v6013_v32  ;;  %v2244_v57 = vsel %vm7256_vm9, %v7255_v46, %v6061_v39  ;;  %vm7257_vm8 = vcmask 949248  }
 0x5c6   :  { %v2232_v12 = vadd.f32 %v7250_v15, %v2216_v19  ;;  %v2215_v27 = vadd.f32 %v2212_v41, %v2199_v30  ;;  %v2228_v40 = vsel %vm7253_vm15, %v7252_v51, %v7250_v15  ;;  %vm7258_vm15 = vcmask 916480  }
 0x5c7   :  { %v2187_v63 = vadd.f32 %v2185_v55, %v2163_v2  ;;  %v6200_v2 = vmul.f32 0.0076396023, %v6092_v17  ;;  %v6223_v49 = vmul.f32 -0.006696033, %v6120_v31  ;;  %vm7260_vm9 = vcmask 932864  }
 0x5c8   :  { %v2248_v0 = vadd.f32 %v6061_v39, %v2232_v12  ;;  %v2231_v34 = vadd.f32 %v2228_v40, %v2215_v27  ;;  %v2301_v39 = vsel %vm7258_vm15, %v6086_v10, %v6096_v42  ;;  %v6237_v7 = vmul.f32 0.008432437, %v6092_v17 }
 0x5c9   :  { %v2207_v60 = vadd.f32 %v2205_v33, %v2187_v63  ;;  %v2517_v41 = vmul.f32 -0.020910295, %v6092_v17  ;;  %v6261_v30 = vmul.f32 0.0020408458, %v6120_v31  ;;  %v6272_v15 = vmul.f32 0.011293989, %v6120_v31 }
 0x5ca   :  { %v2264_v26 = vadd.f32 %v6028_v22, %v2248_v0  ;;  %2449 = vrot.lane.b32.xlu0 %v6200_v2, %s3301_s22  ;;  %v6275_v12 = vmul.f32 -0.0043502236, %v6092_v17  ;;  %v2554_v27 = vmul.f32 -0.012120546, %v6092_v17  ;;  %v2566_v51 = vmul.f32 -0.027359758, %v6120_v31 }
 0x5cb   :  { %v2223_v24 = vadd.f32 %v2221_v20, %v2207_v60  ;;  %v2458_v40 = vmul.f32 -0.006696033, %v6092_v17  ;;  %v6301_v0 = vmul.f32 0.0076396023, %v6120_v31  ;;  %v6310_v46 = vmul.f32 -0.011765804, %v6092_v17 }
 0x5cc   :  { %v6123_v54 = vpop.permute.xlu2 %2306 }
 0x5cd   :  { %v6094_v29 = vpop.permute.xlu1 %2267  ;;  %v2239_v4 = vadd.f32 %v2237_v23, %v2223_v24  ;;  %v2339_v45 = vpop.permute.xlu0 %2338 }
 0x5ce   :  { %v2269_v55 = vsel %vm7254_vm10, %v6034_v21, %v6094_v29  ;;  %v2260_v21 = vsel %vm7257_vm8, %v6075_v8, %v6028_v22  ;;  %v2247_v29 = vadd.f32 %v2244_v57, %v2231_v34  ;;  %vm7259_vm10 = vcmask 941056   ;;  %vm7261_vm8 = vmmov %vm7258_vm15 }
 0x5cf   :  { %v2255_v13 = vadd.f32 %v2253_v18, %v2239_v4  ;;  %v6264_v4 = vmul.f32 0.0020408458, %v6092_v17  ;;  %v6278_v18 = vmul.f32 -0.0034025807, %v6120_v31  ;;  %v2555_v57 = vmul.f32 -0.012120546, %v6120_v31 }
 0x5d0   :  { %v2263_v25 = vadd.f32 %v2260_v21, %v2247_v29  ;;  %v2483_v34 = vmul.f32 0.008432437, %v6120_v31  ;;  %v6332_v29 = vmul.f32 -0.020910295, %v6120_v31  ;;  %vm7262_vm15 = vcmask 957440  }
 0x5d1   :  { %v2271_v11 = vadd.f32 %v2269_v55, %v2255_v13  ;;  %v2589_v55 = vmul.f32 0.52827346, %v6092_v17  ;;  %v2470_v13 = vmul.f32 -0.011765804, %v6120_v31 }
 0x5d2   :  { %2464 = vrot.lane.b32.xlu0 %v6223_v49, %s3303_s24 }
 0x5d4   :  { %v6159_v56 = vpop.permute.xlu2 %2320 }
 0x5d5   :  { %v2282_v44 = vpop.permute.xlu1 %2281  ;;  %v2353_v8 = vpop.permute.xlu0 %2352 }
 0x5d6   :  { %v2285_v32 = vsel %vm360_vm14, %v2282_v44, %v6067_v3  ;;  %v2280_v3 = vadd.f32 %v6052_v37, %v2264_v26  ;;  %v2276_v44 = vsel %vm7259_vm10, %v6049_v58, %v6052_v37  ;;  %v2530_v26 = vmul.f32 0.011293989, %v6092_v17 }
 0x5d7   :  { %v2287_v63 = vadd.f32 %v2285_v32, %v2271_v11  ;;  %v2279_v42 = vadd.f32 %v2276_v44, %v2263_v25  ;;  %v6318_v32 = vmul.f32 0.016368665, %v6092_v17  ;;  %v2507_v11 = vmul.f32 -0.010018936, %v6120_v31 }
 0x5d8   :  { %v2541_v25 = vmul.f32 0.024767846, %v6092_v17  ;;  %v2565_v44 = vmul.f32 -0.027359758, %v6092_v17  ;;  %vm7263_vm10 = vcmask 973824  }
 0x5d9   :  { %v2303_v22 = vadd.f32 %v2301_v39, %v2287_v63  ;;  %v2542_v63 = vmul.f32 0.024767846, %v6120_v31 }
 0x5da   :  { %2486 = vrot.lane.b32.xlu0 %v6237_v7, %s3304_s25 }
 0x5dc   :  { %v2332_v59 = vpop.permute.xlu2 %2331 }
 0x5dd   :  { %v2291_v38 = vpop.permute.xlu1 %2290 }
 0x5de   :  { %v2292_v48 = vsel %vm7260_vm9, %v6073_v36, %v2291_v38  ;;  %v2296_v10 = vadd.f32 %v2291_v38, %v2280_v3  ;;  %v2324_v38 = vsel %vm7261_vm8, %v6159_v56, %v2323_v28  ;;  %v6248_v56 = vmul.f32 0.0020903896, %v6092_v17  ;;  %vm7264_vm9 = vmmov %vm7262_vm15 }
 0x5df   :  { %vm7265_vm8 = vcmask 965632  }
 0x5e0   :  { %v2312_v60 = vadd.f32 %v6123_v54, %v2296_v10 }
 0x5e2   :  { %v2328_v9 = vadd.f32 %v2323_v28, %v2312_v60  ;;  %v6251_v28 = vmul.f32 -0.0010917237, %v6120_v31 }
 0x5e4   :  { %v2351_v33 = vpop.permute.xlu2 %2350 }
 0x5e5   :  { %v2305_v61 = vpop.permute.xlu1 %2304  ;;  %v2354_v37 = vsel %vm428_vm13, %v2351_v33, %v2353_v8  ;;  %v2579_v8 = vmul.f32 0.5124068, %v6120_v31  ;;  %v2578_v33 = vmul.f32 0.5124068, %v6092_v17 }
 0x5e6   :  { %v2308_v62 = vsel %vm360_vm14, %v2305_v61, %v6123_v54  ;;  %v6245_v54 = vmul.f32 0.016368665, %v6120_v31 }
 0x5e8   :  { %2499 = vrot.lane.b32.xlu0 %v6245_v54, %s3303_s24 }
 0x5ed   :  { %v2316_v5 = vpop.permute.xlu1 %2315 }
 0x5ee   :  { %v2317_v35 = vsel %vm394_vm12, %v6132_v53, %v2316_v5  ;;  %v2295_v53 = vadd.f32 %v2292_v48, %v2279_v42  ;;  %v2506_v5 = vmul.f32 -0.010018936, %v6092_v17  ;;  %v2590_v42 = vmul.f32 0.52827346, %v6120_v31 }
 0x5ef   :  { %v2319_v50 = vadd.f32 %v2317_v35, %v2303_v22 }
 0x5f0   :  { %v2311_v16 = vadd.f32 %v2308_v62, %v2295_v53  ;;  %2521 = vrot.lane.b32.xlu0 %v2517_v41, %s3304_s25 }
 0x5f2   :  { %v2327_v19 = vadd.f32 %v2324_v38, %v2311_v16 }
 0x5f5   :  { %v2330_v47 = vpop.permute.xlu1 %2329 }
 0x5f6   :  { %v2333_v58 = vsel %vm411_vm11, %v2330_v47, %v2332_v59  ;;  %v6291_v59 = vmul.f32 0.0049722632, %v6092_v17 }
 0x5f7   :  { %v2335_v20 = vadd.f32 %v2333_v58, %v2319_v50  ;;  %v6356_v50 = vmul.f32 -0.0006548817, %v6120_v31 }
 0x5f8   :  { %2536 = vrot.lane.b32.xlu0 %v6272_v15, %s3306_s27 }
 0x5f9   :  { %v2356_v36 = vadd.f32 %v2354_v37, %v2335_v20 }
 0x5fb   :  { %2357 = vst [vmem:[#allocation7 + $0x10] sm:$0xff] %v2356_v36 }
 0x5fd   :  { %v2341_v23 = vpop.permute.xlu1 %2340 }
 0x5fe   :  { %v2342_v14 = vsel %vm394_vm12, %v2339_v45, %v2341_v23  ;;  %v2346_v24 = vadd.f32 %v2341_v23, %v2328_v9  ;;  %v6288_v45 = vmul.f32 0.0049722632, %v6120_v31 }
 0x5ff   :  { %v2345_v61 = vadd.f32 %v2342_v14, %v2327_v19  ;;  %v2382_v19 = vmul.f32 -0.0006548817, %v6092_v17 }
 0x600   :  { %2362 = vrot.lane.b32.xlu2 %v2346_v24, %s3300_s1  ;;  %2558 = vrot.lane.b32.xlu0 %v2554_v27, %s3307_s28  ;;  %v6383_v24 = vmul.f32 0.00041447996, %v6092_v17 }
 0x601   :  { %2360 = vrot.lane.b32.xlu1 %v2345_v61, %s3300_s1 }
 0x608   :  { %2390 = vrot.lane.b32.xlu2 %v6248_v56, %s3299_s0  ;;  %2571 = vrot.lane.b32.xlu0 %v2566_v51, %s3306_s27 }
 0x609   :  { %2377 = vrot.lane.b32.xlu1 %v6251_v28, %s3300_s1 }
 0x610   :  { %2403 = vrot.lane.b32.xlu2 %v6261_v30, %s3300_s1  ;;  %2593 = vrot.lane.b32.xlu0 %v2589_v55, %s3307_s28 }
 0x611   :  { %2401 = vrot.lane.b32.xlu1 %v6264_v4, %s3300_s1 }
 0x618   :  { %2425 = vrot.lane.b32.xlu2 %v6275_v12, %s3299_s0  ;;  %2604 = vrot.lane.b32.xlu0 %v2555_v57, %s3309_s30 }
 0x619   :  { %2416 = vrot.lane.b32.xlu1 %v6278_v18, %s3301_s22 }
 0x61c   :  { %v2376_v21 = vpop.permute.xlu0 %2375 }
 0x620   :  { %2440 = vrot.lane.b32.xlu2 %v6288_v45, %s3302_s23  ;;  %2618 = vrot.lane.b32.xlu0 %v2530_v26, %s3310_s4 }
 0x621   :  { %2438 = vrot.lane.b32.xlu1 %v6291_v59, %s3302_s23 }
 0x624   :  { %v2393_v39 = vpop.permute.xlu0 %2392 }
 0x628   :  { %2462 = vrot.lane.b32.xlu2 %v2458_v40, %s3303_s24  ;;  %2627 = vrot.lane.b32.xlu0 %v2542_v63, %s3309_s30 }
 0x629   :  { %2451 = vrot.lane.b32.xlu1 %v6301_v0, %s3301_s22 }
 0x62c   :  { %v2415_v3 = vpop.permute.xlu0 %2414 }
 0x630   :  { %2475 = vrot.lane.b32.xlu2 %v2470_v13, %s3302_s23  ;;  %2641 = vrot.lane.b32.xlu0 %v2517_v41, %s3310_s4 }
 0x631   :  { %2473 = vrot.lane.b32.xlu1 %v6310_v46, %s3302_s23 }
 0x634   :  { %v2428_v35 = vpop.permute.xlu0 %2427 }
 0x638   :  { %2497 = vrot.lane.b32.xlu2 %v6318_v32, %s3303_s24  ;;  %2652 = vrot.lane.b32.xlu0 %v2483_v34, %s3312_s6 }
 0x639   :  { %2488 = vrot.lane.b32.xlu1 %v2483_v34, %s3304_s25 }
 0x63c   :  { %v6352_v48 = vpop.permute.xlu0 %2449 }
 0x640   :  { %2512 = vrot.lane.b32.xlu2 %v2507_v11, %s3305_s26  ;;  %2666 = vrot.lane.b32.xlu0 %v2458_v40, %s3313_s7 }
 0x641   :  { %2510 = vrot.lane.b32.xlu1 %v2506_v5, %s3305_s26 }
 0x644   :  { %v2465_v47 = vpop.permute.xlu0 %2464 }
 0x648   :  { %2534 = vrot.lane.b32.xlu2 %v2530_v26, %s3306_s27  ;;  %2675 = vrot.lane.b32.xlu0 %v2470_v13, %s3312_s6 }
 0x649   :  { %2523 = vrot.lane.b32.xlu1 %v6332_v29, %s3304_s25 }
 0x64c   :  { %v6366_v53 = vpop.permute.xlu0 %2486 }
 0x650   :  { %2547 = vrot.lane.b32.xlu2 %v2542_v63, %s3305_s26  ;;  %2689 = vrot.lane.b32.xlu0 %v6200_v2, %s3313_s7  ;;  %v2748_v63 = vmul.f32 0.00041447996, %v6120_v31 }
 0x651   :  { %2545 = vrot.lane.b32.xlu1 %v2541_v25, %s3305_s26 }
 0x658   :  { %2569 = vrot.lane.b32.xlu2 %v2565_v44, %s3306_s27  ;;  %2700 = vrot.lane.b32.xlu0 %v6278_v18, %s3315_s9 }
 0x659   :  { %2560 = vrot.lane.b32.xlu1 %v2555_v57, %s3307_s28 }
 0x65a   :  { %v2363_v22 = vpop.permute.xlu2 %2362  ;;  %v2500_v2 = vpop.permute.xlu0 %2499 }
 0x660   :  { %2584 = vrot.lane.b32.xlu2 %v2579_v8, %s3308_s29  ;;  %2714 = vrot.lane.b32.xlu0 %v6248_v56, %s3316_s10 }
 0x661   :  { %2582 = vrot.lane.b32.xlu1 %v2578_v33, %s3308_s29 }
 0x662   :  { %v2391_v10 = vpop.permute.xlu2 %2390  ;;  %v6380_v23 = vpop.permute.xlu0 %2521 }
 0x663   :  { %v2394_v40 = vsel %vm71_vm1, %v2391_v10, %v2393_v39 }
 0x668   :  { %2602 = vrot.lane.b32.xlu2 %v2554_v27, %s3309_s30  ;;  %2723 = vrot.lane.b32.xlu0 %v6261_v30, %s3315_s9 }
 0x669   :  { %2595 = vrot.lane.b32.xlu1 %v2590_v42, %s3307_s28 }
 0x66a   :  { %v2404_v62 = vpop.permute.xlu2 %2403  ;;  %v2537_v17 = vpop.permute.xlu0 %2536 }
 0x66b   :  { %v2409_v58 = vadd.f32 %v2404_v62, %v6356_v50 }
 0x66d   :  { %v2433_v37 = vadd.f32 %v2428_v35, %v2409_v58 }
 0x670   :  { %2611 = vrot.lane.b32.xlu2 %v2566_v51, %s3308_s29  ;;  %2739 = vrot.lane.b32.xlu0 %v2382_v19, %s3316_s10 }
 0x671   :  { %2609 = vrot.lane.b32.xlu1 %v2565_v44, %s3308_s29 }
 0x672   :  { %v2426_v20 = vpop.permute.xlu2 %2425  ;;  %v6402_v30 = vpop.permute.xlu0 %2558 }
 0x673   :  { %v2361_v60 = vpop.permute.xlu1 %2360  ;;  %v2429_v16 = vsel %vm71_vm1, %v2426_v20, %v2428_v35  ;;  %v6414_v35 = vld [vmem:[#allocation5 + $0x18] sm:$0xff] }
 0x674   :  { %v2364_v36 = vsel %vm55_vm0, %v2361_v60, %v2363_v22  ;;  %v6417_v31 = vmul.f32 0.0040940573, %v6414_v35 }
 0x675   :  { %2366 = vst [vmem:[#allocation8 + $0x10] sm:$0xff] %v2364_v36  ;;  %v6443_v36 = vmul.f32 0.0025966428, %v6414_v35 }
 0x678   :  { %2625 = vrot.lane.b32.xlu2 %v2541_v25, %s3309_s30  ;;  %2753 = vrot.lane.b32.xlu0 %v2748_v63, %s3318_s12 }
 0x679   :  { %2620 = vrot.lane.b32.xlu1 %v6272_v15, %s3310_s4 }
 0x67a   :  { %v2441_v38 = vpop.permute.xlu2 %2440 }
 0x67b   :  { %v2378_v9 = vpop.permute.xlu1 %2377 }
 0x67c   :  { %v2379_v15 = vsel %vm55_vm0, %v2376_v21, %v2378_v9 }
 0x67d   :  { %v2381_v27 = vadd.f32 %v2379_v15, %v6383_v24 }
 0x67f   :  { %v2396_v57 = vadd.f32 %v2394_v40, %v2381_v27 }
 0x680   :  { %2636 = vrot.lane.b32.xlu2 %v2507_v11, %s3311_s5  ;;  %2781 = vrot.lane.b32.xlu0 %v6417_v31, %s3299_s0 }
 0x681   :  { %2634 = vrot.lane.b32.xlu1 %v2506_v5, %s3311_s5 }
 0x682   :  { %v2463_v14 = vpop.permute.xlu2 %2462 }
 0x683   :  { %v2402_v61 = vpop.permute.xlu1 %2401  ;;  %v2466_v41 = vsel %vm146_vm4, %v2463_v14, %v2465_v47  ;;  %v6429_v47 = vld [vmem:[#allocation5 + $0x20] sm:$0xff] }
 0x684   :  { %v2405_v18 = vsel %vm55_vm0, %v2402_v61, %v2404_v62  ;;  %v6432_v58 = vmul.f32 -0.00074680534, %v6429_v47 }
 0x685   :  { %v2408_v56 = vadd.f32 %v2405_v18, %v2382_v19  ;;  %v6456_v19 = vmul.f32 0.012738791, %v6429_v47 }
 0x687   :  { %v2432_v51 = vadd.f32 %v2429_v16, %v2408_v56  ;;  %v6467_v56 = vmul.f32 -0.020694051, %v6414_v35 }
 0x688   :  { %2650 = vrot.lane.b32.xlu2 %v6237_v7, %s3312_s6  ;;  %2794 = vrot.lane.b32.xlu0 %v6432_v58, %s3300_s1 }
 0x689   :  { %2643 = vrot.lane.b32.xlu1 %v6332_v29, %s3310_s4 }
 0x68a   :  { %v2476_v55 = vpop.permute.xlu2 %2475 }
 0x68b   :  { %v2417_v13 = vpop.permute.xlu1 %2416 }
 0x68c   :  { %v2418_v34 = vsel %vm96_vm2, %v2415_v3, %v2417_v13  ;;  %v6480_v13 = vmul.f32 0.013649909, %v6429_v47 }
 0x68d   :  { %v2420_v11 = vadd.f32 %v2418_v34, %v2396_v57 }
 0x690   :  { %2659 = vrot.lane.b32.xlu2 %v6245_v54, %s3311_s5  ;;  %v2572_v54 = vpop.permute.xlu0 %2571  ;;  %2816 = vrot.lane.b32.xlu0 %v6443_v36, %s3299_s0 }
 0x691   :  { %2657 = vrot.lane.b32.xlu1 %v6318_v32, %s3311_s5 }
 0x692   :  { %v2498_v7 = vpop.permute.xlu2 %2497 }
 0x693   :  { %v2439_v5 = vpop.permute.xlu1 %2438  ;;  %v2501_v26 = vsel %vm146_vm4, %v2498_v7, %v2500_v2  ;;  %v6491_v7 = vmul.f32 -0.0019867925, %v6429_v47 }
 0x694   :  { %v2442_v21 = vsel %vm121_vm3, %v2439_v5, %v2441_v38 }
 0x695   :  { %v2444_v29 = vadd.f32 %v2442_v21, %v2420_v11  ;;  %v6497_v21 = vmul.f32 -0.026075976, %v6414_v35 }
 0x697   :  { %v2468_v39 = vadd.f32 %v2466_v41, %v2444_v29 }
 0x698   :  { %2673 = vrot.lane.b32.xlu2 %v6310_v46, %s3312_s6  ;;  %v6425_v46 = vpop.permute.xlu0 %2593  ;;  %2831 = vrot.lane.b32.xlu0 %v6456_v19, %s3302_s23 }
 0x699   :  { %2668 = vrot.lane.b32.xlu1 %v6223_v49, %s3313_s7 }
 0x69a   :  { %v2513_v32 = vpop.permute.xlu2 %2512 }
 0x69b   :  { %v2452_v25 = vpop.permute.xlu1 %2451 }
 0x69c   :  { %v2453_v3 = vsel %vm96_vm2, %v6352_v48, %v2452_v25  ;;  %v2457_v44 = vadd.f32 %v2452_v25, %v2433_v37  ;;  %v6516_v25 = vmul.f32 -0.05423136, %v6429_v47 }
 0x69d   :  { %v2456_v22 = vadd.f32 %v2453_v3, %v2432_v51 }
 0x69e   :  { %v2481_v8 = vadd.f32 %v2476_v55, %v2457_v44 }
 0x6a0   :  { %2684 = vrot.lane.b32.xlu2 %v6288_v45, %s3314_s8  ;;  %v2505_v49 = vadd.f32 %v2500_v2, %v2481_v8  ;;  %v2605_v45 = vpop.permute.xlu0 %2604  ;;  %2853 = vrot.lane.b32.xlu0 %v6467_v56, %s3303_s24 }
 0x6a1   :  { %2682 = vrot.lane.b32.xlu1 %v6291_v59, %s3314_s8 }
 0x6a2   :  { %v2535_v33 = vpop.permute.xlu2 %2534 }
 0x6a3   :  { %v2474_v48 = vpop.permute.xlu1 %2473  ;;  %v2538_v10 = vsel %vm221_vm7, %v2535_v33, %v2537_v17 }
 0x6a4   :  { %v2477_v42 = vsel %vm121_vm3, %v2474_v48, %v2476_v55  ;;  %v6527_v48 = vmul.f32 -0.007496154, %v6429_v47 }
 0x6a5   :  { %v2480_v62 = vadd.f32 %v2477_v42, %v2456_v22  ;;  %v6530_v42 = vmul.f32 -0.007496154, %v6414_v35 }
 0x6a7   :  { %v2504_v37 = vadd.f32 %v2501_v26, %v2480_v62  ;;  %v6494_v26 = vmul.f32 -0.0019867925, %v6414_v35  ;;  %v2921_v62 = vmul.f32 0.10020082, %v6414_v35 }
 0x6a8   :  { %2698 = vrot.lane.b32.xlu2 %v6153_v6, %s3315_s9  ;;  %v6451_v6 = vpop.permute.xlu0 %2618  ;;  %2866 = vrot.lane.b32.xlu0 %v6480_v13, %s3302_s23 }
 0x6a9   :  { %2691 = vrot.lane.b32.xlu1 %v6301_v0, %s3313_s7 }
 0x6aa   :  { %v2548_v59 = vpop.permute.xlu2 %2547 }
 0x6ab   :  { %v2489_v20 = vpop.permute.xlu1 %2488 }
 0x6ac   :  { %v2490_v60 = vsel %vm171_vm5, %v6366_v53, %v2489_v20 }
 0x6ad   :  { %v2492_v16 = vadd.f32 %v2490_v60, %v2468_v39  ;;  %v6510_v39 = vmul.f32 -0.00074680534, %v6414_v35 }
 0x6b0   :  { %2707 = vrot.lane.b32.xlu2 %v6174_v1, %s3314_s8  ;;  %v2628_v1 = vpop.permute.xlu0 %2627  ;;  %2888 = vrot.lane.b32.xlu0 %v6497_v21, %s3303_s24 }
 0x6b1   :  { %2705 = vrot.lane.b32.xlu1 %v6275_v12, %s3314_s8 }
 0x6b2   :  { %v2570_v0 = vpop.permute.xlu2 %2569 }
 0x6b3   :  { %v2511_v2 = vpop.permute.xlu1 %2510  ;;  %v2573_v38 = vsel %vm221_vm7, %v2570_v0, %v2572_v54  ;;  %v6543_v0 = vmul.f32 0.012738791, %v6414_v35 }
 0x6b4   :  { %v2514_v53 = vsel %vm196_vm6, %v2511_v2, %v2513_v32  ;;  %v6513_v32 = vmul.f32 0.0040940573, %v6429_v47 }
 0x6b5   :  { %v2516_v9 = vadd.f32 %v2514_v53, %v2492_v16  ;;  %v2933_v53 = vmul.f32 -0.096178465, %v6429_v47 }
 0x6b7   :  { %v2540_v14 = vadd.f32 %v2538_v10, %v2516_v9 }
 0x6b8   :  { %2721 = vrot.lane.b32.xlu2 %v6264_v4, %s3315_s9  ;;  %2903 = vrot.lane.b32.xlu0 %v6516_v25, %s3305_s26 }
 0x6b9   :  { %2716 = vrot.lane.b32.xlu1 %v6126_v52, %s3316_s10  ;;  %v6475_v52 = vpop.permute.xlu0 %2641 }
 0x6ba   :  { %v2585_v12 = vpop.permute.xlu2 %2584 }
 0x6bb   :  { %v2524_v61 = vpop.permute.xlu1 %2523 }
 0x6bc   :  { %v2525_v41 = vsel %vm171_vm5, %v6380_v23, %v2524_v61  ;;  %v2529_v15 = vadd.f32 %v2524_v61, %v2505_v49 }
 0x6bd   :  { %v2528_v18 = vadd.f32 %v2525_v41, %v2504_v37  ;;  %v6557_v41 = vmul.f32 -0.0064904117, %v6429_v47 }
 0x6be   :  { %v2553_v27 = vadd.f32 %v2548_v59, %v2529_v15 }
 0x6c0   :  { %2732 = vrot.lane.b32.xlu2 %v6251_v28, %s3317_s11  ;;  %v2577_v4 = vadd.f32 %v2572_v54, %v2553_v27  ;;  %2925 = vrot.lane.b32.xlu0 %v2921_v62, %s3306_s27  ;;  %v6563_v27 = vmul.f32 0.31488052, %v6414_v35 }
 0x6c1   :  { %2730 = vrot.lane.b32.xlu1 %v6099_v43, %s3317_s11  ;;  %v2653_v43 = vpop.permute.xlu0 %2652 }
 0x6c2   :  { %v2603_v51 = vpop.permute.xlu2 %2602 }
 0x6c3   :  { %v2546_v23 = vpop.permute.xlu1 %2545  ;;  %v2606_v40 = vsel %vm7262_vm15, %v2603_v51, %v2605_v45  ;;  %vm7266_vm15 = vmmov %vm7263_vm10 }
 0x6c4   :  { %v2549_v17 = vsel %vm196_vm6, %v2546_v23, %v2548_v59 }
 0x6c5   :  { %v2552_v55 = vadd.f32 %v2549_v17, %v2528_v18  ;;  %v6560_v18 = vmul.f32 -0.0064904117, %v6414_v35  ;;  %v2860_v17 = vmul.f32 0.013649909, %v6414_v35 }
 0x6c7   :  { %v2576_v57 = vadd.f32 %v2573_v38, %v2552_v55  ;;  %v6546_v38 = vmul.f32 0.0025966428, %v6429_v47 }
 0x6c8   :  { %2751 = vrot.lane.b32.xlu2 %v6383_v24, %s3318_s12  ;;  %2938 = vrot.lane.b32.xlu0 %v2933_v53, %s3305_s26 }
 0x6c9   :  { %2741 = vrot.lane.b32.xlu1 %v6356_v50, %s3316_s10  ;;  %v6505_v50 = vpop.permute.xlu0 %2666 }
 0x6ca   :  { %v2612_v28 = vpop.permute.xlu2 %2611 }
 0x6cb   :  { %v2561_v34 = vpop.permute.xlu1 %2560 }
 0x6cc   :  { %v2562_v11 = vsel %vm7263_vm10, %v6402_v30, %v2561_v34  ;;  %vm7267_vm10 = vcmask 932864  }
 0x6cd   :  { %v2564_v5 = vadd.f32 %v2562_v11, %v2540_v14 }
 0x6d0   :  { %2768 = vrot.lane.b32.xlu2 %v6491_v7, %s3300_s1  ;;  %2960 = vrot.lane.b32.xlu0 %v6563_v27, %s3306_s27 }
 0x6d1   :  { %2766 = vrot.lane.b32.xlu1 %v6494_v26, %s3300_s1  ;;  %v2676_v44 = vpop.permute.xlu0 %2675 }
 0x6d2   :  { %v2626_v24 = vpop.permute.xlu2 %2625 }
 0x6d3   :  { %v2583_v30 = vpop.permute.xlu1 %2582  ;;  %v2629_v29 = vsel %vm7264_vm9, %v2626_v24, %v2628_v1  ;;  %vm7268_vm9 = vmmov %vm7265_vm8 }
 0x6d4   :  { %v2586_v63 = vsel %vm7265_vm8, %v2583_v30, %v2585_v12  ;;  %vm7269_vm8 = vcmask 949248  }
 0x6d5   :  { %v2588_v54 = vadd.f32 %v2586_v63, %v2564_v5 }
 0x6d7   :  { %v2608_v3 = vadd.f32 %v2606_v40, %v2588_v54  ;;  %v6590_v54 = vmul.f32 0.033074383, %v6414_v35 }
 0x6d8   :  { %2792 = vrot.lane.b32.xlu2 %v6510_v39, %s3300_s1 }
 0x6d9   :  { %2783 = vrot.lane.b32.xlu1 %v6513_v32, %s3299_s0 }
 0x6da   :  { %v2637_v22 = vpop.permute.xlu2 %2636 }
 0x6db   :  { %v2596_v8 = vpop.permute.xlu1 %2595 }
 0x6dc   :  { %v2597_v49 = vsel %vm7266_vm15, %v6425_v46, %v2596_v8  ;;  %v2601_v33 = vadd.f32 %v2596_v8, %v2577_v4  ;;  %v6538_v46 = vpop.permute.xlu0 %2689  ;;  %vm7270_vm15 = vmmov %vm7267_vm10 }
 0x6dd   :  { %v2600_v10 = vadd.f32 %v2597_v49, %v2576_v57  ;;  %v6577_v57 = vmul.f32 -0.020694051, %v6429_v47 }
 0x6de   :  { %v2617_v37 = vadd.f32 %v2612_v28, %v2601_v33 }
 0x6e0   :  { %2807 = vrot.lane.b32.xlu2 %v6527_v48, %s3301_s22  ;;  %v2633_v45 = vadd.f32 %v2628_v1, %v2617_v37  ;;  %v6602_v37 = vmul.f32 -0.05423136, %v6414_v35 }
 0x6e1   :  { %2805 = vrot.lane.b32.xlu1 %v6530_v42, %s3301_s22 }
 0x6e2   :  { %v2651_v59 = vpop.permute.xlu2 %2650 }
 0x6e3   :  { %v2610_v20 = vpop.permute.xlu1 %2609  ;;  %v2654_v60 = vsel %vm7267_vm10, %v2651_v59, %v2653_v43  ;;  %vm7271_vm10 = vcmask 941056   ;;  %v2946_v43 = vmul.f32 -0.3163002, %v6429_v47 }
 0x6e4   :  { %v2613_v16 = vsel %vm7268_vm9, %v2610_v20, %v2612_v28  ;;  %v2701_v14 = vpop.permute.xlu0 %2700  ;;  %vm7272_vm9 = vmmov %vm7269_vm8 }
 0x6e5   :  { %v2616_v2 = vadd.f32 %v2613_v16, %v2600_v10  ;;  %2971 = vrot.lane.b32.xlu0 %v2946_v43, %s3308_s29 }
 0x6e7   :  { %v2632_v9 = vadd.f32 %v2629_v29, %v2616_v2  ;;  %v6587_v29 = vmul.f32 0.033074383, %v6429_v47  ;;  %v2909_v2 = vmul.f32 0.048260726, %v6429_v47 }
 0x6e8   :  { %2829 = vrot.lane.b32.xlu2 %v6543_v0, %s3302_s23 }
 0x6e9   :  { %2818 = vrot.lane.b32.xlu1 %v6546_v38, %s3299_s0  ;;  %s3153_s0 = sshll.u32 %s6763_s3, 4  ;;  %s3154_s0 = int_to_ptr.hbm [resolvable:$true] %s3153_s0 }
 0x6ea   :  { %v2660_v1 = vpop.permute.xlu2 %2659 }
 0x6eb   :  { %v2621_v12 = vpop.permute.xlu1 %2620 }
 0x6ec   :  { %v2622_v61 = vsel %vm7269_vm8, %v6451_v6, %v2621_v12  ;;  %v6571_v6 = vpop.permute.xlu0 %2714  ;;  %vm7273_vm8 = vmmov %vm7271_vm10 }
 0x6ed   :  { %v2624_v15 = vadd.f32 %v2622_v61, %v2608_v3  ;;  %2985 = vrot.lane.b32.xlu0 %v2921_v62, %s3309_s30  ;;  %v6605_v62 = vmul.f32 -0.026075976, %v6429_v47 }
 0x6f0   :  { %2842 = vrot.lane.b32.xlu2 %v6557_v41, %s3301_s22 }
 0x6f1   :  { %2840 = vrot.lane.b32.xlu1 %v6560_v18, %s3301_s22 }
 0x6f2   :  { %v2674_v4 = vpop.permute.xlu2 %2673 }
 0x6f3   :  { %v2635_v51 = vpop.permute.xlu1 %2634  ;;  %v2677_v23 = vsel %vm7270_vm15, %v2674_v4, %v2676_v44  ;;  %vm7274_vm15 = vcmask 916480  }
 0x6f4   :  { %v2638_v40 = vsel %vm7271_vm10, %v2635_v51, %v2637_v22  ;;  %v2724_v34 = vpop.permute.xlu0 %2723  ;;  %v2922_v51 = vmul.f32 0.10020082, %v6429_v47  ;;  %vm7275_vm10 = vcmask 883712  }
 0x6f5   :  { %v2640_v55 = vadd.f32 %v2638_v40, %v2624_v15  ;;  %2994 = vrot.lane.b32.xlu0 %v2933_v53, %s3308_s29 }
 0x6f7   :  { %v2656_v28 = vadd.f32 %v2654_v60, %v2640_v55 }
 0x6f8   :  { %2864 = vrot.lane.b32.xlu2 %v2860_v17, %s3302_s23 }
 0x6f9   :  { %2855 = vrot.lane.b32.xlu1 %v6577_v57, %s3303_s24 }
 0x6fa   :  { %v2685_v11 = vpop.permute.xlu2 %2684 }
 0x6fb   :  { %v2644_v5 = vpop.permute.xlu1 %2643 }
 0x6fc   :  { %v2645_v24 = vsel %vm7272_vm9, %v6475_v52, %v2644_v5  ;;  %v2649_v30 = vadd.f32 %v2644_v5, %v2633_v45  ;;  %v6597_v8 = vpop.permute.xlu0 %2739  ;;  %vm7276_vm9 = vmmov %vm7274_vm15 }
 0x6fd   :  { %v2648_v63 = vadd.f32 %v2645_v24, %v2632_v9  ;;  %3010 = vrot.lane.b32.xlu0 %v2909_v2, %s3309_s30  ;;  %v2945_v24 = vmul.f32 -0.3163002, %v6414_v35 }
 0x6fe   :  { %v2665_v3 = vadd.f32 %v2660_v1, %v2649_v30 }
 0x700   :  { %2879 = vrot.lane.b32.xlu2 %v6587_v29, %s3304_s25  ;;  %v2681_v22 = vadd.f32 %v2676_v44, %v2665_v3 }
 0x701   :  { %2877 = vrot.lane.b32.xlu1 %v6590_v54, %s3304_s25 }
 0x702   :  { %v2699_v52 = vpop.permute.xlu2 %2698 }
 0x703   :  { %v2658_v49 = vpop.permute.xlu1 %2657  ;;  %v2702_v33 = vsel %vm394_vm12, %v2699_v52, %v2701_v14  ;;  %v6616_v14 = vmul.f32 0.048260726, %v6414_v35 }
 0x704   :  { %v2661_v10 = vsel %vm7273_vm8, %v2658_v49, %v2660_v1  ;;  %v2754_v20 = vpop.permute.xlu0 %2753 }
 0x705   :  { %v2664_v45 = vadd.f32 %v2661_v10, %v2648_v63  ;;  %3040 = vrot.lane.b32.xlu0 %v2860_v17, %s3311_s5 }
 0x707   :  { %v2680_v59 = vadd.f32 %v2677_v23, %v2664_v45 }
 0x708   :  { %2901 = vrot.lane.b32.xlu2 %v6602_v37, %s3305_s26 }
 0x709   :  { %2890 = vrot.lane.b32.xlu1 %v6605_v62, %s3303_s24 }
 0x70a   :  { %v2708_v44 = vpop.permute.xlu2 %2707 }
 0x70b   :  { %v2669_v60 = vpop.permute.xlu1 %2668 }
 0x70c   :  { %v2670_v16 = vsel %vm360_vm14, %v6505_v50, %v2669_v60  ;;  %v2932_v50 = vmul.f32 -0.096178465, %v6414_v35  ;;  %v6625_v15 = vpop.permute.xlu0 %2781 }
 0x70d   :  { %v2672_v9 = vadd.f32 %v2670_v16, %v2656_v28  ;;  %3058 = vrot.lane.b32.xlu0 %v6557_v41, %s3312_s6 }
 0x710   :  { %2914 = vrot.lane.b32.xlu2 %v2909_v2, %s3304_s25 }
 0x711   :  { %2912 = vrot.lane.b32.xlu1 %v6616_v14, %s3304_s25 }
 0x712   :  { %v2722_v53 = vpop.permute.xlu2 %2721 }
 0x713   :  { %v2683_v1 = vpop.permute.xlu1 %2682  ;;  %v2725_v12 = vsel %vm394_vm12, %v2722_v53, %v2724_v34 }
 0x714   :  { %v2686_v61 = vsel %vm7274_vm15, %v2683_v1, %v2685_v11  ;;  %v2795_v63 = vpop.permute.xlu0 %2794  ;;  %v2773_v1 = vmul.f32 7.561995e-05, %v6414_v35  ;;  %vm7285_vm15 = vcmask 932864  }
 0x715   :  { %v2688_v4 = vadd.f32 %v2686_v61, %v2672_v9  ;;  %3088 = vrot.lane.b32.xlu0 %v6510_v39, %s3314_s8 }
 0x717   :  { %v2704_v23 = vadd.f32 %v2702_v33, %v2688_v4  ;;  %v2957_v33 = vmul.f32 0.31488052, %v6429_v47 }
 0x718   :  { %2936 = vrot.lane.b32.xlu2 %v2932_v50, %s3305_s26 }
 0x719   :  { %2927 = vrot.lane.b32.xlu1 %v2922_v51, %s3306_s27 }
 0x71a   :  { %v2733_v40 = vpop.permute.xlu2 %2732 }
 0x71b   :  { %v2692_v55 = vpop.permute.xlu1 %2691 }
 0x71c   :  { %v2693_v28 = vsel %vm360_vm14, %v6538_v46, %v2692_v55  ;;  %v2697_v11 = vadd.f32 %v2692_v55, %v2681_v22  ;;  %v6644_v41 = vpop.permute.xlu0 %2816 }
 0x71d   :  { %v2696_v5 = vadd.f32 %v2693_v28, %v2680_v59  ;;  %v6664_v28 = vmul.f32 0.00078125054, %v6414_v35 }
 0x71e   :  { %v2713_v30 = vadd.f32 %v2708_v44, %v2697_v11 }
 0x720   :  { %2951 = vrot.lane.b32.xlu2 %v2946_v43, %s3307_s28  ;;  %v2729_v17 = vadd.f32 %v2724_v34, %v2713_v30 }
 0x721   :  { %2949 = vrot.lane.b32.xlu1 %v2945_v24, %s3307_s28 }
 0x722   :  { %v2752_v3 = vpop.permute.xlu2 %2751 }
 0x723   :  { %v2706_v52 = vpop.permute.xlu1 %2705  ;;  %v2755_v49 = vsel %vm7275_vm10, %v2752_v3, %v2754_v20  ;;  %vm7286_vm10 = vmmov %vm7276_vm9 }
 0x724   :  { %v2709_v46 = vsel %vm7276_vm9, %v2706_v52, %v2708_v44  ;;  %v2774_v44 = vmul.f32 7.561995e-05, %v6429_v47  ;;  %v2832_v20 = vpop.permute.xlu0 %2831 }
 0x725   :  { %v2712_v22 = vadd.f32 %v2709_v46, %v2696_v5 }
 0x726   :  { %3108 = vrot.lane.b32.xlu0 %v2774_v44, %s3315_s9 }
 0x727   :  { %v2728_v10 = vadd.f32 %v2725_v12, %v2712_v22 }
 0x728   :  { %2969 = vrot.lane.b32.xlu2 %v2945_v24, %s3308_s29 }
 0x729   :  { %2962 = vrot.lane.b32.xlu1 %v2957_v33, %s3306_s27 }
 0x72a   :  { %v2769_v43 = vpop.permute.xlu2 %2768 }
 0x72b   :  { %v2717_v34 = vpop.permute.xlu1 %2716 }
 0x72c   :  { %v2718_v45 = vsel %vm411_vm11, %v6571_v6, %v2717_v34  ;;  %v2854_v4 = vpop.permute.xlu0 %2853 }
 0x72d   :  { %v2720_v59 = vadd.f32 %v2718_v45, %v2704_v23 }
 0x72e   :  { %3019 = vrot.lane.b32.xlu0 %v6587_v29, %s3311_s5 }
 0x730   :  { %2978 = vrot.lane.b32.xlu2 %v2957_v33, %s3307_s28 }
 0x731   :  { %2976 = vrot.lane.b32.xlu1 %v6563_v27, %s3307_s28 }
 0x732   :  { %v2793_v39 = vpop.permute.xlu2 %2792 }
 0x733   :  { %v2731_v60 = vpop.permute.xlu1 %2730  ;;  %v2796_v16 = vsel %vm55_vm0, %v2793_v39, %v2795_v63 }
 0x734   :  { %v2734_v2 = vsel %vm428_vm13, %v2731_v60, %v2733_v40  ;;  %v2867_v30 = vpop.permute.xlu0 %2866 }
 0x735   :  { %v2736_v9 = vadd.f32 %v2734_v2, %v2720_v59 }
 0x736   :  { %3049 = vrot.lane.b32.xlu0 %v6543_v0, %s3313_s7 }
 0x737   :  { %v2757_v53 = vadd.f32 %v2755_v49, %v2736_v9 }
 0x738   :  { %2992 = vrot.lane.b32.xlu2 %v2932_v50, %s3308_s29 }
 0x739   :  { %2987 = vrot.lane.b32.xlu1 %v2922_v51, %s3309_s30  ;;  %v2760_v11 = vadd.f32 %v6664_v28, %v2757_v53 }
 0x73a   :  { %v2808_v6 = vpop.permute.xlu2 %2807 }
 0x73b   :  { %v2742_v27 = vpop.permute.xlu1 %2741 }
 0x73c   :  { %v2743_v12 = vsel %vm411_vm11, %v6597_v8, %v2742_v27  ;;  %v2747_v61 = vadd.f32 %v2742_v27, %v2729_v17  ;;  %v2889_v17 = vpop.permute.xlu0 %2888 }
 0x73d   :  { %v2746_v23 = vadd.f32 %v2743_v12, %v2728_v10 }
 0x73e   :  { %v2776_v40 = vadd.f32 %v2774_v44, %v2747_v61  ;;  %3067 = vrot.lane.b32.xlu0 %v6527_v48, %s3314_s8 }
 0x73f   :  { %v2775_v55 = vadd.f32 %v2773_v1, %v2746_v23 }
 0x740   :  { %3008 = vrot.lane.b32.xlu2 %v6616_v14, %s3309_s30  ;;  %v2800_v29 = vadd.f32 %v2795_v63, %v2776_v40 }
 0x741   :  { %3001 = vrot.lane.b32.xlu1 %v6602_v37, %s3310_s4  ;;  %v2799_v50 = vadd.f32 %v2796_v16, %v2775_v55 }
 0x742   :  { %v2830_v8 = vpop.permute.xlu2 %2829 }
 0x743   :  { %v2767_v51 = vpop.permute.xlu1 %2766  ;;  %v2833_v5 = vsel %vm121_vm3, %v2830_v8, %v2832_v20 }
 0x744   :  { %v2770_v35 = vsel %vm55_vm0, %v2767_v51, %v2769_v43 }
 0x745   :  { %v2772_v24 = vadd.f32 %v2770_v35, %v2760_v11 }
 0x746   :  { %3097 = vrot.lane.b32.xlu0 %v6494_v26, %s3316_s10 }
 0x748   :  { %3026 = vrot.lane.b32.xlu2 %v6605_v62, %s3310_s4 }
 0x749   :  { %3024 = vrot.lane.b32.xlu1 %v6497_v21, %s3310_s4 }
 0x74a   :  { %v2843_v0 = vpop.permute.xlu2 %2842 }
 0x74b   :  { %v2784_v37 = vpop.permute.xlu1 %2783 }
 0x74c   :  { %v2785_v14 = vsel %vm71_vm1, %v6625_v15, %v2784_v37  ;;  %v2904_v15 = vpop.permute.xlu0 %2903 }
 0x74d   :  { %v2787_v63 = vadd.f32 %v2785_v14, %v2772_v24 }
 0x750   :  { %3056 = vrot.lane.b32.xlu2 %v6560_v18, %s3312_s6 }
 0x751   :  { %3042 = vrot.lane.b32.xlu1 %v6480_v13, %s3311_s5 }
 0x752   :  { %v2865_v48 = vpop.permute.xlu2 %2864 }
 0x753   :  { %v2806_v62 = vpop.permute.xlu1 %2805  ;;  %v2868_v21 = vsel %vm121_vm3, %v2865_v48, %v2867_v30  ;;  %vm7279_vm3 = vcmask 957440  }
 0x754   :  { %v2809_v3 = vsel %vm96_vm2, %v2806_v62, %v2808_v6  ;;  %v2926_v45 = vpop.permute.xlu0 %2925 }
 0x755   :  { %v2811_v52 = vadd.f32 %v2809_v3, %v2787_v63 }
 0x757   :  { %v2835_v49 = vadd.f32 %v2833_v5, %v2811_v52 }
 0x758   :  { %3074 = vrot.lane.b32.xlu2 %v6546_v38, %s3313_s7 }
 0x759   :  { %3072 = vrot.lane.b32.xlu1 %v6443_v36, %s3313_s7 }
 0x75a   :  { %v2880_v26 = vpop.permute.xlu2 %2879 }
 0x75b   :  { %v2819_v18 = vpop.permute.xlu1 %2818 }
 0x75c   :  { %v2820_v13 = vsel %vm71_vm1, %v6644_v41, %v2819_v18  ;;  %v2824_v46 = vadd.f32 %v2819_v18, %v2800_v29  ;;  %v3115_v41 = vmul.f32 0.00078125054, %v6429_v47  ;;  %v2939_v16 = vpop.permute.xlu0 %2938  ;;  %vm7277_vm1 = vcmask 965632  }
 0x75d   :  { %v2823_v22 = vadd.f32 %v2820_v13, %v2799_v50  ;;  %vm7281_vm8 = vmmov %vm7277_vm1 }
 0x75e   :  { %v2848_v33 = vadd.f32 %v2843_v0, %v2824_v46  ;;  %3120 = vrot.lane.b32.xlu0 %v3115_v41, %s3317_s11 }
 0x760   :  { %3106 = vrot.lane.b32.xlu2 %v2773_v1, %s3315_s9  ;;  %v2872_v10 = vadd.f32 %v2867_v30, %v2848_v33 }
 0x761   :  { %3090 = vrot.lane.b32.xlu1 %v6432_v58, %s3314_s8 }
 0x762   :  { %v2902_v43 = vpop.permute.xlu2 %2901 }
 0x763   :  { %v2841_v38 = vpop.permute.xlu1 %2840  ;;  %v2905_v34 = vsel %vm196_vm6, %v2902_v43, %v2904_v15 }
 0x764   :  { %v2844_v36 = vsel %vm96_vm2, %v2841_v38, %v2843_v0  ;;  %v2961_v53 = vpop.permute.xlu0 %2960  ;;  %vm7278_vm2 = vcmask 973824  }
 0x765   :  { %v2847_v59 = vadd.f32 %v2844_v36, %v2823_v22 }
 0x767   :  { %v2871_v44 = vadd.f32 %v2868_v21, %v2847_v59 }
 0x768   :  { %3017 = vrot.lane.b32.xlu2 %v6590_v54, %s3311_s5 }
 0x769   :  { %3003 = vrot.lane.b32.xlu1 %v6516_v25, %s3310_s4 }
 0x76a   :  { %v2915_v39 = vpop.permute.xlu2 %2914 }
 0x76b   :  { %v2856_v20 = vpop.permute.xlu1 %2855 }
 0x76c   :  { %v2857_v58 = vsel %vm146_vm4, %v2854_v4, %v2856_v20  ;;  %v2972_v61 = vpop.permute.xlu0 %2971 }
 0x76d   :  { %v2859_v60 = vadd.f32 %v2857_v58, %v2835_v49 }
 0x770   :  { %3035 = vrot.lane.b32.xlu2 %v6577_v57, %s3312_s6 }
 0x771   :  { %3033 = vrot.lane.b32.xlu1 %v6467_v56, %s3312_s6 }
 0x772   :  { %v2937_v54 = vpop.permute.xlu2 %2936 }
 0x773   :  { %v2878_v2 = vpop.permute.xlu1 %2877 }
 0x774   :  { %v2881_v25 = vsel %vm171_vm5, %v2878_v2, %v2880_v26  ;;  %v2986_v55 = vpop.permute.xlu0 %2985  ;;  %v2940_v26 = vsel %vm196_vm6, %v2937_v54, %v2939_v16  ;;  %vm7283_vm6 = vcmask 949248  }
 0x775   :  { %v2883_v9 = vadd.f32 %v2881_v25, %v2859_v60  ;;  %vm7287_vm9 = vmmov %vm7283_vm6 }
 0x777   :  { %v2907_v47 = vadd.f32 %v2905_v34, %v2883_v9 }
 0x778   :  { %3065 = vrot.lane.b32.xlu2 %v6530_v42, %s3314_s8 }
 0x779   :  { %3051 = vrot.lane.b32.xlu1 %v6456_v19, %s3313_s7 }
 0x77a   :  { %v2952_v6 = vpop.permute.xlu2 %2951 }
 0x77b   :  { %v2891_v1 = vpop.permute.xlu1 %2890 }
 0x77c   :  { %v2892_v57 = vsel %vm146_vm4, %v2889_v17, %v2891_v1  ;;  %v2896_v27 = vadd.f32 %v2891_v1, %v2872_v10  ;;  %v2995_v8 = vpop.permute.xlu0 %2994  ;;  %vm7280_vm4 = vmmov %vm7278_vm2 }
 0x77d   :  { %v2895_v12 = vadd.f32 %v2892_v57, %v2871_v44 }
 0x77e   :  { %v2920_v63 = vadd.f32 %v2915_v39, %v2896_v27 }
 0x780   :  { %3083 = vrot.lane.b32.xlu2 %v6513_v32, %s3315_s9  ;;  %v2944_v21 = vadd.f32 %v2939_v16, %v2920_v63 }
 0x781   :  { %3081 = vrot.lane.b32.xlu1 %v6417_v31, %s3315_s9 }
 0x782   :  { %v2970_v56 = vpop.permute.xlu2 %2969 }
 0x783   :  { %v2913_v4 = vpop.permute.xlu1 %2912  ;;  %v2973_v42 = vsel %vm7277_vm1, %v2970_v56, %v2972_v61 }
 0x784   :  { %v3011_v35 = vpop.permute.xlu0 %3010  ;;  %v2916_v62 = vsel %vm171_vm5, %v2913_v4, %v2915_v39  ;;  %vm7282_vm5 = vmmov %vm7279_vm3 }
 0x785   :  { %v2919_v49 = vadd.f32 %v2916_v62, %v2895_v12 }
 0x787   :  { %v2943_v46 = vadd.f32 %v2940_v26, %v2919_v49 }
 0x788   :  { %3118 = vrot.lane.b32.xlu2 %v6664_v28, %s3317_s11 }
 0x789   :  { %3099 = vrot.lane.b32.xlu1 %v6491_v7, %s3316_s10 }
 0x78a   :  { %v2979_v32 = vpop.permute.xlu2 %2978 }
 0x78b   :  { %v2928_v19 = vpop.permute.xlu1 %2927 }
 0x78c   :  { %v2929_v23 = vsel %vm221_vm7, %v2926_v45, %v2928_v19  ;;  %v3041_v30 = vpop.permute.xlu0 %3040 }
 0x78d   :  { %v2931_v40 = vadd.f32 %v2929_v23, %v2907_v47 }
 0x792   :  { %v2993_v11 = vpop.permute.xlu2 %2992 }
 0x793   :  { %v2950_v29 = vpop.permute.xlu1 %2949  ;;  %v2996_v36 = vsel %vm7281_vm8, %v2993_v11, %v2995_v8 }
 0x794   :  { %v2953_v31 = vsel %vm7278_vm2, %v2950_v29, %v2952_v6  ;;  %v3059_v48 = vpop.permute.xlu0 %3058  ;;  %vm7289_vm2 = vmmov %vm7285_vm15 }
 0x795   :  { %v2955_v50 = vadd.f32 %v2953_v31, %v2931_v40 }
 0x797   :  { %v2975_v51 = vadd.f32 %v2973_v42, %v2955_v50 }
 0x79a   :  { %v3009_v28 = vpop.permute.xlu2 %3008 }
 0x79b   :  { %v2963_v5 = vpop.permute.xlu1 %2962  ;;  %v3012_v41 = vsel %vm7282_vm5, %v3009_v28, %v3011_v35 }
 0x79c   :  { %v2968_v52 = vadd.f32 %v2963_v5, %v2944_v21  ;;  %v2964_v18 = vsel %vm221_vm7, %v2961_v53, %v2963_v5  ;;  %v3089_v22 = vpop.permute.xlu0 %3088  ;;  %vm7284_vm7 = vcmask 941056  }
 0x79d   :  { %v2967_v10 = vadd.f32 %v2964_v18, %v2943_v46  ;;  %vm7288_vm1 = vmmov %vm7284_vm7 }
 0x79e   :  { %v2984_v13 = vadd.f32 %v2979_v32, %v2968_v52 }
 0x7a0   :  { %v3000_v43 = vadd.f32 %v2995_v8, %v2984_v13 }
 0x7a2   :  { %v3027_v14 = vpop.permute.xlu2 %3026  ;;  %v3016_v59 = vadd.f32 %v3011_v35, %v3000_v43 }
 0x7a3   :  { %v2977_v24 = vpop.permute.xlu1 %2976 }
 0x7a4   :  { %v2980_v33 = vsel %vm7280_vm4, %v2977_v24, %v2979_v32  ;;  %v3109_v39 = vpop.permute.xlu0 %3108  ;;  %v3032_v20 = vadd.f32 %v3027_v14, %v3016_v59 }
 0x7a5   :  { %v2983_v38 = vadd.f32 %v2980_v33, %v2967_v10 }
 0x7a7   :  { %v2999_v44 = vadd.f32 %v2996_v36, %v2983_v38 }
 0x7a9   :  { %v3015_v60 = vadd.f32 %v3012_v41, %v2999_v44 }
 0x7aa   :  { %v3057_v3 = vpop.permute.xlu2 %3056 }
 0x7ab   :  { %v2988_v0 = vpop.permute.xlu1 %2987  ;;  %v3060_v53 = vsel %vm7285_vm15, %v3057_v3, %v3059_v48 }
 0x7ac   :  { %v2989_v7 = vsel %vm7279_vm3, %v2986_v55, %v2988_v0  ;;  %v3020_v27 = vpop.permute.xlu0 %3019  ;;  %vm7290_vm3 = vmmov %vm7286_vm10 }
 0x7ad   :  { %v2991_v37 = vadd.f32 %v2989_v7, %v2975_v51 }
 0x7b2   :  { %v3075_v34 = vpop.permute.xlu2 %3074 }
 0x7b3   :  { %v3002_v17 = vpop.permute.xlu1 %3001 }
 0x7b4   :  { %v3050_v31 = vpop.permute.xlu0 %3049 }
 0x7ba   :  { %v3107_v16 = vpop.permute.xlu2 %3106 }
 0x7bb   :  { %v3025_v15 = vpop.permute.xlu1 %3024  ;;  %v3110_v23 = vsel %vm394_vm12, %v3107_v16, %v3109_v39 }
 0x7bc   :  { %v3028_v58 = vsel %vm7283_vm6, %v3025_v15, %v3027_v14  ;;  %v3068_v51 = vpop.permute.xlu0 %3067 }
 0x7bd   :  { %v3031_v25 = vadd.f32 %v3028_v58, %v3015_v60 }
 0x7c2   :  { %v3018_v4 = vpop.permute.xlu2 %3017 }
 0x7c3   :  { %v3043_v45 = vpop.permute.xlu1 %3042  ;;  %v3021_v28 = vsel %vm7288_vm1, %v3018_v4, %v3020_v27 }
 0x7c4   :  { %v3044_v54 = vsel %vm7284_vm7, %v3041_v30, %v3043_v45  ;;  %v3048_v2 = vadd.f32 %v3043_v45, %v3032_v20  ;;  %v3098_v30 = vpop.permute.xlu0 %3097 }
 0x7c5   :  { %v3047_v47 = vadd.f32 %v3044_v54, %v3031_v25 }
 0x7c6   :  { %v3064_v6 = vadd.f32 %v3059_v48, %v3048_v2 }
 0x7c7   :  { %v3063_v57 = vadd.f32 %v3060_v53, %v3047_v47 }
 0x7c8   :  { %v3080_v12 = vadd.f32 %v3075_v34, %v3064_v6 }
 0x7ca   :  { %v3036_v50 = vpop.permute.xlu2 %3035 }
 0x7cb   :  { %v3073_v9 = vpop.permute.xlu1 %3072 }
 0x7cc   :  { %v3076_v1 = vsel %vm360_vm14, %v3073_v9, %v3075_v34 }
 0x7cd   :  { %v3079_v56 = vadd.f32 %v3076_v1, %v3063_v57 }
 0x7d2   :  { %v3066_v11 = vpop.permute.xlu2 %3065 }
 0x7d3   :  { %v3091_v61 = vpop.permute.xlu1 %3090  ;;  %v3069_v3 = vsel %vm7290_vm3, %v3066_v11, %v3068_v51 }
 0x7d4   :  { %v3092_v42 = vsel %vm7286_vm10, %v3089_v22, %v3091_v61  ;;  %v3096_v19 = vadd.f32 %v3091_v61, %v3080_v12 }
 0x7d5   :  { %v3095_v40 = vadd.f32 %v3092_v42, %v3079_v56 }
 0x7d6   :  { %v3114_v55 = vadd.f32 %v3109_v39, %v3096_v19 }
 0x7d7   :  { %v3113_v32 = vadd.f32 %v3110_v23, %v3095_v40 }
 0x7d8   :  { %3130 = vrot.lane.b32.xlu2 %v3114_v55, %s3300_s1 }
 0x7d9   :  { %3128 = vrot.lane.b32.xlu1 %v3113_v32, %s3300_s1 }
 0x7da   :  { %v3084_v14 = vpop.permute.xlu2 %3083 }
 0x7db   :  { %v3004_v29 = vpop.permute.xlu1 %3003 }
 0x7dc   :  { %v3005_v5 = vsel %vm7287_vm9, %v3002_v17, %v3004_v29  ;;  %v3121_v17 = vpop.permute.xlu0 %3120 }
 0x7dd   :  { %v3007_v24 = vadd.f32 %v3005_v5, %v2991_v37 }
 0x7df   :  { %v3023_v7 = vadd.f32 %v3021_v28, %v3007_v24 }
 0x7e2   :  { %v3119_v26 = vpop.permute.xlu2 %3118 }
 0x7e3   :  { %v3034_v8 = vpop.permute.xlu1 %3033  ;;  %v3122_v13 = vsel %vm428_vm13, %v3119_v26, %v3121_v17 }
 0x7e4   :  { %v3037_v0 = vsel %vm7289_vm2, %v3034_v8, %v3036_v50 }
 0x7e5   :  { %v3039_v48 = vadd.f32 %v3037_v0, %v3023_v7 }
 0x7eb   :  { %v3052_v35 = vpop.permute.xlu1 %3051 }
 0x7ec   :  { %v3053_v63 = vsel %vm360_vm14, %v3050_v31, %v3052_v35 }
 0x7ed   :  { %v3055_v21 = vadd.f32 %v3053_v63, %v3039_v48 }
 0x7ef   :  { %v3071_v49 = vadd.f32 %v3069_v3, %v3055_v21 }
 0x7f3   :  { %v3082_v62 = vpop.permute.xlu1 %3081 }
 0x7f4   :  { %v3085_v52 = vsel %vm394_vm12, %v3082_v62, %v3084_v14 }
 0x7f5   :  { %v3087_v37 = vadd.f32 %v3085_v52, %v3071_v49 }
 0x7fb   :  { %v3100_v15 = vpop.permute.xlu1 %3099 }
 0x7fc   :  { %v3101_v18 = vsel %vm411_vm11, %v3098_v30, %v3100_v15 }
 0x7fd   :  { %v3103_v46 = vadd.f32 %v3101_v18, %v3087_v37 }
 0x7ff   :  { %v3124_v22 = vadd.f32 %v3122_v13, %v3103_v46 }
 0x801   :  { %3125 = vst [vmem:[#allocation7 + $0x18] sm:$0xff] %v3124_v22 }
 0x802   :  { %3145 = dma.vmem_to_hbm [thread:$0]  %s3141_s14, 512, %s3143_s17, [#allocation4]  }
 0x832   :  { %v3131_v33 = vpop.permute.xlu2 %3130 }
 0x84b   :  { %v3129_v10 = vpop.permute.xlu1 %3128 }
 0x84c   :  { %v3132_v43 = vsel %vm55_vm0, %v3129_v10, %v3131_v33 }
 0x84d   :  { %3134 = vst [vmem:[#allocation8 + $0x18] sm:$0xff] %v3132_v43 }
 0x84e   :  { %3156 = dma.vmem_to_hbm [thread:$0]  %s3152_s19, 512, %s3154_s0, [#allocation9]  }
 0x84f   :  { %3293 = dma.done.wait [#allocation4], 512  }
 0x850   :  { %3294 = vsyncadd [#allocation4], 4294966784 }
 0x851   :  { %3295 = dma.done.wait [#allocation9], 512  }
 0x852   :  { %3296 = vsyncadd [#allocation9], 4294966784 }
 0x853   :  { %3165 = vsyncpa [#allocation3], 1 }
 0x854   :  { %3166 = vsyncpa [#allocation6], 1 }
 0x855   :  { %3167 = vsyncpa [#allocation4], 1 }
 0x856   :  { %3168 = vsyncpa [#allocation9], 1 }

</bundles_post_ra>
